<compile_context>
chip_gen: v6e
topology: v6e:2x2x1
jax: 0.10.0
libtpu: 0.0.40
codegen_flags: <defaults>
</compile_context>

<pallas_src>
import functools
import math

import jax
import jax.numpy as jnp
from jax import lax
from jax.experimental import pallas as pl
from jax.experimental.pallas import tpu as pltpu


def _round_up(a, b):
    return (a + b - 1) // b * b


# ---------------------------------------------------------------------------
# Corner geometry (shared by the kernel glue and the fp32 golden reference):
# fractional sampling positions -> 8 corner gather indices + trilinear weights
# at *group* resolution. OOB corners get weight 0 (matches zero-padding
# semantics of the original deformable-conv im2col).
# ---------------------------------------------------------------------------
def _corner_geometry(offset, x_shape, kernel_size, stride, padding,
                     channel_per_group):
    N, C, D, H, W = x_shape
    kd, kh, kw = kernel_size
    sd, sh, sw = stride
    pd, ph, pw = padding
    K = kd * kh * kw
    G = C // channel_per_group
    outD = (D + 2 * pd - kd) // sd + 1
    outH = (H + 2 * ph - kh) // sh + 1
    outW = (W + 2 * pw - kw) // sw + 1
    P = outD * outH * outW

    off = offset.reshape(N, G, K, 3, outD, outH, outW).astype(jnp.float32)

    kk = jnp.arange(K)
    kds = (kk // (kh * kw)).astype(jnp.float32)
    khs = ((kk // kw) % kh).astype(jnp.float32)
    kws = (kk % kw).astype(jnp.float32)

    od = jnp.arange(outD, dtype=jnp.float32) * sd - pd
    oh = jnp.arange(outH, dtype=jnp.float32) * sh - ph
    ow = jnp.arange(outW, dtype=jnp.float32) * sw - pw

    base_d = kds[:, None, None, None] + od[None, :, None, None]
    base_h = khs[:, None, None, None] + oh[None, None, :, None]
    base_w = kws[:, None, None, None] + ow[None, None, None, :]

    pos_d = off[:, :, :, 0] + base_d[None, None]   # (N, G, K, outD, outH, outW)
    pos_h = off[:, :, :, 1] + base_h[None, None]
    pos_w = off[:, :, :, 2] + base_w[None, None]

    d0f = jnp.floor(pos_d); ld = pos_d - d0f; d0 = d0f.astype(jnp.int32)
    h0f = jnp.floor(pos_h); lh = pos_h - h0f; h0 = h0f.astype(jnp.int32)
    w0f = jnp.floor(pos_w); lw = pos_w - w0f; w0 = w0f.astype(jnp.int32)

    idx_list, wgt_list = [], []
    for a in (0, 1):
        for b in (0, 1):
            for c in (0, 1):
                di = d0 + a
                hi = h0 + b
                wi = w0 + c
                valid = ((di >= 0) & (di < D) & (hi >= 0) & (hi < H)
                         & (wi >= 0) & (wi < W)).astype(jnp.float32)
                wgt = ((ld if a else 1.0 - ld)
                       * (lh if b else 1.0 - lh)
                       * (lw if c else 1.0 - lw)) * valid
                idx = (jnp.clip(di, 0, D - 1) * (H * W)
                       + jnp.clip(hi, 0, H - 1) * W
                       + jnp.clip(wi, 0, W - 1))
                idx_list.append(idx.reshape(N, G, K, P))
                wgt_list.append(wgt.reshape(N, G, K, P))

    idx8 = jnp.stack(idx_list, axis=2)    # (N, G, 8, K, P) int32
    wgt8 = jnp.stack(wgt_list, axis=2)    # (N, G, 8, K, P) f32
    return idx8, wgt8, (outD, outH, outW)


# ---------------------------------------------------------------------------
# Kernel-facing HBM streams. Padding happens on the small group-resolution
# tensors BEFORE the gather; the gather source is bf16; the value layout is
# chosen so the gather result needs only a free reshape (no transpose).
# ---------------------------------------------------------------------------
def _build_streams(x, offset, kernel_size, stride, padding, channel_per_group,
                   k_pad, p_pad):
    """Returns
        vals (N, C*8*K_pad, P_pad) bf16, rows ordered (group, channel, corner, k)
        wgts (N, G*8*K_pad, P_pad) bf16, rows ordered (group, corner, k)
        (outD, outH, outW)
    """
    N, C, D, H, W = x.shape
    cpg = channel_per_group
    G = C // cpg
    K = kernel_size[0] * kernel_size[1] * kernel_size[2]

    idx8, wgt8, out_dims = _corner_geometry(
        offset, x.shape, kernel_size, stride, padding, cpg)
    P = out_dims[0] * out_dims[1] * out_dims[2]

    # Pad K->K_pad (sublane alignment) and P->P_pad (lane tile) on the small
    # pre-gather tensors. Padded rows/cols have zero weight; the index pad
    # value 0 is in range and its gathered value never contributes.
    pad = ((0, 0), (0, 0), (0, 0), (0, k_pad - K), (0, p_pad - P))
    idx8 = jnp.pad(idx8, pad)
    wgt8 = jnp.pad(wgt8, pad).astype(jnp.bfloat16)
    wgts = wgt8.reshape(N, G * 8 * k_pad, p_pad)

    # Group-resolution gather from a bf16 source; the index broadcasts over the
    # channel_per_group axis, so no channel-repeated int32 index and no
    # post-gather cast / transpose pass over `vals`.
    x_g = x.reshape(N, G, cpg, D * H * W).astype(jnp.bfloat16)
    idx_flat = idx8.reshape(N, G, 1, 8 * k_pad * p_pad)
    vals = jnp.take_along_axis(x_g, idx_flat, axis=3)     # (N, G, cpg, 8*Kp*Pp)
    vals = vals.reshape(N, C * 8 * k_pad, p_pad)          # pure reshape
    return vals, wgts, out_dims


# ---------------------------------------------------------------------------
# Pure-f32 golden reference (no K padding, no bf16 quantization anywhere).
# ---------------------------------------------------------------------------
def _reference_fp32(x, offset, weight, stride, padding, channel_per_group):
    N, C, D, H, W = x.shape
    C_out = weight.shape[0]
    kernel_size = tuple(weight.shape[2:])
    K = kernel_size[0] * kernel_size[1] * kernel_size[2]
    cpg = channel_per_group
    G = C // cpg

    idx8, wgt8, (outD, outH, outW) = _corner_geometry(
        offset, x.shape, kernel_size, stride, padding, cpg)
    P = outD * outH * outW

    x_g = x.reshape(N, G, cpg, D * H * W).astype(jnp.float32)
    idx = idx8.reshape(N, G, 1, 8 * K * P)
    v = jnp.take_along_axis(x_g, idx, axis=3).reshape(N, G, cpg, 8, K, P)
    col = jnp.sum(v * wgt8[:, :, None], axis=3)            # (N, G, cpg, K, P)
    out = jnp.einsum('ok,nkp->nop',
                     weight.reshape(C_out, C * K).astype(jnp.float32),
                     col.reshape(N, C * K, P),
                     preferred_element_type=jnp.float32)
    return out.reshape(N, C_out, outD, outH, outW)


# ---------------------------------------------------------------------------
# Pallas kernel: per (batch n, P-tile p) grid step.
#   w8_ref  : (1, G*8*K_pad, TP)     bf16  corner weights (group resolution)
#   v_ref   : (1, C*8*K_pad, TP)     bf16  gathered corner values
#   m_ref   : (G, C_out, cpg*K_pad)  bf16  conv weight, per-group chunks
#   o_ref   : (1, C_out, TP)         f32   output block (accumulated over groups)
#   colf_ref: (cpg*K_pad, TP)        f32   per-group im2col column accumulator
# ---------------------------------------------------------------------------
def _deform_conv3d_kernel(w8_ref, v_ref, m_ref, o_ref, colf_ref, *,
                          num_groups, channel_per_group, k_pad):
    cpg = channel_per_group
    o_ref[...] = jnp.zeros_like(o_ref)

    def group_body(g, carry):
        wbase = g * (8 * k_pad)
        vbase = g * (cpg * 8 * k_pad)
        # Trilinear corner combine (VPU) with f32 accumulation in VMEM scratch.
        # The group's corner-weight slab is loaded & cast once per corner and
        # reused across the cpg channels of the group.
        for r in range(8):
            w_r = w8_ref[0, pl.ds(pl.multiple_of(wbase + r * k_pad, k_pad),
                                  k_pad), :].astype(jnp.float32)
            for c in range(cpg):
                v = v_ref[0, pl.ds(pl.multiple_of(vbase + (c * 8 + r) * k_pad,
                                                  k_pad), k_pad),
                          :].astype(jnp.float32)
                row = c * k_pad
                if r == 0:
                    colf_ref[pl.ds(row, k_pad), :] = v * w_r
                else:
                    colf_ref[pl.ds(row, k_pad), :] += v * w_r
        # Per-group MXU accumulation into the f32 output block: the matmul of
        # group g overlaps with the corner combine of group g+1.
        col_b = colf_ref[...].astype(jnp.bfloat16)          # (cpg*K_pad, TP)
        o_ref[0] += jnp.dot(m_ref[g], col_b,
                            preferred_element_type=jnp.float32)
        return carry

    lax.fori_loop(0, num_groups, group_body, 0, unroll=(num_groups <= 4))


# ---------------------------------------------------------------------------
# Wrapper: tile selection (per-generation VMEM budget), stream construction,
# pallas_call.
# ---------------------------------------------------------------------------
def conv_offset3d(x, offset, weight, stride=(1, 1, 1), padding=(0, 0, 0),
                  channel_per_group=1, p_tile=512):
    N, C, D, H, W = x.shape
    C_out = weight.shape[0]
    kernel_size = tuple(weight.shape[2:])
    kd, kh, kw = kernel_size
    K = kd * kh * kw
    k_pad = _round_up(K, 16)                 # sublane-aligned bf16 row blocks
    cpg = channel_per_group
    assert C % cpg == 0, "in_channels must be divisible by channel_per_group"
    G = C // cpg
    assert offset.shape[1] == G * K * 3, "offset channel count mismatch"
    sd, sh, sw = stride
    pd, ph, pw = padding
    outD = (D + 2 * pd - kd) // sd + 1
    outH = (H + 2 * ph - kh) // sh + 1
    outW = (W + 2 * pw - kw) // sw + 1
    P = outD * outH * outW
    CKg = cpg * k_pad                        # per-group contraction chunk

    # ---- per-generation tile / VMEM budget (v5e/v6e: 128 MiB, v7x: 64 MiB) ----
    try:
        vmem_cap = int(getattr(pltpu.get_tpu_info(), "vmem_capacity_bytes",
                               64 * 1024 * 1024))
    except Exception:
        vmem_cap = 64 * 1024 * 1024
    vmem_limit = max(int(vmem_cap * 0.8), 16 * 1024 * 1024)

    def step_bytes(tp_):
        w_blk = G * 8 * k_pad * tp_ * 2          # bf16, double-buffered
        v_blk = C * 8 * k_pad * tp_ * 2
        o_blk = C_out * tp_ * 4
        colf = CKg * tp_ * 4
        wmat_b = G * C_out * CKg * 2             # single-buffered
        return 2 * (w_blk + v_blk + o_blk) + colf + wmat_b

    tp = min(max(_round_up(p_tile, 128), 128), _round_up(P, 128))
    # If the whole (lane-rounded) position axis is only marginally larger than
    # the requested tile, take it in one tile: no padded-column work.
    if _round_up(P, 128) <= 2 * tp:
        tp = _round_up(P, 128)
    while tp > 128 and step_bytes(tp) > (vmem_limit * 9) // 10:
        tp -= 128
    # v7x has 2 TensorCores sharing the ("parallel","parallel") grid: keep at
    # least 2 grid tiles when the problem allows it.
    while tp > 128 and N * ((P + tp - 1) // tp) < 2:
        tp -= 128
    p_pad = _round_up(P, tp)

    vals, wgts, _ = _build_streams(x, offset, kernel_size, stride, padding,
                                   cpg, k_pad, p_pad)

    # Conv weight as per-group chunks: (G, C_out, cpg*K_pad) bf16.
    wk = weight.reshape(C_out, C, K).astype(jnp.float32)
    wk = jnp.pad(wk, ((0, 0), (0, 0), (0, k_pad - K)))
    wmat = jnp.transpose(wk.reshape(C_out, G, CKg), (1, 0, 2)).astype(jnp.bfloat16)

    kernel = functools.partial(_deform_conv3d_kernel, num_groups=G,
                               channel_per_group=cpg, k_pad=k_pad)

    def _call(single_buffer_wmat):
        if single_buffer_wmat:
            # wmat is never re-fetched (constant index map): single-buffer it.
            wmat_spec = pl.BlockSpec((G, C_out, CKg), lambda n, p: (0, 0, 0),
                                     pipeline_mode=pl.Buffered(1))
        else:
            wmat_spec = pl.BlockSpec((G, C_out, CKg), lambda n, p: (0, 0, 0))
        return pl.pallas_call(
            kernel,
            out_shape=jax.ShapeDtypeStruct((N, C_out, p_pad), jnp.float32),
            grid_spec=pltpu.PrefetchScalarGridSpec(
                num_scalar_prefetch=0,
                grid=(N, p_pad // tp),
                in_specs=[
                    pl.BlockSpec((1, G * 8 * k_pad, tp), lambda n, p: (n, 0, p)),
                    pl.BlockSpec((1, C * 8 * k_pad, tp), lambda n, p: (n, 0, p)),
                    wmat_spec,
                ],
                out_specs=pl.BlockSpec((1, C_out, tp), lambda n, p: (n, 0, p)),
                scratch_shapes=[pltpu.VMEM((CKg, tp), jnp.float32)],
            ),
            compiler_params=pltpu.CompilerParams(
                dimension_semantics=("parallel", "parallel"),
                vmem_limit_bytes=vmem_limit),
        )(wgts, vals, wmat)

    try:
        out = _call(True)
    except Exception:
        # pl.Buffered(1) not supported on this jax/libtpu: default buffering.
        out = _call(False)

    out = out[:, :, :P]
    return out.reshape(N, C_out, outD, outH, outW)


if __name__ == "__main__":
    # Small, deterministic example consistent with ConvOffset3d.__init__ shapes.
    N = 2
    C_in = 4
    C_out = 6
    kD = kH = kW = 3
    D = H = 8
    W = 10                       # P = 640 -> exercises the P tiling path
    stride = (1, 1, 1)
    padding = (1, 1, 1)
    channel_per_group = 2
    G = C_in // channel_per_group
    K = kD * kH * kW
    outD = (D + 2 * padding[0] - kD) // stride[0] + 1
    outH = (H + 2 * padding[1] - kH) // stride[1] + 1
    outW = (W + 2 * padding[2] - kW) // stride[2] + 1
    P = outD * outH * outW
    k_pad = _round_up(K, 16)

    key = jax.random.PRNGKey(0)
    kx, koff, kw_ = jax.random.split(key, 3)

    x = jax.random.normal(kx, (N, C_in, D, H, W), dtype=jnp.float32)
    offset = 0.5 * jax.random.normal(
        koff, (N, G * K * 3, outD, outH, outW), dtype=jnp.float32)

    # reset_parameters(): uniform(-stdv, stdv), stdv = 1/sqrt(C_in*kD*kH*kW)
    stdv = 1.0 / math.sqrt(C_in * kD * kH * kW)
    weight = jax.random.uniform(
        kw_, (C_out, C_in, kD, kH, kW), dtype=jnp.float32,
        minval=-stdv, maxval=stdv)

    out = conv_offset3d(x, offset, weight, stride, padding, channel_per_group,
                        p_tile=512)
    out = jax.block_until_ready(out)
    assert out.shape == (N, C_out, outD, outH, outW)

    # (1) Tight reference mirroring the kernel's bf16 stream quantization
    #     (corner combine and matmul accumulation stay in f32).
    vals_s, wgts_s, _ = _build_streams(x, offset, (kD, kH, kW), stride, padding,
                                       channel_per_group, k_pad, P)
    vals_f = vals_s.astype(jnp.float32).reshape(N, G, channel_per_group, 8,
                                                k_pad, P)
    wgts_f = wgts_s.astype(jnp.float32).reshape(N, G, 8, k_pad, P)[:, :, None]
    col = jnp.sum(vals_f * wgts_f, axis=3)                 # (N, G, cpg, Kp, P)
    col = col.reshape(N, C_in * k_pad, P).astype(jnp.bfloat16)
    wk = jnp.pad(weight.reshape(C_out, C_in, K),
                 ((0, 0), (0, 0), (0, k_pad - K)))
    wmat_ref = wk.reshape(C_out, C_in * k_pad).astype(jnp.bfloat16)
    ref = jnp.einsum('ok,nkp->nop', wmat_ref, col,
                     preferred_element_type=jnp.float32)
    ref = ref.reshape(N, C_out, outD, outH, outW)
    assert jnp.allclose(out, ref, atol=1e-2, rtol=1e-2), "mismatch vs bf16 ref"

    # (2) fp32 golden reference (no padding / no bf16) with a looser tolerance
    #     to bound the quantization drift of the bf16 streams.
    gold = _reference_fp32(x, offset, weight, stride, padding,
                           channel_per_group)
    assert jnp.allclose(out, gold, atol=5e-2, rtol=5e-2), "mismatch vs fp32 ref"

    print("KERNEL_OK")
</pallas_src>

<mosaic_0001>
module attributes {stable_mosaic.version = 11 : i64} {
  func.func @_deform_conv3d_kernel(%arg0: i32, %arg1: i32, %arg2: memref<1x512x640xbf16, #tpu.memory_space<vmem>>, %arg3: memref<1x1024x640xbf16, #tpu.memory_space<vmem>>, %arg4: memref<2x6x64xbf16, #tpu.memory_space<vmem>>, %arg5: memref<1x6x640xf32, #tpu.memory_space<vmem>>, %arg6: memref<64x640xf32, #tpu.memory_space<vmem>>) attributes {dimension_semantics = [#tpu.dimension_semantics<parallel>, #tpu.dimension_semantics<parallel>], iteration_bounds = array<i64: 2, 1>, scalar_prefetch = 0 : i64, scratch_operands = 1 : i64, tpu.core_type = #tpu.core_type<tc>, window_params = [{transform_indices = @transform_0, window_bounds = array<i64: 1, 512, 640>}, {transform_indices = @transform_1, window_bounds = array<i64: 1, 1024, 640>}, {pipeline_mode = #tpu.pipeline_mode<synchronous>, transform_indices = @transform_2, window_bounds = array<i64: 2, 6, 64>}, {transform_indices = @transform_3, window_bounds = array<i64: 1, 6, 640>}]} {
    %cst = arith.constant 0.000000e+00 : f32
    %0 = vector.broadcast %cst : f32 to vector<1x6x640xf32>
    %c0 = arith.constant 0 : index
    %c0_0 = arith.constant 0 : index
    %c0_1 = arith.constant 0 : index
    %1 = vector.load %arg5[%c0, %c0_0, %c0_1] : memref<1x6x640xf32, #tpu.memory_space<vmem>>, vector<1x6x640xf32>
    tpu.vector_store %arg5[%c0, %c0_0, %c0_1], %0 {strides = array<i32>} : memref<1x6x640xf32, #tpu.memory_space<vmem>>, vector<1x6x640xf32>,
    %c0_i32 = arith.constant 0 : i32
    %c256_i32 = arith.constant 256 : i32
    %2 = arith.muli %c0_i32, %c256_i32 : i32
    %c512_i32 = arith.constant 512 : i32
    %3 = arith.muli %c0_i32, %c512_i32 : i32
    %c0_i32_2 = arith.constant 0 : i32
    %4 = arith.addi %2, %c0_i32_2 : i32
    %5 = tpu.assume_multiple %4, 32 : i32
    %c0_3 = arith.constant 0 : index
    %6 = arith.index_cast %5 : i32 to index
    %c0_4 = arith.constant 0 : index
    %7 = vector.load %arg2[%c0_3, %6, %c0_4] : memref<1x512x640xbf16, #tpu.memory_space<vmem>>, vector<1x32x640xbf16>
    %8 = vector.shape_cast %7 : vector<1x32x640xbf16> to vector<32x640xbf16>
    %9 = arith.extf %8 : vector<32x640xbf16> to vector<32x640xf32>
    %c0_i32_5 = arith.constant 0 : i32
    %10 = arith.addi %3, %c0_i32_5 : i32
    %11 = tpu.assume_multiple %10, 32 : i32
    %c0_6 = arith.constant 0 : index
    %12 = arith.index_cast %11 : i32 to index
    %c0_7 = arith.constant 0 : index
    %13 = vector.load %arg3[%c0_6, %12, %c0_7] : memref<1x1024x640xbf16, #tpu.memory_space<vmem>>, vector<1x32x640xbf16>
    %14 = vector.shape_cast %13 : vector<1x32x640xbf16> to vector<32x640xbf16>
    %15 = arith.extf %14 : vector<32x640xbf16> to vector<32x640xf32>
    %16 = arith.mulf %15, %9 : vector<32x640xf32>
    %c0_8 = arith.constant 0 : index
    %c0_9 = arith.constant 0 : index
    %17 = vector.load %arg6[%c0_8, %c0_9] : memref<64x640xf32, #tpu.memory_space<vmem>>, vector<32x640xf32>
    tpu.vector_store %arg6[%c0_8, %c0_9], %16 {strides = array<i32>} : memref<64x640xf32, #tpu.memory_space<vmem>>, vector<32x640xf32>,
    %c256_i32_10 = arith.constant 256 : i32
    %18 = arith.addi %3, %c256_i32_10 : i32
    %19 = tpu.assume_multiple %18, 32 : i32
    %c0_11 = arith.constant 0 : index
    %20 = arith.index_cast %19 : i32 to index
    %c0_12 = arith.constant 0 : index
    %21 = vector.load %arg3[%c0_11, %20, %c0_12] : memref<1x1024x640xbf16, #tpu.memory_space<vmem>>, vector<1x32x640xbf16>
    %22 = vector.shape_cast %21 : vector<1x32x640xbf16> to vector<32x640xbf16>
    %23 = arith.extf %22 : vector<32x640xbf16> to vector<32x640xf32>
    %24 = arith.mulf %23, %9 : vector<32x640xf32>
    %c32 = arith.constant 32 : index
    %c0_13 = arith.constant 0 : index
    %25 = vector.load %arg6[%c32, %c0_13] : memref<64x640xf32, #tpu.memory_space<vmem>>, vector<32x640xf32>
    tpu.vector_store %arg6[%c32, %c0_13], %24 {strides = array<i32>} : memref<64x640xf32, #tpu.memory_space<vmem>>, vector<32x640xf32>,
    %c32_i32 = arith.constant 32 : i32
    %26 = arith.addi %2, %c32_i32 : i32
    %27 = tpu.assume_multiple %26, 32 : i32
    %c0_14 = arith.constant 0 : index
    %28 = arith.index_cast %27 : i32 to index
    %c0_15 = arith.constant 0 : index
    %29 = vector.load %arg2[%c0_14, %28, %c0_15] : memref<1x512x640xbf16, #tpu.memory_space<vmem>>, vector<1x32x640xbf16>
    %30 = vector.shape_cast %29 : vector<1x32x640xbf16> to vector<32x640xbf16>
    %31 = arith.extf %30 : vector<32x640xbf16> to vector<32x640xf32>
    %c32_i32_16 = arith.constant 32 : i32
    %32 = arith.addi %3, %c32_i32_16 : i32
    %33 = tpu.assume_multiple %32, 32 : i32
    %c0_17 = arith.constant 0 : index
    %34 = arith.index_cast %33 : i32 to index
    %c0_18 = arith.constant 0 : index
    %35 = vector.load %arg3[%c0_17, %34, %c0_18] : memref<1x1024x640xbf16, #tpu.memory_space<vmem>>, vector<1x32x640xbf16>
    %36 = vector.shape_cast %35 : vector<1x32x640xbf16> to vector<32x640xbf16>
    %37 = arith.extf %36 : vector<32x640xbf16> to vector<32x640xf32>
    %c0_19 = arith.constant 0 : index
    %c0_20 = arith.constant 0 : index
    %38 = vector.load %arg6[%c0_19, %c0_20] : memref<64x640xf32, #tpu.memory_space<vmem>>, vector<32x640xf32>
    %39 = arith.mulf %37, %31 : vector<32x640xf32>
    %40 = arith.addf %38, %39 : vector<32x640xf32>
    %c0_21 = arith.constant 0 : index
    %c0_22 = arith.constant 0 : index
    %41 = vector.load %arg6[%c0_21, %c0_22] : memref<64x640xf32, #tpu.memory_space<vmem>>, vector<32x640xf32>
    tpu.vector_store %arg6[%c0_21, %c0_22], %40 {strides = array<i32>} : memref<64x640xf32, #tpu.memory_space<vmem>>, vector<32x640xf32>,
    %c288_i32 = arith.constant 288 : i32
    %42 = arith.addi %3, %c288_i32 : i32
    %43 = tpu.assume_multiple %42, 32 : i32
    %c0_23 = arith.constant 0 : index
    %44 = arith.index_cast %43 : i32 to index
    %c0_24 = arith.constant 0 : index
    %45 = vector.load %arg3[%c0_23, %44, %c0_24] : memref<1x1024x640xbf16, #tpu.memory_space<vmem>>, vector<1x32x640xbf16>
    %46 = vector.shape_cast %45 : vector<1x32x640xbf16> to vector<32x640xbf16>
    %47 = arith.extf %46 : vector<32x640xbf16> to vector<32x640xf32>
    %c32_25 = arith.constant 32 : index
    %c0_26 = arith.constant 0 : index
    %48 = vector.load %arg6[%c32_25, %c0_26] : memref<64x640xf32, #tpu.memory_space<vmem>>, vector<32x640xf32>
    %49 = arith.mulf %47, %31 : vector<32x640xf32>
    %50 = arith.addf %48, %49 : vector<32x640xf32>
    %c32_27 = arith.constant 32 : index
    %c0_28 = arith.constant 0 : index
    %51 = vector.load %arg6[%c32_27, %c0_28] : memref<64x640xf32, #tpu.memory_space<vmem>>, vector<32x640xf32>
    tpu.vector_store %arg6[%c32_27, %c0_28], %50 {strides = array<i32>} : memref<64x640xf32, #tpu.memory_space<vmem>>, vector<32x640xf32>,
    %c64_i32 = arith.constant 64 : i32
    %52 = arith.addi %2, %c64_i32 : i32
    %53 = tpu.assume_multiple %52, 32 : i32
    %c0_29 = arith.constant 0 : index
    %54 = arith.index_cast %53 : i32 to index
    %c0_30 = arith.constant 0 : index
    %55 = vector.load %arg2[%c0_29, %54, %c0_30] : memref<1x512x640xbf16, #tpu.memory_space<vmem>>, vector<1x32x640xbf16>
    %56 = vector.shape_cast %55 : vector<1x32x640xbf16> to vector<32x640xbf16>
    %57 = arith.extf %56 : vector<32x640xbf16> to vector<32x640xf32>
    %c64_i32_31 = arith.constant 64 : i32
    %58 = arith.addi %3, %c64_i32_31 : i32
    %59 = tpu.assume_multiple %58, 32 : i32
    %c0_32 = arith.constant 0 : index
    %60 = arith.index_cast %59 : i32 to index
    %c0_33 = arith.constant 0 : index
    %61 = vector.load %arg3[%c0_32, %60, %c0_33] : memref<1x1024x640xbf16, #tpu.memory_space<vmem>>, vector<1x32x640xbf16>
    %62 = vector.shape_cast %61 : vector<1x32x640xbf16> to vector<32x640xbf16>
    %63 = arith.extf %62 : vector<32x640xbf16> to vector<32x640xf32>
    %c0_34 = arith.constant 0 : index
    %c0_35 = arith.constant 0 : index
    %64 = vector.load %arg6[%c0_34, %c0_35] : memref<64x640xf32, #tpu.memory_space<vmem>>, vector<32x640xf32>
    %65 = arith.mulf %63, %57 : vector<32x640xf32>
    %66 = arith.addf %64, %65 : vector<32x640xf32>
    %c0_36 = arith.constant 0 : index
    %c0_37 = arith.constant 0 : index
    %67 = vector.load %arg6[%c0_36, %c0_37] : memref<64x640xf32, #tpu.memory_space<vmem>>, vector<32x640xf32>
    tpu.vector_store %arg6[%c0_36, %c0_37], %66 {strides = array<i32>} : memref<64x640xf32, #tpu.memory_space<vmem>>, vector<32x640xf32>,
    %c320_i32 = arith.constant 320 : i32
    %68 = arith.addi %3, %c320_i32 : i32
    %69 = tpu.assume_multiple %68, 32 : i32
    %c0_38 = arith.constant 0 : index
    %70 = arith.index_cast %69 : i32 to index
    %c0_39 = arith.constant 0 : index
    %71 = vector.load %arg3[%c0_38, %70, %c0_39] : memref<1x1024x640xbf16, #tpu.memory_space<vmem>>, vector<1x32x640xbf16>
    %72 = vector.shape_cast %71 : vector<1x32x640xbf16> to vector<32x640xbf16>
    %73 = arith.extf %72 : vector<32x640xbf16> to vector<32x640xf32>
    %c32_40 = arith.constant 32 : index
    %c0_41 = arith.constant 0 : index
    %74 = vector.load %arg6[%c32_40, %c0_41] : memref<64x640xf32, #tpu.memory_space<vmem>>, vector<32x640xf32>
    %75 = arith.mulf %73, %57 : vector<32x640xf32>
    %76 = arith.addf %74, %75 : vector<32x640xf32>
    %c32_42 = arith.constant 32 : index
    %c0_43 = arith.constant 0 : index
    %77 = vector.load %arg6[%c32_42, %c0_43] : memref<64x640xf32, #tpu.memory_space<vmem>>, vector<32x640xf32>
    tpu.vector_store %arg6[%c32_42, %c0_43], %76 {strides = array<i32>} : memref<64x640xf32, #tpu.memory_space<vmem>>, vector<32x640xf32>,
    %c96_i32 = arith.constant 96 : i32
    %78 = arith.addi %2, %c96_i32 : i32
    %79 = tpu.assume_multiple %78, 32 : i32
    %c0_44 = arith.constant 0 : index
    %80 = arith.index_cast %79 : i32 to index
    %c0_45 = arith.constant 0 : index
    %81 = vector.load %arg2[%c0_44, %80, %c0_45] : memref<1x512x640xbf16, #tpu.memory_space<vmem>>, vector<1x32x640xbf16>
    %82 = vector.shape_cast %81 : vector<1x32x640xbf16> to vector<32x640xbf16>
    %83 = arith.extf %82 : vector<32x640xbf16> to vector<32x640xf32>
    %c96_i32_46 = arith.constant 96 : i32
    %84 = arith.addi %3, %c96_i32_46 : i32
    %85 = tpu.assume_multiple %84, 32 : i32
    %c0_47 = arith.constant 0 : index
    %86 = arith.index_cast %85 : i32 to index
    %c0_48 = arith.constant 0 : index
    %87 = vector.load %arg3[%c0_47, %86, %c0_48] : memref<1x1024x640xbf16, #tpu.memory_space<vmem>>, vector<1x32x640xbf16>
    %88 = vector.shape_cast %87 : vector<1x32x640xbf16> to vector<32x640xbf16>
    %89 = arith.extf %88 : vector<32x640xbf16> to vector<32x640xf32>
    %c0_49 = arith.constant 0 : index
    %c0_50 = arith.constant 0 : index
    %90 = vector.load %arg6[%c0_49, %c0_50] : memref<64x640xf32, #tpu.memory_space<vmem>>, vector<32x640xf32>
    %91 = arith.mulf %89, %83 : vector<32x640xf32>
    %92 = arith.addf %90, %91 : vector<32x640xf32>
    %c0_51 = arith.constant 0 : index
    %c0_52 = arith.constant 0 : index
    %93 = vector.load %arg6[%c0_51, %c0_52] : memref<64x640xf32, #tpu.memory_space<vmem>>, vector<32x640xf32>
    tpu.vector_store %arg6[%c0_51, %c0_52], %92 {strides = array<i32>} : memref<64x640xf32, #tpu.memory_space<vmem>>, vector<32x640xf32>,
    %c352_i32 = arith.constant 352 : i32
    %94 = arith.addi %3, %c352_i32 : i32
    %95 = tpu.assume_multiple %94, 32 : i32
    %c0_53 = arith.constant 0 : index
    %96 = arith.index_cast %95 : i32 to index
    %c0_54 = arith.constant 0 : index
    %97 = vector.load %arg3[%c0_53, %96, %c0_54] : memref<1x1024x640xbf16, #tpu.memory_space<vmem>>, vector<1x32x640xbf16>
    %98 = vector.shape_cast %97 : vector<1x32x640xbf16> to vector<32x640xbf16>
    %99 = arith.extf %98 : vector<32x640xbf16> to vector<32x640xf32>
    %c32_55 = arith.constant 32 : index
    %c0_56 = arith.constant 0 : index
    %100 = vector.load %arg6[%c32_55, %c0_56] : memref<64x640xf32, #tpu.memory_space<vmem>>, vector<32x640xf32>
    %101 = arith.mulf %99, %83 : vector<32x640xf32>
    %102 = arith.addf %100, %101 : vector<32x640xf32>
    %c32_57 = arith.constant 32 : index
    %c0_58 = arith.constant 0 : index
    %103 = vector.load %arg6[%c32_57, %c0_58] : memref<64x640xf32, #tpu.memory_space<vmem>>, vector<32x640xf32>
    tpu.vector_store %arg6[%c32_57, %c0_58], %102 {strides = array<i32>} : memref<64x640xf32, #tpu.memory_space<vmem>>, vector<32x640xf32>,
    %c128_i32 = arith.constant 128 : i32
    %104 = arith.addi %2, %c128_i32 : i32
    %105 = tpu.assume_multiple %104, 32 : i32
    %c0_59 = arith.constant 0 : index
    %106 = arith.index_cast %105 : i32 to index
    %c0_60 = arith.constant 0 : index
    %107 = vector.load %arg2[%c0_59, %106, %c0_60] : memref<1x512x640xbf16, #tpu.memory_space<vmem>>, vector<1x32x640xbf16>
    %108 = vector.shape_cast %107 : vector<1x32x640xbf16> to vector<32x640xbf16>
    %109 = arith.extf %108 : vector<32x640xbf16> to vector<32x640xf32>
    %c128_i32_61 = arith.constant 128 : i32
    %110 = arith.addi %3, %c128_i32_61 : i32
    %111 = tpu.assume_multiple %110, 32 : i32
    %c0_62 = arith.constant 0 : index
    %112 = arith.index_cast %111 : i32 to index
    %c0_63 = arith.constant 0 : index
    %113 = vector.load %arg3[%c0_62, %112, %c0_63] : memref<1x1024x640xbf16, #tpu.memory_space<vmem>>, vector<1x32x640xbf16>
    %114 = vector.shape_cast %113 : vector<1x32x640xbf16> to vector<32x640xbf16>
    %115 = arith.extf %114 : vector<32x640xbf16> to vector<32x640xf32>
    %c0_64 = arith.constant 0 : index
    %c0_65 = arith.constant 0 : index
    %116 = vector.load %arg6[%c0_64, %c0_65] : memref<64x640xf32, #tpu.memory_space<vmem>>, vector<32x640xf32>
    %117 = arith.mulf %115, %109 : vector<32x640xf32>
    %118 = arith.addf %116, %117 : vector<32x640xf32>
    %c0_66 = arith.constant 0 : index
    %c0_67 = arith.constant 0 : index
    %119 = vector.load %arg6[%c0_66, %c0_67] : memref<64x640xf32, #tpu.memory_space<vmem>>, vector<32x640xf32>
    tpu.vector_store %arg6[%c0_66, %c0_67], %118 {strides = array<i32>} : memref<64x640xf32, #tpu.memory_space<vmem>>, vector<32x640xf32>,
    %c384_i32 = arith.constant 384 : i32
    %120 = arith.addi %3, %c384_i32 : i32
    %121 = tpu.assume_multiple %120, 32 : i32
    %c0_68 = arith.constant 0 : index
    %122 = arith.index_cast %121 : i32 to index
    %c0_69 = arith.constant 0 : index
    %123 = vector.load %arg3[%c0_68, %122, %c0_69] : memref<1x1024x640xbf16, #tpu.memory_space<vmem>>, vector<1x32x640xbf16>
    %124 = vector.shape_cast %123 : vector<1x32x640xbf16> to vector<32x640xbf16>
    %125 = arith.extf %124 : vector<32x640xbf16> to vector<32x640xf32>
    %c32_70 = arith.constant 32 : index
    %c0_71 = arith.constant 0 : index
    %126 = vector.load %arg6[%c32_70, %c0_71] : memref<64x640xf32, #tpu.memory_space<vmem>>, vector<32x640xf32>
    %127 = arith.mulf %125, %109 : vector<32x640xf32>
    %128 = arith.addf %126, %127 : vector<32x640xf32>
    %c32_72 = arith.constant 32 : index
    %c0_73 = arith.constant 0 : index
    %129 = vector.load %arg6[%c32_72, %c0_73] : memref<64x640xf32, #tpu.memory_space<vmem>>, vector<32x640xf32>
    tpu.vector_store %arg6[%c32_72, %c0_73], %128 {strides = array<i32>} : memref<64x640xf32, #tpu.memory_space<vmem>>, vector<32x640xf32>,
    %c160_i32 = arith.constant 160 : i32
    %130 = arith.addi %2, %c160_i32 : i32
    %131 = tpu.assume_multiple %130, 32 : i32
    %c0_74 = arith.constant 0 : index
    %132 = arith.index_cast %131 : i32 to index
    %c0_75 = arith.constant 0 : index
    %133 = vector.load %arg2[%c0_74, %132, %c0_75] : memref<1x512x640xbf16, #tpu.memory_space<vmem>>, vector<1x32x640xbf16>
    %134 = vector.shape_cast %133 : vector<1x32x640xbf16> to vector<32x640xbf16>
    %135 = arith.extf %134 : vector<32x640xbf16> to vector<32x640xf32>
    %c160_i32_76 = arith.constant 160 : i32
    %136 = arith.addi %3, %c160_i32_76 : i32
    %137 = tpu.assume_multiple %136, 32 : i32
    %c0_77 = arith.constant 0 : index
    %138 = arith.index_cast %137 : i32 to index
    %c0_78 = arith.constant 0 : index
    %139 = vector.load %arg3[%c0_77, %138, %c0_78] : memref<1x1024x640xbf16, #tpu.memory_space<vmem>>, vector<1x32x640xbf16>
    %140 = vector.shape_cast %139 : vector<1x32x640xbf16> to vector<32x640xbf16>
    %141 = arith.extf %140 : vector<32x640xbf16> to vector<32x640xf32>
    %c0_79 = arith.constant 0 : index
    %c0_80 = arith.constant 0 : index
    %142 = vector.load %arg6[%c0_79, %c0_80] : memref<64x640xf32, #tpu.memory_space<vmem>>, vector<32x640xf32>
    %143 = arith.mulf %141, %135 : vector<32x640xf32>
    %144 = arith.addf %142, %143 : vector<32x640xf32>
    %c0_81 = arith.constant 0 : index
    %c0_82 = arith.constant 0 : index
    %145 = vector.load %arg6[%c0_81, %c0_82] : memref<64x640xf32, #tpu.memory_space<vmem>>, vector<32x640xf32>
    tpu.vector_store %arg6[%c0_81, %c0_82], %144 {strides = array<i32>} : memref<64x640xf32, #tpu.memory_space<vmem>>, vector<32x640xf32>,
    %c416_i32 = arith.constant 416 : i32
    %146 = arith.addi %3, %c416_i32 : i32
    %147 = tpu.assume_multiple %146, 32 : i32
    %c0_83 = arith.constant 0 : index
    %148 = arith.index_cast %147 : i32 to index
    %c0_84 = arith.constant 0 : index
    %149 = vector.load %arg3[%c0_83, %148, %c0_84] : memref<1x1024x640xbf16, #tpu.memory_space<vmem>>, vector<1x32x640xbf16>
    %150 = vector.shape_cast %149 : vector<1x32x640xbf16> to vector<32x640xbf16>
    %151 = arith.extf %150 : vector<32x640xbf16> to vector<32x640xf32>
    %c32_85 = arith.constant 32 : index
    %c0_86 = arith.constant 0 : index
    %152 = vector.load %arg6[%c32_85, %c0_86] : memref<64x640xf32, #tpu.memory_space<vmem>>, vector<32x640xf32>
    %153 = arith.mulf %151, %135 : vector<32x640xf32>
    %154 = arith.addf %152, %153 : vector<32x640xf32>
    %c32_87 = arith.constant 32 : index
    %c0_88 = arith.constant 0 : index
    %155 = vector.load %arg6[%c32_87, %c0_88] : memref<64x640xf32, #tpu.memory_space<vmem>>, vector<32x640xf32>
    tpu.vector_store %arg6[%c32_87, %c0_88], %154 {strides = array<i32>} : memref<64x640xf32, #tpu.memory_space<vmem>>, vector<32x640xf32>,
    %c192_i32 = arith.constant 192 : i32
    %156 = arith.addi %2, %c192_i32 : i32
    %157 = tpu.assume_multiple %156, 32 : i32
    %c0_89 = arith.constant 0 : index
    %158 = arith.index_cast %157 : i32 to index
    %c0_90 = arith.constant 0 : index
    %159 = vector.load %arg2[%c0_89, %158, %c0_90] : memref<1x512x640xbf16, #tpu.memory_space<vmem>>, vector<1x32x640xbf16>
    %160 = vector.shape_cast %159 : vector<1x32x640xbf16> to vector<32x640xbf16>
    %161 = arith.extf %160 : vector<32x640xbf16> to vector<32x640xf32>
    %c192_i32_91 = arith.constant 192 : i32
    %162 = arith.addi %3, %c192_i32_91 : i32
    %163 = tpu.assume_multiple %162, 32 : i32
    %c0_92 = arith.constant 0 : index
    %164 = arith.index_cast %163 : i32 to index
    %c0_93 = arith.constant 0 : index
    %165 = vector.load %arg3[%c0_92, %164, %c0_93] : memref<1x1024x640xbf16, #tpu.memory_space<vmem>>, vector<1x32x640xbf16>
    %166 = vector.shape_cast %165 : vector<1x32x640xbf16> to vector<32x640xbf16>
    %167 = arith.extf %166 : vector<32x640xbf16> to vector<32x640xf32>
    %c0_94 = arith.constant 0 : index
    %c0_95 = arith.constant 0 : index
    %168 = vector.load %arg6[%c0_94, %c0_95] : memref<64x640xf32, #tpu.memory_space<vmem>>, vector<32x640xf32>
    %169 = arith.mulf %167, %161 : vector<32x640xf32>
    %170 = arith.addf %168, %169 : vector<32x640xf32>
    %c0_96 = arith.constant 0 : index
    %c0_97 = arith.constant 0 : index
    %171 = vector.load %arg6[%c0_96, %c0_97] : memref<64x640xf32, #tpu.memory_space<vmem>>, vector<32x640xf32>
    tpu.vector_store %arg6[%c0_96, %c0_97], %170 {strides = array<i32>} : memref<64x640xf32, #tpu.memory_space<vmem>>, vector<32x640xf32>,
    %c448_i32 = arith.constant 448 : i32
    %172 = arith.addi %3, %c448_i32 : i32
    %173 = tpu.assume_multiple %172, 32 : i32
    %c0_98 = arith.constant 0 : index
    %174 = arith.index_cast %173 : i32 to index
    %c0_99 = arith.constant 0 : index
    %175 = vector.load %arg3[%c0_98, %174, %c0_99] : memref<1x1024x640xbf16, #tpu.memory_space<vmem>>, vector<1x32x640xbf16>
    %176 = vector.shape_cast %175 : vector<1x32x640xbf16> to vector<32x640xbf16>
    %177 = arith.extf %176 : vector<32x640xbf16> to vector<32x640xf32>
    %c32_100 = arith.constant 32 : index
    %c0_101 = arith.constant 0 : index
    %178 = vector.load %arg6[%c32_100, %c0_101] : memref<64x640xf32, #tpu.memory_space<vmem>>, vector<32x640xf32>
    %179 = arith.mulf %177, %161 : vector<32x640xf32>
    %180 = arith.addf %178, %179 : vector<32x640xf32>
    %c32_102 = arith.constant 32 : index
    %c0_103 = arith.constant 0 : index
    %181 = vector.load %arg6[%c32_102, %c0_103] : memref<64x640xf32, #tpu.memory_space<vmem>>, vector<32x640xf32>
    tpu.vector_store %arg6[%c32_102, %c0_103], %180 {strides = array<i32>} : memref<64x640xf32, #tpu.memory_space<vmem>>, vector<32x640xf32>,
    %c224_i32 = arith.constant 224 : i32
    %182 = arith.addi %2, %c224_i32 : i32
    %183 = tpu.assume_multiple %182, 32 : i32
    %c0_104 = arith.constant 0 : index
    %184 = arith.index_cast %183 : i32 to index
    %c0_105 = arith.constant 0 : index
    %185 = vector.load %arg2[%c0_104, %184, %c0_105] : memref<1x512x640xbf16, #tpu.memory_space<vmem>>, vector<1x32x640xbf16>
    %186 = vector.shape_cast %185 : vector<1x32x640xbf16> to vector<32x640xbf16>
    %187 = arith.extf %186 : vector<32x640xbf16> to vector<32x640xf32>
    %c224_i32_106 = arith.constant 224 : i32
    %188 = arith.addi %3, %c224_i32_106 : i32
    %189 = tpu.assume_multiple %188, 32 : i32
    %c0_107 = arith.constant 0 : index
    %190 = arith.index_cast %189 : i32 to index
    %c0_108 = arith.constant 0 : index
    %191 = vector.load %arg3[%c0_107, %190, %c0_108] : memref<1x1024x640xbf16, #tpu.memory_space<vmem>>, vector<1x32x640xbf16>
    %192 = vector.shape_cast %191 : vector<1x32x640xbf16> to vector<32x640xbf16>
    %193 = arith.extf %192 : vector<32x640xbf16> to vector<32x640xf32>
    %c0_109 = arith.constant 0 : index
    %c0_110 = arith.constant 0 : index
    %194 = vector.load %arg6[%c0_109, %c0_110] : memref<64x640xf32, #tpu.memory_space<vmem>>, vector<32x640xf32>
    %195 = arith.mulf %193, %187 : vector<32x640xf32>
    %196 = arith.addf %194, %195 : vector<32x640xf32>
    %c0_111 = arith.constant 0 : index
    %c0_112 = arith.constant 0 : index
    %197 = vector.load %arg6[%c0_111, %c0_112] : memref<64x640xf32, #tpu.memory_space<vmem>>, vector<32x640xf32>
    tpu.vector_store %arg6[%c0_111, %c0_112], %196 {strides = array<i32>} : memref<64x640xf32, #tpu.memory_space<vmem>>, vector<32x640xf32>,
    %c480_i32 = arith.constant 480 : i32
    %198 = arith.addi %3, %c480_i32 : i32
    %199 = tpu.assume_multiple %198, 32 : i32
    %c0_113 = arith.constant 0 : index
    %200 = arith.index_cast %199 : i32 to index
    %c0_114 = arith.constant 0 : index
    %201 = vector.load %arg3[%c0_113, %200, %c0_114] : memref<1x1024x640xbf16, #tpu.memory_space<vmem>>, vector<1x32x640xbf16>
    %202 = vector.shape_cast %201 : vector<1x32x640xbf16> to vector<32x640xbf16>
    %203 = arith.extf %202 : vector<32x640xbf16> to vector<32x640xf32>
    %c32_115 = arith.constant 32 : index
    %c0_116 = arith.constant 0 : index
    %204 = vector.load %arg6[%c32_115, %c0_116] : memref<64x640xf32, #tpu.memory_space<vmem>>, vector<32x640xf32>
    %205 = arith.mulf %203, %187 : vector<32x640xf32>
    %206 = arith.addf %204, %205 : vector<32x640xf32>
    %c32_117 = arith.constant 32 : index
    %c0_118 = arith.constant 0 : index
    %207 = vector.load %arg6[%c32_117, %c0_118] : memref<64x640xf32, #tpu.memory_space<vmem>>, vector<32x640xf32>
    tpu.vector_store %arg6[%c32_117, %c0_118], %206 {strides = array<i32>} : memref<64x640xf32, #tpu.memory_space<vmem>>, vector<32x640xf32>,
    %c0_119 = arith.constant 0 : index
    %c0_120 = arith.constant 0 : index
    %208 = vector.load %arg6[%c0_119, %c0_120] : memref<64x640xf32, #tpu.memory_space<vmem>>, vector<64x640xf32>
    %209 = arith.truncf %208 : vector<64x640xf32> to vector<64x640xbf16>
    %c0_121 = arith.constant 0 : index
    %c0_122 = arith.constant 0 : index
    %c0_123 = arith.constant 0 : index
    %210 = vector.load %arg5[%c0_121, %c0_122, %c0_123] : memref<1x6x640xf32, #tpu.memory_space<vmem>>, vector<1x6x640xf32>
    %211 = vector.shape_cast %210 : vector<1x6x640xf32> to vector<6x640xf32>
    %212 = arith.index_cast %c0_i32 : i32 to index
    %c0_124 = arith.constant 0 : index
    %c0_125 = arith.constant 0 : index
    %213 = vector.load %arg4[%212, %c0_124, %c0_125] : memref<2x6x64xbf16, #tpu.memory_space<vmem>>, vector<1x6x64xbf16>
    %214 = vector.shape_cast %213 : vector<1x6x64xbf16> to vector<6x64xbf16>
    %cst_126 = arith.constant dense<0.000000e+00> : vector<6x640xf32>
    %215 = tpu.matmul %214, %209, %cst_126 {dimension_numbers = #tpu.dot_dimension_numbers<[1], [0], [0], [1], [0, 0, 1, 1], [], []>} : vector<6x64xbf16>, vector<64x640xbf16>, vector<6x640xf32> -> vector<6x640xf32>
    %216 = arith.addf %211, %215 : vector<6x640xf32>
    %c0_127 = arith.constant 0 : index
    %c0_128 = arith.constant 0 : index
    %c0_129 = arith.constant 0 : index
    %217 = vector.load %arg5[%c0_127, %c0_128, %c0_129] : memref<1x6x640xf32, #tpu.memory_space<vmem>>, vector<1x6x640xf32>
    %218 = vector.shape_cast %217 : vector<1x6x640xf32> to vector<6x640xf32>
    %219 = vector.shape_cast %216 : vector<6x640xf32> to vector<1x6x640xf32>
    tpu.vector_store %arg5[%c0_127, %c0_128, %c0_129], %219 {strides = array<i32>} : memref<1x6x640xf32, #tpu.memory_space<vmem>>, vector<1x6x640xf32>,
    %c1_i32 = arith.constant 1 : i32
    %c256_i32_130 = arith.constant 256 : i32
    %220 = arith.muli %c1_i32, %c256_i32_130 : i32
    %c512_i32_131 = arith.constant 512 : i32
    %221 = arith.muli %c1_i32, %c512_i32_131 : i32
    %c0_i32_132 = arith.constant 0 : i32
    %222 = arith.addi %220, %c0_i32_132 : i32
    %223 = tpu.assume_multiple %222, 32 : i32
    %c0_133 = arith.constant 0 : index
    %224 = arith.index_cast %223 : i32 to index
    %c0_134 = arith.constant 0 : index
    %225 = vector.load %arg2[%c0_133, %224, %c0_134] : memref<1x512x640xbf16, #tpu.memory_space<vmem>>, vector<1x32x640xbf16>
    %226 = vector.shape_cast %225 : vector<1x32x640xbf16> to vector<32x640xbf16>
    %227 = arith.extf %226 : vector<32x640xbf16> to vector<32x640xf32>
    %c0_i32_135 = arith.constant 0 : i32
    %228 = arith.addi %221, %c0_i32_135 : i32
    %229 = tpu.assume_multiple %228, 32 : i32
    %c0_136 = arith.constant 0 : index
    %230 = arith.index_cast %229 : i32 to index
    %c0_137 = arith.constant 0 : index
    %231 = vector.load %arg3[%c0_136, %230, %c0_137] : memref<1x1024x640xbf16, #tpu.memory_space<vmem>>, vector<1x32x640xbf16>
    %232 = vector.shape_cast %231 : vector<1x32x640xbf16> to vector<32x640xbf16>
    %233 = arith.extf %232 : vector<32x640xbf16> to vector<32x640xf32>
    %234 = arith.mulf %233, %227 : vector<32x640xf32>
    %c0_138 = arith.constant 0 : index
    %c0_139 = arith.constant 0 : index
    %235 = vector.load %arg6[%c0_138, %c0_139] : memref<64x640xf32, #tpu.memory_space<vmem>>, vector<32x640xf32>
    tpu.vector_store %arg6[%c0_138, %c0_139], %234 {strides = array<i32>} : memref<64x640xf32, #tpu.memory_space<vmem>>, vector<32x640xf32>,
    %c256_i32_140 = arith.constant 256 : i32
    %236 = arith.addi %221, %c256_i32_140 : i32
    %237 = tpu.assume_multiple %236, 32 : i32
    %c0_141 = arith.constant 0 : index
    %238 = arith.index_cast %237 : i32 to index
    %c0_142 = arith.constant 0 : index
    %239 = vector.load %arg3[%c0_141, %238, %c0_142] : memref<1x1024x640xbf16, #tpu.memory_space<vmem>>, vector<1x32x640xbf16>
    %240 = vector.shape_cast %239 : vector<1x32x640xbf16> to vector<32x640xbf16>
    %241 = arith.extf %240 : vector<32x640xbf16> to vector<32x640xf32>
    %242 = arith.mulf %241, %227 : vector<32x640xf32>
    %c32_143 = arith.constant 32 : index
    %c0_144 = arith.constant 0 : index
    %243 = vector.load %arg6[%c32_143, %c0_144] : memref<64x640xf32, #tpu.memory_space<vmem>>, vector<32x640xf32>
    tpu.vector_store %arg6[%c32_143, %c0_144], %242 {strides = array<i32>} : memref<64x640xf32, #tpu.memory_space<vmem>>, vector<32x640xf32>,
    %c32_i32_145 = arith.constant 32 : i32
    %244 = arith.addi %220, %c32_i32_145 : i32
    %245 = tpu.assume_multiple %244, 32 : i32
    %c0_146 = arith.constant 0 : index
    %246 = arith.index_cast %245 : i32 to index
    %c0_147 = arith.constant 0 : index
    %247 = vector.load %arg2[%c0_146, %246, %c0_147] : memref<1x512x640xbf16, #tpu.memory_space<vmem>>, vector<1x32x640xbf16>
    %248 = vector.shape_cast %247 : vector<1x32x640xbf16> to vector<32x640xbf16>
    %249 = arith.extf %248 : vector<32x640xbf16> to vector<32x640xf32>
    %c32_i32_148 = arith.constant 32 : i32
    %250 = arith.addi %221, %c32_i32_148 : i32
    %251 = tpu.assume_multiple %250, 32 : i32
    %c0_149 = arith.constant 0 : index
    %252 = arith.index_cast %251 : i32 to index
    %c0_150 = arith.constant 0 : index
    %253 = vector.load %arg3[%c0_149, %252, %c0_150] : memref<1x1024x640xbf16, #tpu.memory_space<vmem>>, vector<1x32x640xbf16>
    %254 = vector.shape_cast %253 : vector<1x32x640xbf16> to vector<32x640xbf16>
    %255 = arith.extf %254 : vector<32x640xbf16> to vector<32x640xf32>
    %c0_151 = arith.constant 0 : index
    %c0_152 = arith.constant 0 : index
    %256 = vector.load %arg6[%c0_151, %c0_152] : memref<64x640xf32, #tpu.memory_space<vmem>>, vector<32x640xf32>
    %257 = arith.mulf %255, %249 : vector<32x640xf32>
    %258 = arith.addf %256, %257 : vector<32x640xf32>
    %c0_153 = arith.constant 0 : index
    %c0_154 = arith.constant 0 : index
    %259 = vector.load %arg6[%c0_153, %c0_154] : memref<64x640xf32, #tpu.memory_space<vmem>>, vector<32x640xf32>
    tpu.vector_store %arg6[%c0_153, %c0_154], %258 {strides = array<i32>} : memref<64x640xf32, #tpu.memory_space<vmem>>, vector<32x640xf32>,
    %c288_i32_155 = arith.constant 288 : i32
    %260 = arith.addi %221, %c288_i32_155 : i32
    %261 = tpu.assume_multiple %260, 32 : i32
    %c0_156 = arith.constant 0 : index
    %262 = arith.index_cast %261 : i32 to index
    %c0_157 = arith.constant 0 : index
    %263 = vector.load %arg3[%c0_156, %262, %c0_157] : memref<1x1024x640xbf16, #tpu.memory_space<vmem>>, vector<1x32x640xbf16>
    %264 = vector.shape_cast %263 : vector<1x32x640xbf16> to vector<32x640xbf16>
    %265 = arith.extf %264 : vector<32x640xbf16> to vector<32x640xf32>
    %c32_158 = arith.constant 32 : index
    %c0_159 = arith.constant 0 : index
    %266 = vector.load %arg6[%c32_158, %c0_159] : memref<64x640xf32, #tpu.memory_space<vmem>>, vector<32x640xf32>
    %267 = arith.mulf %265, %249 : vector<32x640xf32>
    %268 = arith.addf %266, %267 : vector<32x640xf32>
    %c32_160 = arith.constant 32 : index
    %c0_161 = arith.constant 0 : index
    %269 = vector.load %arg6[%c32_160, %c0_161] : memref<64x640xf32, #tpu.memory_space<vmem>>, vector<32x640xf32>
    tpu.vector_store %arg6[%c32_160, %c0_161], %268 {strides = array<i32>} : memref<64x640xf32, #tpu.memory_space<vmem>>, vector<32x640xf32>,
    %c64_i32_162 = arith.constant 64 : i32
    %270 = arith.addi %220, %c64_i32_162 : i32
    %271 = tpu.assume_multiple %270, 32 : i32
    %c0_163 = arith.constant 0 : index
    %272 = arith.index_cast %271 : i32 to index
    %c0_164 = arith.constant 0 : index
    %273 = vector.load %arg2[%c0_163, %272, %c0_164] : memref<1x512x640xbf16, #tpu.memory_space<vmem>>, vector<1x32x640xbf16>
    %274 = vector.shape_cast %273 : vector<1x32x640xbf16> to vector<32x640xbf16>
    %275 = arith.extf %274 : vector<32x640xbf16> to vector<32x640xf32>
    %c64_i32_165 = arith.constant 64 : i32
    %276 = arith.addi %221, %c64_i32_165 : i32
    %277 = tpu.assume_multiple %276, 32 : i32
    %c0_166 = arith.constant 0 : index
    %278 = arith.index_cast %277 : i32 to index
    %c0_167 = arith.constant 0 : index
    %279 = vector.load %arg3[%c0_166, %278, %c0_167] : memref<1x1024x640xbf16, #tpu.memory_space<vmem>>, vector<1x32x640xbf16>
    %280 = vector.shape_cast %279 : vector<1x32x640xbf16> to vector<32x640xbf16>
    %281 = arith.extf %280 : vector<32x640xbf16> to vector<32x640xf32>
    %c0_168 = arith.constant 0 : index
    %c0_169 = arith.constant 0 : index
    %282 = vector.load %arg6[%c0_168, %c0_169] : memref<64x640xf32, #tpu.memory_space<vmem>>, vector<32x640xf32>
    %283 = arith.mulf %281, %275 : vector<32x640xf32>
    %284 = arith.addf %282, %283 : vector<32x640xf32>
    %c0_170 = arith.constant 0 : index
    %c0_171 = arith.constant 0 : index
    %285 = vector.load %arg6[%c0_170, %c0_171] : memref<64x640xf32, #tpu.memory_space<vmem>>, vector<32x640xf32>
    tpu.vector_store %arg6[%c0_170, %c0_171], %284 {strides = array<i32>} : memref<64x640xf32, #tpu.memory_space<vmem>>, vector<32x640xf32>,
    %c320_i32_172 = arith.constant 320 : i32
    %286 = arith.addi %221, %c320_i32_172 : i32
    %287 = tpu.assume_multiple %286, 32 : i32
    %c0_173 = arith.constant 0 : index
    %288 = arith.index_cast %287 : i32 to index
    %c0_174 = arith.constant 0 : index
    %289 = vector.load %arg3[%c0_173, %288, %c0_174] : memref<1x1024x640xbf16, #tpu.memory_space<vmem>>, vector<1x32x640xbf16>
    %290 = vector.shape_cast %289 : vector<1x32x640xbf16> to vector<32x640xbf16>
    %291 = arith.extf %290 : vector<32x640xbf16> to vector<32x640xf32>
    %c32_175 = arith.constant 32 : index
    %c0_176 = arith.constant 0 : index
    %292 = vector.load %arg6[%c32_175, %c0_176] : memref<64x640xf32, #tpu.memory_space<vmem>>, vector<32x640xf32>
    %293 = arith.mulf %291, %275 : vector<32x640xf32>
    %294 = arith.addf %292, %293 : vector<32x640xf32>
    %c32_177 = arith.constant 32 : index
    %c0_178 = arith.constant 0 : index
    %295 = vector.load %arg6[%c32_177, %c0_178] : memref<64x640xf32, #tpu.memory_space<vmem>>, vector<32x640xf32>
    tpu.vector_store %arg6[%c32_177, %c0_178], %294 {strides = array<i32>} : memref<64x640xf32, #tpu.memory_space<vmem>>, vector<32x640xf32>,
    %c96_i32_179 = arith.constant 96 : i32
    %296 = arith.addi %220, %c96_i32_179 : i32
    %297 = tpu.assume_multiple %296, 32 : i32
    %c0_180 = arith.constant 0 : index
    %298 = arith.index_cast %297 : i32 to index
    %c0_181 = arith.constant 0 : index
    %299 = vector.load %arg2[%c0_180, %298, %c0_181] : memref<1x512x640xbf16, #tpu.memory_space<vmem>>, vector<1x32x640xbf16>
    %300 = vector.shape_cast %299 : vector<1x32x640xbf16> to vector<32x640xbf16>
    %301 = arith.extf %300 : vector<32x640xbf16> to vector<32x640xf32>
    %c96_i32_182 = arith.constant 96 : i32
    %302 = arith.addi %221, %c96_i32_182 : i32
    %303 = tpu.assume_multiple %302, 32 : i32
    %c0_183 = arith.constant 0 : index
    %304 = arith.index_cast %303 : i32 to index
    %c0_184 = arith.constant 0 : index
    %305 = vector.load %arg3[%c0_183, %304, %c0_184] : memref<1x1024x640xbf16, #tpu.memory_space<vmem>>, vector<1x32x640xbf16>
    %306 = vector.shape_cast %305 : vector<1x32x640xbf16> to vector<32x640xbf16>
    %307 = arith.extf %306 : vector<32x640xbf16> to vector<32x640xf32>
    %c0_185 = arith.constant 0 : index
    %c0_186 = arith.constant 0 : index
    %308 = vector.load %arg6[%c0_185, %c0_186] : memref<64x640xf32, #tpu.memory_space<vmem>>, vector<32x640xf32>
    %309 = arith.mulf %307, %301 : vector<32x640xf32>
    %310 = arith.addf %308, %309 : vector<32x640xf32>
    %c0_187 = arith.constant 0 : index
    %c0_188 = arith.constant 0 : index
    %311 = vector.load %arg6[%c0_187, %c0_188] : memref<64x640xf32, #tpu.memory_space<vmem>>, vector<32x640xf32>
    tpu.vector_store %arg6[%c0_187, %c0_188], %310 {strides = array<i32>} : memref<64x640xf32, #tpu.memory_space<vmem>>, vector<32x640xf32>,
    %c352_i32_189 = arith.constant 352 : i32
    %312 = arith.addi %221, %c352_i32_189 : i32
    %313 = tpu.assume_multiple %312, 32 : i32
    %c0_190 = arith.constant 0 : index
    %314 = arith.index_cast %313 : i32 to index
    %c0_191 = arith.constant 0 : index
    %315 = vector.load %arg3[%c0_190, %314, %c0_191] : memref<1x1024x640xbf16, #tpu.memory_space<vmem>>, vector<1x32x640xbf16>
    %316 = vector.shape_cast %315 : vector<1x32x640xbf16> to vector<32x640xbf16>
    %317 = arith.extf %316 : vector<32x640xbf16> to vector<32x640xf32>
    %c32_192 = arith.constant 32 : index
    %c0_193 = arith.constant 0 : index
    %318 = vector.load %arg6[%c32_192, %c0_193] : memref<64x640xf32, #tpu.memory_space<vmem>>, vector<32x640xf32>
    %319 = arith.mulf %317, %301 : vector<32x640xf32>
    %320 = arith.addf %318, %319 : vector<32x640xf32>
    %c32_194 = arith.constant 32 : index
    %c0_195 = arith.constant 0 : index
    %321 = vector.load %arg6[%c32_194, %c0_195] : memref<64x640xf32, #tpu.memory_space<vmem>>, vector<32x640xf32>
    tpu.vector_store %arg6[%c32_194, %c0_195], %320 {strides = array<i32>} : memref<64x640xf32, #tpu.memory_space<vmem>>, vector<32x640xf32>,
    %c128_i32_196 = arith.constant 128 : i32
    %322 = arith.addi %220, %c128_i32_196 : i32
    %323 = tpu.assume_multiple %322, 32 : i32
    %c0_197 = arith.constant 0 : index
    %324 = arith.index_cast %323 : i32 to index
    %c0_198 = arith.constant 0 : index
    %325 = vector.load %arg2[%c0_197, %324, %c0_198] : memref<1x512x640xbf16, #tpu.memory_space<vmem>>, vector<1x32x640xbf16>
    %326 = vector.shape_cast %325 : vector<1x32x640xbf16> to vector<32x640xbf16>
    %327 = arith.extf %326 : vector<32x640xbf16> to vector<32x640xf32>
    %c128_i32_199 = arith.constant 128 : i32
    %328 = arith.addi %221, %c128_i32_199 : i32
    %329 = tpu.assume_multiple %328, 32 : i32
    %c0_200 = arith.constant 0 : index
    %330 = arith.index_cast %329 : i32 to index
    %c0_201 = arith.constant 0 : index
    %331 = vector.load %arg3[%c0_200, %330, %c0_201] : memref<1x1024x640xbf16, #tpu.memory_space<vmem>>, vector<1x32x640xbf16>
    %332 = vector.shape_cast %331 : vector<1x32x640xbf16> to vector<32x640xbf16>
    %333 = arith.extf %332 : vector<32x640xbf16> to vector<32x640xf32>
    %c0_202 = arith.constant 0 : index
    %c0_203 = arith.constant 0 : index
    %334 = vector.load %arg6[%c0_202, %c0_203] : memref<64x640xf32, #tpu.memory_space<vmem>>, vector<32x640xf32>
    %335 = arith.mulf %333, %327 : vector<32x640xf32>
    %336 = arith.addf %334, %335 : vector<32x640xf32>
    %c0_204 = arith.constant 0 : index
    %c0_205 = arith.constant 0 : index
    %337 = vector.load %arg6[%c0_204, %c0_205] : memref<64x640xf32, #tpu.memory_space<vmem>>, vector<32x640xf32>
    tpu.vector_store %arg6[%c0_204, %c0_205], %336 {strides = array<i32>} : memref<64x640xf32, #tpu.memory_space<vmem>>, vector<32x640xf32>,
    %c384_i32_206 = arith.constant 384 : i32
    %338 = arith.addi %221, %c384_i32_206 : i32
    %339 = tpu.assume_multiple %338, 32 : i32
    %c0_207 = arith.constant 0 : index
    %340 = arith.index_cast %339 : i32 to index
    %c0_208 = arith.constant 0 : index
    %341 = vector.load %arg3[%c0_207, %340, %c0_208] : memref<1x1024x640xbf16, #tpu.memory_space<vmem>>, vector<1x32x640xbf16>
    %342 = vector.shape_cast %341 : vector<1x32x640xbf16> to vector<32x640xbf16>
    %343 = arith.extf %342 : vector<32x640xbf16> to vector<32x640xf32>
    %c32_209 = arith.constant 32 : index
    %c0_210 = arith.constant 0 : index
    %344 = vector.load %arg6[%c32_209, %c0_210] : memref<64x640xf32, #tpu.memory_space<vmem>>, vector<32x640xf32>
    %345 = arith.mulf %343, %327 : vector<32x640xf32>
    %346 = arith.addf %344, %345 : vector<32x640xf32>
    %c32_211 = arith.constant 32 : index
    %c0_212 = arith.constant 0 : index
    %347 = vector.load %arg6[%c32_211, %c0_212] : memref<64x640xf32, #tpu.memory_space<vmem>>, vector<32x640xf32>
    tpu.vector_store %arg6[%c32_211, %c0_212], %346 {strides = array<i32>} : memref<64x640xf32, #tpu.memory_space<vmem>>, vector<32x640xf32>,
    %c160_i32_213 = arith.constant 160 : i32
    %348 = arith.addi %220, %c160_i32_213 : i32
    %349 = tpu.assume_multiple %348, 32 : i32
    %c0_214 = arith.constant 0 : index
    %350 = arith.index_cast %349 : i32 to index
    %c0_215 = arith.constant 0 : index
    %351 = vector.load %arg2[%c0_214, %350, %c0_215] : memref<1x512x640xbf16, #tpu.memory_space<vmem>>, vector<1x32x640xbf16>
    %352 = vector.shape_cast %351 : vector<1x32x640xbf16> to vector<32x640xbf16>
    %353 = arith.extf %352 : vector<32x640xbf16> to vector<32x640xf32>
    %c160_i32_216 = arith.constant 160 : i32
    %354 = arith.addi %221, %c160_i32_216 : i32
    %355 = tpu.assume_multiple %354, 32 : i32
    %c0_217 = arith.constant 0 : index
    %356 = arith.index_cast %355 : i32 to index
    %c0_218 = arith.constant 0 : index
    %357 = vector.load %arg3[%c0_217, %356, %c0_218] : memref<1x1024x640xbf16, #tpu.memory_space<vmem>>, vector<1x32x640xbf16>
    %358 = vector.shape_cast %357 : vector<1x32x640xbf16> to vector<32x640xbf16>
    %359 = arith.extf %358 : vector<32x640xbf16> to vector<32x640xf32>
    %c0_219 = arith.constant 0 : index
    %c0_220 = arith.constant 0 : index
    %360 = vector.load %arg6[%c0_219, %c0_220] : memref<64x640xf32, #tpu.memory_space<vmem>>, vector<32x640xf32>
    %361 = arith.mulf %359, %353 : vector<32x640xf32>
    %362 = arith.addf %360, %361 : vector<32x640xf32>
    %c0_221 = arith.constant 0 : index
    %c0_222 = arith.constant 0 : index
    %363 = vector.load %arg6[%c0_221, %c0_222] : memref<64x640xf32, #tpu.memory_space<vmem>>, vector<32x640xf32>
    tpu.vector_store %arg6[%c0_221, %c0_222], %362 {strides = array<i32>} : memref<64x640xf32, #tpu.memory_space<vmem>>, vector<32x640xf32>,
    %c416_i32_223 = arith.constant 416 : i32
    %364 = arith.addi %221, %c416_i32_223 : i32
    %365 = tpu.assume_multiple %364, 32 : i32
    %c0_224 = arith.constant 0 : index
    %366 = arith.index_cast %365 : i32 to index
    %c0_225 = arith.constant 0 : index
    %367 = vector.load %arg3[%c0_224, %366, %c0_225] : memref<1x1024x640xbf16, #tpu.memory_space<vmem>>, vector<1x32x640xbf16>
    %368 = vector.shape_cast %367 : vector<1x32x640xbf16> to vector<32x640xbf16>
    %369 = arith.extf %368 : vector<32x640xbf16> to vector<32x640xf32>
    %c32_226 = arith.constant 32 : index
    %c0_227 = arith.constant 0 : index
    %370 = vector.load %arg6[%c32_226, %c0_227] : memref<64x640xf32, #tpu.memory_space<vmem>>, vector<32x640xf32>
    %371 = arith.mulf %369, %353 : vector<32x640xf32>
    %372 = arith.addf %370, %371 : vector<32x640xf32>
    %c32_228 = arith.constant 32 : index
    %c0_229 = arith.constant 0 : index
    %373 = vector.load %arg6[%c32_228, %c0_229] : memref<64x640xf32, #tpu.memory_space<vmem>>, vector<32x640xf32>
    tpu.vector_store %arg6[%c32_228, %c0_229], %372 {strides = array<i32>} : memref<64x640xf32, #tpu.memory_space<vmem>>, vector<32x640xf32>,
    %c192_i32_230 = arith.constant 192 : i32
    %374 = arith.addi %220, %c192_i32_230 : i32
    %375 = tpu.assume_multiple %374, 32 : i32
    %c0_231 = arith.constant 0 : index
    %376 = arith.index_cast %375 : i32 to index
    %c0_232 = arith.constant 0 : index
    %377 = vector.load %arg2[%c0_231, %376, %c0_232] : memref<1x512x640xbf16, #tpu.memory_space<vmem>>, vector<1x32x640xbf16>
    %378 = vector.shape_cast %377 : vector<1x32x640xbf16> to vector<32x640xbf16>
    %379 = arith.extf %378 : vector<32x640xbf16> to vector<32x640xf32>
    %c192_i32_233 = arith.constant 192 : i32
    %380 = arith.addi %221, %c192_i32_233 : i32
    %381 = tpu.assume_multiple %380, 32 : i32
    %c0_234 = arith.constant 0 : index
    %382 = arith.index_cast %381 : i32 to index
    %c0_235 = arith.constant 0 : index
    %383 = vector.load %arg3[%c0_234, %382, %c0_235] : memref<1x1024x640xbf16, #tpu.memory_space<vmem>>, vector<1x32x640xbf16>
    %384 = vector.shape_cast %383 : vector<1x32x640xbf16> to vector<32x640xbf16>
    %385 = arith.extf %384 : vector<32x640xbf16> to vector<32x640xf32>
    %c0_236 = arith.constant 0 : index
    %c0_237 = arith.constant 0 : index
    %386 = vector.load %arg6[%c0_236, %c0_237] : memref<64x640xf32, #tpu.memory_space<vmem>>, vector<32x640xf32>
    %387 = arith.mulf %385, %379 : vector<32x640xf32>
    %388 = arith.addf %386, %387 : vector<32x640xf32>
    %c0_238 = arith.constant 0 : index
    %c0_239 = arith.constant 0 : index
    %389 = vector.load %arg6[%c0_238, %c0_239] : memref<64x640xf32, #tpu.memory_space<vmem>>, vector<32x640xf32>
    tpu.vector_store %arg6[%c0_238, %c0_239], %388 {strides = array<i32>} : memref<64x640xf32, #tpu.memory_space<vmem>>, vector<32x640xf32>,
    %c448_i32_240 = arith.constant 448 : i32
    %390 = arith.addi %221, %c448_i32_240 : i32
    %391 = tpu.assume_multiple %390, 32 : i32
    %c0_241 = arith.constant 0 : index
    %392 = arith.index_cast %391 : i32 to index
    %c0_242 = arith.constant 0 : index
    %393 = vector.load %arg3[%c0_241, %392, %c0_242] : memref<1x1024x640xbf16, #tpu.memory_space<vmem>>, vector<1x32x640xbf16>
    %394 = vector.shape_cast %393 : vector<1x32x640xbf16> to vector<32x640xbf16>
    %395 = arith.extf %394 : vector<32x640xbf16> to vector<32x640xf32>
    %c32_243 = arith.constant 32 : index
    %c0_244 = arith.constant 0 : index
    %396 = vector.load %arg6[%c32_243, %c0_244] : memref<64x640xf32, #tpu.memory_space<vmem>>, vector<32x640xf32>
    %397 = arith.mulf %395, %379 : vector<32x640xf32>
    %398 = arith.addf %396, %397 : vector<32x640xf32>
    %c32_245 = arith.constant 32 : index
    %c0_246 = arith.constant 0 : index
    %399 = vector.load %arg6[%c32_245, %c0_246] : memref<64x640xf32, #tpu.memory_space<vmem>>, vector<32x640xf32>
    tpu.vector_store %arg6[%c32_245, %c0_246], %398 {strides = array<i32>} : memref<64x640xf32, #tpu.memory_space<vmem>>, vector<32x640xf32>,
    %c224_i32_247 = arith.constant 224 : i32
    %400 = arith.addi %220, %c224_i32_247 : i32
    %401 = tpu.assume_multiple %400, 32 : i32
    %c0_248 = arith.constant 0 : index
    %402 = arith.index_cast %401 : i32 to index
    %c0_249 = arith.constant 0 : index
    %403 = vector.load %arg2[%c0_248, %402, %c0_249] : memref<1x512x640xbf16, #tpu.memory_space<vmem>>, vector<1x32x640xbf16>
    %404 = vector.shape_cast %403 : vector<1x32x640xbf16> to vector<32x640xbf16>
    %405 = arith.extf %404 : vector<32x640xbf16> to vector<32x640xf32>
    %c224_i32_250 = arith.constant 224 : i32
    %406 = arith.addi %221, %c224_i32_250 : i32
    %407 = tpu.assume_multiple %406, 32 : i32
    %c0_251 = arith.constant 0 : index
    %408 = arith.index_cast %407 : i32 to index
    %c0_252 = arith.constant 0 : index
    %409 = vector.load %arg3[%c0_251, %408, %c0_252] : memref<1x1024x640xbf16, #tpu.memory_space<vmem>>, vector<1x32x640xbf16>
    %410 = vector.shape_cast %409 : vector<1x32x640xbf16> to vector<32x640xbf16>
    %411 = arith.extf %410 : vector<32x640xbf16> to vector<32x640xf32>
    %c0_253 = arith.constant 0 : index
    %c0_254 = arith.constant 0 : index
    %412 = vector.load %arg6[%c0_253, %c0_254] : memref<64x640xf32, #tpu.memory_space<vmem>>, vector<32x640xf32>
    %413 = arith.mulf %411, %405 : vector<32x640xf32>
    %414 = arith.addf %412, %413 : vector<32x640xf32>
    %c0_255 = arith.constant 0 : index
    %c0_256 = arith.constant 0 : index
    %415 = vector.load %arg6[%c0_255, %c0_256] : memref<64x640xf32, #tpu.memory_space<vmem>>, vector<32x640xf32>
    tpu.vector_store %arg6[%c0_255, %c0_256], %414 {strides = array<i32>} : memref<64x640xf32, #tpu.memory_space<vmem>>, vector<32x640xf32>,
    %c480_i32_257 = arith.constant 480 : i32
    %416 = arith.addi %221, %c480_i32_257 : i32
    %417 = tpu.assume_multiple %416, 32 : i32
    %c0_258 = arith.constant 0 : index
    %418 = arith.index_cast %417 : i32 to index
    %c0_259 = arith.constant 0 : index
    %419 = vector.load %arg3[%c0_258, %418, %c0_259] : memref<1x1024x640xbf16, #tpu.memory_space<vmem>>, vector<1x32x640xbf16>
    %420 = vector.shape_cast %419 : vector<1x32x640xbf16> to vector<32x640xbf16>
    %421 = arith.extf %420 : vector<32x640xbf16> to vector<32x640xf32>
    %c32_260 = arith.constant 32 : index
    %c0_261 = arith.constant 0 : index
    %422 = vector.load %arg6[%c32_260, %c0_261] : memref<64x640xf32, #tpu.memory_space<vmem>>, vector<32x640xf32>
    %423 = arith.mulf %421, %405 : vector<32x640xf32>
    %424 = arith.addf %422, %423 : vector<32x640xf32>
    %c32_262 = arith.constant 32 : index
    %c0_263 = arith.constant 0 : index
    %425 = vector.load %arg6[%c32_262, %c0_263] : memref<64x640xf32, #tpu.memory_space<vmem>>, vector<32x640xf32>
    tpu.vector_store %arg6[%c32_262, %c0_263], %424 {strides = array<i32>} : memref<64x640xf32, #tpu.memory_space<vmem>>, vector<32x640xf32>,
    %c0_264 = arith.constant 0 : index
    %c0_265 = arith.constant 0 : index
    %426 = vector.load %arg6[%c0_264, %c0_265] : memref<64x640xf32, #tpu.memory_space<vmem>>, vector<64x640xf32>
    %427 = arith.truncf %426 : vector<64x640xf32> to vector<64x640xbf16>
    %c0_266 = arith.constant 0 : index
    %c0_267 = arith.constant 0 : index
    %c0_268 = arith.constant 0 : index
    %428 = vector.load %arg5[%c0_266, %c0_267, %c0_268] : memref<1x6x640xf32, #tpu.memory_space<vmem>>, vector<1x6x640xf32>
    %429 = vector.shape_cast %428 : vector<1x6x640xf32> to vector<6x640xf32>
    %430 = arith.index_cast %c1_i32 : i32 to index
    %c0_269 = arith.constant 0 : index
    %c0_270 = arith.constant 0 : index
    %431 = vector.load %arg4[%430, %c0_269, %c0_270] : memref<2x6x64xbf16, #tpu.memory_space<vmem>>, vector<1x6x64xbf16>
    %432 = vector.shape_cast %431 : vector<1x6x64xbf16> to vector<6x64xbf16>
    %cst_271 = arith.constant dense<0.000000e+00> : vector<6x640xf32>
    %433 = tpu.matmul %432, %427, %cst_271 {dimension_numbers = #tpu.dot_dimension_numbers<[1], [0], [0], [1], [0, 0, 1, 1], [], []>} : vector<6x64xbf16>, vector<64x640xbf16>, vector<6x640xf32> -> vector<6x640xf32>
    %434 = arith.addf %429, %433 : vector<6x640xf32>
    %c0_272 = arith.constant 0 : index
    %c0_273 = arith.constant 0 : index
    %c0_274 = arith.constant 0 : index
    %435 = vector.load %arg5[%c0_272, %c0_273, %c0_274] : memref<1x6x640xf32, #tpu.memory_space<vmem>>, vector<1x6x640xf32>
    %436 = vector.shape_cast %435 : vector<1x6x640xf32> to vector<6x640xf32>
    %437 = vector.shape_cast %434 : vector<6x640xf32> to vector<1x6x640xf32>
    tpu.vector_store %arg5[%c0_272, %c0_273, %c0_274], %437 {strides = array<i32>} : memref<1x6x640xf32, #tpu.memory_space<vmem>>, vector<1x6x640xf32>,
    %c2_i32 = arith.constant 2 : i32
    return
  }
  func.func @transform_0(%arg0: i32, %arg1: i32) -> (i32, i32, i32) {
    %c0_i32 = arith.constant 0 : i32
    %c0_i32_0 = arith.constant 0 : i32
    return %arg0, %c0_i32, %arg1 : i32, i32, i32
  }
  func.func @transform_1(%arg0: i32, %arg1: i32) -> (i32, i32, i32) {
    %c0_i32 = arith.constant 0 : i32
    %c0_i32_0 = arith.constant 0 : i32
    return %arg0, %c0_i32, %arg1 : i32, i32, i32
  }
  func.func @transform_2(%arg0: i32, %arg1: i32) -> (i32, i32, i32) {
    %c0_i32 = arith.constant 0 : i32
    %c0_i32_0 = arith.constant 0 : i32
    %c0_i32_1 = arith.constant 0 : i32
    %c0_i32_2 = arith.constant 0 : i32
    return %c0_i32, %c0_i32_0, %c0_i32_1 : i32, i32, i32
  }
  func.func @transform_3(%arg0: i32, %arg1: i32) -> (i32, i32, i32) {
    %c0_i32 = arith.constant 0 : i32
    %c0_i32_0 = arith.constant 0 : i32
    return %arg0, %c0_i32, %arg1 : i32, i32, i32
  }
}

module attributes {stable_mosaic.version = 11 : i64} {
  func.func @_deform_conv3d_kernel(%arg0: i32, %arg1: i32, %arg2: memref<1x512x640xbf16, #tpu.memory_space<vmem>>, %arg3: memref<1x1024x640xbf16, #tpu.memory_space<vmem>>, %arg4: memref<2x6x64xbf16, #tpu.memory_space<vmem>>, %arg5: memref<1x6x640xf32, #tpu.memory_space<vmem>>, %arg6: memref<64x640xf32, #tpu.memory_space<vmem>>) attributes {dimension_semantics = [#tpu.dimension_semantics<parallel>, #tpu.dimension_semantics<parallel>], iteration_bounds = array<i64: 2, 1>, scalar_prefetch = 0 : i64, scratch_operands = 1 : i64, tpu.core_type = #tpu.core_type<tc>, window_params = [{transform_indices = @transform_0, window_bounds = array<i64: 1, 512, 640>}, {transform_indices = @transform_1, window_bounds = array<i64: 1, 1024, 640>}, {pipeline_mode = #tpu.pipeline_mode<synchronous>, transform_indices = @transform_2, window_bounds = array<i64: 2, 6, 64>}, {transform_indices = @transform_3, window_bounds = array<i64: 1, 6, 640>}]} {
    %cst = arith.constant 0.000000e+00 : f32
    %0 = vector.broadcast %cst : f32 to vector<1x6x640xf32>
    %c0 = arith.constant 0 : index
    %c0_0 = arith.constant 0 : index
    %c0_1 = arith.constant 0 : index
    %1 = vector.load %arg5[%c0, %c0_0, %c0_1] : memref<1x6x640xf32, #tpu.memory_space<vmem>>, vector<1x6x640xf32>
    tpu.vector_store %arg5[%c0, %c0_0, %c0_1], %0 {strides = array<i32>} : memref<1x6x640xf32, #tpu.memory_space<vmem>>, vector<1x6x640xf32>,
    %c0_i32 = arith.constant 0 : i32
    %c256_i32 = arith.constant 256 : i32
    %2 = arith.muli %c0_i32, %c256_i32 : i32
    %c512_i32 = arith.constant 512 : i32
    %3 = arith.muli %c0_i32, %c512_i32 : i32
    %c0_i32_2 = arith.constant 0 : i32
    %4 = arith.addi %2, %c0_i32_2 : i32
    %5 = tpu.assume_multiple %4, 32 : i32
    %c0_3 = arith.constant 0 : index
    %6 = arith.index_cast %5 : i32 to index
    %c0_4 = arith.constant 0 : index
    %7 = vector.load %arg2[%c0_3, %6, %c0_4] : memref<1x512x640xbf16, #tpu.memory_space<vmem>>, vector<1x32x640xbf16>
    %8 = vector.shape_cast %7 : vector<1x32x640xbf16> to vector<32x640xbf16>
    %9 = arith.extf %8 : vector<32x640xbf16> to vector<32x640xf32>
    %c0_i32_5 = arith.constant 0 : i32
    %10 = arith.addi %3, %c0_i32_5 : i32
    %11 = tpu.assume_multiple %10, 32 : i32
    %c0_6 = arith.constant 0 : index
    %12 = arith.index_cast %11 : i32 to index
    %c0_7 = arith.constant 0 : index
    %13 = vector.load %arg3[%c0_6, %12, %c0_7] : memref<1x1024x640xbf16, #tpu.memory_space<vmem>>, vector<1x32x640xbf16>
    %14 = vector.shape_cast %13 : vector<1x32x640xbf16> to vector<32x640xbf16>
    %15 = arith.extf %14 : vector<32x640xbf16> to vector<32x640xf32>
    %16 = arith.mulf %15, %9 : vector<32x640xf32>
    %c0_8 = arith.constant 0 : index
    %c0_9 = arith.constant 0 : index
    %17 = vector.load %arg6[%c0_8, %c0_9] : memref<64x640xf32, #tpu.memory_space<vmem>>, vector<32x640xf32>
    tpu.vector_store %arg6[%c0_8, %c0_9], %16 {strides = array<i32>} : memref<64x640xf32, #tpu.memory_space<vmem>>, vector<32x640xf32>,
    %c256_i32_10 = arith.constant 256 : i32
    %18 = arith.addi %3, %c256_i32_10 : i32
    %19 = tpu.assume_multiple %18, 32 : i32
    %c0_11 = arith.constant 0 : index
    %20 = arith.index_cast %19 : i32 to index
    %c0_12 = arith.constant 0 : index
    %21 = vector.load %arg3[%c0_11, %20, %c0_12] : memref<1x1024x640xbf16, #tpu.memory_space<vmem>>, vector<1x32x640xbf16>
    %22 = vector.shape_cast %21 : vector<1x32x640xbf16> to vector<32x640xbf16>
    %23 = arith.extf %22 : vector<32x640xbf16> to vector<32x640xf32>
    %24 = arith.mulf %23, %9 : vector<32x640xf32>
    %c32 = arith.constant 32 : index
    %c0_13 = arith.constant 0 : index
    %25 = vector.load %arg6[%c32, %c0_13] : memref<64x640xf32, #tpu.memory_space<vmem>>, vector<32x640xf32>
    tpu.vector_store %arg6[%c32, %c0_13], %24 {strides = array<i32>} : memref<64x640xf32, #tpu.memory_space<vmem>>, vector<32x640xf32>,
    %c32_i32 = arith.constant 32 : i32
    %26 = arith.addi %2, %c32_i32 : i32
    %27 = tpu.assume_multiple %26, 32 : i32
    %c0_14 = arith.constant 0 : index
    %28 = arith.index_cast %27 : i32 to index
    %c0_15 = arith.constant 0 : index
    %29 = vector.load %arg2[%c0_14, %28, %c0_15] : memref<1x512x640xbf16, #tpu.memory_space<vmem>>, vector<1x32x640xbf16>
    %30 = vector.shape_cast %29 : vector<1x32x640xbf16> to vector<32x640xbf16>
    %31 = arith.extf %30 : vector<32x640xbf16> to vector<32x640xf32>
    %c32_i32_16 = arith.constant 32 : i32
    %32 = arith.addi %3, %c32_i32_16 : i32
    %33 = tpu.assume_multiple %32, 32 : i32
    %c0_17 = arith.constant 0 : index
    %34 = arith.index_cast %33 : i32 to index
    %c0_18 = arith.constant 0 : index
    %35 = vector.load %arg3[%c0_17, %34, %c0_18] : memref<1x1024x640xbf16, #tpu.memory_space<vmem>>, vector<1x32x640xbf16>
    %36 = vector.shape_cast %35 : vector<1x32x640xbf16> to vector<32x640xbf16>
    %37 = arith.extf %36 : vector<32x640xbf16> to vector<32x640xf32>
    %c0_19 = arith.constant 0 : index
    %c0_20 = arith.constant 0 : index
    %38 = vector.load %arg6[%c0_19, %c0_20] : memref<64x640xf32, #tpu.memory_space<vmem>>, vector<32x640xf32>
    %39 = arith.mulf %37, %31 : vector<32x640xf32>
    %40 = arith.addf %38, %39 : vector<32x640xf32>
    %c0_21 = arith.constant 0 : index
    %c0_22 = arith.constant 0 : index
    %41 = vector.load %arg6[%c0_21, %c0_22] : memref<64x640xf32, #tpu.memory_space<vmem>>, vector<32x640xf32>
    tpu.vector_store %arg6[%c0_21, %c0_22], %40 {strides = array<i32>} : memref<64x640xf32, #tpu.memory_space<vmem>>, vector<32x640xf32>,
    %c288_i32 = arith.constant 288 : i32
    %42 = arith.addi %3, %c288_i32 : i32
    %43 = tpu.assume_multiple %42, 32 : i32
    %c0_23 = arith.constant 0 : index
    %44 = arith.index_cast %43 : i32 to index
    %c0_24 = arith.constant 0 : index
    %45 = vector.load %arg3[%c0_23, %44, %c0_24] : memref<1x1024x640xbf16, #tpu.memory_space<vmem>>, vector<1x32x640xbf16>
    %46 = vector.shape_cast %45 : vector<1x32x640xbf16> to vector<32x640xbf16>
    %47 = arith.extf %46 : vector<32x640xbf16> to vector<32x640xf32>
    %c32_25 = arith.constant 32 : index
    %c0_26 = arith.constant 0 : index
    %48 = vector.load %arg6[%c32_25, %c0_26] : memref<64x640xf32, #tpu.memory_space<vmem>>, vector<32x640xf32>
    %49 = arith.mulf %47, %31 : vector<32x640xf32>
    %50 = arith.addf %48, %49 : vector<32x640xf32>
    %c32_27 = arith.constant 32 : index
    %c0_28 = arith.constant 0 : index
    %51 = vector.load %arg6[%c32_27, %c0_28] : memref<64x640xf32, #tpu.memory_space<vmem>>, vector<32x640xf32>
    tpu.vector_store %arg6[%c32_27, %c0_28], %50 {strides = array<i32>} : memref<64x640xf32, #tpu.memory_space<vmem>>, vector<32x640xf32>,
    %c64_i32 = arith.constant 64 : i32
    %52 = arith.addi %2, %c64_i32 : i32
    %53 = tpu.assume_multiple %52, 32 : i32
    %c0_29 = arith.constant 0 : index
    %54 = arith.index_cast %53 : i32 to index
    %c0_30 = arith.constant 0 : index
    %55 = vector.load %arg2[%c0_29, %54, %c0_30] : memref<1x512x640xbf16, #tpu.memory_space<vmem>>, vector<1x32x640xbf16>
    %56 = vector.shape_cast %55 : vector<1x32x640xbf16> to vector<32x640xbf16>
    %57 = arith.extf %56 : vector<32x640xbf16> to vector<32x640xf32>
    %c64_i32_31 = arith.constant 64 : i32
    %58 = arith.addi %3, %c64_i32_31 : i32
    %59 = tpu.assume_multiple %58, 32 : i32
    %c0_32 = arith.constant 0 : index
    %60 = arith.index_cast %59 : i32 to index
    %c0_33 = arith.constant 0 : index
    %61 = vector.load %arg3[%c0_32, %60, %c0_33] : memref<1x1024x640xbf16, #tpu.memory_space<vmem>>, vector<1x32x640xbf16>
    %62 = vector.shape_cast %61 : vector<1x32x640xbf16> to vector<32x640xbf16>
    %63 = arith.extf %62 : vector<32x640xbf16> to vector<32x640xf32>
    %c0_34 = arith.constant 0 : index
    %c0_35 = arith.constant 0 : index
    %64 = vector.load %arg6[%c0_34, %c0_35] : memref<64x640xf32, #tpu.memory_space<vmem>>, vector<32x640xf32>
    %65 = arith.mulf %63, %57 : vector<32x640xf32>
    %66 = arith.addf %64, %65 : vector<32x640xf32>
    %c0_36 = arith.constant 0 : index
    %c0_37 = arith.constant 0 : index
    %67 = vector.load %arg6[%c0_36, %c0_37] : memref<64x640xf32, #tpu.memory_space<vmem>>, vector<32x640xf32>
    tpu.vector_store %arg6[%c0_36, %c0_37], %66 {strides = array<i32>} : memref<64x640xf32, #tpu.memory_space<vmem>>, vector<32x640xf32>,
    %c320_i32 = arith.constant 320 : i32
    %68 = arith.addi %3, %c320_i32 : i32
    %69 = tpu.assume_multiple %68, 32 : i32
    %c0_38 = arith.constant 0 : index
    %70 = arith.index_cast %69 : i32 to index
    %c0_39 = arith.constant 0 : index
    %71 = vector.load %arg3[%c0_38, %70, %c0_39] : memref<1x1024x640xbf16, #tpu.memory_space<vmem>>, vector<1x32x640xbf16>
    %72 = vector.shape_cast %71 : vector<1x32x640xbf16> to vector<32x640xbf16>
    %73 = arith.extf %72 : vector<32x640xbf16> to vector<32x640xf32>
    %c32_40 = arith.constant 32 : index
    %c0_41 = arith.constant 0 : index
    %74 = vector.load %arg6[%c32_40, %c0_41] : memref<64x640xf32, #tpu.memory_space<vmem>>, vector<32x640xf32>
    %75 = arith.mulf %73, %57 : vector<32x640xf32>
    %76 = arith.addf %74, %75 : vector<32x640xf32>
    %c32_42 = arith.constant 32 : index
    %c0_43 = arith.constant 0 : index
    %77 = vector.load %arg6[%c32_42, %c0_43] : memref<64x640xf32, #tpu.memory_space<vmem>>, vector<32x640xf32>
    tpu.vector_store %arg6[%c32_42, %c0_43], %76 {strides = array<i32>} : memref<64x640xf32, #tpu.memory_space<vmem>>, vector<32x640xf32>,
    %c96_i32 = arith.constant 96 : i32
    %78 = arith.addi %2, %c96_i32 : i32
    %79 = tpu.assume_multiple %78, 32 : i32
    %c0_44 = arith.constant 0 : index
    %80 = arith.index_cast %79 : i32 to index
    %c0_45 = arith.constant 0 : index
    %81 = vector.load %arg2[%c0_44, %80, %c0_45] : memref<1x512x640xbf16, #tpu.memory_space<vmem>>, vector<1x32x640xbf16>
    %82 = vector.shape_cast %81 : vector<1x32x640xbf16> to vector<32x640xbf16>
    %83 = arith.extf %82 : vector<32x640xbf16> to vector<32x640xf32>
    %c96_i32_46 = arith.constant 96 : i32
    %84 = arith.addi %3, %c96_i32_46 : i32
    %85 = tpu.assume_multiple %84, 32 : i32
    %c0_47 = arith.constant 0 : index
    %86 = arith.index_cast %85 : i32 to index
    %c0_48 = arith.constant 0 : index
    %87 = vector.load %arg3[%c0_47, %86, %c0_48] : memref<1x1024x640xbf16, #tpu.memory_space<vmem>>, vector<1x32x640xbf16>
    %88 = vector.shape_cast %87 : vector<1x32x640xbf16> to vector<32x640xbf16>
    %89 = arith.extf %88 : vector<32x640xbf16> to vector<32x640xf32>
    %c0_49 = arith.constant 0 : index
    %c0_50 = arith.constant 0 : index
    %90 = vector.load %arg6[%c0_49, %c0_50] : memref<64x640xf32, #tpu.memory_space<vmem>>, vector<32x640xf32>
    %91 = arith.mulf %89, %83 : vector<32x640xf32>
    %92 = arith.addf %90, %91 : vector<32x640xf32>
    %c0_51 = arith.constant 0 : index
    %c0_52 = arith.constant 0 : index
    %93 = vector.load %arg6[%c0_51, %c0_52] : memref<64x640xf32, #tpu.memory_space<vmem>>, vector<32x640xf32>
    tpu.vector_store %arg6[%c0_51, %c0_52], %92 {strides = array<i32>} : memref<64x640xf32, #tpu.memory_space<vmem>>, vector<32x640xf32>,
    %c352_i32 = arith.constant 352 : i32
    %94 = arith.addi %3, %c352_i32 : i32
    %95 = tpu.assume_multiple %94, 32 : i32
    %c0_53 = arith.constant 0 : index
    %96 = arith.index_cast %95 : i32 to index
    %c0_54 = arith.constant 0 : index
    %97 = vector.load %arg3[%c0_53, %96, %c0_54] : memref<1x1024x640xbf16, #tpu.memory_space<vmem>>, vector<1x32x640xbf16>
    %98 = vector.shape_cast %97 : vector<1x32x640xbf16> to vector<32x640xbf16>
    %99 = arith.extf %98 : vector<32x640xbf16> to vector<32x640xf32>
    %c32_55 = arith.constant 32 : index
    %c0_56 = arith.constant 0 : index
    %100 = vector.load %arg6[%c32_55, %c0_56] : memref<64x640xf32, #tpu.memory_space<vmem>>, vector<32x640xf32>
    %101 = arith.mulf %99, %83 : vector<32x640xf32>
    %102 = arith.addf %100, %101 : vector<32x640xf32>
    %c32_57 = arith.constant 32 : index
    %c0_58 = arith.constant 0 : index
    %103 = vector.load %arg6[%c32_57, %c0_58] : memref<64x640xf32, #tpu.memory_space<vmem>>, vector<32x640xf32>
    tpu.vector_store %arg6[%c32_57, %c0_58], %102 {strides = array<i32>} : memref<64x640xf32, #tpu.memory_space<vmem>>, vector<32x640xf32>,
    %c128_i32 = arith.constant 128 : i32
    %104 = arith.addi %2, %c128_i32 : i32
    %105 = tpu.assume_multiple %104, 32 : i32
    %c0_59 = arith.constant 0 : index
    %106 = arith.index_cast %105 : i32 to index
    %c0_60 = arith.constant 0 : index
    %107 = vector.load %arg2[%c0_59, %106, %c0_60] : memref<1x512x640xbf16, #tpu.memory_space<vmem>>, vector<1x32x640xbf16>
    %108 = vector.shape_cast %107 : vector<1x32x640xbf16> to vector<32x640xbf16>
    %109 = arith.extf %108 : vector<32x640xbf16> to vector<32x640xf32>
    %c128_i32_61 = arith.constant 128 : i32
    %110 = arith.addi %3, %c128_i32_61 : i32
    %111 = tpu.assume_multiple %110, 32 : i32
    %c0_62 = arith.constant 0 : index
    %112 = arith.index_cast %111 : i32 to index
    %c0_63 = arith.constant 0 : index
    %113 = vector.load %arg3[%c0_62, %112, %c0_63] : memref<1x1024x640xbf16, #tpu.memory_space<vmem>>, vector<1x32x640xbf16>
    %114 = vector.shape_cast %113 : vector<1x32x640xbf16> to vector<32x640xbf16>
    %115 = arith.extf %114 : vector<32x640xbf16> to vector<32x640xf32>
    %c0_64 = arith.constant 0 : index
    %c0_65 = arith.constant 0 : index
    %116 = vector.load %arg6[%c0_64, %c0_65] : memref<64x640xf32, #tpu.memory_space<vmem>>, vector<32x640xf32>
    %117 = arith.mulf %115, %109 : vector<32x640xf32>
    %118 = arith.addf %116, %117 : vector<32x640xf32>
    %c0_66 = arith.constant 0 : index
    %c0_67 = arith.constant 0 : index
    %119 = vector.load %arg6[%c0_66, %c0_67] : memref<64x640xf32, #tpu.memory_space<vmem>>, vector<32x640xf32>
    tpu.vector_store %arg6[%c0_66, %c0_67], %118 {strides = array<i32>} : memref<64x640xf32, #tpu.memory_space<vmem>>, vector<32x640xf32>,
    %c384_i32 = arith.constant 384 : i32
    %120 = arith.addi %3, %c384_i32 : i32
    %121 = tpu.assume_multiple %120, 32 : i32
    %c0_68 = arith.constant 0 : index
    %122 = arith.index_cast %121 : i32 to index
    %c0_69 = arith.constant 0 : index
    %123 = vector.load %arg3[%c0_68, %122, %c0_69] : memref<1x1024x640xbf16, #tpu.memory_space<vmem>>, vector<1x32x640xbf16>
    %124 = vector.shape_cast %123 : vector<1x32x640xbf16> to vector<32x640xbf16>
    %125 = arith.extf %124 : vector<32x640xbf16> to vector<32x640xf32>
    %c32_70 = arith.constant 32 : index
    %c0_71 = arith.constant 0 : index
    %126 = vector.load %arg6[%c32_70, %c0_71] : memref<64x640xf32, #tpu.memory_space<vmem>>, vector<32x640xf32>
    %127 = arith.mulf %125, %109 : vector<32x640xf32>
    %128 = arith.addf %126, %127 : vector<32x640xf32>
    %c32_72 = arith.constant 32 : index
    %c0_73 = arith.constant 0 : index
    %129 = vector.load %arg6[%c32_72, %c0_73] : memref<64x640xf32, #tpu.memory_space<vmem>>, vector<32x640xf32>
    tpu.vector_store %arg6[%c32_72, %c0_73], %128 {strides = array<i32>} : memref<64x640xf32, #tpu.memory_space<vmem>>, vector<32x640xf32>,
    %c160_i32 = arith.constant 160 : i32
    %130 = arith.addi %2, %c160_i32 : i32
    %131 = tpu.assume_multiple %130, 32 : i32
    %c0_74 = arith.constant 0 : index
    %132 = arith.index_cast %131 : i32 to index
    %c0_75 = arith.constant 0 : index
    %133 = vector.load %arg2[%c0_74, %132, %c0_75] : memref<1x512x640xbf16, #tpu.memory_space<vmem>>, vector<1x32x640xbf16>
    %134 = vector.shape_cast %133 : vector<1x32x640xbf16> to vector<32x640xbf16>
    %135 = arith.extf %134 : vector<32x640xbf16> to vector<32x640xf32>
    %c160_i32_76 = arith.constant 160 : i32
    %136 = arith.addi %3, %c160_i32_76 : i32
    %137 = tpu.assume_multiple %136, 32 : i32
    %c0_77 = arith.constant 0 : index
    %138 = arith.index_cast %137 : i32 to index
    %c0_78 = arith.constant 0 : index
    %139 = vector.load %arg3[%c0_77, %138, %c0_78] : memref<1x1024x640xbf16, #tpu.memory_space<vmem>>, vector<1x32x640xbf16>
    %140 = vector.shape_cast %139 : vector<1x32x640xbf16> to vector<32x640xbf16>
    %141 = arith.extf %140 : vector<32x640xbf16> to vector<32x640xf32>
    %c0_79 = arith.constant 0 : index
    %c0_80 = arith.constant 0 : index
    %142 = vector.load %arg6[%c0_79, %c0_80] : memref<64x640xf32, #tpu.memory_space<vmem>>, vector<32x640xf32>
    %143 = arith.mulf %141, %135 : vector<32x640xf32>
    %144 = arith.addf %142, %143 : vector<32x640xf32>
    %c0_81 = arith.constant 0 : index
    %c0_82 = arith.constant 0 : index
    %145 = vector.load %arg6[%c0_81, %c0_82] : memref<64x640xf32, #tpu.memory_space<vmem>>, vector<32x640xf32>
    tpu.vector_store %arg6[%c0_81, %c0_82], %144 {strides = array<i32>} : memref<64x640xf32, #tpu.memory_space<vmem>>, vector<32x640xf32>,
    %c416_i32 = arith.constant 416 : i32
    %146 = arith.addi %3, %c416_i32 : i32
    %147 = tpu.assume_multiple %146, 32 : i32
    %c0_83 = arith.constant 0 : index
    %148 = arith.index_cast %147 : i32 to index
    %c0_84 = arith.constant 0 : index
    %149 = vector.load %arg3[%c0_83, %148, %c0_84] : memref<1x1024x640xbf16, #tpu.memory_space<vmem>>, vector<1x32x640xbf16>
    %150 = vector.shape_cast %149 : vector<1x32x640xbf16> to vector<32x640xbf16>
    %151 = arith.extf %150 : vector<32x640xbf16> to vector<32x640xf32>
    %c32_85 = arith.constant 32 : index
    %c0_86 = arith.constant 0 : index
    %152 = vector.load %arg6[%c32_85, %c0_86] : memref<64x640xf32, #tpu.memory_space<vmem>>, vector<32x640xf32>
    %153 = arith.mulf %151, %135 : vector<32x640xf32>
    %154 = arith.addf %152, %153 : vector<32x640xf32>
    %c32_87 = arith.constant 32 : index
    %c0_88 = arith.constant 0 : index
    %155 = vector.load %arg6[%c32_87, %c0_88] : memref<64x640xf32, #tpu.memory_space<vmem>>, vector<32x640xf32>
    tpu.vector_store %arg6[%c32_87, %c0_88], %154 {strides = array<i32>} : memref<64x640xf32, #tpu.memory_space<vmem>>, vector<32x640xf32>,
    %c192_i32 = arith.constant 192 : i32
    %156 = arith.addi %2, %c192_i32 : i32
    %157 = tpu.assume_multiple %156, 32 : i32
    %c0_89 = arith.constant 0 : index
    %158 = arith.index_cast %157 : i32 to index
    %c0_90 = arith.constant 0 : index
    %159 = vector.load %arg2[%c0_89, %158, %c0_90] : memref<1x512x640xbf16, #tpu.memory_space<vmem>>, vector<1x32x640xbf16>
    %160 = vector.shape_cast %159 : vector<1x32x640xbf16> to vector<32x640xbf16>
    %161 = arith.extf %160 : vector<32x640xbf16> to vector<32x640xf32>
    %c192_i32_91 = arith.constant 192 : i32
    %162 = arith.addi %3, %c192_i32_91 : i32
    %163 = tpu.assume_multiple %162, 32 : i32
    %c0_92 = arith.constant 0 : index
    %164 = arith.index_cast %163 : i32 to index
    %c0_93 = arith.constant 0 : index
    %165 = vector.load %arg3[%c0_92, %164, %c0_93] : memref<1x1024x640xbf16, #tpu.memory_space<vmem>>, vector<1x32x640xbf16>
    %166 = vector.shape_cast %165 : vector<1x32x640xbf16> to vector<32x640xbf16>
    %167 = arith.extf %166 : vector<32x640xbf16> to vector<32x640xf32>
    %c0_94 = arith.constant 0 : index
    %c0_95 = arith.constant 0 : index
    %168 = vector.load %arg6[%c0_94, %c0_95] : memref<64x640xf32, #tpu.memory_space<vmem>>, vector<32x640xf32>
    %169 = arith.mulf %167, %161 : vector<32x640xf32>
    %170 = arith.addf %168, %169 : vector<32x640xf32>
    %c0_96 = arith.constant 0 : index
    %c0_97 = arith.constant 0 : index
    %171 = vector.load %arg6[%c0_96, %c0_97] : memref<64x640xf32, #tpu.memory_space<vmem>>, vector<32x640xf32>
    tpu.vector_store %arg6[%c0_96, %c0_97], %170 {strides = array<i32>} : memref<64x640xf32, #tpu.memory_space<vmem>>, vector<32x640xf32>,
    %c448_i32 = arith.constant 448 : i32
    %172 = arith.addi %3, %c448_i32 : i32
    %173 = tpu.assume_multiple %172, 32 : i32
    %c0_98 = arith.constant 0 : index
    %174 = arith.index_cast %173 : i32 to index
    %c0_99 = arith.constant 0 : index
    %175 = vector.load %arg3[%c0_98, %174, %c0_99] : memref<1x1024x640xbf16, #tpu.memory_space<vmem>>, vector<1x32x640xbf16>
    %176 = vector.shape_cast %175 : vector<1x32x640xbf16> to vector<32x640xbf16>
    %177 = arith.extf %176 : vector<32x640xbf16> to vector<32x640xf32>
    %c32_100 = arith.constant 32 : index
    %c0_101 = arith.constant 0 : index
    %178 = vector.load %arg6[%c32_100, %c0_101] : memref<64x640xf32, #tpu.memory_space<vmem>>, vector<32x640xf32>
    %179 = arith.mulf %177, %161 : vector<32x640xf32>
    %180 = arith.addf %178, %179 : vector<32x640xf32>
    %c32_102 = arith.constant 32 : index
    %c0_103 = arith.constant 0 : index
    %181 = vector.load %arg6[%c32_102, %c0_103] : memref<64x640xf32, #tpu.memory_space<vmem>>, vector<32x640xf32>
    tpu.vector_store %arg6[%c32_102, %c0_103], %180 {strides = array<i32>} : memref<64x640xf32, #tpu.memory_space<vmem>>, vector<32x640xf32>,
    %c224_i32 = arith.constant 224 : i32
    %182 = arith.addi %2, %c224_i32 : i32
    %183 = tpu.assume_multiple %182, 32 : i32
    %c0_104 = arith.constant 0 : index
    %184 = arith.index_cast %183 : i32 to index
    %c0_105 = arith.constant 0 : index
    %185 = vector.load %arg2[%c0_104, %184, %c0_105] : memref<1x512x640xbf16, #tpu.memory_space<vmem>>, vector<1x32x640xbf16>
    %186 = vector.shape_cast %185 : vector<1x32x640xbf16> to vector<32x640xbf16>
    %187 = arith.extf %186 : vector<32x640xbf16> to vector<32x640xf32>
    %c224_i32_106 = arith.constant 224 : i32
    %188 = arith.addi %3, %c224_i32_106 : i32
    %189 = tpu.assume_multiple %188, 32 : i32
    %c0_107 = arith.constant 0 : index
    %190 = arith.index_cast %189 : i32 to index
    %c0_108 = arith.constant 0 : index
    %191 = vector.load %arg3[%c0_107, %190, %c0_108] : memref<1x1024x640xbf16, #tpu.memory_space<vmem>>, vector<1x32x640xbf16>
    %192 = vector.shape_cast %191 : vector<1x32x640xbf16> to vector<32x640xbf16>
    %193 = arith.extf %192 : vector<32x640xbf16> to vector<32x640xf32>
    %c0_109 = arith.constant 0 : index
    %c0_110 = arith.constant 0 : index
    %194 = vector.load %arg6[%c0_109, %c0_110] : memref<64x640xf32, #tpu.memory_space<vmem>>, vector<32x640xf32>
    %195 = arith.mulf %193, %187 : vector<32x640xf32>
    %196 = arith.addf %194, %195 : vector<32x640xf32>
    %c0_111 = arith.constant 0 : index
    %c0_112 = arith.constant 0 : index
    %197 = vector.load %arg6[%c0_111, %c0_112] : memref<64x640xf32, #tpu.memory_space<vmem>>, vector<32x640xf32>
    tpu.vector_store %arg6[%c0_111, %c0_112], %196 {strides = array<i32>} : memref<64x640xf32, #tpu.memory_space<vmem>>, vector<32x640xf32>,
    %c480_i32 = arith.constant 480 : i32
    %198 = arith.addi %3, %c480_i32 : i32
    %199 = tpu.assume_multiple %198, 32 : i32
    %c0_113 = arith.constant 0 : index
    %200 = arith.index_cast %199 : i32 to index
    %c0_114 = arith.constant 0 : index
    %201 = vector.load %arg3[%c0_113, %200, %c0_114] : memref<1x1024x640xbf16, #tpu.memory_space<vmem>>, vector<1x32x640xbf16>
    %202 = vector.shape_cast %201 : vector<1x32x640xbf16> to vector<32x640xbf16>
    %203 = arith.extf %202 : vector<32x640xbf16> to vector<32x640xf32>
    %c32_115 = arith.constant 32 : index
    %c0_116 = arith.constant 0 : index
    %204 = vector.load %arg6[%c32_115, %c0_116] : memref<64x640xf32, #tpu.memory_space<vmem>>, vector<32x640xf32>
    %205 = arith.mulf %203, %187 : vector<32x640xf32>
    %206 = arith.addf %204, %205 : vector<32x640xf32>
    %c32_117 = arith.constant 32 : index
    %c0_118 = arith.constant 0 : index
    %207 = vector.load %arg6[%c32_117, %c0_118] : memref<64x640xf32, #tpu.memory_space<vmem>>, vector<32x640xf32>
    tpu.vector_store %arg6[%c32_117, %c0_118], %206 {strides = array<i32>} : memref<64x640xf32, #tpu.memory_space<vmem>>, vector<32x640xf32>,
    %c0_119 = arith.constant 0 : index
    %c0_120 = arith.constant 0 : index
    %208 = vector.load %arg6[%c0_119, %c0_120] : memref<64x640xf32, #tpu.memory_space<vmem>>, vector<64x640xf32>
    %209 = arith.truncf %208 : vector<64x640xf32> to vector<64x640xbf16>
    %c0_121 = arith.constant 0 : index
    %c0_122 = arith.constant 0 : index
    %c0_123 = arith.constant 0 : index
    %210 = vector.load %arg5[%c0_121, %c0_122, %c0_123] : memref<1x6x640xf32, #tpu.memory_space<vmem>>, vector<1x6x640xf32>
    %211 = vector.shape_cast %210 : vector<1x6x640xf32> to vector<6x640xf32>
    %212 = arith.index_cast %c0_i32 : i32 to index
    %c0_124 = arith.constant 0 : index
    %c0_125 = arith.constant 0 : index
    %213 = vector.load %arg4[%212, %c0_124, %c0_125] : memref<2x6x64xbf16, #tpu.memory_space<vmem>>, vector<1x6x64xbf16>
    %214 = vector.shape_cast %213 : vector<1x6x64xbf16> to vector<6x64xbf16>
    %cst_126 = arith.constant dense<0.000000e+00> : vector<6x640xf32>
    %215 = tpu.matmul %214, %209, %cst_126 {dimension_numbers = #tpu.dot_dimension_numbers<[1], [0], [0], [1], [0, 0, 1, 1], [], []>} : vector<6x64xbf16>, vector<64x640xbf16>, vector<6x640xf32> -> vector<6x640xf32>
    %216 = arith.addf %211, %215 : vector<6x640xf32>
    %c0_127 = arith.constant 0 : index
    %c0_128 = arith.constant 0 : index
    %c0_129 = arith.constant 0 : index
    %217 = vector.load %arg5[%c0_127, %c0_128, %c0_129] : memref<1x6x640xf32, #tpu.memory_space<vmem>>, vector<1x6x640xf32>
    %218 = vector.shape_cast %217 : vector<1x6x640xf32> to vector<6x640xf32>
    %219 = vector.shape_cast %216 : vector<6x640xf32> to vector<1x6x640xf32>
    tpu.vector_store %arg5[%c0_127, %c0_128, %c0_129], %219 {strides = array<i32>} : memref<1x6x640xf32, #tpu.memory_space<vmem>>, vector<1x6x640xf32>,
    %c1_i32 = arith.constant 1 : i32
    %c256_i32_130 = arith.constant 256 : i32
    %220 = arith.muli %c1_i32, %c256_i32_130 : i32
    %c512_i32_131 = arith.constant 512 : i32
    %221 = arith.muli %c1_i32, %c512_i32_131 : i32
    %c0_i32_132 = arith.constant 0 : i32
    %222 = arith.addi %220, %c0_i32_132 : i32
    %223 = tpu.assume_multiple %222, 32 : i32
    %c0_133 = arith.constant 0 : index
    %224 = arith.index_cast %223 : i32 to index
    %c0_134 = arith.constant 0 : index
    %225 = vector.load %arg2[%c0_133, %224, %c0_134] : memref<1x512x640xbf16, #tpu.memory_space<vmem>>, vector<1x32x640xbf16>
    %226 = vector.shape_cast %225 : vector<1x32x640xbf16> to vector<32x640xbf16>
    %227 = arith.extf %226 : vector<32x640xbf16> to vector<32x640xf32>
    %c0_i32_135 = arith.constant 0 : i32
    %228 = arith.addi %221, %c0_i32_135 : i32
    %229 = tpu.assume_multiple %228, 32 : i32
    %c0_136 = arith.constant 0 : index
    %230 = arith.index_cast %229 : i32 to index
    %c0_137 = arith.constant 0 : index
    %231 = vector.load %arg3[%c0_136, %230, %c0_137] : memref<1x1024x640xbf16, #tpu.memory_space<vmem>>, vector<1x32x640xbf16>
    %232 = vector.shape_cast %231 : vector<1x32x640xbf16> to vector<32x640xbf16>
    %233 = arith.extf %232 : vector<32x640xbf16> to vector<32x640xf32>
    %234 = arith.mulf %233, %227 : vector<32x640xf32>
    %c0_138 = arith.constant 0 : index
    %c0_139 = arith.constant 0 : index
    %235 = vector.load %arg6[%c0_138, %c0_139] : memref<64x640xf32, #tpu.memory_space<vmem>>, vector<32x640xf32>
    tpu.vector_store %arg6[%c0_138, %c0_139], %234 {strides = array<i32>} : memref<64x640xf32, #tpu.memory_space<vmem>>, vector<32x640xf32>,
    %c256_i32_140 = arith.constant 256 : i32
    %236 = arith.addi %221, %c256_i32_140 : i32
    %237 = tpu.assume_multiple %236, 32 : i32
    %c0_141 = arith.constant 0 : index
    %238 = arith.index_cast %237 : i32 to index
    %c0_142 = arith.constant 0 : index
    %239 = vector.load %arg3[%c0_141, %238, %c0_142] : memref<1x1024x640xbf16, #tpu.memory_space<vmem>>, vector<1x32x640xbf16>
    %240 = vector.shape_cast %239 : vector<1x32x640xbf16> to vector<32x640xbf16>
    %241 = arith.extf %240 : vector<32x640xbf16> to vector<32x640xf32>
    %242 = arith.mulf %241, %227 : vector<32x640xf32>
    %c32_143 = arith.constant 32 : index
    %c0_144 = arith.constant 0 : index
    %243 = vector.load %arg6[%c32_143, %c0_144] : memref<64x640xf32, #tpu.memory_space<vmem>>, vector<32x640xf32>
    tpu.vector_store %arg6[%c32_143, %c0_144], %242 {strides = array<i32>} : memref<64x640xf32, #tpu.memory_space<vmem>>, vector<32x640xf32>,
    %c32_i32_145 = arith.constant 32 : i32
    %244 = arith.addi %220, %c32_i32_145 : i32
    %245 = tpu.assume_multiple %244, 32 : i32
    %c0_146 = arith.constant 0 : index
    %246 = arith.index_cast %245 : i32 to index
    %c0_147 = arith.constant 0 : index
    %247 = vector.load %arg2[%c0_146, %246, %c0_147] : memref<1x512x640xbf16, #tpu.memory_space<vmem>>, vector<1x32x640xbf16>
    %248 = vector.shape_cast %247 : vector<1x32x640xbf16> to vector<32x640xbf16>
    %249 = arith.extf %248 : vector<32x640xbf16> to vector<32x640xf32>
    %c32_i32_148 = arith.constant 32 : i32
    %250 = arith.addi %221, %c32_i32_148 : i32
    %251 = tpu.assume_multiple %250, 32 : i32
    %c0_149 = arith.constant 0 : index
    %252 = arith.index_cast %251 : i32 to index
    %c0_150 = arith.constant 0 : index
    %253 = vector.load %arg3[%c0_149, %252, %c0_150] : memref<1x1024x640xbf16, #tpu.memory_space<vmem>>, vector<1x32x640xbf16>
    %254 = vector.shape_cast %253 : vector<1x32x640xbf16> to vector<32x640xbf16>
    %255 = arith.extf %254 : vector<32x640xbf16> to vector<32x640xf32>
    %c0_151 = arith.constant 0 : index
    %c0_152 = arith.constant 0 : index
    %256 = vector.load %arg6[%c0_151, %c0_152] : memref<64x640xf32, #tpu.memory_space<vmem>>, vector<32x640xf32>
    %257 = arith.mulf %255, %249 : vector<32x640xf32>
    %258 = arith.addf %256, %257 : vector<32x640xf32>
    %c0_153 = arith.constant 0 : index
    %c0_154 = arith.constant 0 : index
    %259 = vector.load %arg6[%c0_153, %c0_154] : memref<64x640xf32, #tpu.memory_space<vmem>>, vector<32x640xf32>
    tpu.vector_store %arg6[%c0_153, %c0_154], %258 {strides = array<i32>} : memref<64x640xf32, #tpu.memory_space<vmem>>, vector<32x640xf32>,
    %c288_i32_155 = arith.constant 288 : i32
    %260 = arith.addi %221, %c288_i32_155 : i32
    %261 = tpu.assume_multiple %260, 32 : i32
    %c0_156 = arith.constant 0 : index
    %262 = arith.index_cast %261 : i32 to index
    %c0_157 = arith.constant 0 : index
    %263 = vector.load %arg3[%c0_156, %262, %c0_157] : memref<1x1024x640xbf16, #tpu.memory_space<vmem>>, vector<1x32x640xbf16>
    %264 = vector.shape_cast %263 : vector<1x32x640xbf16> to vector<32x640xbf16>
    %265 = arith.extf %264 : vector<32x640xbf16> to vector<32x640xf32>
    %c32_158 = arith.constant 32 : index
    %c0_159 = arith.constant 0 : index
    %266 = vector.load %arg6[%c32_158, %c0_159] : memref<64x640xf32, #tpu.memory_space<vmem>>, vector<32x640xf32>
    %267 = arith.mulf %265, %249 : vector<32x640xf32>
    %268 = arith.addf %266, %267 : vector<32x640xf32>
    %c32_160 = arith.constant 32 : index
    %c0_161 = arith.constant 0 : index
    %269 = vector.load %arg6[%c32_160, %c0_161] : memref<64x640xf32, #tpu.memory_space<vmem>>, vector<32x640xf32>
    tpu.vector_store %arg6[%c32_160, %c0_161], %268 {strides = array<i32>} : memref<64x640xf32, #tpu.memory_space<vmem>>, vector<32x640xf32>,
    %c64_i32_162 = arith.constant 64 : i32
    %270 = arith.addi %220, %c64_i32_162 : i32
    %271 = tpu.assume_multiple %270, 32 : i32
    %c0_163 = arith.constant 0 : index
    %272 = arith.index_cast %271 : i32 to index
    %c0_164 = arith.constant 0 : index
    %273 = vector.load %arg2[%c0_163, %272, %c0_164] : memref<1x512x640xbf16, #tpu.memory_space<vmem>>, vector<1x32x640xbf16>
    %274 = vector.shape_cast %273 : vector<1x32x640xbf16> to vector<32x640xbf16>
    %275 = arith.extf %274 : vector<32x640xbf16> to vector<32x640xf32>
    %c64_i32_165 = arith.constant 64 : i32
    %276 = arith.addi %221, %c64_i32_165 : i32
    %277 = tpu.assume_multiple %276, 32 : i32
    %c0_166 = arith.constant 0 : index
    %278 = arith.index_cast %277 : i32 to index
    %c0_167 = arith.constant 0 : index
    %279 = vector.load %arg3[%c0_166, %278, %c0_167] : memref<1x1024x640xbf16, #tpu.memory_space<vmem>>, vector<1x32x640xbf16>
    %280 = vector.shape_cast %279 : vector<1x32x640xbf16> to vector<32x640xbf16>
    %281 = arith.extf %280 : vector<32x640xbf16> to vector<32x640xf32>
    %c0_168 = arith.constant 0 : index
    %c0_169 = arith.constant 0 : index
    %282 = vector.load %arg6[%c0_168, %c0_169] : memref<64x640xf32, #tpu.memory_space<vmem>>, vector<32x640xf32>
    %283 = arith.mulf %281, %275 : vector<32x640xf32>
    %284 = arith.addf %282, %283 : vector<32x640xf32>
    %c0_170 = arith.constant 0 : index
    %c0_171 = arith.constant 0 : index
    %285 = vector.load %arg6[%c0_170, %c0_171] : memref<64x640xf32, #tpu.memory_space<vmem>>, vector<32x640xf32>
    tpu.vector_store %arg6[%c0_170, %c0_171], %284 {strides = array<i32>} : memref<64x640xf32, #tpu.memory_space<vmem>>, vector<32x640xf32>,
    %c320_i32_172 = arith.constant 320 : i32
    %286 = arith.addi %221, %c320_i32_172 : i32
    %287 = tpu.assume_multiple %286, 32 : i32
    %c0_173 = arith.constant 0 : index
    %288 = arith.index_cast %287 : i32 to index
    %c0_174 = arith.constant 0 : index
    %289 = vector.load %arg3[%c0_173, %288, %c0_174] : memref<1x1024x640xbf16, #tpu.memory_space<vmem>>, vector<1x32x640xbf16>
    %290 = vector.shape_cast %289 : vector<1x32x640xbf16> to vector<32x640xbf16>
    %291 = arith.extf %290 : vector<32x640xbf16> to vector<32x640xf32>
    %c32_175 = arith.constant 32 : index
    %c0_176 = arith.constant 0 : index
    %292 = vector.load %arg6[%c32_175, %c0_176] : memref<64x640xf32, #tpu.memory_space<vmem>>, vector<32x640xf32>
    %293 = arith.mulf %291, %275 : vector<32x640xf32>
    %294 = arith.addf %292, %293 : vector<32x640xf32>
    %c32_177 = arith.constant 32 : index
    %c0_178 = arith.constant 0 : index
    %295 = vector.load %arg6[%c32_177, %c0_178] : memref<64x640xf32, #tpu.memory_space<vmem>>, vector<32x640xf32>
    tpu.vector_store %arg6[%c32_177, %c0_178], %294 {strides = array<i32>} : memref<64x640xf32, #tpu.memory_space<vmem>>, vector<32x640xf32>,
    %c96_i32_179 = arith.constant 96 : i32
    %296 = arith.addi %220, %c96_i32_179 : i32
    %297 = tpu.assume_multiple %296, 32 : i32
    %c0_180 = arith.constant 0 : index
    %298 = arith.index_cast %297 : i32 to index
    %c0_181 = arith.constant 0 : index
    %299 = vector.load %arg2[%c0_180, %298, %c0_181] : memref<1x512x640xbf16, #tpu.memory_space<vmem>>, vector<1x32x640xbf16>
    %300 = vector.shape_cast %299 : vector<1x32x640xbf16> to vector<32x640xbf16>
    %301 = arith.extf %300 : vector<32x640xbf16> to vector<32x640xf32>
    %c96_i32_182 = arith.constant 96 : i32
    %302 = arith.addi %221, %c96_i32_182 : i32
    %303 = tpu.assume_multiple %302, 32 : i32
    %c0_183 = arith.constant 0 : index
    %304 = arith.index_cast %303 : i32 to index
    %c0_184 = arith.constant 0 : index
    %305 = vector.load %arg3[%c0_183, %304, %c0_184] : memref<1x1024x640xbf16, #tpu.memory_space<vmem>>, vector<1x32x640xbf16>
    %306 = vector.shape_cast %305 : vector<1x32x640xbf16> to vector<32x640xbf16>
    %307 = arith.extf %306 : vector<32x640xbf16> to vector<32x640xf32>
    %c0_185 = arith.constant 0 : index
    %c0_186 = arith.constant 0 : index
    %308 = vector.load %arg6[%c0_185, %c0_186] : memref<64x640xf32, #tpu.memory_space<vmem>>, vector<32x640xf32>
    %309 = arith.mulf %307, %301 : vector<32x640xf32>
    %310 = arith.addf %308, %309 : vector<32x640xf32>
    %c0_187 = arith.constant 0 : index
    %c0_188 = arith.constant 0 : index
    %311 = vector.load %arg6[%c0_187, %c0_188] : memref<64x640xf32, #tpu.memory_space<vmem>>, vector<32x640xf32>
    tpu.vector_store %arg6[%c0_187, %c0_188], %310 {strides = array<i32>} : memref<64x640xf32, #tpu.memory_space<vmem>>, vector<32x640xf32>,
    %c352_i32_189 = arith.constant 352 : i32
    %312 = arith.addi %221, %c352_i32_189 : i32
    %313 = tpu.assume_multiple %312, 32 : i32
    %c0_190 = arith.constant 0 : index
    %314 = arith.index_cast %313 : i32 to index
    %c0_191 = arith.constant 0 : index
    %315 = vector.load %arg3[%c0_190, %314, %c0_191] : memref<1x1024x640xbf16, #tpu.memory_space<vmem>>, vector<1x32x640xbf16>
    %316 = vector.shape_cast %315 : vector<1x32x640xbf16> to vector<32x640xbf16>
    %317 = arith.extf %316 : vector<32x640xbf16> to vector<32x640xf32>
    %c32_192 = arith.constant 32 : index
    %c0_193 = arith.constant 0 : index
    %318 = vector.load %arg6[%c32_192, %c0_193] : memref<64x640xf32, #tpu.memory_space<vmem>>, vector<32x640xf32>
    %319 = arith.mulf %317, %301 : vector<32x640xf32>
    %320 = arith.addf %318, %319 : vector<32x640xf32>
    %c32_194 = arith.constant 32 : index
    %c0_195 = arith.constant 0 : index
    %321 = vector.load %arg6[%c32_194, %c0_195] : memref<64x640xf32, #tpu.memory_space<vmem>>, vector<32x640xf32>
    tpu.vector_store %arg6[%c32_194, %c0_195], %320 {strides = array<i32>} : memref<64x640xf32, #tpu.memory_space<vmem>>, vector<32x640xf32>,
    %c128_i32_196 = arith.constant 128 : i32
    %322 = arith.addi %220, %c128_i32_196 : i32
    %323 = tpu.assume_multiple %322, 32 : i32
    %c0_197 = arith.constant 0 : index
    %324 = arith.index_cast %323 : i32 to index
    %c0_198 = arith.constant 0 : index
    %325 = vector.load %arg2[%c0_197, %324, %c0_198] : memref<1x512x640xbf16, #tpu.memory_space<vmem>>, vector<1x32x640xbf16>
    %326 = vector.shape_cast %325 : vector<1x32x640xbf16> to vector<32x640xbf16>
    %327 = arith.extf %326 : vector<32x640xbf16> to vector<32x640xf32>
    %c128_i32_199 = arith.constant 128 : i32
    %328 = arith.addi %221, %c128_i32_199 : i32
    %329 = tpu.assume_multiple %328, 32 : i32
    %c0_200 = arith.constant 0 : index
    %330 = arith.index_cast %329 : i32 to index
    %c0_201 = arith.constant 0 : index
    %331 = vector.load %arg3[%c0_200, %330, %c0_201] : memref<1x1024x640xbf16, #tpu.memory_space<vmem>>, vector<1x32x640xbf16>
    %332 = vector.shape_cast %331 : vector<1x32x640xbf16> to vector<32x640xbf16>
    %333 = arith.extf %332 : vector<32x640xbf16> to vector<32x640xf32>
    %c0_202 = arith.constant 0 : index
    %c0_203 = arith.constant 0 : index
    %334 = vector.load %arg6[%c0_202, %c0_203] : memref<64x640xf32, #tpu.memory_space<vmem>>, vector<32x640xf32>
    %335 = arith.mulf %333, %327 : vector<32x640xf32>
    %336 = arith.addf %334, %335 : vector<32x640xf32>
    %c0_204 = arith.constant 0 : index
    %c0_205 = arith.constant 0 : index
    %337 = vector.load %arg6[%c0_204, %c0_205] : memref<64x640xf32, #tpu.memory_space<vmem>>, vector<32x640xf32>
    tpu.vector_store %arg6[%c0_204, %c0_205], %336 {strides = array<i32>} : memref<64x640xf32, #tpu.memory_space<vmem>>, vector<32x640xf32>,
    %c384_i32_206 = arith.constant 384 : i32
    %338 = arith.addi %221, %c384_i32_206 : i32
    %339 = tpu.assume_multiple %338, 32 : i32
    %c0_207 = arith.constant 0 : index
    %340 = arith.index_cast %339 : i32 to index
    %c0_208 = arith.constant 0 : index
    %341 = vector.load %arg3[%c0_207, %340, %c0_208] : memref<1x1024x640xbf16, #tpu.memory_space<vmem>>, vector<1x32x640xbf16>
    %342 = vector.shape_cast %341 : vector<1x32x640xbf16> to vector<32x640xbf16>
    %343 = arith.extf %342 : vector<32x640xbf16> to vector<32x640xf32>
    %c32_209 = arith.constant 32 : index
    %c0_210 = arith.constant 0 : index
    %344 = vector.load %arg6[%c32_209, %c0_210] : memref<64x640xf32, #tpu.memory_space<vmem>>, vector<32x640xf32>
    %345 = arith.mulf %343, %327 : vector<32x640xf32>
    %346 = arith.addf %344, %345 : vector<32x640xf32>
    %c32_211 = arith.constant 32 : index
    %c0_212 = arith.constant 0 : index
    %347 = vector.load %arg6[%c32_211, %c0_212] : memref<64x640xf32, #tpu.memory_space<vmem>>, vector<32x640xf32>
    tpu.vector_store %arg6[%c32_211, %c0_212], %346 {strides = array<i32>} : memref<64x640xf32, #tpu.memory_space<vmem>>, vector<32x640xf32>,
    %c160_i32_213 = arith.constant 160 : i32
    %348 = arith.addi %220, %c160_i32_213 : i32
    %349 = tpu.assume_multiple %348, 32 : i32
    %c0_214 = arith.constant 0 : index
    %350 = arith.index_cast %349 : i32 to index
    %c0_215 = arith.constant 0 : index
    %351 = vector.load %arg2[%c0_214, %350, %c0_215] : memref<1x512x640xbf16, #tpu.memory_space<vmem>>, vector<1x32x640xbf16>
    %352 = vector.shape_cast %351 : vector<1x32x640xbf16> to vector<32x640xbf16>
    %353 = arith.extf %352 : vector<32x640xbf16> to vector<32x640xf32>
    %c160_i32_216 = arith.constant 160 : i32
    %354 = arith.addi %221, %c160_i32_216 : i32
    %355 = tpu.assume_multiple %354, 32 : i32
    %c0_217 = arith.constant 0 : index
    %356 = arith.index_cast %355 : i32 to index
    %c0_218 = arith.constant 0 : index
    %357 = vector.load %arg3[%c0_217, %356, %c0_218] : memref<1x1024x640xbf16, #tpu.memory_space<vmem>>, vector<1x32x640xbf16>
    %358 = vector.shape_cast %357 : vector<1x32x640xbf16> to vector<32x640xbf16>
    %359 = arith.extf %358 : vector<32x640xbf16> to vector<32x640xf32>
    %c0_219 = arith.constant 0 : index
    %c0_220 = arith.constant 0 : index
    %360 = vector.load %arg6[%c0_219, %c0_220] : memref<64x640xf32, #tpu.memory_space<vmem>>, vector<32x640xf32>
    %361 = arith.mulf %359, %353 : vector<32x640xf32>
    %362 = arith.addf %360, %361 : vector<32x640xf32>
    %c0_221 = arith.constant 0 : index
    %c0_222 = arith.constant 0 : index
    %363 = vector.load %arg6[%c0_221, %c0_222] : memref<64x640xf32, #tpu.memory_space<vmem>>, vector<32x640xf32>
    tpu.vector_store %arg6[%c0_221, %c0_222], %362 {strides = array<i32>} : memref<64x640xf32, #tpu.memory_space<vmem>>, vector<32x640xf32>,
    %c416_i32_223 = arith.constant 416 : i32
    %364 = arith.addi %221, %c416_i32_223 : i32
    %365 = tpu.assume_multiple %364, 32 : i32
    %c0_224 = arith.constant 0 : index
    %366 = arith.index_cast %365 : i32 to index
    %c0_225 = arith.constant 0 : index
    %367 = vector.load %arg3[%c0_224, %366, %c0_225] : memref<1x1024x640xbf16, #tpu.memory_space<vmem>>, vector<1x32x640xbf16>
    %368 = vector.shape_cast %367 : vector<1x32x640xbf16> to vector<32x640xbf16>
    %369 = arith.extf %368 : vector<32x640xbf16> to vector<32x640xf32>
    %c32_226 = arith.constant 32 : index
    %c0_227 = arith.constant 0 : index
    %370 = vector.load %arg6[%c32_226, %c0_227] : memref<64x640xf32, #tpu.memory_space<vmem>>, vector<32x640xf32>
    %371 = arith.mulf %369, %353 : vector<32x640xf32>
    %372 = arith.addf %370, %371 : vector<32x640xf32>
    %c32_228 = arith.constant 32 : index
    %c0_229 = arith.constant 0 : index
    %373 = vector.load %arg6[%c32_228, %c0_229] : memref<64x640xf32, #tpu.memory_space<vmem>>, vector<32x640xf32>
    tpu.vector_store %arg6[%c32_228, %c0_229], %372 {strides = array<i32>} : memref<64x640xf32, #tpu.memory_space<vmem>>, vector<32x640xf32>,
    %c192_i32_230 = arith.constant 192 : i32
    %374 = arith.addi %220, %c192_i32_230 : i32
    %375 = tpu.assume_multiple %374, 32 : i32
    %c0_231 = arith.constant 0 : index
    %376 = arith.index_cast %375 : i32 to index
    %c0_232 = arith.constant 0 : index
    %377 = vector.load %arg2[%c0_231, %376, %c0_232] : memref<1x512x640xbf16, #tpu.memory_space<vmem>>, vector<1x32x640xbf16>
    %378 = vector.shape_cast %377 : vector<1x32x640xbf16> to vector<32x640xbf16>
    %379 = arith.extf %378 : vector<32x640xbf16> to vector<32x640xf32>
    %c192_i32_233 = arith.constant 192 : i32
    %380 = arith.addi %221, %c192_i32_233 : i32
    %381 = tpu.assume_multiple %380, 32 : i32
    %c0_234 = arith.constant 0 : index
    %382 = arith.index_cast %381 : i32 to index
    %c0_235 = arith.constant 0 : index
    %383 = vector.load %arg3[%c0_234, %382, %c0_235] : memref<1x1024x640xbf16, #tpu.memory_space<vmem>>, vector<1x32x640xbf16>
    %384 = vector.shape_cast %383 : vector<1x32x640xbf16> to vector<32x640xbf16>
    %385 = arith.extf %384 : vector<32x640xbf16> to vector<32x640xf32>
    %c0_236 = arith.constant 0 : index
    %c0_237 = arith.constant 0 : index
    %386 = vector.load %arg6[%c0_236, %c0_237] : memref<64x640xf32, #tpu.memory_space<vmem>>, vector<32x640xf32>
    %387 = arith.mulf %385, %379 : vector<32x640xf32>
    %388 = arith.addf %386, %387 : vector<32x640xf32>
    %c0_238 = arith.constant 0 : index
    %c0_239 = arith.constant 0 : index
    %389 = vector.load %arg6[%c0_238, %c0_239] : memref<64x640xf32, #tpu.memory_space<vmem>>, vector<32x640xf32>
    tpu.vector_store %arg6[%c0_238, %c0_239], %388 {strides = array<i32>} : memref<64x640xf32, #tpu.memory_space<vmem>>, vector<32x640xf32>,
    %c448_i32_240 = arith.constant 448 : i32
    %390 = arith.addi %221, %c448_i32_240 : i32
    %391 = tpu.assume_multiple %390, 32 : i32
    %c0_241 = arith.constant 0 : index
    %392 = arith.index_cast %391 : i32 to index
    %c0_242 = arith.constant 0 : index
    %393 = vector.load %arg3[%c0_241, %392, %c0_242] : memref<1x1024x640xbf16, #tpu.memory_space<vmem>>, vector<1x32x640xbf16>
    %394 = vector.shape_cast %393 : vector<1x32x640xbf16> to vector<32x640xbf16>
    %395 = arith.extf %394 : vector<32x640xbf16> to vector<32x640xf32>
    %c32_243 = arith.constant 32 : index
    %c0_244 = arith.constant 0 : index
    %396 = vector.load %arg6[%c32_243, %c0_244] : memref<64x640xf32, #tpu.memory_space<vmem>>, vector<32x640xf32>
    %397 = arith.mulf %395, %379 : vector<32x640xf32>
    %398 = arith.addf %396, %397 : vector<32x640xf32>
    %c32_245 = arith.constant 32 : index
    %c0_246 = arith.constant 0 : index
    %399 = vector.load %arg6[%c32_245, %c0_246] : memref<64x640xf32, #tpu.memory_space<vmem>>, vector<32x640xf32>
    tpu.vector_store %arg6[%c32_245, %c0_246], %398 {strides = array<i32>} : memref<64x640xf32, #tpu.memory_space<vmem>>, vector<32x640xf32>,
    %c224_i32_247 = arith.constant 224 : i32
    %400 = arith.addi %220, %c224_i32_247 : i32
    %401 = tpu.assume_multiple %400, 32 : i32
    %c0_248 = arith.constant 0 : index
    %402 = arith.index_cast %401 : i32 to index
    %c0_249 = arith.constant 0 : index
    %403 = vector.load %arg2[%c0_248, %402, %c0_249] : memref<1x512x640xbf16, #tpu.memory_space<vmem>>, vector<1x32x640xbf16>
    %404 = vector.shape_cast %403 : vector<1x32x640xbf16> to vector<32x640xbf16>
    %405 = arith.extf %404 : vector<32x640xbf16> to vector<32x640xf32>
    %c224_i32_250 = arith.constant 224 : i32
    %406 = arith.addi %221, %c224_i32_250 : i32
    %407 = tpu.assume_multiple %406, 32 : i32
    %c0_251 = arith.constant 0 : index
    %408 = arith.index_cast %407 : i32 to index
    %c0_252 = arith.constant 0 : index
    %409 = vector.load %arg3[%c0_251, %408, %c0_252] : memref<1x1024x640xbf16, #tpu.memory_space<vmem>>, vector<1x32x640xbf16>
    %410 = vector.shape_cast %409 : vector<1x32x640xbf16> to vector<32x640xbf16>
    %411 = arith.extf %410 : vector<32x640xbf16> to vector<32x640xf32>
    %c0_253 = arith.constant 0 : index
    %c0_254 = arith.constant 0 : index
    %412 = vector.load %arg6[%c0_253, %c0_254] : memref<64x640xf32, #tpu.memory_space<vmem>>, vector<32x640xf32>
    %413 = arith.mulf %411, %405 : vector<32x640xf32>
    %414 = arith.addf %412, %413 : vector<32x640xf32>
    %c0_255 = arith.constant 0 : index
    %c0_256 = arith.constant 0 : index
    %415 = vector.load %arg6[%c0_255, %c0_256] : memref<64x640xf32, #tpu.memory_space<vmem>>, vector<32x640xf32>
    tpu.vector_store %arg6[%c0_255, %c0_256], %414 {strides = array<i32>} : memref<64x640xf32, #tpu.memory_space<vmem>>, vector<32x640xf32>,
    %c480_i32_257 = arith.constant 480 : i32
    %416 = arith.addi %221, %c480_i32_257 : i32
    %417 = tpu.assume_multiple %416, 32 : i32
    %c0_258 = arith.constant 0 : index
    %418 = arith.index_cast %417 : i32 to index
    %c0_259 = arith.constant 0 : index
    %419 = vector.load %arg3[%c0_258, %418, %c0_259] : memref<1x1024x640xbf16, #tpu.memory_space<vmem>>, vector<1x32x640xbf16>
    %420 = vector.shape_cast %419 : vector<1x32x640xbf16> to vector<32x640xbf16>
    %421 = arith.extf %420 : vector<32x640xbf16> to vector<32x640xf32>
    %c32_260 = arith.constant 32 : index
    %c0_261 = arith.constant 0 : index
    %422 = vector.load %arg6[%c32_260, %c0_261] : memref<64x640xf32, #tpu.memory_space<vmem>>, vector<32x640xf32>
    %423 = arith.mulf %421, %405 : vector<32x640xf32>
    %424 = arith.addf %422, %423 : vector<32x640xf32>
    %c32_262 = arith.constant 32 : index
    %c0_263 = arith.constant 0 : index
    %425 = vector.load %arg6[%c32_262, %c0_263] : memref<64x640xf32, #tpu.memory_space<vmem>>, vector<32x640xf32>
    tpu.vector_store %arg6[%c32_262, %c0_263], %424 {strides = array<i32>} : memref<64x640xf32, #tpu.memory_space<vmem>>, vector<32x640xf32>,
    %c0_264 = arith.constant 0 : index
    %c0_265 = arith.constant 0 : index
    %426 = vector.load %arg6[%c0_264, %c0_265] : memref<64x640xf32, #tpu.memory_space<vmem>>, vector<64x640xf32>
    %427 = arith.truncf %426 : vector<64x640xf32> to vector<64x640xbf16>
    %c0_266 = arith.constant 0 : index
    %c0_267 = arith.constant 0 : index
    %c0_268 = arith.constant 0 : index
    %428 = vector.load %arg5[%c0_266, %c0_267, %c0_268] : memref<1x6x640xf32, #tpu.memory_space<vmem>>, vector<1x6x640xf32>
    %429 = vector.shape_cast %428 : vector<1x6x640xf32> to vector<6x640xf32>
    %430 = arith.index_cast %c1_i32 : i32 to index
    %c0_269 = arith.constant 0 : index
    %c0_270 = arith.constant 0 : index
    %431 = vector.load %arg4[%430, %c0_269, %c0_270] : memref<2x6x64xbf16, #tpu.memory_space<vmem>>, vector<1x6x64xbf16>
    %432 = vector.shape_cast %431 : vector<1x6x64xbf16> to vector<6x64xbf16>
    %cst_271 = arith.constant dense<0.000000e+00> : vector<6x640xf32>
    %433 = tpu.matmul %432, %427, %cst_271 {dimension_numbers = #tpu.dot_dimension_numbers<[1], [0], [0], [1], [0, 0, 1, 1], [], []>} : vector<6x64xbf16>, vector<64x640xbf16>, vector<6x640xf32> -> vector<6x640xf32>
    %434 = arith.addf %429, %433 : vector<6x640xf32>
    %c0_272 = arith.constant 0 : index
    %c0_273 = arith.constant 0 : index
    %c0_274 = arith.constant 0 : index
    %435 = vector.load %arg5[%c0_272, %c0_273, %c0_274] : memref<1x6x640xf32, #tpu.memory_space<vmem>>, vector<1x6x640xf32>
    %436 = vector.shape_cast %435 : vector<1x6x640xf32> to vector<6x640xf32>
    %437 = vector.shape_cast %434 : vector<6x640xf32> to vector<1x6x640xf32>
    tpu.vector_store %arg5[%c0_272, %c0_273, %c0_274], %437 {strides = array<i32>} : memref<1x6x640xf32, #tpu.memory_space<vmem>>, vector<1x6x640xf32>,
    %c2_i32 = arith.constant 2 : i32
    return
  }
  func.func @transform_0(%arg0: i32, %arg1: i32) -> (i32, i32, i32) {
    %c0_i32 = arith.constant 0 : i32
    %c0_i32_0 = arith.constant 0 : i32
    return %arg0, %c0_i32, %arg1 : i32, i32, i32
  }
  func.func @transform_1(%arg0: i32, %arg1: i32) -> (i32, i32, i32) {
    %c0_i32 = arith.constant 0 : i32
    %c0_i32_0 = arith.constant 0 : i32
    return %arg0, %c0_i32, %arg1 : i32, i32, i32
  }
  func.func @transform_2(%arg0: i32, %arg1: i32) -> (i32, i32, i32) {
    %c0_i32 = arith.constant 0 : i32
    %c0_i32_0 = arith.constant 0 : i32
    %c0_i32_1 = arith.constant 0 : i32
    %c0_i32_2 = arith.constant 0 : i32
    return %c0_i32, %c0_i32_0, %c0_i32_1 : i32, i32, i32
  }
  func.func @transform_3(%arg0: i32, %arg1: i32) -> (i32, i32, i32) {
    %c0_i32 = arith.constant 0 : i32
    %c0_i32_0 = arith.constant 0 : i32
    return %arg0, %c0_i32, %arg1 : i32, i32, i32
  }
}

</mosaic_0001>

<bundles_post_ra>
// kernel: tpu_custom_call.1
= control target key start
LH: loop header
LB: loop body
LE: loop exit
PB: predicated region body
PF: predicated region fallthrough
CT: control target
= control target key end

     0   :  { %8 = vsyncpa [#allocation4], 0  ;;  %s8090_s0 = inlined_call_operand.hbm [shape: bf16[2,512,640], index: 0, kind: input, shape index: {}]   ;;  %s8091_s1 = inlined_call_operand.hbm [shape: bf16[2,1024,640], index: 1, kind: input, shape index: {}]   ;;  %s8092_s2 = inlined_call_operand.vmem [shape: bf16[2,6,64], index: 2, kind: input, shape index: {}]   ;;  %s8093_s3 = inlined_call_operand.vmem [shape: f32[2,6,640], index: 3, kind: output, shape index: {}]  }
   0x1   :  { %10 = vsyncpa [#allocation4 + $0x1], 0 }
   0x2   :  { %11 = vsyncpa [#allocation6], 0 }
   0x3   :  { %13 = vsyncpa [#allocation6 + $0x1], 0  ;;  %s6682_s12 = smov 0   ;;  %s6684_s13 = smov 0  }
   0x4   :  { %s6686_s14 = smov 0   ;;  %s6688_s15 = smov 0  }
   0x5   :  { %s6690_s16 = smov 0   ;;  %s6692_s17 = smov 0  }
   0x6 LB: > { %s4905_s18 = sadd.s32 4294967295, %s6652_s17   ;;  %s31_s19 = sadd.s32 1, %s6648_s16  ;;  %s6652_s17 = sphi %s6692_s17, %s19_s17   ;;  %s6648_s16 = sphi %s6690_s16, %s8183_s16   ;;  %s6644_s15 = sphi %s6688_s15, %s8182_s15   ;;  %s6640_s14 = sphi %s6686_s14, %s8181_s14   ;;  %s6636_s13 = sphi %s6684_s13, %s8180_s13   ;;  %s6632_s12 = sphi %s6682_s12, %s8179_s12  }
   0x7   : > { %p33_p0 = scmp.ge.s32.totalorder %s31_s19, 2  ;;  %s40_s20 = sadd.s32 1, %s6640_s14 }
   0x8   : > { %p47_p1 = scmp.ne.s32.totalorder %s6640_s14, %s6636_s13  ;;  %p48_p2 = scmp.eq.s32.totalorder %s6652_s17, 0 }
   0x9   : > { %s8185_s19 = smov (%p33_p0, %s31_s19), 0  ;;  %p53_p4 = scmp.ne.s32.totalorder %s6636_s13, %s6632_s12 }
   0xa   : > { %p49_p3 = por %p48_p2, %p47_p1  ;;  %s35_s21 = ssub.s32 %s6648_s16, %s8185_s19 }
   0xb   : > { %p54_p5 = scmp.eq.s32.totalorder %s4905_s18, 0  ;;  %p38_p6 = scmp.eq.s32.totalorder %s35_s21, 0 }
   0xc   : > { %p5526_p8 = scmp.lt.s32.totalorder %s6652_s17, 2  ;;  %s6730_s24 = sand.u32 1, %s6640_s14  }
   0xd   : > { %p6721_p7 = por %p54_p5, %p53_p4  ;;  %s5509_s25 = smul.u32 20480, %s6648_s16 }
   0xe   : > { %s6727_s23 = scalar_select %p38_p6, %s6640_s14, %s40_s20  }
   0xf   : > { %s5508_s26 = smul.u32 1280, %s6730_s24  ;;  %s169_s29 = scalar_lea.hbm %s8090_s0, %s5509_s25 }
  0x10   : > { %p6737_p9 = pnand %p5526_p8, %p49_p3  ;;  %s158_s6 = scalar_lea.sflag [#allocation4], %s6730_s24 }
  0x11   : > { %s161_s4 = scalar_lea.vmem [#allocation3], %s5508_s26  ;;  %s6654_s8 = smov [#allocation3]  }
  0x12   : > { %s170_s5 = sshll.u32 %s161_s4, 4  ;;  %p5584_p10 = pneg %p6737_p9  ;;  %s171_s5 = int_to_ptr.vmem [resolvable:$true] %s170_s5 }
  0x13   : > { %s5595_s7 = scalar_lea.vmem %s171_s5, 20480  ;;  %s5600_s9 = sshll.u32 %s6654_s8, 4  ;;  %s5601_s9 = int_to_ptr.vmem [resolvable:$false] %s5600_s9 }
  0x14   : > { %p5596_p11 = scmp.ne.s32.totalorder %s171_s5, %s5595_s7  ;;  %s5602_s10 = scalar_lea.vmem %s5601_s9, 40960 }
  0x15   : > { %p5603_p0 = scmp.lt.s32.totalorder %s171_s5, %s5601_s9  ;;  %p5604_p1 = scmp.lt.s32.totalorder %s5602_s10, %s5595_s7 }
  0x16   : > { %p5598_p12 = pnand %p5596_p11, %p5584_p10 }
  0x17   : > { %p5605_p2 = por %p5604_p1, %p5603_p0 }
  0x18   : > { %p5599_p13 = pneg %p5598_p12 }
  0x1a   : > { %p5606_p3 = pnand %p5605_p2, %p5599_p13 }
  0x1c   : > { %5609 = shalt.err (!%p5606_p3)
}
  0x1d   : > { %s6655_s11 = smov 320   ;;  %s6656_s12 = smov 20  }
  0x1e   : > { %5522 = dma.hbm_to_vmem [thread:$0]  (!%p6737_p9), %s169_s29, 20480, %s171_s5, %s158_s6, %s6655_s11, %s6655_s11, %s6656_s12  }
  0x1f   : > { %p4911_p4 = scmp.ge.s32.totalorder %s6652_s17, 1  ;;  %p201_p5 = scmp.lt.s32.totalorder %s6652_s17, 3 }
  0x20   : > { %s5510_s18 = smul.u32 2560, %s6730_s24  ;;  %s181_s7 = scalar_lea.sflag [#allocation6], %s6730_s24 }
  0x21   : > { %p6755_p6 = pnand %p4911_p4, %p201_p5  ;;  %s5511_s21 = smul.u32 40960, %s6648_s16 }
  0x22   : > { %s184_s28 = scalar_lea.vmem [#allocation5], %s5510_s18  ;;  %s6657_s29 = smov [#allocation5]  }
  0x23   : > { %s192_s27 = scalar_lea.hbm %s8091_s1, %s5511_s21  ;;  %s193_s4 = sshll.u32 %s184_s28, 4  ;;  %s194_s4 = int_to_ptr.vmem [resolvable:$true] %s193_s4 }
  0x24   : > { %s5623_s8 = scalar_lea.vmem %s194_s4, 40960  ;;  %s5628_s5 = sshll.u32 %s6657_s29, 4  ;;  %s5629_s5 = int_to_ptr.vmem [resolvable:$false] %s5628_s5 }
  0x25   : > { %p5624_p8 = scmp.ne.s32.totalorder %s194_s4, %s5623_s8  ;;  %s5630_s6 = scalar_lea.vmem %s5629_s5, 81920 }
  0x26   : > { %p5631_p13 = scmp.lt.s32.totalorder %s194_s4, %s5629_s5  ;;  %p5632_p0 = scmp.lt.s32.totalorder %s5630_s6, %s5623_s8 }
  0x27   : > { %p5626_p11 = pnand %p5624_p8, %p5584_p10 }
  0x28   : > { %p5633_p1 = por %p5632_p0, %p5631_p13 }
  0x29   : > { %p5627_p12 = pneg %p5626_p11 }
  0x2b   : > { %p5634_p2 = pnand %p5633_p1, %p5627_p12 }
  0x2d   : > { %5637 = shalt.err (!%p5634_p2)
}
  0x2e   : > { %5525 = dma.hbm_to_vmem [thread:$0]  (!%p6737_p9), %s192_s27, 40960, %s194_s4, %s181_s7, %s6655_s11, %s6655_s11, %s6656_s12  }
  0x2f   : > { %205 = sbr.rel (%p6755_p6) target bundleno = 632 (0x278), region = 32 }
  0x34   : > { %s207_s24 = sand.u32 1, %s6636_s13  }
  0x35   : > { %s5512_s9 = smul.u32 1280, %s207_s24  ;;  %s208_s10 = scalar_lea.sflag [#allocation4], %s207_s24 }
  0x37   : > { %s6775_s18 = scalar_lea.vmem [#allocation3], %s5512_s9 }
  0x38   : > { %5663 = dma.done.wait (%p6721_p7), %s208_s10, 20480  }
  0x39   : > { %5665 = vsyncadd (%p6721_p7), %s208_s10, 4294946816  ;;  %s5513_s30 = smul.u32 2560, %s207_s24  ;;  %s217_s21 = scalar_lea.sflag [#allocation6], %s207_s24 }
  0x3b   : > { %s6781_s25 = scalar_lea.vmem [#allocation5], %s5513_s30 }
  0x3c   : > { %5667 = dma.done.wait (%p6721_p7), %s217_s21, 40960  }
  0x3d   : > { %5669 = vsyncadd (%p6721_p7), %s217_s21, 4294926336  ;;  %v6788_v0 = vld [vmem:[%s6775_s18 + $0x28] sm:$0xff]  ;;  %v6791_v1 = vld [vmem:[%s6775_s18 + $0x3c] sm:$0xff]  ;;  %v6658_v51 = vmov 1935823168   ;;  %v6620_v54 = vlaneseq  ;;  %vm2368_vm0 = vcmask 523264  }
  0x3e   : > { %v4919_v2 = vld [vmem:[%s6781_s25 + $0x2a8] sm:$0xff]  ;;  %v4922_v3 = vld [vmem:[%s6781_s25 + $0x2bc] sm:$0xff]  ;;  %v6860_v32 = vld [vmem:[%s6775_s18 + $0x30] sm:$0xff]  ;;  %v6618_v52 = vunpack.c.l.s4 %v6658_v51  ;;  %vm6661_vm1 = vmmov 0   ;;  %p255_p7 = scmp.lt.s32.totalorder %s6644_s15, 1 }
  0x3f   : > { %v6796_v4 = vld [vmem:[%s6775_s18 + $0x78] sm:$0xff]  ;;  %v6799_v5 = vld [vmem:[%s6775_s18 + $0x8c] sm:$0xff]  ;;  %6606 = vmul.bf16.f32.vacc3 %v4919_v2, %v6788_v0  ;;  %6582 = vmul.bf16.f32.vacc0 %v4922_v3, %v6791_v1  ;;  %v6863_v33 = vld [vmem:[%s6775_s18 + $0x44] sm:$0xff]  ;;  %v6621_v55 = vshrl.u32 %v6620_v54, 7 }
  0x40   : > { %v4955_v6 = vld [vmem:[%s6781_s25 + $0x2f8] sm:$0xff]  ;;  %v4958_v7 = vld [vmem:[%s6781_s25 + $0x30c] sm:$0xff]  ;;  %v4923_v35 = vld [vmem:[%s6781_s25 + $0x2c4] sm:$0xff]  ;;  %v6619_v53 = vunpack.c.0.s8 %v6618_v52  ;;  %s8187_s15 = smov (!%p255_p7, %s6644_s15), 1 }
  0x41   : > { %v6804_v8 = vld [vmem:[%s6775_s18 + $0xc8] sm:$0xff]  ;;  %v6807_v9 = vld [vmem:[%s6775_s18 + $0xdc] sm:$0xff]  ;;  %6607 = vmac.bf16.f32.vacc3 %v4955_v6, %v6796_v4  ;;  %6583 = vmac.bf16.f32.vacc0 %v4958_v7, %v6799_v5  ;;  %v4920_v34 = vld [vmem:[%s6781_s25 + $0x2b0] sm:$0xff]  ;;  %6534 = vmul.bf16.f32.vacc1 %v4923_v35, %v6863_v33  ;;  %s5514_s28 = smul.u32 40, %s8187_s15 }
  0x42   : > { %v4991_v10 = vld [vmem:[%s6781_s25 + $0x348] sm:$0xff]  ;;  %v4994_v11 = vld [vmem:[%s6781_s25 + $0x35c] sm:$0xff]  ;;  %v6873_v37 = vld [vmem:[%s6775_s18 + $0x94] sm:$0xff]  ;;  %v6897_v56 = vsub.s32 %v6619_v53, %v6621_v55 }
  0x43   : > { %v6812_v12 = vld [vmem:[%s6775_s18 + $0x118] sm:$0xff]  ;;  %v6815_v13 = vld [vmem:[%s6775_s18 + $0x12c] sm:$0xff]  ;;  %6608 = vmac.bf16.f32.vacc3 %v4991_v10, %v6804_v8  ;;  %6584 = vmac.bf16.f32.vacc0 %v4994_v11, %v6807_v9  ;;  %v6870_v36 = vld [vmem:[%s6775_s18 + $0x80] sm:$0xff]  ;;  %s7824_s8 = scalar_lea.vmem %s8093_s3, %s5514_s28 }
  0x44   : > { %v5027_v14 = vld [vmem:[%s6781_s25 + $0x398] sm:$0xff]  ;;  %v5030_v15 = vld [vmem:[%s6781_s25 + $0x3ac] sm:$0xff]  ;;  %v4956_v38 = vld [vmem:[%s6781_s25 + $0x300] sm:$0xff] }
  0x45   : > { %v6820_v16 = vld [vmem:[%s6775_s18 + $0x168] sm:$0xff]  ;;  %v6823_v17 = vld [vmem:[%s6775_s18 + $0x17c] sm:$0xff]  ;;  %6609 = vmac.bf16.f32.vacc3 %v5027_v14, %v6812_v12  ;;  %6585 = vmac.bf16.f32.vacc0 %v5030_v15, %v6815_v13  ;;  %v4959_v39 = vld [vmem:[%s6781_s25 + $0x314] sm:$0xff] }
  0x46   : > { %v5063_v18 = vld [vmem:[%s6781_s25 + $0x3e8] sm:$0xff]  ;;  %v5066_v19 = vld [vmem:[%s6781_s25 + $0x3fc] sm:$0xff]  ;;  %v6880_v40 = vld [vmem:[%s6775_s18 + $0xd0] sm:$0xff]  ;;  %6535 = vmac.bf16.f32.vacc1 %v4959_v39, %v6873_v37 }
  0x47   : > { %v6828_v20 = vld [vmem:[%s6775_s18 + $0x1b8] sm:$0xff]  ;;  %v6835_v21 = vld [vmem:[%s6775_s18 + $0x1cc] sm:$0xff]  ;;  %6610 = vmac.bf16.f32.vacc3 %v5063_v18, %v6820_v16  ;;  %6586 = vmac.bf16.f32.vacc0 %v5066_v19, %v6823_v17  ;;  %v6883_v41 = vld [vmem:[%s6775_s18 + $0xe4] sm:$0xff] }
  0x48   : > { %v5099_v22 = vld [vmem:[%s6781_s25 + $0x438] sm:$0xff]  ;;  %v5102_v23 = vld [vmem:[%s6781_s25 + $0x44c] sm:$0xff]  ;;  %v4995_v43 = vld [vmem:[%s6781_s25 + $0x364] sm:$0xff] }
  0x49   : > { %v6840_v24 = vld [vmem:[%s6775_s18 + $0x208] sm:$0xff]  ;;  %v6843_v25 = vld [vmem:[%s6775_s18 + $0x21c] sm:$0xff]  ;;  %6611 = vmac.bf16.f32.vacc3 %v5099_v22, %v6828_v20  ;;  %6587 = vmac.bf16.f32.vacc0 %v5102_v23, %v6835_v21  ;;  %v4992_v42 = vld [vmem:[%s6781_s25 + $0x350] sm:$0xff]  ;;  %6536 = vmac.bf16.f32.vacc1 %v4995_v43, %v6883_v41 }
  0x4a   : > { %v5135_v26 = vld [vmem:[%s6781_s25 + $0x488] sm:$0xff]  ;;  %v5138_v27 = vld [vmem:[%s6781_s25 + $0x49c] sm:$0xff]  ;;  %v6893_v45 = vld [vmem:[%s6775_s18 + $0x134] sm:$0xff] }
  0x4b   : > { %v6850_v28 = vld [vmem:[%s6775_s18 + $0x258] sm:$0xff]  ;;  %v6853_v29 = vld [vmem:[%s6775_s18 + $0x26c] sm:$0xff]  ;;  %6612 = vmac.bf16.f32.vacc3 %v5135_v26, %v6840_v24  ;;  %6588 = vmac.bf16.f32.vacc0 %v5138_v27, %v6843_v25  ;;  %v6890_v44 = vld [vmem:[%s6775_s18 + $0x120] sm:$0xff] }
  0x4c   : > { %v5171_v30 = vld [vmem:[%s6781_s25 + $0x4d8] sm:$0xff]  ;;  %v5174_v31 = vld [vmem:[%s6781_s25 + $0x4ec] sm:$0xff]  ;;  %v5028_v46 = vld [vmem:[%s6781_s25 + $0x3a0] sm:$0xff] }
  0x4d   : > { %6613 = vmac.bf16.f32.vacc3 %v5171_v30, %v6850_v28  ;;  %6589 = vmac.bf16.f32.vacc0 %v5174_v31, %v6853_v29  ;;  %v5031_v3 = vld [vmem:[%s6781_s25 + $0x3b4] sm:$0xff]  ;;  %v6909_v7 = vld [vmem:[%s6775_s18 + $0x184] sm:$0xff] }
  0x4e   : > { %v6906_v6 = vld [vmem:[%s6775_s18 + $0x170] sm:$0xff]  ;;  %v5067_v14 = vld [vmem:[%s6781_s25 + $0x404] sm:$0xff]  ;;  %6537 = vmac.bf16.f32.vacc1 %v5031_v3, %v6893_v45 }
  0x4f   : > { %v6614_v47 = vmovacc.add.low.vacc3  ;;  %v6590_v59 = vmovacc.add.low.vacc0  ;;  %v5064_v11 = vld [vmem:[%s6781_s25 + $0x3f0] sm:$0xff]  ;;  %v6918_v15 = vld [vmem:[%s6775_s18 + $0x1c0] sm:$0xff]  ;;  %6538 = vmac.bf16.f32.vacc1 %v5067_v14, %v6909_v7 }
  0x50   : > { %v6615_v48 = vmovacc.add.high.vacc3  ;;  %v6591_v60 = vmovacc.add.high.vacc0  ;;  %v6921_v18 = vld [vmem:[%s6775_s18 + $0x1d4] sm:$0xff]  ;;  %v5100_v19 = vld [vmem:[%s6781_s25 + $0x440] sm:$0xff] }
  0x51   : > { %v5103_v22 = vld [vmem:[%s6781_s25 + $0x454] sm:$0xff]  ;;  %v6931_v26 = vld [vmem:[%s6775_s18 + $0x224] sm:$0xff] }
  0x52   : > { %v6616_v49 = vcombine.low %v6614_v47, %v6615_v48  ;;  %v6617_v50 = vcombine.high %v6614_v47, %v6615_v48  ;;  %v6592_v61 = vcombine.low %v6590_v59, %v6591_v60  ;;  %v6593_v62 = vcombine.high %v6590_v59, %v6591_v60  ;;  %v6928_v23 = vld [vmem:[%s6775_s18 + $0x210] sm:$0xff]  ;;  %v5139_v30 = vld [vmem:[%s6781_s25 + $0x4a4] sm:$0xff] }
  0x53   : > { %6558 = vmul.bf16.f32.vacc3 %v4920_v34, %v6860_v32  ;;  %v5136_v27 = vld [vmem:[%s6781_s25 + $0x490] sm:$0xff]  ;;  %v6937_v31 = vld [vmem:[%s6775_s18 + $0x260] sm:$0xff]  ;;  %6539 = vmac.bf16.f32.vacc1 %v5103_v22, %v6921_v18 }
  0x54   : > { %v6623_v57 = vrot.slane %v6616_v49, %v6897_v56  ;;  %v6629_v58 = vrot.slane %v6617_v50, %v6897_v56  ;;  %v6599_v63 = vrot.slane %v6592_v61, %v6897_v56  ;;  %v6605_v2 = vrot.slane %v6593_v62, %v6897_v56  ;;  %v6940_v34 = vld [vmem:[%s6775_s18 + $0x274] sm:$0xff]  ;;  %v5172_v35 = vld [vmem:[%s6781_s25 + $0x4e0] sm:$0xff] }
  0x55   : > { %6559 = vmac.bf16.f32.vacc3 %v4956_v38, %v6870_v36  ;;  %v5175_v38 = vld [vmem:[%s6781_s25 + $0x4f4] sm:$0xff]  ;;  %6540 = vmac.bf16.f32.vacc1 %v5139_v30, %v6931_v26  ;;  %v6958_v59 = vld [vmem:[%s6775_s18] sm:$0xff] }
  0x56   : > { %v2358_v10 = vpack.c.bf16 %v6605_v2, %v6629_v58  ;;  %6560 = vmac.bf16.f32.vacc3 %v4992_v42, %v6880_v40  ;;  %6541 = vmac.bf16.f32.vacc1 %v5175_v38, %v6940_v34  ;;  %v2357_v58 = vpack.c.bf16 %v6599_v63, %v6623_v57  ;;  %v6961_v60 = vld [vmem:[%s6775_s18 + $0x14] sm:$0xff]  ;;  %v4913_v61 = vld [vmem:[%s6781_s25 + $0x280] sm:$0xff] }
  0x57   : > { %6561 = vmac.bf16.f32.vacc3 %v5028_v46, %v6890_v44  ;;  %v4916_v62 = vld [vmem:[%s6781_s25 + $0x294] sm:$0xff]  ;;  %v6969_v3 = vld [vmem:[%s6775_s18 + $0x64] sm:$0xff]  ;;  %6510 = vmul.bf16.f32.vacc2 %v4913_v61, %v6958_v59 }
  0x58   : > { %2380 = vmatprep.subr.bf16.mxu0 %v2358_v10  ;;  %6562 = vmac.bf16.f32.vacc3 %v5064_v11, %v6906_v6  ;;  %v6542_v49 = vmovacc.add.low.vacc1  ;;  %v6966_v2 = vld [vmem:[%s6775_s18 + $0x50] sm:$0xff]  ;;  %v4952_v11 = vld [vmem:[%s6781_s25 + $0x2e4] sm:$0xff]  ;;  %6486 = vmul.bf16.f32.vacc0 %v4916_v62, %v6961_v60 }
  0x59   : > { %6563 = vmac.bf16.f32.vacc3 %v5100_v19, %v6918_v15  ;;  %v6543_v50 = vmovacc.add.high.vacc1  ;;  %2381 = vmatpush1.bf16.msra.mxu0 %v2357_v58  ;;  %v4949_v10 = vld [vmem:[%s6781_s25 + $0x2d0] sm:$0xff]  ;;  %v6974_v57 = vld [vmem:[%s6775_s18 + $0xa0] sm:$0xff]  ;;  %6487 = vmac.bf16.f32.vacc0 %v4952_v11, %v6969_v3 }
  0x5a   : > { %6564 = vmac.bf16.f32.vacc3 %v5136_v27, %v6928_v23  ;;  %8123 = vst [vmem:[#allocation9_spill] sm:$0xff] %v6974_v57  ;;  %v6977_v63 = vld [vmem:[%s6775_s18 + $0xb4] sm:$0xff]  ;;  %v4985_v14 = vld [vmem:[%s6781_s25 + $0x320] sm:$0xff]  ;;  %6511 = vmac.bf16.f32.vacc2 %v4949_v10, %v6966_v2  ;;  %v7032_v10 = vld [vmem:[%s6775_s18 + $0x8] sm:$0xff] }
  0x5b   : > { %6565 = vmac.bf16.f32.vacc3 %v5172_v35, %v6937_v31  ;;  %v6544_v51 = vcombine.low %v6542_v49, %v6543_v50  ;;  %v6545_v52 = vcombine.high %v6542_v49, %v6543_v50  ;;  %8124 = vst [vmem:[#allocation10_spill] sm:$0xff] %v6977_v63  ;;  %v4988_v19 = vld [vmem:[%s6781_s25 + $0x334] sm:$0xff]  ;;  %v6985_v27 = vld [vmem:[%s6775_s18 + $0x104] sm:$0xff]  ;;  %6512 = vmac.bf16.f32.vacc2 %v4985_v14, %v6974_v57  ;;  %v7035_v11 = vld [vmem:[%s6775_s18 + $0x1c] sm:$0xff] }
  0x5c   : > { %v6982_v22 = vld [vmem:[%s6775_s18 + $0xf0] sm:$0xff]  ;;  %8126 = vst [vmem:[#allocation12_spill] sm:$0xff] %v6985_v27  ;;  %v5024_v35 = vld [vmem:[%s6781_s25 + $0x384] sm:$0xff]  ;;  %6488 = vmac.bf16.f32.vacc0 %v4988_v19, %v6977_v63  ;;  %v4917_v19 = vld [vmem:[%s6781_s25 + $0x29c] sm:$0xff] }
  0x5d   : > { %v6566_v39 = vmovacc.add.low.vacc3  ;;  %v6551_v53 = vrot.slane %v6544_v51, %v6897_v56  ;;  %v6557_v54 = vrot.slane %v6545_v52, %v6897_v56  ;;  %8125 = vst [vmem:[#allocation11_spill] sm:$0xff] %v6982_v22  ;;  %v5021_v30 = vld [vmem:[%s6781_s25 + $0x370] sm:$0xff]  ;;  %v6990_v38 = vld [vmem:[%s6775_s18 + $0x140] sm:$0xff]  ;;  %6489 = vmac.bf16.f32.vacc0 %v5024_v35, %v6985_v27  ;;  %v4914_v14 = vld [vmem:[%s6781_s25 + $0x288] sm:$0xff] }
  0x5e   : > { %v6567_v42 = vmovacc.add.high.vacc3  ;;  %8127 = vst [vmem:[#allocation13_spill] sm:$0xff] %v6990_v38  ;;  %v7005_v49 = vld [vmem:[%s6775_s18 + $0x1a4] sm:$0xff]  ;;  %v5093_v50 = vld [vmem:[%s6781_s25 + $0x410] sm:$0xff]  ;;  %6513 = vmac.bf16.f32.vacc2 %v5021_v30, %v6982_v22  ;;  %v7042_v30 = vld [vmem:[%s6775_s18 + $0x58] sm:$0xff]  ;;  %6462 = vmul.bf16.f32.vacc1 %v4914_v14, %v7032_v10 }
  0x5f   : > { %8130 = vst [vmem:[#allocation16_spill] sm:$0xff] %v7005_v49  ;;  %v7012_v51 = vld [vmem:[%s6775_s18 + $0x1e0] sm:$0xff]  ;;  %v7015_v52 = vld [vmem:[%s6775_s18 + $0x1f4] sm:$0xff]  ;;  %8135 = vst [vmem:[#allocation21_spill] sm:$0xff] %v7042_v30 }
  0x60   : > { %v6568_v43 = vcombine.low %v6566_v39, %v6567_v42  ;;  %v6569_v46 = vcombine.high %v6566_v39, %v6567_v42  ;;  %v6993_v39 = vld [vmem:[%s6775_s18 + $0x154] sm:$0xff]  ;;  %v5057_v42 = vld [vmem:[%s6781_s25 + $0x3c0] sm:$0xff]  ;;  %8131 = vst [vmem:[#allocation17_spill] sm:$0xff] %v7012_v51  ;;  %8132 = vst [vmem:[#allocation18_spill] sm:$0xff] %v7015_v52 }
  0x61   : > { %8128 = vst [vmem:[#allocation14_spill] sm:$0xff] %v6993_v39  ;;  %v7025_v58 = vld [vmem:[%s6775_s18 + $0x244] sm:$0xff]  ;;  %v5165_v61 = vld [vmem:[%s6781_s25 + $0x4b0] sm:$0xff]  ;;  %6514 = vmac.bf16.f32.vacc2 %v5057_v42, %v6990_v38  ;;  %v4950_v42 = vld [vmem:[%s6781_s25 + $0x2d8] sm:$0xff] }
  0x62   : > { %v6575_v47 = vrot.slane %v6568_v43, %v6897_v56  ;;  %v6581_v48 = vrot.slane %v6569_v46, %v6897_v56  ;;  %v5060_v46 = vld [vmem:[%s6781_s25 + $0x3d4] sm:$0xff]  ;;  %8134 = vst [vmem:[#allocation20_spill] sm:$0xff] %v7025_v58  ;;  %v5168_v62 = vld [vmem:[%s6781_s25 + $0x4c4] sm:$0xff]  ;;  %v7045_v35 = vld [vmem:[%s6775_s18 + $0x6c] sm:$0xff]  ;;  %6463 = vmac.bf16.f32.vacc1 %v4950_v42, %v7042_v30 }
  0x63   : > { %6490 = vmac.bf16.f32.vacc0 %v5060_v46, %v6993_v39  ;;  %8136 = vst [vmem:[#allocation22_spill] sm:$0xff] %v7045_v35  ;;  %v7052_v46 = vld [vmem:[%s6775_s18 + $0xa8] sm:$0xff]  ;;  %v7055_v39 = vld [vmem:[%s6775_s18 + $0xbc] sm:$0xff] }
  0x64   : > { %v2360_v55 = vpack.c.bf16 %v6557_v54, %v6581_v48  ;;  %v2359_v43 = vpack.c.bf16 %v6551_v53, %v6575_v47  ;;  %v7002_v48 = vld [vmem:[%s6775_s18 + $0x190] sm:$0xff]  ;;  %v5096_v47 = vld [vmem:[%s6781_s25 + $0x424] sm:$0xff]  ;;  %v4989_v27 = vld [vmem:[%s6781_s25 + $0x33c] sm:$0xff] }
  0x65   : > { %8129 = vst [vmem:[#allocation15_spill] sm:$0xff] %v7002_v48  ;;  %v5129_v53 = vld [vmem:[%s6781_s25 + $0x460] sm:$0xff]  ;;  %v5132_v54 = vld [vmem:[%s6781_s25 + $0x474] sm:$0xff]  ;;  %6515 = vmac.bf16.f32.vacc2 %v5093_v50, %v7002_v48  ;;  %6491 = vmac.bf16.f32.vacc0 %v5096_v47, %v7005_v49  ;;  %v4986_v38 = vld [vmem:[%s6781_s25 + $0x328] sm:$0xff] }
  0x66   : > { %2421 = vmatprep.subr.bf16.mxu1 %v2360_v55  ;;  %v7022_v55 = vld [vmem:[%s6775_s18 + $0x230] sm:$0xff]  ;;  %6516 = vmac.bf16.f32.vacc2 %v5129_v53, %v7012_v51  ;;  %6492 = vmac.bf16.f32.vacc0 %v5132_v54, %v7015_v52  ;;  %v7060_v50 = vld [vmem:[%s6775_s18 + $0xf8] sm:$0xff]  ;;  %6464 = vmac.bf16.f32.vacc1 %v4986_v38, %v7052_v46  ;;  %v5130_v30 = vld [vmem:[%s6781_s25 + $0x468] sm:$0xff] }
  0x67   : > { %2422 = vmatpush1.bf16.msra.mxu1 %v2359_v43  ;;  %8133 = vst [vmem:[#allocation19_spill] sm:$0xff] %v7022_v55  ;;  %v4953_v43 = vld [vmem:[%s6781_s25 + $0x2ec] sm:$0xff]  ;;  %6517 = vmac.bf16.f32.vacc2 %v5165_v61, %v7022_v55  ;;  %6493 = vmac.bf16.f32.vacc0 %v5168_v62, %v7025_v58  ;;  %v7077_v58 = vld [vmem:[%s6775_s18 + $0x15c] sm:$0xff] }
  0x68   : > { %v5097_v14 = vld [vmem:[%s6781_s25 + $0x42c] sm:$0xff]  ;;  %v7099_v42 = vld [vmem:[%s6775_s18 + $0x1fc] sm:$0xff] }
  0x69   : > { %v6518_v47 = vmovacc.add.low.vacc2  ;;  %v6494_v51 = vmovacc.add.low.vacc0  ;;  %8139 = vst [vmem:[#allocation25_spill] sm:$0xff] %v7099_v42  ;;  %v5169_v38 = vld [vmem:[%s6781_s25 + $0x4cc] sm:$0xff] }
  0x6a   : > { %v6519_v49 = vmovacc.add.high.vacc2  ;;  %v6495_v22 = vmovacc.add.high.vacc0 }
  0x6c   : > { %v6520_v48 = vcombine.low %v6518_v47, %v6519_v49  ;;  %v6521_v53 = vcombine.high %v6518_v47, %v6519_v49  ;;  %v6496_v63 = vcombine.low %v6494_v51, %v6495_v22  ;;  %v6497_v61 = vcombine.high %v6494_v51, %v6495_v22  ;;  %v7069_v49 = vld [vmem:[%s6775_s18 + $0x10c] sm:$0xff]  ;;  %v5022_v47 = vld [vmem:[%s6781_s25 + $0x378] sm:$0xff] }
  0x6d   : > { %8137 = vst [vmem:[#allocation23_spill] sm:$0xff] %v7069_v49  ;;  %v5058_v22 = vld [vmem:[%s6781_s25 + $0x3c8] sm:$0xff]  ;;  %v7084_v51 = vld [vmem:[%s6775_s18 + $0x198] sm:$0xff]  ;;  %6438 = vmul.bf16.f32.vacc2 %v4917_v19, %v7035_v11  ;;  %6465 = vmac.bf16.f32.vacc1 %v5022_v47, %v7060_v50 }
  0x6e   : > { %v6527_v54 = vrot.slane %v6520_v48, %v6897_v56  ;;  %v6533_v52 = vrot.slane %v6521_v53, %v6897_v56  ;;  %v6503_v55 = vrot.slane %v6496_v63, %v6897_v56  ;;  %v6509_v57 = vrot.slane %v6497_v61, %v6897_v56  ;;  %v5025_v48 = vld [vmem:[%s6781_s25 + $0x38c] sm:$0xff]  ;;  %v5061_v63 = vld [vmem:[%s6781_s25 + $0x3dc] sm:$0xff] }
  0x6f   : > { %v7074_v53 = vld [vmem:[%s6775_s18 + $0x148] sm:$0xff]  ;;  %6439 = vmac.bf16.f32.vacc2 %v4953_v43, %v7045_v35  ;;  %v7105_v19 = vld [vmem:[%s6775_s18 + $0x238] sm:$0xff] }
  0x70   : > { %v2353_v62 = vpack.c.bf16 %v6509_v57, %v6533_v52  ;;  %v7089_v57 = vld [vmem:[%s6775_s18 + $0x1ac] sm:$0xff]  ;;  %v5094_v52 = vld [vmem:[%s6781_s25 + $0x418] sm:$0xff]  ;;  %6440 = vmac.bf16.f32.vacc2 %v4989_v27, %v7055_v39  ;;  %8140 = vst [vmem:[#allocation26_spill] sm:$0xff] %v7105_v19  ;;  %6466 = vmac.bf16.f32.vacc1 %v5058_v22, %v7074_v53 }
  0x71   : > { %v7095_v61 = vld [vmem:[%s6775_s18 + $0x1e8] sm:$0xff]  ;;  %6441 = vmac.bf16.f32.vacc2 %v5025_v48, %v7069_v49  ;;  %v5166_v35 = vld [vmem:[%s6781_s25 + $0x4b8] sm:$0xff]  ;;  %6467 = vmac.bf16.f32.vacc1 %v5094_v52, %v7084_v51 }
  0x72   : > { %2382 = vmatprep.subr.bf16.mxu0 %v2353_v62  ;;  %8138 = vst [vmem:[#allocation24_spill] sm:$0xff] %v7095_v61  ;;  %v5133_v62 = vld [vmem:[%s6781_s25 + $0x47c] sm:$0xff]  ;;  %v7109_v43 = vld [vmem:[%s6775_s18 + $0x24c] sm:$0xff]  ;;  %6442 = vmac.bf16.f32.vacc2 %v5061_v63, %v7077_v58  ;;  %6468 = vmac.bf16.f32.vacc1 %v5130_v30, %v7095_v61 }
  0x73   : > { %8141 = vst [vmem:[#allocation27_spill] sm:$0xff] %v7109_v43  ;;  %6443 = vmac.bf16.f32.vacc2 %v5097_v14, %v7089_v57  ;;  %6469 = vmac.bf16.f32.vacc1 %v5166_v35, %v7105_v19  ;;  %v4946_v19 = vld [vmem:[%s6781_s25 + $0x8c] sm:$0xff] }
  0x74   : > { %6444 = vmac.bf16.f32.vacc2 %v5133_v62, %v7099_v42  ;;  %v4979_v42 = vld [vmem:[%s6781_s25 + $0xc8] sm:$0xff] }
  0x75   : > { %v6470_v27 = vmovacc.add.low.vacc1  ;;  %6445 = vmac.bf16.f32.vacc2 %v5169_v38, %v7109_v43  ;;  %v313_v38 = vld [vmem:[%s6781_s25 + $0x28] sm:$0xff]  ;;  %v4943_v43 = vld [vmem:[%s6781_s25 + $0x78] sm:$0xff] }
  0x76   : > { %v6471_v47 = vmovacc.add.high.vacc1  ;;  %v5051_v61 = vld [vmem:[%s6781_s25 + $0x168] sm:$0xff]  ;;  %6414 = vmul.bf16.f32.vacc3 %v313_v38, %v6788_v0  ;;  %v5124_v38 = vld [vmem:[%s6781_s25 + $0x210] sm:$0xff] }
  0x77   : > { %v6446_v30 = vmovacc.add.low.vacc2  ;;  %6415 = vmac.bf16.f32.vacc3 %v4943_v43, %v6796_v4  ;;  %v5162_v0 = vld [vmem:[%s6781_s25 + $0x26c] sm:$0xff]  ;;  %v317_v4 = vld [vmem:[%s6781_s25 + $0x44] sm:$0xff] }
  0x78   : > { %v6472_v48 = vcombine.low %v6470_v27, %v6471_v47  ;;  %v6473_v49 = vcombine.high %v6470_v27, %v6471_v47  ;;  %v6447_v52 = vmovacc.add.high.vacc2  ;;  %6416 = vmac.bf16.f32.vacc3 %v4979_v42, %v6804_v8  ;;  %v4980_v43 = vld [vmem:[%s6781_s25 + $0xd0] sm:$0xff]  ;;  %v4983_v8 = vld [vmem:[%s6781_s25 + $0xe4] sm:$0xff] }
  0x79   : > { %v5052_v42 = vld [vmem:[%s6781_s25 + $0x170] sm:$0xff] }
  0x7a   : > { %v6479_v22 = vrot.slane %v6472_v48, %v6897_v56  ;;  %v6485_v63 = vrot.slane %v6473_v49, %v6897_v56  ;;  %v6448_v35 = vcombine.low %v6446_v30, %v6447_v52  ;;  %v6449_v14 = vcombine.high %v6446_v30, %v6447_v52  ;;  %v316_v48 = vld [vmem:[%s6781_s25 + $0x3c] sm:$0xff] }
  0x7b   : > { %v2352_v49 = vpack.c.bf16 %v6503_v55, %v6527_v54  ;;  %v4982_v30 = vld [vmem:[%s6781_s25 + $0xdc] sm:$0xff]  ;;  %6390 = vmul.bf16.f32.vacc0 %v316_v48, %v6791_v1  ;;  %v5090_v55 = vld [vmem:[%s6781_s25 + $0x1cc] sm:$0xff]  ;;  %6342 = vmul.bf16.f32.vacc2 %v317_v4, %v6863_v33  ;;  %v5127_v48 = vld [vmem:[%s6781_s25 + $0x224] sm:$0xff] }
  0x7c   : > { %v6455_v62 = vrot.slane %v6448_v35, %v6897_v56  ;;  %v6461_v27 = vrot.slane %v6449_v14, %v6897_v56  ;;  %v5015_v52 = vld [vmem:[%s6781_s25 + $0x118] sm:$0xff]  ;;  %v5018_v35 = vld [vmem:[%s6781_s25 + $0x12c] sm:$0xff]  ;;  %6391 = vmac.bf16.f32.vacc0 %v4946_v19, %v6799_v5  ;;  %v4944_v5 = vld [vmem:[%s6781_s25 + $0x80] sm:$0xff] }
  0x7d   : > { %2383 = vmatpush1.bf16.msra.mxu0 %v2352_v49  ;;  %v5054_v14 = vld [vmem:[%s6781_s25 + $0x17c] sm:$0xff]  ;;  %v5123_v54 = vld [vmem:[%s6781_s25 + $0x208] sm:$0xff]  ;;  %6392 = vmac.bf16.f32.vacc0 %v4982_v30, %v6807_v9  ;;  %v314_v1 = vld [vmem:[%s6781_s25 + $0x30] sm:$0xff]  ;;  %6417 = vmac.bf16.f32.vacc3 %v5015_v52, %v6812_v12 }
  0x7e   : > { %v2355_v47 = vpack.c.bf16 %v6461_v27, %v6485_v63  ;;  %v5087_v63 = vld [vmem:[%s6781_s25 + $0x1b8] sm:$0xff]  ;;  %6393 = vmac.bf16.f32.vacc0 %v5018_v35, %v6815_v13  ;;  %6418 = vmac.bf16.f32.vacc3 %v5051_v61, %v6820_v16  ;;  %v5016_v9 = vld [vmem:[%s6781_s25 + $0x120] sm:$0xff]  ;;  %6366 = vmul.bf16.f32.vacc1 %v314_v1, %v6860_v32 }
  0x7f   : > { %v5126_v27 = vld [vmem:[%s6781_s25 + $0x21c] sm:$0xff]  ;;  %v4947_v19 = vld [vmem:[%s6781_s25 + $0x94] sm:$0xff]  ;;  %6394 = vmac.bf16.f32.vacc0 %v5054_v14, %v6823_v17  ;;  %6419 = vmac.bf16.f32.vacc3 %v5087_v63, %v6828_v20  ;;  %v5055_v13 = vld [vmem:[%s6781_s25 + $0x184] sm:$0xff]  ;;  %6367 = vmac.bf16.f32.vacc1 %v4944_v5, %v6870_v36 }
  0x80   : > { %2423 = vmatprep.subr.bf16.mxu1 %v2355_v47  ;;  %v2354_v47 = vpack.c.bf16 %v6455_v62, %v6479_v22  ;;  %v5159_v49 = vld [vmem:[%s6781_s25 + $0x258] sm:$0xff]  ;;  %6395 = vmac.bf16.f32.vacc0 %v5090_v55, %v6835_v21  ;;  %6420 = vmac.bf16.f32.vacc3 %v5123_v54, %v6840_v24  ;;  %6343 = vmac.bf16.f32.vacc2 %v4947_v19, %v6873_v37  ;;  %v5088_v16 = vld [vmem:[%s6781_s25 + $0x1c0] sm:$0xff]  ;;  %v4937_v54 = vld [vmem:[%s6781_s25 + $0x50] sm:$0xff] }
  0x81   : > { %v5019_v12 = vld [vmem:[%s6781_s25 + $0x134] sm:$0xff]  ;;  %6396 = vmac.bf16.f32.vacc0 %v5126_v27, %v6843_v25  ;;  %6421 = vmac.bf16.f32.vacc3 %v5159_v49, %v6850_v28  ;;  %6368 = vmac.bf16.f32.vacc1 %v4980_v43, %v6880_v40  ;;  %6344 = vmac.bf16.f32.vacc2 %v4983_v8, %v6883_v41  ;;  %v5160_v30 = vld [vmem:[%s6781_s25 + $0x260] sm:$0xff] }
  0x82   : > { %2424 = vmatpush1.bf16.msra.mxu1 %v2354_v47  ;;  %v5091_v17 = vld [vmem:[%s6781_s25 + $0x1d4] sm:$0xff]  ;;  %6397 = vmac.bf16.f32.vacc0 %v5162_v0, %v6853_v29  ;;  %6369 = vmac.bf16.f32.vacc1 %v5016_v9, %v6890_v44  ;;  %6345 = vmac.bf16.f32.vacc2 %v5019_v12, %v6893_v45  ;;  %v4940_v27 = vld [vmem:[%s6781_s25 + $0x64] sm:$0xff] }
  0x83   : > { %v6422_v20 = vmovacc.add.low.vacc3  ;;  %v5163_v35 = vld [vmem:[%s6781_s25 + $0x274] sm:$0xff]  ;;  %6370 = vmac.bf16.f32.vacc1 %v5052_v42, %v6906_v6  ;;  %6346 = vmac.bf16.f32.vacc2 %v5055_v13, %v6909_v7  ;;  %v4973_v47 = vld [vmem:[%s6781_s25 + $0xa0] sm:$0xff] }
  0x84   : > { %v6423_v21 = vmovacc.add.high.vacc3  ;;  %v6398_v33 = vmovacc.add.low.vacc0  ;;  %6371 = vmac.bf16.f32.vacc1 %v5088_v16, %v6918_v15  ;;  %6347 = vmac.bf16.f32.vacc2 %v5091_v17, %v6921_v18  ;;  %v310_v55 = vld [vmem:[%s6781_s25 + $0x14] sm:$0xff]  ;;  %v5012_v1 = vld [vmem:[%s6781_s25 + $0x104] sm:$0xff] }
  0x85   : > { %v6399_v37 = vmovacc.add.high.vacc0  ;;  %6372 = vmac.bf16.f32.vacc1 %v5124_v38, %v6928_v23  ;;  %6348 = vmac.bf16.f32.vacc2 %v5127_v48, %v6931_v26  ;;  %v4976_v49 = vld [vmem:[%s6781_s25 + $0xb4] sm:$0xff]  ;;  %v5045_v4 = vld [vmem:[%s6781_s25 + $0x140] sm:$0xff]  ;;  %v8143_v16 = vld [vmem:[#allocation10_spill] sm:$0xff] }
  0x86   : > { %v6424_v24 = vcombine.low %v6422_v20, %v6423_v21  ;;  %v6425_v25 = vcombine.high %v6422_v20, %v6423_v21  ;;  %6373 = vmac.bf16.f32.vacc1 %v5160_v30, %v6937_v31  ;;  %6349 = vmac.bf16.f32.vacc2 %v5163_v35, %v6940_v34  ;;  %v307_v34 = vld [vmem:[%s6781_s25] sm:$0xff]  ;;  %v5009_v0 = vld [vmem:[%s6781_s25 + $0xf0] sm:$0xff]  ;;  %v308_v17 = vld [vmem:[%s6781_s25 + $0x8] sm:$0xff] }
  0x87   : > { %v6400_v61 = vcombine.low %v6398_v33, %v6399_v37  ;;  %v6401_v22 = vcombine.high %v6398_v33, %v6399_v37  ;;  %v5048_v5 = vld [vmem:[%s6781_s25 + $0x154] sm:$0xff]  ;;  %6318 = vmul.bf16.f32.vacc3 %v307_v34, %v6958_v59  ;;  %v5084_v43 = vld [vmem:[%s6781_s25 + $0x1a4] sm:$0xff]  ;;  %6294 = vmul.bf16.f32.vacc0 %v310_v55, %v6961_v60  ;;  %v311_v20 = vld [vmem:[%s6781_s25 + $0x1c] sm:$0xff] }
  0x88   : > { %v6431_v32 = vrot.slane %v6424_v24, %v6897_v56  ;;  %v6437_v36 = vrot.slane %v6425_v25, %v6897_v56  ;;  %v6374_v29 = vmovacc.add.low.vacc1  ;;  %v6350_v7 = vmovacc.add.low.vacc2  ;;  %v5081_v19 = vld [vmem:[%s6781_s25 + $0x190] sm:$0xff]  ;;  %v5117_v8 = vld [vmem:[%s6781_s25 + $0x1e0] sm:$0xff]  ;;  %v4938_v60 = vld [vmem:[%s6781_s25 + $0x58] sm:$0xff] }
  0x89   : > { %v6407_v62 = vrot.slane %v6400_v61, %v6897_v56  ;;  %v6413_v28 = vrot.slane %v6401_v22, %v6897_v56  ;;  %v6375_v40 = vmovacc.add.high.vacc1  ;;  %v6351_v15 = vmovacc.add.high.vacc2  ;;  %v8142_v9 = vld [vmem:[#allocation9_spill] sm:$0xff]  ;;  %v5120_v12 = vld [vmem:[%s6781_s25 + $0x1f4] sm:$0xff]  ;;  %v4941_v24 = vld [vmem:[%s6781_s25 + $0x6c] sm:$0xff] }
  0x8a   : > { %6319 = vmac.bf16.f32.vacc3 %v4937_v54, %v6966_v2  ;;  %6295 = vmac.bf16.f32.vacc0 %v4940_v27, %v6969_v3  ;;  %v5153_v13 = vld [vmem:[%s6781_s25 + $0x230] sm:$0xff]  ;;  %v5156_v59 = vld [vmem:[%s6781_s25 + $0x244] sm:$0xff]  ;;  %v8145_v3 = vld [vmem:[#allocation12_spill] sm:$0xff] }
  0x8b   : > { %v2348_v52 = vpack.c.bf16 %v6413_v28, %v6437_v36  ;;  %v6376_v41 = vcombine.low %v6374_v29, %v6375_v40  ;;  %v6377_v44 = vcombine.high %v6374_v29, %v6375_v40  ;;  %v6352_v18 = vcombine.low %v6350_v7, %v6351_v15  ;;  %v8144_v2 = vld [vmem:[#allocation11_spill] sm:$0xff]  ;;  %v8146_v21 = vld [vmem:[#allocation13_spill] sm:$0xff]  ;;  %v4974_v25 = vld [vmem:[%s6781_s25 + $0xa8] sm:$0xff] }
  0x8c   : > { %v6353_v23 = vcombine.high %v6350_v7, %v6351_v15  ;;  %v2347_v63 = vpack.c.bf16 %v6407_v62, %v6431_v32  ;;  %6320 = vmac.bf16.f32.vacc3 %v4973_v47, %v8142_v9  ;;  %6296 = vmac.bf16.f32.vacc0 %v4976_v49, %v8143_v16  ;;  %v4977_v32 = vld [vmem:[%s6781_s25 + $0xbc] sm:$0xff]  ;;  %v8147_v36 = vld [vmem:[#allocation14_spill] sm:$0xff]  ;;  %v8148_v33 = vld [vmem:[#allocation15_spill] sm:$0xff] }
  0x8d   : > { %2384 = vmatprep.subr.bf16.mxu0 %v2348_v52  ;;  %v6383_v45 = vrot.slane %v6376_v41, %v6897_v56  ;;  %v6389_v6 = vrot.slane %v6377_v44, %v6897_v56  ;;  %v6359_v26 = vrot.slane %v6352_v18, %v6897_v56  ;;  %6321 = vmac.bf16.f32.vacc3 %v5009_v0, %v8144_v2  ;;  %v5010_v37 = vld [vmem:[%s6781_s25 + $0xf8] sm:$0xff]  ;;  %v5013_v61 = vld [vmem:[%s6781_s25 + $0x10c] sm:$0xff]  ;;  %v8150_v62 = vld [vmem:[#allocation17_spill] sm:$0xff] }
  0x8e   : > { %v6365_v31 = vrot.slane %v6353_v23, %v6897_v56  ;;  %2385 = vmatpush1.bf16.msra.mxu0 %v2347_v63  ;;  %6297 = vmac.bf16.f32.vacc0 %v5012_v1, %v8145_v3  ;;  %6322 = vmac.bf16.f32.vacc3 %v5045_v4, %v8146_v21  ;;  %v8149_v22 = vld [vmem:[#allocation16_spill] sm:$0xff]  ;;  %v5046_v28 = vld [vmem:[%s6781_s25 + $0x148] sm:$0xff]  ;;  %6270 = vmul.bf16.f32.vacc1 %v308_v17, %v7032_v10  ;;  %v8151_v38 = vld [vmem:[#allocation21_spill] sm:$0xff] }
  0x8f   : > { %v2349_v42 = vpack.c.bf16 %v6359_v26, %v6383_v45  ;;  %6298 = vmac.bf16.f32.vacc0 %v5048_v5, %v8147_v36  ;;  %6323 = vmac.bf16.f32.vacc3 %v5081_v19, %v8148_v33  ;;  %6271 = vmac.bf16.f32.vacc1 %v4938_v60, %v8151_v38  ;;  %v5049_v48 = vld [vmem:[%s6781_s25 + $0x15c] sm:$0xff]  ;;  %v8152_v52 = vld [vmem:[#allocation18_spill] sm:$0xff]  ;;  %v8153_v35 = vld [vmem:[#allocation19_spill] sm:$0xff] }
  0x90   : > { %v2350_v14 = vpack.c.bf16 %v6365_v31, %v6389_v6  ;;  %6299 = vmac.bf16.f32.vacc0 %v5084_v43, %v8149_v22  ;;  %6324 = vmac.bf16.f32.vacc3 %v5117_v8, %v8150_v62  ;;  %v5082_v30 = vld [vmem:[%s6781_s25 + $0x198] sm:$0xff]  ;;  %v5085_v10 = vld [vmem:[%s6781_s25 + $0x1ac] sm:$0xff]  ;;  %6272 = vmac.bf16.f32.vacc1 %v4974_v25, %v7052_v46  ;;  %v8158_v49 = vld [vmem:[#allocation25_spill] sm:$0xff] }
  0x91   : > { %6300 = vmac.bf16.f32.vacc0 %v5120_v12, %v8152_v52  ;;  %6325 = vmac.bf16.f32.vacc3 %v5153_v13, %v8153_v35  ;;  %v5118_v7 = vld [vmem:[%s6781_s25 + $0x1e8] sm:$0xff]  ;;  %v8155_v18 = vld [vmem:[#allocation20_spill] sm:$0xff]  ;;  %6273 = vmac.bf16.f32.vacc1 %v5010_v37, %v7060_v50  ;;  %v8156_v47 = vld [vmem:[#allocation23_spill] sm:$0xff]  ;;  %v8113_v17 = vmov 0  }
  0x92   : > { %2425 = vmatprep.subr.bf16.mxu1 %v2350_v14  ;;  %v8154_v15 = vld [vmem:[#allocation22_spill] sm:$0xff]  ;;  %6301 = vmac.bf16.f32.vacc0 %v5156_v59, %v8155_v18  ;;  %v5121_v55 = vld [vmem:[%s6781_s25 + $0x1fc] sm:$0xff]  ;;  %6274 = vmac.bf16.f32.vacc1 %v5046_v28, %v7074_v53  ;;  %v8160_v5 = vld [vmem:[#allocation27_spill] sm:$0xff]  ;;  %2404 = vmatprep.mubr.bf16.mxu0 %v8113_v17  ;;  %v8115_v3 = vmov 0.0  }
  0x93   : > { %2426 = vmatpush1.bf16.msra.mxu1 %v2349_v42  ;;  %v6326_v29 = vmovacc.add.low.vacc3  ;;  %v5154_v54 = vld [vmem:[%s6781_s25 + $0x238] sm:$0xff]  ;;  %v5157_v27 = vld [vmem:[%s6781_s25 + $0x24c] sm:$0xff]  ;;  %6275 = vmac.bf16.f32.vacc1 %v5082_v30, %v7084_v51  ;;  %v2367_v13 = vld [vmem:[%s8092_s2] sm:$0x7]  ;;  %2445 = vmatprep.mubr.bf16.mxu1 %v8113_v17  ;;  %265 = vst [vmem:[%s7824_s8] sm:$0x3f] %v8115_v3 }
  0x94   : > { %v6327_v40 = vmovacc.add.high.vacc3  ;;  %v6302_v23 = vmovacc.add.low.vacc0  ;;  %v8157_v46 = vld [vmem:[#allocation24_spill] sm:$0xff]  ;;  %v7273_v59 = vld [vmem:[%s6775_s18 + $0x2a8] sm:$0xff]  ;;  %266 = vst [vmem:[%s7824_s8 + $0x8] sm:$0x3f] %v8115_v3  ;;  %267 = vst [vmem:[%s7824_s8 + $0x10] sm:$0x3f] %v8115_v3 }
  0x95   : > { %v6303_v26 = vmovacc.add.high.vacc0  ;;  %6276 = vmac.bf16.f32.vacc1 %v5118_v7, %v8157_v46  ;;  %v7276_v16 = vld [vmem:[%s6775_s18 + $0x2bc] sm:$0xff]  ;;  %v5210_v2 = vld [vmem:[%s6781_s25 + $0x7a8] sm:$0xff]  ;;  %268 = vst [vmem:[%s7824_s8 + $0x18] sm:$0x3f] %v8115_v3  ;;  %269 = vst [vmem:[%s7824_s8 + $0x20] sm:$0x3f] %v8115_v3 }
  0x96   : > { %v6328_v41 = vcombine.low %v6326_v29, %v6327_v40  ;;  %v6329_v44 = vcombine.high %v6326_v29, %v6327_v40  ;;  %6246 = vmul.bf16.f32.vacc3 %v311_v20, %v7035_v11  ;;  %v5213_v20 = vld [vmem:[%s6781_s25 + $0x7bc] sm:$0xff]  ;;  %v7288_v21 = vld [vmem:[%s6775_s18 + $0x30c] sm:$0xff]  ;;  %6198 = vmul.bf16.f32.vacc2 %v5210_v2, %v7273_v59 }
  0x97   : > { %6247 = vmac.bf16.f32.vacc3 %v4941_v24, %v8154_v15  ;;  %v6304_v31 = vcombine.low %v6302_v23, %v6303_v26  ;;  %v6305_v14 = vcombine.high %v6302_v23, %v6303_v26  ;;  %v7283_v60 = vld [vmem:[%s6775_s18 + $0x2f8] sm:$0xff]  ;;  %v5249_v25 = vld [vmem:[%s6781_s25 + $0x80c] sm:$0xff] }
  0x98   : > { %v6335_v45 = vrot.slane %v6328_v41, %v6897_v56  ;;  %v6341_v6 = vrot.slane %v6329_v44, %v6897_v56  ;;  %6248 = vmac.bf16.f32.vacc3 %v4977_v32, %v7055_v39  ;;  %v8159_v39 = vld [vmem:[#allocation26_spill] sm:$0xff]  ;;  %v5246_v24 = vld [vmem:[%s6781_s25 + $0x7f8] sm:$0xff] }
  0x99   : > { %v6311_v63 = vrot.slane %v6304_v31, %v6897_v56  ;;  %v6317_v34 = vrot.slane %v6305_v14, %v6897_v56  ;;  %6249 = vmac.bf16.f32.vacc3 %v5013_v61, %v8156_v47  ;;  %6277 = vmac.bf16.f32.vacc1 %v5154_v54, %v8159_v39  ;;  %v7293_v32 = vld [vmem:[%s6775_s18 + $0x348] sm:$0xff]  ;;  %v7296_v36 = vld [vmem:[%s6775_s18 + $0x35c] sm:$0xff] }
  0x9a   : > { %6250 = vmac.bf16.f32.vacc3 %v5049_v48, %v7077_v58  ;;  %v5282_v33 = vld [vmem:[%s6781_s25 + $0x848] sm:$0xff]  ;;  %v5285_v37 = vld [vmem:[%s6781_s25 + $0x85c] sm:$0xff]  ;;  %6199 = vmac.bf16.f32.vacc2 %v5246_v24, %v7283_v60 }
  0x9b   : > { %v2343_v11 = vpack.c.bf16 %v6317_v34, %v6341_v6  ;;  %6251 = vmac.bf16.f32.vacc3 %v5085_v10, %v7089_v57  ;;  %v6278_v0 = vmovacc.add.low.vacc1  ;;  %v2342_v42 = vpack.c.bf16 %v6311_v63, %v6335_v45  ;;  %v7301_v61 = vld [vmem:[%s6775_s18 + $0x398] sm:$0xff]  ;;  %v7304_v22 = vld [vmem:[%s6775_s18 + $0x3ac] sm:$0xff] }
  0x9c   : > { %6252 = vmac.bf16.f32.vacc3 %v5121_v55, %v8158_v49  ;;  %v6279_v1 = vmovacc.add.high.vacc1  ;;  %v5318_v28 = vld [vmem:[%s6781_s25 + $0x898] sm:$0xff]  ;;  %v5321_v38 = vld [vmem:[%s6781_s25 + $0x8ac] sm:$0xff]  ;;  %6200 = vmac.bf16.f32.vacc2 %v5282_v33, %v7293_v32 }
  0x9d   : > { %2386 = vmatprep.subr.bf16.mxu0 %v2343_v11  ;;  %6253 = vmac.bf16.f32.vacc3 %v5157_v27, %v8160_v5  ;;  %v7309_v48 = vld [vmem:[%s6775_s18 + $0x3e8] sm:$0xff]  ;;  %v7316_v30 = vld [vmem:[%s6775_s18 + $0x3fc] sm:$0xff]  ;;  %6201 = vmac.bf16.f32.vacc2 %v5318_v28, %v7301_v61 }
  0x9e   : > { %v6280_v50 = vcombine.low %v6278_v0, %v6279_v1  ;;  %v6281_v4 = vcombine.high %v6278_v0, %v6279_v1  ;;  %2387 = vmatpush1.bf16.msra.mxu0 %v2342_v42  ;;  %6174 = vmul.bf16.f32.vacc1 %v5213_v20, %v7276_v16  ;;  %v5354_v52 = vld [vmem:[%s6781_s25 + $0x8e8] sm:$0xff]  ;;  %v5357_v35 = vld [vmem:[%s6781_s25 + $0x8fc] sm:$0xff] }
  0x9f   : > { %v6254_v51 = vmovacc.add.low.vacc3  ;;  %5484 = vmatprep.subr.bf16.mxu0 %v8115_v3  ;;  %6175 = vmac.bf16.f32.vacc1 %v5249_v25, %v7288_v21  ;;  %v7321_v29 = vld [vmem:[%s6775_s18 + $0x438] sm:$0xff]  ;;  %v7327_v40 = vld [vmem:[%s6775_s18 + $0x44c] sm:$0xff]  ;;  %6202 = vmac.bf16.f32.vacc2 %v5354_v52, %v7309_v48  ;;  %v7405_v28 = vld [vmem:[%s6775_s18 + $0x280] sm:$0xff] }
  0xa0   : > { %v6287_v53 = vrot.slane %v6280_v50, %v6897_v56  ;;  %v6293_v58 = vrot.slane %v6281_v4, %v6897_v56  ;;  %v6255_v57 = vmovacc.add.high.vacc3  ;;  %6176 = vmac.bf16.f32.vacc1 %v5285_v37, %v7296_v36  ;;  %v5390_v41 = vld [vmem:[%s6781_s25 + $0x938] sm:$0xff]  ;;  %v5393_v44 = vld [vmem:[%s6781_s25 + $0x94c] sm:$0xff]  ;;  %v5204_v52 = vld [vmem:[%s6781_s25 + $0x780] sm:$0xff] }
  0xa1   : > { %5177 = vmatmul.mubr.msk.bf16.vlgmr.msra.gmra.mxu0 %vm2368_vm0, %v2367_v13  ;;  %v7333_v45 = vld [vmem:[%s6775_s18 + $0x488] sm:$0xff]  ;;  %6177 = vmac.bf16.f32.vacc1 %v5321_v38, %v7304_v22  ;;  %v7338_v6 = vld [vmem:[%s6775_s18 + $0x49c] sm:$0xff]  ;;  %6203 = vmac.bf16.f32.vacc2 %v5390_v41, %v7321_v29  ;;  %v7408_v38 = vld [vmem:[%s6775_s18 + $0x294] sm:$0xff] }
  0xa2   : > { %v6256_v19 = vcombine.low %v6254_v51, %v6255_v57  ;;  %v6257_v43 = vcombine.high %v6254_v51, %v6255_v57  ;;  %v5426_v10 = vld [vmem:[%s6781_s25 + $0x988] sm:$0xff]  ;;  %v5429_v7 = vld [vmem:[%s6781_s25 + $0x99c] sm:$0xff]  ;;  %6178 = vmac.bf16.f32.vacc1 %v5357_v35, %v7316_v30  ;;  %v5207_v41 = vld [vmem:[%s6781_s25 + $0x794] sm:$0xff]  ;;  %6126 = vmul.bf16.f32.vacc3 %v5204_v52, %v7405_v28  ;;  %5492 = vmatprep.mubr.msk.bf16.mxu0 %vm6661_vm1, %v8115_v3 }
  0xa3   : > { %v7343_v15 = vld [vmem:[%s6775_s18 + $0x4d8] sm:$0xff]  ;;  %v7348_v18 = vld [vmem:[%s6775_s18 + $0x4ec] sm:$0xff]  ;;  %6179 = vmac.bf16.f32.vacc1 %v5393_v44, %v7327_v40  ;;  %6204 = vmac.bf16.f32.vacc2 %v5426_v10, %v7333_v45  ;;  %v7416_v10 = vld [vmem:[%s6775_s18 + $0x2e4] sm:$0xff] }
  0xa4   : > { %v6263_v8 = vrot.slane %v6256_v19, %v6897_v56  ;;  %v6269_v9 = vrot.slane %v6257_v43, %v6897_v56  ;;  %v5462_v23 = vld [vmem:[%s6781_s25 + $0x9d8] sm:$0xff]  ;;  %v5465_v26 = vld [vmem:[%s6781_s25 + $0x9ec] sm:$0xff]  ;;  %6180 = vmac.bf16.f32.vacc1 %v5429_v7, %v7338_v6  ;;  %v4951_v52 = vld [vmem:[%s6781_s25 + $0x2e0] ss:$20 sps:$4 sm:$0xff]  }
  0xa5   : > { %v7353_v31 = vld [vmem:[%s6775_s18 + $0x38] ss:$20 sps:$4 sm:$0xff]   ;;  %v7359_v63 = vld [vmem:[%s6775_s18 + $0x88] ss:$20 sps:$4 sm:$0xff]   ;;  %6205 = vmac.bf16.f32.vacc2 %v5462_v23, %v7343_v15  ;;  %6181 = vmac.bf16.f32.vacc1 %v5465_v26, %v7348_v18  ;;  %v7413_v44 = vld [vmem:[%s6775_s18 + $0x2d0] sm:$0xff] }
  0xa6   : > { %v2345_v12 = vpack.c.bf16 %v6269_v9, %v6293_v58  ;;  %v2344_v62 = vpack.c.bf16 %v6263_v8, %v6287_v53  ;;  %v4921_v14 = vld [vmem:[%s6781_s25 + $0x2b8] ss:$20 sps:$4 sm:$0xff]   ;;  %v4957_v34 = vld [vmem:[%s6781_s25 + $0x308] ss:$20 sps:$4 sm:$0xff]   ;;  %v5240_v7 = vld [vmem:[%s6781_s25 + $0x7d0] sm:$0xff] }
  0xa7   : > { %v7365_v55 = vld [vmem:[%s6775_s18 + $0xd8] ss:$20 sps:$4 sm:$0xff]   ;;  %v7369_v27 = vld [vmem:[%s6775_s18 + $0x128] ss:$20 sps:$4 sm:$0xff]   ;;  %v6206_v11 = vmovacc.add.low.vacc2  ;;  %v6182_v1 = vmovacc.add.low.vacc1  ;;  %6222 = vmul.bf16.f32.vacc0 %v4921_v14, %v7353_v31  ;;  %v7422_v26 = vld [vmem:[%s6775_s18 + $0x320] sm:$0xff]  ;;  %6127 = vmac.bf16.f32.vacc3 %v5240_v7, %v7413_v44 }
  0xa8   : > { %2427 = vmatprep.subr.bf16.mxu1 %v2345_v12  ;;  %v4993_v54 = vld [vmem:[%s6781_s25 + $0x358] ss:$20 sps:$4 sm:$0xff]   ;;  %v6207_v47 = vmovacc.add.high.vacc2  ;;  %v6183_v50 = vmovacc.add.high.vacc1  ;;  %v5029_v51 = vld [vmem:[%s6781_s25 + $0x3a8] ss:$20 sps:$4 sm:$0xff]   ;;  %6223 = vmac.bf16.f32.vacc0 %v4957_v34, %v7359_v63  ;;  %v5276_v34 = vld [vmem:[%s6781_s25 + $0x820] sm:$0xff] }
  0xa9   : > { %2428 = vmatpush1.bf16.msra.mxu1 %v2344_v62  ;;  %v7379_v57 = vld [vmem:[%s6775_s18 + $0x178] ss:$20 sps:$4 sm:$0xff]   ;;  %v7385_v8 = vld [vmem:[%s6775_s18 + $0x1c8] ss:$20 sps:$4 sm:$0xff]   ;;  %6224 = vmac.bf16.f32.vacc0 %v4993_v54, %v7365_v55  ;;  %6128 = vmac.bf16.f32.vacc3 %v5276_v34, %v7422_v26  ;;  %v7496_v7 = vld [vmem:[%s6775_s18 + $0x100] ss:$20 sps:$4 sm:$0xff]  }
  0xaa   : > { %v6208_v46 = vcombine.low %v6206_v11, %v6207_v47  ;;  %v6209_v49 = vcombine.high %v6206_v11, %v6207_v47  ;;  %v6184_v4 = vcombine.low %v6182_v1, %v6183_v50  ;;  %v6185_v53 = vcombine.high %v6182_v1, %v6183_v50  ;;  %v5065_v43 = vld [vmem:[%s6781_s25 + $0x3f8] ss:$20 sps:$4 sm:$0xff]   ;;  %v5101_v9 = vld [vmem:[%s6781_s25 + $0x448] ss:$20 sps:$4 sm:$0xff]   ;;  %v7430_v11 = vld [vmem:[%s6775_s18 + $0x370] sm:$0xff] }
  0xab   : > { %v7390_v12 = vld [vmem:[%s6775_s18 + $0x218] ss:$20 sps:$4 sm:$0xff]   ;;  %6225 = vmac.bf16.f32.vacc0 %v5029_v51, %v7369_v27  ;;  %v5173_v2 = vld [vmem:[%s6781_s25 + $0x4e8] ss:$20 sps:$4 sm:$0xff]   ;;  %6102 = vmul.bf16.f32.vacc2 %v5207_v41, %v7408_v38  ;;  %v7442_v1 = vld [vmem:[%s6775_s18 + $0x3c0] sm:$0xff] }
  0xac   : > { %5178 = vmatmul.mubr.msk.bf16.vlgmr.msra.gmra.mxu1 %vm2368_vm0, %v2367_v13  ;;  %v6215_v39 = vrot.slane %v6208_v46, %v6897_v56  ;;  %v6221_v0 = vrot.slane %v6209_v49, %v6897_v56  ;;  %v6191_v58 = vrot.slane %v6184_v4, %v6897_v56  ;;  %v6197_v5 = vrot.slane %v6185_v53, %v6897_v56  ;;  %v5137_v42 = vld [vmem:[%s6781_s25 + $0x498] ss:$20 sps:$4 sm:$0xff]   ;;  %v7395_v13 = vld [vmem:[%s6775_s18 + $0x268] ss:$20 sps:$4 sm:$0xff]   ;;  %v5312_v46 = vld [vmem:[%s6781_s25 + $0x870] sm:$0xff] }
  0xad   : > { %4638 = vmatprep.mubr.bf16.mxu1 %v8113_v17  ;;  %6226 = vmac.bf16.f32.vacc0 %v5065_v43, %v7379_v57  ;;  %v5243_v23 = vld [vmem:[%s6781_s25 + $0x7e4] sm:$0xff]  ;;  %v7425_v14 = vld [vmem:[%s6775_s18 + $0x334] sm:$0xff]  ;;  %6129 = vmac.bf16.f32.vacc3 %v5312_v46, %v7430_v11 }
  0xae   : > { %v4592_v19 = vpack.c.bf16 %v6197_v5, %v6221_v0  ;;  %6227 = vmac.bf16.f32.vacc0 %v5101_v9, %v7385_v8  ;;  %v5279_v54 = vld [vmem:[%s6781_s25 + $0x834] sm:$0xff]  ;;  %v7433_v47 = vld [vmem:[%s6775_s18 + $0x384] sm:$0xff]  ;;  %v4591_v0 = vpack.c.bf16 %v6191_v58, %v6215_v39  ;;  %6103 = vmac.bf16.f32.vacc2 %v5243_v23, %v7416_v10 }
  0xaf   : > { %6228 = vmac.bf16.f32.vacc0 %v5137_v42, %v7390_v12  ;;  %v5315_v49 = vld [vmem:[%s6781_s25 + $0x884] sm:$0xff]  ;;  %v7445_v50 = vld [vmem:[%s6775_s18 + $0x3d4] sm:$0xff]  ;;  %6104 = vmac.bf16.f32.vacc2 %v5279_v54, %v7425_v14 }
  0xb0   : > { %4614 = vmatprep.subr.bf16.mxu1 %v4592_v19  ;;  %6229 = vmac.bf16.f32.vacc0 %v5173_v2, %v7395_v13  ;;  %v5348_v4 = vld [vmem:[%s6781_s25 + $0x8c0] sm:$0xff]  ;;  %v5351_v53 = vld [vmem:[%s6781_s25 + $0x8d4] sm:$0xff]  ;;  %6105 = vmac.bf16.f32.vacc2 %v5315_v49, %v7433_v47 }
  0xb1   : > { %4615 = vmatpush1.bf16.msra.mxu1 %v4591_v0  ;;  %v7452_v39 = vld [vmem:[%s6775_s18 + $0x410] sm:$0xff]  ;;  %v7455_v58 = vld [vmem:[%s6775_s18 + $0x424] sm:$0xff]  ;;  %6130 = vmac.bf16.f32.vacc3 %v5348_v4, %v7442_v1  ;;  %6106 = vmac.bf16.f32.vacc2 %v5351_v53, %v7445_v50 }
  0xb2   : > { %v6230_v20 = vmovacc.add.low.vacc0  ;;  %v5384_v5 = vld [vmem:[%s6781_s25 + $0x910] sm:$0xff]  ;;  %v5387_v51 = vld [vmem:[%s6781_s25 + $0x924] sm:$0xff] }
  0xb3   : > { %v6231_v24 = vmovacc.add.high.vacc0  ;;  %v7462_v19 = vld [vmem:[%s6775_s18 + $0x460] sm:$0xff]  ;;  %v7465_v43 = vld [vmem:[%s6775_s18 + $0x474] sm:$0xff]  ;;  %6131 = vmac.bf16.f32.vacc3 %v5384_v5, %v7452_v39  ;;  %6107 = vmac.bf16.f32.vacc2 %v5387_v51, %v7455_v58 }
  0xb4   : > { %v5420_v9 = vld [vmem:[%s6781_s25 + $0x960] sm:$0xff]  ;;  %v5423_v42 = vld [vmem:[%s6781_s25 + $0x974] sm:$0xff] }
  0xb5   : > { %v6232_v25 = vcombine.low %v6230_v20, %v6231_v24  ;;  %v6233_v33 = vcombine.high %v6230_v20, %v6231_v24  ;;  %v7472_v2 = vld [vmem:[%s6775_s18 + $0x4b0] sm:$0xff]  ;;  %v7475_v20 = vld [vmem:[%s6775_s18 + $0x4c4] sm:$0xff]  ;;  %6132 = vmac.bf16.f32.vacc3 %v5420_v9, %v7462_v19  ;;  %6108 = vmac.bf16.f32.vacc2 %v5423_v42, %v7465_v43 }
  0xb6   : > { %v5456_v24 = vld [vmem:[%s6781_s25 + $0x9b0] sm:$0xff] }
  0xb7   : > { %v6239_v37 = vrot.slane %v6232_v25, %v6897_v56  ;;  %v6245_v62 = vrot.slane %v6233_v33, %v6897_v56  ;;  %v5459_v25 = vld [vmem:[%s6781_s25 + $0x9c4] sm:$0xff]  ;;  %6133 = vmac.bf16.f32.vacc3 %v5456_v24, %v7472_v2  ;;  %v5023_v24 = vld [vmem:[%s6781_s25 + $0x380] ss:$20 sps:$4 sm:$0xff]  }
  0xb8   : > { %v7482_v33 = vld [vmem:[%s6775_s18 + $0x10] ss:$20 sps:$4 sm:$0xff]   ;;  %6109 = vmac.bf16.f32.vacc2 %v5459_v25, %v7475_v20  ;;  %v7512_v25 = vld [vmem:[%s6775_s18 + $0x1a0] ss:$20 sps:$4 sm:$0xff]  }
  0xb9   : > { %v2361_v35 = vpack.c.bf16 %v6245_v62, %v6239_v37  ;;  %v4915_v37 = vld [vmem:[%s6781_s25 + $0x290] ss:$20 sps:$4 sm:$0xff]   ;;  %v7486_v62 = vld [vmem:[%s6775_s18 + $0x60] ss:$20 sps:$4 sm:$0xff]   ;;  %v6134_v23 = vmovacc.add.low.vacc3 }
  0xba   : > { %v4987_v41 = vld [vmem:[%s6781_s25 + $0x330] ss:$20 sps:$4 sm:$0xff]   ;;  %v6135_v34 = vmovacc.add.high.vacc3  ;;  %v6110_v4 = vmovacc.add.low.vacc2  ;;  %6150 = vmul.bf16.f32.vacc0 %v4915_v37, %v7482_v33  ;;  %v5167_v37 = vld [vmem:[%s6781_s25 + $0x4c0] ss:$20 sps:$4 sm:$0xff]  }
  0xbb   : > { %5485 = vmatpush3.bf16.msra.mxu0 %v2361_v35  ;;  %v7492_v35 = vld [vmem:[%s6775_s18 + $0xb0] ss:$20 sps:$4 sm:$0xff]   ;;  %v6111_v53 = vmovacc.add.high.vacc2  ;;  %6151 = vmac.bf16.f32.vacc0 %v4951_v52, %v7486_v62 }
  0xbc   : > { %5486 = vmatprep.subr.bf16.mxu0 %v8115_v3  ;;  %v6136_v54 = vcombine.low %v6134_v23, %v6135_v34  ;;  %v6137_v46 = vcombine.high %v6134_v23, %v6135_v34  ;;  %v7506_v23 = vld [vmem:[%s6775_s18 + $0x150] ss:$20 sps:$4 sm:$0xff]   ;;  %6152 = vmac.bf16.f32.vacc0 %v4987_v41, %v7492_v35 }
  0xbd   : > { %v6112_v5 = vcombine.low %v6110_v4, %v6111_v53  ;;  %v6113_v51 = vcombine.high %v6110_v4, %v6111_v53  ;;  %v7516_v17 = vld [vmem:[%s6775_s18 + $0x1f0] ss:$20 sps:$4 sm:$0xff]   ;;  %v7521_v53 = vld [vmem:[%s6775_s18 + $0x240] ss:$20 sps:$4 sm:$0xff]   ;;  %6153 = vmac.bf16.f32.vacc0 %v5023_v24, %v7496_v7  ;;  %v5198_v24 = vld [vmem:[%s6781_s25 + $0x528] sm:$0xff] }
  0xbe   : > { %v6143_v49 = vrot.slane %v6136_v54, %v6897_v56  ;;  %v6149_v0 = vrot.slane %v6137_v46, %v6897_v56  ;;  %v5059_v54 = vld [vmem:[%s6781_s25 + $0x3d0] ss:$20 sps:$4 sm:$0xff]   ;;  %v5095_v46 = vld [vmem:[%s6781_s25 + $0x420] ss:$20 sps:$4 sm:$0xff]   ;;  %8161 = vst [vmem:[#allocation9_spill] sm:$0xff] %v7521_v53  ;;  %6054 = vmul.bf16.f32.vacc1 %v5198_v24, %v7273_v59  ;;  %v5414_v24 = vld [vmem:[%s6781_s25 + $0x708] sm:$0xff] }
  0xbf   : > { %v6119_v9 = vrot.slane %v6112_v5, %v6897_v56  ;;  %v6125_v42 = vrot.slane %v6113_v51, %v6897_v56  ;;  %v5131_v4 = vld [vmem:[%s6781_s25 + $0x470] ss:$20 sps:$4 sm:$0xff]   ;;  %6154 = vmac.bf16.f32.vacc0 %v5059_v54, %v7506_v23 }
  0xc0   : > { %6155 = vmac.bf16.f32.vacc0 %v5095_v46, %v7512_v25  ;;  %v5234_v46 = vld [vmem:[%s6781_s25 + $0x578] sm:$0xff] }
  0xc1   : > { %v4587_v34 = vpack.c.bf16 %v6125_v42, %v6149_v0  ;;  %6156 = vmac.bf16.f32.vacc0 %v5131_v4, %v7516_v17  ;;  %v5237_v4 = vld [vmem:[%s6781_s25 + $0x58c] sm:$0xff]  ;;  %6055 = vmac.bf16.f32.vacc1 %v5234_v46, %v7283_v60  ;;  %v4586_v59 = vpack.c.bf16 %v6119_v9, %v6143_v49  ;;  %v5417_v60 = vld [vmem:[%s6781_s25 + $0x71c] sm:$0xff] }
  0xc2   : > { %6157 = vmac.bf16.f32.vacc0 %v5167_v37, %v7521_v53  ;;  %v5270_v37 = vld [vmem:[%s6781_s25 + $0x5c8] sm:$0xff]  ;;  %v5273_v53 = vld [vmem:[%s6781_s25 + $0x5dc] sm:$0xff] }
  0xc3   : > { %4616 = vmatprep.subr.bf16.mxu1 %v4587_v34  ;;  %v5201_v34 = vld [vmem:[%s6781_s25 + $0x53c] sm:$0xff]  ;;  %6056 = vmac.bf16.f32.vacc1 %v5270_v37, %v7293_v32  ;;  %v5125_v37 = vld [vmem:[%s6781_s25 + $0x218] ss:$20 sps:$4 sm:$0xff]  }
  0xc4   : > { %v6158_v52 = vmovacc.add.low.vacc0  ;;  %6030 = vmul.bf16.f32.vacc3 %v5201_v34, %v7276_v16  ;;  %4617 = vmatpush1.bf16.msra.mxu1 %v4586_v59  ;;  %v5450_v16 = vld [vmem:[%s6781_s25 + $0x758] sm:$0xff] }
  0xc5   : > { %v6159_v41 = vmovacc.add.high.vacc0  ;;  %6031 = vmac.bf16.f32.vacc3 %v5237_v4, %v7288_v21  ;;  %v5453_v21 = vld [vmem:[%s6781_s25 + $0x76c] sm:$0xff]  ;;  %v4945_v32 = vld [vmem:[%s6781_s25 + $0x88] ss:$20 sps:$4 sm:$0xff]   ;;  %v5267_v59 = vld [vmem:[%s6781_s25 + $0x5b4] sm:$0xff] }
  0xc6   : > { %6032 = vmac.bf16.f32.vacc3 %v5273_v53, %v7296_v36  ;;  %v315_v34 = vld [vmem:[%s6781_s25 + $0x38] ss:$20 sps:$4 sm:$0xff]   ;;  %v5089_v4 = vld [vmem:[%s6781_s25 + $0x1c8] ss:$20 sps:$4 sm:$0xff]  }
  0xc7   : > { %v6160_v0 = vcombine.low %v6158_v52, %v6159_v41  ;;  %v6161_v5 = vcombine.high %v6158_v52, %v6159_v41  ;;  %v5306_v52 = vld [vmem:[%s6781_s25 + $0x618] sm:$0xff]  ;;  %v5309_v41 = vld [vmem:[%s6781_s25 + $0x62c] sm:$0xff]  ;;  %6078 = vmul.bf16.f32.vacc0 %v315_v34, %v7353_v31  ;;  %v5375_v34 = vld [vmem:[%s6781_s25 + $0x6a4] sm:$0xff] }
  0xc8   : > { %6057 = vmac.bf16.f32.vacc1 %v5306_v52, %v7301_v61  ;;  %6033 = vmac.bf16.f32.vacc3 %v5309_v41, %v7304_v22  ;;  %v4981_v36 = vld [vmem:[%s6781_s25 + $0xd8] ss:$20 sps:$4 sm:$0xff]   ;;  %v5017_v61 = vld [vmem:[%s6781_s25 + $0x128] ss:$20 sps:$4 sm:$0xff]   ;;  %6079 = vmac.bf16.f32.vacc0 %v4945_v32, %v7359_v63 }
  0xc9   : > { %v6167_v51 = vrot.slane %v6160_v0, %v6897_v56  ;;  %v6173_v42 = vrot.slane %v6161_v5, %v6897_v56  ;;  %v5342_v0 = vld [vmem:[%s6781_s25 + $0x668] sm:$0xff]  ;;  %v5345_v5 = vld [vmem:[%s6781_s25 + $0x67c] sm:$0xff]  ;;  %6080 = vmac.bf16.f32.vacc0 %v4981_v36, %v7365_v55  ;;  %v5195_v31 = vld [vmem:[%s6781_s25 + $0x514] sm:$0xff] }
  0xca   : > { %6058 = vmac.bf16.f32.vacc1 %v5342_v0, %v7309_v48  ;;  %6034 = vmac.bf16.f32.vacc3 %v5345_v5, %v7316_v30  ;;  %v5053_v22 = vld [vmem:[%s6781_s25 + $0x178] ss:$20 sps:$4 sm:$0xff]   ;;  %v5161_v41 = vld [vmem:[%s6781_s25 + $0x268] ss:$20 sps:$4 sm:$0xff]   ;;  %6081 = vmac.bf16.f32.vacc0 %v5017_v61, %v7369_v27  ;;  %v309_v36 = vld [vmem:[%s6781_s25 + $0x10] ss:$20 sps:$4 sm:$0xff]  }
  0xcb   : > { %v2356_v54 = vpack.c.bf16 %v6173_v42, %v6167_v51  ;;  %v5378_v51 = vld [vmem:[%s6781_s25 + $0x6b8] sm:$0xff]  ;;  %v5381_v42 = vld [vmem:[%s6781_s25 + $0x6cc] sm:$0xff]  ;;  %6082 = vmac.bf16.f32.vacc0 %v5053_v22, %v7379_v57  ;;  %6006 = vmul.bf16.f32.vacc2 %v309_v36, %v7482_v33  ;;  %v8162_v33 = vld [vmem:[#allocation9_spill] sm:$0xff] }
  0xcc   : > { %6059 = vmac.bf16.f32.vacc1 %v5378_v51, %v7321_v29  ;;  %6035 = vmac.bf16.f32.vacc3 %v5381_v42, %v7327_v40  ;;  %6083 = vmac.bf16.f32.vacc0 %v5089_v4, %v7385_v8  ;;  %v5228_v8 = vld [vmem:[%s6781_s25 + $0x550] sm:$0xff]  ;;  %v5231_v51 = vld [vmem:[%s6781_s25 + $0x564] sm:$0xff] }
  0xcd   : > { %5487 = vmatpush3.bf16.msra.mxu0 %v2356_v54  ;;  %6060 = vmac.bf16.f32.vacc1 %v5414_v24, %v7333_v45  ;;  %6036 = vmac.bf16.f32.vacc3 %v5417_v60, %v7338_v6  ;;  %6084 = vmac.bf16.f32.vacc0 %v5125_v37, %v7390_v12  ;;  %v5264_v42 = vld [vmem:[%s6781_s25 + $0x5a0] sm:$0xff]  ;;  %v7655_v4 = vld [vmem:[%s6775_s18 + $0x314] sm:$0xff] }
  0xce   : > { %5488 = vmatprep.subr.bf16.mxu0 %v8115_v3  ;;  %6061 = vmac.bf16.f32.vacc1 %v5450_v16, %v7343_v15  ;;  %6037 = vmac.bf16.f32.vacc3 %v5453_v21, %v7348_v18  ;;  %v5192_v18 = vld [vmem:[%s6781_s25 + $0x500] sm:$0xff]  ;;  %6085 = vmac.bf16.f32.vacc0 %v5161_v41, %v7395_v13  ;;  %v5300_v13 = vld [vmem:[%s6781_s25 + $0x5f0] sm:$0xff] }
  0xcf   : > { %v5303_v24 = vld [vmem:[%s6781_s25 + $0x604] sm:$0xff]  ;;  %v5339_v16 = vld [vmem:[%s6781_s25 + $0x654] sm:$0xff] }
  0xd0   : > { %v6062_v49 = vmovacc.add.low.vacc1  ;;  %v6038_v40 = vmovacc.add.low.vacc3  ;;  %v6086_v63 = vmovacc.add.low.vacc0  ;;  %v5336_v60 = vld [vmem:[%s6781_s25 + $0x640] sm:$0xff]  ;;  %v5372_v21 = vld [vmem:[%s6781_s25 + $0x690] sm:$0xff] }
  0xd1   : > { %v6063_v48 = vmovacc.add.high.vacc1  ;;  %v6039_v45 = vmovacc.add.high.vacc3  ;;  %v6087_v55 = vmovacc.add.high.vacc0  ;;  %v5047_v61 = vld [vmem:[%s6781_s25 + $0x150] ss:$20 sps:$4 sm:$0xff]   ;;  %v7725_v36 = vld [vmem:[%s6775_s18 + $0x4f4] sm:$0xff] }
  0xd2   : > { %v5247_v37 = vld [vmem:[%s6781_s25 + $0x800] sm:$0xff]  ;;  %v7660_v41 = vld [vmem:[%s6775_s18 + $0x350] sm:$0xff] }
  0xd3   : > { %v6064_v9 = vcombine.low %v6062_v49, %v6063_v48  ;;  %v6065_v30 = vcombine.high %v6062_v49, %v6063_v48  ;;  %v6040_v54 = vcombine.low %v6038_v40, %v6039_v45  ;;  %v6041_v6 = vcombine.high %v6038_v40, %v6039_v45  ;;  %v5155_v40 = vld [vmem:[%s6781_s25 + $0x240] ss:$20 sps:$4 sm:$0xff]  }
  0xd4   : > { %v6088_v0 = vcombine.low %v6086_v63, %v6087_v55  ;;  %v6089_v5 = vcombine.high %v6086_v63, %v6087_v55  ;;  %5982 = vmul.bf16.f32.vacc0 %v5192_v18, %v7405_v28  ;;  %5958 = vmul.bf16.f32.vacc1 %v5195_v31, %v7408_v38  ;;  %v5408_v28 = vld [vmem:[%s6781_s25 + $0x6e0] sm:$0xff]  ;;  %v5444_v38 = vld [vmem:[%s6781_s25 + $0x730] sm:$0xff] }
  0xd5   : > { %v6071_v29 = vrot.slane %v6064_v9, %v6897_v56  ;;  %v6077_v53 = vrot.slane %v6065_v30, %v6897_v56  ;;  %v6047_v15 = vrot.slane %v6040_v54, %v6897_v56  ;;  %v6053_v46 = vrot.slane %v6041_v6, %v6897_v56  ;;  %v5083_v30 = vld [vmem:[%s6781_s25 + $0x1a0] ss:$20 sps:$4 sm:$0xff]   ;;  %v5214_v6 = vld [vmem:[%s6781_s25 + $0x7c4] sm:$0xff] }
  0xd6   : > { %v6095_v27 = vrot.slane %v6088_v0, %v6897_v56  ;;  %v6101_v57 = vrot.slane %v6089_v5, %v6897_v56  ;;  %5983 = vmac.bf16.f32.vacc0 %v5228_v8, %v7413_v44  ;;  %5959 = vmac.bf16.f32.vacc1 %v5231_v51, %v7416_v10  ;;  %v5411_v44 = vld [vmem:[%s6781_s25 + $0x6f4] sm:$0xff]  ;;  %v5447_v10 = vld [vmem:[%s6781_s25 + $0x744] sm:$0xff]  ;;  %v5580_v63 = vld [vmem:[%s8092_s2] sm:$0x7] }
  0xd7   : > { %v4582_v52 = vpack.c.bf16 %v6053_v46, %v6077_v53  ;;  %5984 = vmac.bf16.f32.vacc0 %v5264_v42, %v7422_v26  ;;  %v4581_v32 = vpack.c.bf16 %v6047_v15, %v6071_v29  ;;  %5960 = vmac.bf16.f32.vacc1 %v5267_v59, %v7425_v14  ;;  %v4939_v26 = vld [vmem:[%s6781_s25 + $0x60] ss:$20 sps:$4 sm:$0xff]   ;;  %v4975_v14 = vld [vmem:[%s6781_s25 + $0xb0] ss:$20 sps:$4 sm:$0xff]  }
  0xd8   : > { %v2351_v12 = vpack.c.bf16 %v6101_v57, %v6095_v27  ;;  %5985 = vmac.bf16.f32.vacc0 %v5300_v13, %v7430_v11  ;;  %5961 = vmac.bf16.f32.vacc1 %v5303_v24, %v7433_v47  ;;  %v5011_v11 = vld [vmem:[%s6781_s25 + $0x100] ss:$20 sps:$4 sm:$0xff]   ;;  %6007 = vmac.bf16.f32.vacc2 %v4939_v26, %v7486_v62  ;;  %v5119_v29 = vld [vmem:[%s6781_s25 + $0x1f0] ss:$20 sps:$4 sm:$0xff]  }
  0xd9   : > { %4618 = vmatprep.subr.bf16.mxu1 %v4582_v52  ;;  %5986 = vmac.bf16.f32.vacc0 %v5336_v60, %v7442_v1  ;;  %5962 = vmac.bf16.f32.vacc1 %v5339_v16, %v7445_v50  ;;  %6008 = vmac.bf16.f32.vacc2 %v4975_v14, %v7492_v35  ;;  %v7650_v15 = vld [vmem:[%s6775_s18 + $0x300] sm:$0xff]  ;;  %v5250_v52 = vld [vmem:[%s6781_s25 + $0x814] sm:$0xff]  ;;  %v8163_v5 = vmov 0  }
  0xda   : > { %5489 = vmatpush3.bf16.msra.mxu0 %v2351_v12  ;;  %4619 = vmatpush1.bf16.msra.mxu1 %v4581_v32  ;;  %5987 = vmac.bf16.f32.vacc0 %v5372_v21, %v7452_v39  ;;  %5963 = vmac.bf16.f32.vacc1 %v5375_v34, %v7455_v58  ;;  %6009 = vmac.bf16.f32.vacc2 %v5011_v11, %v7496_v7  ;;  %v7663_v18 = vld [vmem:[%s6775_s18 + $0x364] sm:$0xff]  ;;  %v5283_v31 = vld [vmem:[%s6781_s25 + $0x850] sm:$0xff] }
  0xdb   : > { %5490 = vmatprep.subr.bf16.mxu0 %v8115_v3  ;;  %5988 = vmac.bf16.f32.vacc0 %v5408_v28, %v7462_v19  ;;  %5964 = vmac.bf16.f32.vacc1 %v5411_v44, %v7465_v43  ;;  %6010 = vmac.bf16.f32.vacc2 %v5047_v61, %v7506_v23  ;;  %v5286_v55 = vld [vmem:[%s6781_s25 + $0x864] sm:$0xff]  ;;  %v7676_v27 = vld [vmem:[%s6775_s18 + $0x3b4] sm:$0xff] }
  0xdc   : > { %5989 = vmac.bf16.f32.vacc0 %v5444_v38, %v7472_v2  ;;  %5965 = vmac.bf16.f32.vacc1 %v5447_v10, %v7475_v20  ;;  %6011 = vmac.bf16.f32.vacc2 %v5083_v30, %v7512_v25  ;;  %v7639_v20 = vld [vmem:[%s6775_s18 + $0x2b0] sm:$0xff]  ;;  %v7645_v25 = vld [vmem:[%s6775_s18 + $0x2c4] sm:$0xff] }
  0xdd   : > { %6012 = vmac.bf16.f32.vacc2 %v5119_v29, %v7516_v17  ;;  %v5211_v17 = vld [vmem:[%s6781_s25 + $0x7b0] sm:$0xff]  ;;  %v7672_v0 = vld [vmem:[%s6775_s18 + $0x3a0] sm:$0xff]  ;;  %v7744_v29 = vld [vmem:[%s6775_s18 + $0x308] ss:$20 sps:$4 sm:$0xff]  }
  0xde   : > { %v5990_v47 = vmovacc.add.low.vacc0  ;;  %v5966_v19 = vmovacc.add.low.vacc1  ;;  %6013 = vmac.bf16.f32.vacc2 %v5155_v40, %v8162_v33  ;;  %v5319_v8 = vld [vmem:[%s6781_s25 + $0x8a0] sm:$0xff]  ;;  %v5322_v51 = vld [vmem:[%s6781_s25 + $0x8b4] sm:$0xff]  ;;  %5934 = vmul.bf16.f32.vacc3 %v5211_v17, %v7639_v20 }
  0xdf   : > { %v5991_v1 = vmovacc.add.high.vacc0  ;;  %v5967_v49 = vmovacc.add.high.vacc1  ;;  %5935 = vmac.bf16.f32.vacc3 %v5247_v37, %v7650_v15  ;;  %v7685_v12 = vld [vmem:[%s6775_s18 + $0x3f0] sm:$0xff]  ;;  %v5468_v42 = vld [vmem:[%s8092_s2 + $0x4] sm:$0x7]  ;;  %v7748_v40 = vld [vmem:[%s6775_s18 + $0x358] ss:$20 sps:$4 sm:$0xff]  }
  0xe0   : > { %v6014_v62 = vmovacc.add.low.vacc2  ;;  %v7691_v59 = vld [vmem:[%s6775_s18 + $0x404] sm:$0xff]  ;;  %v5355_v13 = vld [vmem:[%s6781_s25 + $0x8f0] sm:$0xff]  ;;  %5936 = vmac.bf16.f32.vacc3 %v5283_v31, %v7660_v41  ;;  %v5284_v33 = vld [vmem:[%s6781_s25 + $0x858] ss:$20 sps:$4 sm:$0xff]  }
  0xe1   : > { %v5992_v22 = vcombine.low %v5990_v47, %v5991_v1  ;;  %v5993_v50 = vcombine.high %v5990_v47, %v5991_v1  ;;  %v5968_v48 = vcombine.low %v5966_v19, %v5967_v49  ;;  %v5969_v43 = vcombine.high %v5966_v19, %v5967_v49  ;;  %v5358_v24 = vld [vmem:[%s6781_s25 + $0x904] sm:$0xff]  ;;  %v7703_v16 = vld [vmem:[%s6775_s18 + $0x454] sm:$0xff] }
  0xe2   : > { %v6015_v35 = vmovacc.add.high.vacc2  ;;  %v7699_v60 = vld [vmem:[%s6775_s18 + $0x440] sm:$0xff]  ;;  %v5394_v34 = vld [vmem:[%s6781_s25 + $0x954] sm:$0xff]  ;;  %5937 = vmac.bf16.f32.vacc3 %v5319_v8, %v7672_v0  ;;  %v7772_v37 = vld [vmem:[%s6775_s18 + $0x4e8] ss:$20 sps:$4 sm:$0xff]  }
  0xe3   : > { %v5999_v39 = vrot.slane %v5992_v22, %v6897_v56  ;;  %v6005_v58 = vrot.slane %v5993_v50, %v6897_v56  ;;  %v5975_v9 = vrot.slane %v5968_v48, %v6897_v56  ;;  %v5981_v2 = vrot.slane %v5969_v43, %v6897_v56  ;;  %v5391_v21 = vld [vmem:[%s6781_s25 + $0x940] sm:$0xff]  ;;  %v7712_v32 = vld [vmem:[%s6775_s18 + $0x490] sm:$0xff]  ;;  %v7767_v17 = vld [vmem:[%s6775_s18 + $0x498] ss:$20 sps:$4 sm:$0xff]  }
  0xe4   : > { %v6016_v45 = vcombine.low %v6014_v62, %v6015_v35  ;;  %v6017_v54 = vcombine.high %v6014_v62, %v6015_v35  ;;  %5910 = vmul.bf16.f32.vacc2 %v5214_v6, %v7645_v25  ;;  %v7715_v28 = vld [vmem:[%s6775_s18 + $0x4a4] sm:$0xff]  ;;  %v5427_v44 = vld [vmem:[%s6781_s25 + $0x990] sm:$0xff]  ;;  %5938 = vmac.bf16.f32.vacc3 %v5355_v13, %v7685_v12  ;;  %v5241_v13 = vld [vmem:[%s6781_s25 + $0x7d8] sm:$0xff] }
  0xe5   : > { %v4577_v53 = vpack.c.bf16 %v5981_v2, %v6005_v58  ;;  %v4576_v57 = vpack.c.bf16 %v5975_v9, %v5999_v39  ;;  %5911 = vmac.bf16.f32.vacc2 %v5250_v52, %v7655_v4  ;;  %v5430_v38 = vld [vmem:[%s6781_s25 + $0x9a4] sm:$0xff]  ;;  %v5466_v14 = vld [vmem:[%s6781_s25 + $0x9f4] sm:$0xff]  ;;  %5939 = vmac.bf16.f32.vacc3 %v5391_v21, %v7699_v60  ;;  %v7790_v8 = vld [vmem:[%s6775_s18 + $0x2ec] sm:$0xff] }
  0xe6   : > { %v6023_v7 = vrot.slane %v6016_v45, %v6897_v56  ;;  %v6029_v23 = vrot.slane %v6017_v54, %v6897_v56  ;;  %5912 = vmac.bf16.f32.vacc2 %v5286_v55, %v7663_v18  ;;  %v7722_v10 = vld [vmem:[%s6775_s18 + $0x4e0] sm:$0xff]  ;;  %5940 = vmac.bf16.f32.vacc3 %v5427_v44, %v7712_v32  ;;  %v7740_v9 = vld [vmem:[%s6775_s18 + $0x2b8] ss:$20 sps:$4 sm:$0xff]   ;;  %v7752_v62 = vld [vmem:[%s6775_s18 + $0x3a8] ss:$20 sps:$4 sm:$0xff]  }
  0xe7   : > { %4620 = vmatprep.subr.bf16.mxu1 %v4577_v53  ;;  %5913 = vmac.bf16.f32.vacc2 %v5322_v51, %v7676_v27  ;;  %v5463_v26 = vld [vmem:[%s6781_s25 + $0x9e0] sm:$0xff]  ;;  %v5212_v2 = vld [vmem:[%s6781_s25 + $0x7b8] ss:$20 sps:$4 sm:$0xff]   ;;  %v5248_v53 = vld [vmem:[%s6781_s25 + $0x808] ss:$20 sps:$4 sm:$0xff]  }
  0xe8   : > { %v2346_v46 = vpack.c.bf16 %v6029_v23, %v6023_v7  ;;  %4621 = vmatpush1.bf16.msra.mxu1 %v4576_v57  ;;  %5914 = vmac.bf16.f32.vacc2 %v5358_v24, %v7691_v59  ;;  %5941 = vmac.bf16.f32.vacc3 %v5463_v26, %v7722_v10  ;;  %v5320_v35 = vld [vmem:[%s6781_s25 + $0x8a8] ss:$20 sps:$4 sm:$0xff]   ;;  %v7756_v45 = vld [vmem:[%s6775_s18 + $0x3f8] ss:$20 sps:$4 sm:$0xff]   ;;  %5886 = vmul.bf16.f32.vacc1 %v5212_v2, %v7740_v9 }
  0xe9   : > { %5496 = vmatprep.subr.bf16.mxu1 %v8115_v3  ;;  %5915 = vmac.bf16.f32.vacc2 %v5394_v34, %v7703_v16  ;;  %5887 = vmac.bf16.f32.vacc1 %v5248_v53, %v7744_v29  ;;  %v5356_v54 = vld [vmem:[%s6781_s25 + $0x8f8] ss:$20 sps:$4 sm:$0xff]   ;;  %v7762_v7 = vld [vmem:[%s6775_s18 + $0x448] ss:$20 sps:$4 sm:$0xff]  }
  0xea   : > { %5491 = vmatpush3.bf16.msra.mxu0 %v2346_v46  ;;  %5916 = vmac.bf16.f32.vacc2 %v5430_v38, %v7715_v28  ;;  %v5942_v11 = vmovacc.add.low.vacc3  ;;  %5888 = vmac.bf16.f32.vacc1 %v5284_v33, %v7748_v40  ;;  %v5392_v23 = vld [vmem:[%s6781_s25 + $0x948] ss:$20 sps:$4 sm:$0xff]   ;;  %v5428_v46 = vld [vmem:[%s6781_s25 + $0x998] ss:$20 sps:$4 sm:$0xff]  }
  0xeb   : > { %5469 = vmatmul.mubr.msk.bf16.vlgmr.msra.gmra.mxu1 %vm2368_vm0, %v5468_v42  ;;  %v5943_v61 = vmovacc.add.high.vacc3  ;;  %5917 = vmac.bf16.f32.vacc2 %v5466_v14, %v7725_v36  ;;  %5889 = vmac.bf16.f32.vacc1 %v5320_v35, %v7752_v62  ;;  %v5464_v52 = vld [vmem:[%s6781_s25 + $0x9e8] ss:$20 sps:$4 sm:$0xff]   ;;  %v5244_v14 = vld [vmem:[%s6781_s25 + $0x7ec] sm:$0xff] }
  0xec   : > { %5504 = vmatprep.mubr.msk.bf16.mxu1 %vm6661_vm1, %v8115_v3  ;;  %5890 = vmac.bf16.f32.vacc1 %v5356_v54, %v7756_v45  ;;  %v7777_v31 = vld [vmem:[%s6775_s18 + $0x288] sm:$0xff]  ;;  %v7786_v57 = vld [vmem:[%s6775_s18 + $0x2d8] sm:$0xff] }
  0xed   : > { %5493 = vmatmul.mubr.msk.bf16.vlgmr.msra.gmra.mxu0 %vm2368_vm0, %v5580_v63  ;;  %v5944_v47 = vcombine.low %v5942_v11, %v5943_v61  ;;  %v5945_v1 = vcombine.high %v5942_v11, %v5943_v61  ;;  %v5918_v39 = vmovacc.add.low.vacc2  ;;  %v7780_v63 = vld [vmem:[%s6775_s18 + $0x29c] sm:$0xff]  ;;  %5891 = vmac.bf16.f32.vacc1 %v5392_v23, %v7762_v7  ;;  %v5205_v55 = vld [vmem:[%s6781_s25 + $0x788] sm:$0xff] }
  0xee   : > { %4679 = vmatprep.mubr.bf16.mxu0 %v8163_v5  ;;  %v5919_v58 = vmovacc.add.high.vacc2  ;;  %v5208_v5 = vld [vmem:[%s6781_s25 + $0x79c] sm:$0xff]  ;;  %5892 = vmac.bf16.f32.vacc1 %v5428_v46, %v7767_v17  ;;  %v7803_v11 = vld [vmem:[%s6775_s18 + $0x328] sm:$0xff]  ;;  %5862 = vmul.bf16.f32.vacc0 %v5205_v55, %v7777_v31 }
  0xef   : > { %v5951_v22 = vrot.slane %v5944_v47, %v6897_v56  ;;  %v5957_v50 = vrot.slane %v5945_v1, %v6897_v56  ;;  %5893 = vmac.bf16.f32.vacc1 %v5464_v52, %v7772_v37  ;;  %v7811_v1 = vld [vmem:[%s6775_s18 + $0x33c] sm:$0xff]  ;;  %v5316_v53 = vld [vmem:[%s6781_s25 + $0x88c] sm:$0xff]  ;;  %5863 = vmac.bf16.f32.vacc0 %v5241_v13, %v7786_v57 }
  0xf0   : > { %v5920_v19 = vcombine.low %v5918_v39, %v5919_v58  ;;  %v5921_v49 = vcombine.high %v5918_v39, %v5919_v58  ;;  %v7841_v33 = vld [vmem:[%s6775_s18 + $0x3c8] sm:$0xff]  ;;  %5838 = vmul.bf16.f32.vacc3 %v5208_v5, %v7780_v63  ;;  %v7847_v35 = vld [vmem:[%s6775_s18 + $0x3dc] sm:$0xff] }
  0xf1   : > { %v5894_v24 = vmovacc.add.low.vacc1  ;;  %5839 = vmac.bf16.f32.vacc3 %v5244_v14, %v7790_v8  ;;  %v5349_v54 = vld [vmem:[%s6781_s25 + $0x8c8] sm:$0xff]  ;;  %v5352_v23 = vld [vmem:[%s6781_s25 + $0x8dc] sm:$0xff] }
  0xf2   : > { %v5927_v48 = vrot.slane %v5920_v19, %v6897_v56  ;;  %v5933_v43 = vrot.slane %v5921_v49, %v6897_v56  ;;  %v5895_v21 = vmovacc.add.high.vacc1  ;;  %v7816_v49 = vld [vmem:[%s6775_s18 + $0x378] sm:$0xff]  ;;  %v7857_v46 = vld [vmem:[%s6775_s18 + $0x42c] sm:$0xff] }
  0xf3   : > { %v5385_v52 = vld [vmem:[%s6781_s25 + $0x918] sm:$0xff]  ;;  %v5388_v55 = vld [vmem:[%s6781_s25 + $0x92c] sm:$0xff] }
  0xf4   : > { %v4594_v30 = vpack.c.bf16 %v5933_v43, %v5957_v50  ;;  %v4593_v6 = vpack.c.bf16 %v5927_v48, %v5951_v22  ;;  %v5896_v34 = vcombine.low %v5894_v24, %v5895_v21  ;;  %v5897_v44 = vcombine.high %v5894_v24, %v5895_v21  ;;  %v5277_v22 = vld [vmem:[%s6781_s25 + $0x828] sm:$0xff]  ;;  %v5280_v50 = vld [vmem:[%s6781_s25 + $0x83c] sm:$0xff] }
  0xf5   : > { %v7819_v48 = vld [vmem:[%s6775_s18 + $0x38c] sm:$0xff]  ;;  %5864 = vmac.bf16.f32.vacc0 %v5277_v22, %v7803_v11  ;;  %5840 = vmac.bf16.f32.vacc3 %v5280_v50, %v7811_v1  ;;  %v7867_v13 = vld [vmem:[%s6775_s18 + $0x47c] sm:$0xff] }
  0xf6   : > { %4655 = vmatprep.subr.bf16.mxu0 %v4594_v30  ;;  %v5903_v38 = vrot.slane %v5896_v34, %v6897_v56  ;;  %v5909_v26 = vrot.slane %v5897_v44, %v6897_v56  ;;  %v5313_v30 = vld [vmem:[%s6781_s25 + $0x878] sm:$0xff]  ;;  %v7863_v5 = vld [vmem:[%s6775_s18 + $0x468] sm:$0xff]  ;;  %5841 = vmac.bf16.f32.vacc3 %v5316_v53, %v7819_v48 }
  0xf7   : > { %4656 = vmatpush1.bf16.msra.mxu0 %v4593_v6  ;;  %v7853_v6 = vld [vmem:[%s6775_s18 + $0x418] sm:$0xff]  ;;  %5865 = vmac.bf16.f32.vacc0 %v5313_v30, %v7816_v49  ;;  %v5421_v24 = vld [vmem:[%s6781_s25 + $0x968] sm:$0xff]  ;;  %5842 = vmac.bf16.f32.vacc3 %v5352_v23, %v7847_v35 }
  0xf8   : > { %v4595_v19 = vpack.c.bf16 %v5909_v26, %v5903_v38  ;;  %v5424_v21 = vld [vmem:[%s6781_s25 + $0x97c] sm:$0xff]  ;;  %5866 = vmac.bf16.f32.vacc0 %v5349_v54, %v7841_v33  ;;  %v7877_v44 = vld [vmem:[%s6775_s18 + $0x4cc] sm:$0xff]  ;;  %5843 = vmac.bf16.f32.vacc3 %v5388_v55, %v7857_v46 }
  0xf9   : > { %v7873_v34 = vld [vmem:[%s6775_s18 + $0x4b8] sm:$0xff]  ;;  %v5460_v26 = vld [vmem:[%s6781_s25 + $0x9cc] sm:$0xff]  ;;  %5867 = vmac.bf16.f32.vacc0 %v5385_v52, %v7853_v6  ;;  %5844 = vmac.bf16.f32.vacc3 %v5424_v21, %v7867_v13 }
  0xfa   : > { %5497 = vmatpush3.bf16.msra.mxu1 %v4595_v19  ;;  %v5457_v38 = vld [vmem:[%s6781_s25 + $0x9b8] sm:$0xff]  ;;  %5868 = vmac.bf16.f32.vacc0 %v5421_v24, %v7863_v5  ;;  %5845 = vmac.bf16.f32.vacc3 %v5460_v26, %v7877_v44  ;;  %v7892_v52 = vld [vmem:[%s6775_s18 + $0x290] ss:$20 sps:$4 sm:$0xff]   ;;  %v7896_v24 = vld [vmem:[%s6775_s18 + $0x2e0] ss:$20 sps:$4 sm:$0xff]  }
  0xfb   : > { %5498 = vmatprep.subr.bf16.mxu1 %v8115_v3  ;;  %5869 = vmac.bf16.f32.vacc0 %v5457_v38, %v7873_v34  ;;  %v5206_v55 = vld [vmem:[%s6781_s25 + $0x790] ss:$20 sps:$4 sm:$0xff]   ;;  %v5242_v38 = vld [vmem:[%s6781_s25 + $0x7e0] ss:$20 sps:$4 sm:$0xff]  }
  0xfc   : > { %v7900_v26 = vld [vmem:[%s6775_s18 + $0x330] ss:$20 sps:$4 sm:$0xff]   ;;  %5814 = vmul.bf16.f32.vacc2 %v5206_v55, %v7892_v52  ;;  %v7924_v55 = vld [vmem:[%s6775_s18 + $0x4c0] ss:$20 sps:$4 sm:$0xff]  }
  0xfd   : > { %v5870_v14 = vmovacc.add.low.vacc0  ;;  %5815 = vmac.bf16.f32.vacc2 %v5242_v38, %v7896_v24  ;;  %v5199_v38 = vld [vmem:[%s6781_s25 + $0x530] sm:$0xff]  ;;  %v5202_v3 = vld [vmem:[%s6781_s25 + $0x544] sm:$0xff] }
  0xfe   : > { %v5871_v22 = vmovacc.add.high.vacc0  ;;  %5790 = vmul.bf16.f32.vacc1 %v5199_v38, %v7639_v20  ;;  %v5451_v20 = vld [vmem:[%s6781_s25 + $0x760] sm:$0xff]  ;;  %v5452_v38 = vld [vmem:[%s6781_s25 + $0x768] ss:$20 sps:$4 sm:$0xff]  }
 0x100   : > { %v5872_v50 = vcombine.low %v5870_v14, %v5871_v22  ;;  %5766 = vmul.bf16.f32.vacc0 %v5202_v3, %v7645_v25 }
 0x161   : > { %v7793_v51 = vpop.f32.mrf.mxu0 }
 0x162   : > { %8164 = vst [vmem:[#allocation10_spill] sm:$0xff] %v7793_v51 }
 0x163   : > { %v7806_v61 = vpop.f32.mrf.mxu0 }
 0x164   : > { %8166 = vst [vmem:[#allocation12_spill] sm:$0xff] %v7806_v61  ;;  %v5271_v61 = vld [vmem:[%s6781_s25 + $0x5d0] sm:$0xff] }
 0x165   : > { %v2410_v39 = vpop.f32.mrf.mxu0 }
 0x166   : > { %v5873_v39 = vcombine.high %v5870_v14, %v5871_v22  ;;  %v5278_v14 = vld [vmem:[%s6781_s25 + $0x830] ss:$20 sps:$4 sm:$0xff]   ;;  %v7904_v22 = vld [vmem:[%s6775_s18 + $0x380] ss:$20 sps:$4 sm:$0xff]  }
 0x167   : > { %v2411_v43 = vpop.f32.mrf.mxu0  ;;  %5816 = vmac.bf16.f32.vacc2 %v5278_v14, %v7900_v26  ;;  %v5238_v14 = vld [vmem:[%s6781_s25 + $0x594] sm:$0xff] }
 0x168   : > { %v5885_v19 = vrot.slane %v5873_v39, %v6897_v56  ;;  %v5846_v43 = vmovacc.add.low.vacc3  ;;  %v7908_v39 = vld [vmem:[%s6775_s18 + $0x3d0] ss:$20 sps:$4 sm:$0xff]   ;;  %5767 = vmac.bf16.f32.vacc0 %v5238_v14, %v7655_v4  ;;  %v5193_v14 = vld [vmem:[%s6781_s25 + $0x508] sm:$0xff] }
 0x169   : > { %8168 = vst [vmem:[#allocation14_spill] sm:$0xff] %v7908_v39 }
 0x16c   : > { %v7795_v42 = vpop.f32.mrf.mxu1 }
 0x16d   : > { %8165 = vst [vmem:[#allocation11_spill] sm:$0xff] %v7795_v42 }
 0x16e   : > { %v7808_v47 = vpop.f32.mrf.mxu1 }
 0x16f   : > { %8167 = vst [vmem:[#allocation13_spill] sm:$0xff] %v7808_v47  ;;  %v5235_v47 = vld [vmem:[%s6781_s25 + $0x580] sm:$0xff] }
 0x170   : > { %v2451_v58 = vpop.f32.mrf.mxu1  ;;  %5791 = vmac.bf16.f32.vacc1 %v5235_v47, %v7650_v15  ;;  %v5454_v15 = vld [vmem:[%s6781_s25 + $0x774] sm:$0xff] }
 0x171   : > { %v5879_v58 = vrot.slane %v5872_v50, %v6897_v56  ;;  %v5314_v50 = vld [vmem:[%s6781_s25 + $0x880] ss:$20 sps:$4 sm:$0xff]   ;;  %5792 = vmac.bf16.f32.vacc1 %v5271_v61, %v7660_v41  ;;  %v5272_v61 = vld [vmem:[%s6781_s25 + $0x5d8] ss:$20 sps:$4 sm:$0xff]  }
 0x172   : > { %v2452_v2 = vpop.f32.mrf.mxu1  ;;  %5817 = vmac.bf16.f32.vacc2 %v5314_v50, %v7904_v22 }
 0x173   : > { %v5847_v2 = vmovacc.add.high.vacc3 }
 0x175   : > { %v5848_v30 = vcombine.low %v5846_v43, %v5847_v2  ;;  %v5849_v53 = vcombine.high %v5846_v43, %v5847_v2  ;;  %v7914_v43 = vld [vmem:[%s6775_s18 + $0x420] ss:$20 sps:$4 sm:$0xff]  }
 0x176   : > { %8169 = vst [vmem:[#allocation15_spill] sm:$0xff] %v7914_v43  ;;  %v5386_v2 = vld [vmem:[%s6781_s25 + $0x920] ss:$20 sps:$4 sm:$0xff]  }
 0x177   : > { %v5855_v54 = vrot.slane %v5848_v30, %v6897_v56  ;;  %v5861_v23 = vrot.slane %v5849_v53, %v6897_v56  ;;  %v7919_v30 = vld [vmem:[%s6775_s18 + $0x470] ss:$20 sps:$4 sm:$0xff]  }
 0x178   : > { %8170 = vst [vmem:[#allocation16_spill] sm:$0xff] %v7919_v30 }
 0x179   : > { %v4589_v21 = vpack.c.bf16 %v5861_v23, %v5885_v19  ;;  %v5350_v19 = vld [vmem:[%s6781_s25 + $0x8d0] ss:$20 sps:$4 sm:$0xff]   ;;  %v4588_v53 = vpack.c.bf16 %v5855_v54, %v5879_v58 }
 0x17a   : > { %v5422_v23 = vld [vmem:[%s6781_s25 + $0x970] ss:$20 sps:$4 sm:$0xff]   ;;  %5818 = vmac.bf16.f32.vacc2 %v5350_v19, %v7908_v39 }
 0x17b   : > { %4657 = vmatprep.subr.bf16.mxu0 %v4589_v21  ;;  %v5458_v21 = vld [vmem:[%s6781_s25 + $0x9c0] ss:$20 sps:$4 sm:$0xff]   ;;  %5819 = vmac.bf16.f32.vacc2 %v5386_v2, %v7914_v43  ;;  %v5274_v58 = vld [vmem:[%s6781_s25 + $0x5e4] sm:$0xff] }
 0x17c   : > { %4658 = vmatpush1.bf16.msra.mxu0 %v4588_v53  ;;  %5820 = vmac.bf16.f32.vacc2 %v5422_v23, %v7919_v30  ;;  %v5307_v54 = vld [vmem:[%s6781_s25 + $0x620] sm:$0xff]  ;;  %v5310_v43 = vld [vmem:[%s6781_s25 + $0x634] sm:$0xff]  ;;  %5768 = vmac.bf16.f32.vacc0 %v5274_v58, %v7663_v18 }
 0x17d   : > { %5821 = vmac.bf16.f32.vacc2 %v5458_v21, %v7924_v55  ;;  %v5343_v39 = vld [vmem:[%s6781_s25 + $0x670] sm:$0xff]  ;;  %v5346_v30 = vld [vmem:[%s6781_s25 + $0x684] sm:$0xff]  ;;  %5793 = vmac.bf16.f32.vacc1 %v5307_v54, %v7672_v0  ;;  %5769 = vmac.bf16.f32.vacc0 %v5310_v43, %v7676_v27  ;;  %v5196_v54 = vld [vmem:[%s6781_s25 + $0x51c] sm:$0xff] }
 0x17e   : > { %v5379_v21 = vld [vmem:[%s6781_s25 + $0x6c0] sm:$0xff]  ;;  %5794 = vmac.bf16.f32.vacc1 %v5343_v39, %v7685_v12  ;;  %5770 = vmac.bf16.f32.vacc0 %v5346_v30, %v7691_v59  ;;  %v5344_v39 = vld [vmem:[%s6781_s25 + $0x678] ss:$20 sps:$4 sm:$0xff]   ;;  %v5380_v43 = vld [vmem:[%s6781_s25 + $0x6c8] ss:$20 sps:$4 sm:$0xff]  }
 0x17f   : > { %v5822_v50 = vmovacc.add.low.vacc2  ;;  %5795 = vmac.bf16.f32.vacc1 %v5379_v21, %v7699_v60  ;;  %v5416_v30 = vld [vmem:[%s6781_s25 + $0x718] ss:$20 sps:$4 sm:$0xff]  }
 0x180   : > { %v5823_v53 = vmovacc.add.high.vacc2 }
 0x182   : > { %v5824_v19 = vcombine.low %v5822_v50, %v5823_v53  ;;  %v5825_v42 = vcombine.high %v5822_v50, %v5823_v53  ;;  %v5382_v50 = vld [vmem:[%s6781_s25 + $0x6d4] sm:$0xff]  ;;  %v8171_v53 = vmov 0.0   ;;  %5718 = vmul.bf16.f32.vacc2 %v5193_v14, %v7777_v31 }
 0x183   : > { %5771 = vmac.bf16.f32.vacc0 %v5382_v50, %v7703_v16  ;;  %v5445_v31 = vld [vmem:[%s6781_s25 + $0x738] sm:$0xff] }
 0x184   : > { %v5831_v51 = vrot.slane %v5824_v19, %v6897_v56  ;;  %v5837_v2 = vrot.slane %v5825_v42, %v6897_v56  ;;  %v5415_v42 = vld [vmem:[%s6781_s25 + $0x710] sm:$0xff]  ;;  %v5229_v19 = vld [vmem:[%s6781_s25 + $0x558] sm:$0xff] }
 0x185   : > { %5796 = vmac.bf16.f32.vacc1 %v5415_v42, %v7712_v32  ;;  %5719 = vmac.bf16.f32.vacc2 %v5229_v19, %v7786_v57  ;;  %v5448_v57 = vld [vmem:[%s6781_s25 + $0x74c] sm:$0xff] }
 0x186   : > { %v4590_v23 = vpack.c.bf16 %v5837_v2, %v5831_v51  ;;  %v5418_v51 = vld [vmem:[%s6781_s25 + $0x724] sm:$0xff]  ;;  %5797 = vmac.bf16.f32.vacc1 %v5451_v20, %v7722_v10  ;;  %v5268_v2 = vld [vmem:[%s6781_s25 + $0x5bc] sm:$0xff] }
 0x187   : > { %5772 = vmac.bf16.f32.vacc0 %v5418_v51, %v7715_v28  ;;  %v5200_v28 = vld [vmem:[%s6781_s25 + $0x538] ss:$20 sps:$4 sm:$0xff]   ;;  %v5236_v10 = vld [vmem:[%s6781_s25 + $0x588] ss:$20 sps:$4 sm:$0xff]  }
 0x188   : > { %5499 = vmatpush3.bf16.msra.mxu1 %v4590_v23  ;;  %v5798_v3 = vmovacc.add.low.vacc1  ;;  %5773 = vmac.bf16.f32.vacc0 %v5454_v15, %v7725_v36  ;;  %v5308_v36 = vld [vmem:[%s6781_s25 + $0x628] ss:$20 sps:$4 sm:$0xff]   ;;  %5742 = vmul.bf16.f32.vacc3 %v5200_v28, %v7740_v9  ;;  %v5232_v9 = vld [vmem:[%s6781_s25 + $0x56c] sm:$0xff] }
 0x189   : > { %5500 = vmatprep.subr.bf16.mxu1 %v8171_v53  ;;  %v5799_v25 = vmovacc.add.high.vacc1  ;;  %5743 = vmac.bf16.f32.vacc3 %v5236_v10, %v7744_v29  ;;  %v5265_v29 = vld [vmem:[%s6781_s25 + $0x5a8] sm:$0xff] }
 0x18a   : > { %v5774_v27 = vmovacc.add.low.vacc0  ;;  %5744 = vmac.bf16.f32.vacc3 %v5272_v61, %v7748_v40  ;;  %v5301_v40 = vld [vmem:[%s6781_s25 + $0x5f8] sm:$0xff]  ;;  %v5304_v23 = vld [vmem:[%s6781_s25 + $0x60c] sm:$0xff]  ;;  %5720 = vmac.bf16.f32.vacc2 %v5265_v29, %v7803_v11 }
 0x18b   : > { %v5800_v4 = vcombine.low %v5798_v3, %v5799_v25  ;;  %v5801_v41 = vcombine.high %v5798_v3, %v5799_v25  ;;  %v5775_v12 = vmovacc.add.high.vacc0  ;;  %5745 = vmac.bf16.f32.vacc3 %v5308_v36, %v7752_v62  ;;  %v5337_v51 = vld [vmem:[%s6781_s25 + $0x648] sm:$0xff]  ;;  %v5412_v25 = vld [vmem:[%s6781_s25 + $0x6fc] sm:$0xff]  ;;  %v8175_v61 = vld [vmem:[#allocation11_spill] sm:$0xff] }
 0x18c   : > { %5746 = vmac.bf16.f32.vacc3 %v5344_v39, %v7756_v45  ;;  %5694 = vmul.bf16.f32.vacc1 %v5196_v54, %v7780_v63  ;;  %v5376_v15 = vld [vmem:[%s6781_s25 + $0x6ac] sm:$0xff]  ;;  %5721 = vmac.bf16.f32.vacc2 %v5301_v40, %v7816_v49  ;;  %v8176_v36 = vld [vmem:[#allocation12_spill] sm:$0xff]  ;;  %v2366_v40 = vld [vmem:[%s7824_s8 + $0x20] sm:$0x3f] }
 0x18d   : > { %v5807_v18 = vrot.slane %v5800_v4, %v6897_v56  ;;  %v5813_v0 = vrot.slane %v5801_v41, %v6897_v56  ;;  %v5776_v59 = vcombine.low %v5774_v27, %v5775_v12  ;;  %v5777_v60 = vcombine.high %v5774_v27, %v5775_v12  ;;  %v5409_v3 = vld [vmem:[%s6781_s25 + $0x6e8] sm:$0xff]  ;;  %v5266_v41 = vld [vmem:[%s6781_s25 + $0x5b0] ss:$20 sps:$4 sm:$0xff]   ;;  %v5446_v12 = vld [vmem:[%s6781_s25 + $0x740] ss:$20 sps:$4 sm:$0xff]  }
 0x18e   : > { %5747 = vmac.bf16.f32.vacc3 %v5380_v43, %v7762_v7  ;;  %5695 = vmac.bf16.f32.vacc1 %v5232_v9, %v7790_v8  ;;  %5722 = vmac.bf16.f32.vacc2 %v5337_v51, %v7841_v33  ;;  %v5410_v27 = vld [vmem:[%s6781_s25 + $0x6f0] ss:$20 sps:$4 sm:$0xff]   ;;  %v2363_v28 = vld [vmem:[%s7824_s8 + $0x8] sm:$0x3f] }
 0x18f   : > { %v5783_v16 = vrot.slane %v5776_v59, %v6897_v56  ;;  %v5789_v32 = vrot.slane %v5777_v60, %v6897_v56  ;;  %5748 = vmac.bf16.f32.vacc3 %v5416_v30, %v7767_v17  ;;  %v5340_v17 = vld [vmem:[%s6781_s25 + $0x65c] sm:$0xff]  ;;  %5696 = vmac.bf16.f32.vacc1 %v5268_v2, %v7811_v1  ;;  %v2364_v60 = vld [vmem:[%s7824_s8 + $0x10] sm:$0x3f]  ;;  %v8174_v10 = vld [vmem:[#allocation10_spill] sm:$0xff] }
 0x190   : > { %5749 = vmac.bf16.f32.vacc3 %v5452_v38, %v7772_v37  ;;  %v5373_v37 = vld [vmem:[%s6781_s25 + $0x698] sm:$0xff]  ;;  %5697 = vmac.bf16.f32.vacc1 %v5304_v23, %v7819_v48  ;;  %v2362_v59 = vld [vmem:[%s7824_s8] sm:$0x3f]  ;;  %v2495_v39 = vadd.f32 %v8176_v36, %v2363_v28 }
 0x191   : > { %v4584_v47 = vpack.c.bf16 %v5789_v32, %v5813_v0  ;;  %v4583_v58 = vpack.c.bf16 %v5783_v16, %v5807_v18  ;;  %5698 = vmac.bf16.f32.vacc1 %v5340_v17, %v7847_v35  ;;  %5723 = vmac.bf16.f32.vacc2 %v5373_v37, %v7853_v6  ;;  %v5338_v18 = vld [vmem:[%s6781_s25 + $0x650] ss:$20 sps:$4 sm:$0xff]   ;;  %v5374_v0 = vld [vmem:[%s6781_s25 + $0x6a0] ss:$20 sps:$4 sm:$0xff]   ;;  %v8172_v32 = vld [vmem:[#allocation14_spill] sm:$0xff] }
 0x192   : > { %v5750_v62 = vmovacc.add.low.vacc3  ;;  %5699 = vmac.bf16.f32.vacc1 %v5376_v15, %v7857_v46  ;;  %5724 = vmac.bf16.f32.vacc2 %v5409_v3, %v7863_v5  ;;  %v8177_v43 = vld [vmem:[#allocation13_spill] sm:$0xff]  ;;  %v8178_v30 = vld [vmem:[#allocation16_spill] sm:$0xff]  ;;  %2500 = vst [vmem:[%s7824_s8 + $0x8] sm:$0x3f] %v2495_v39 }
 0x193   : > { %4659 = vmatprep.subr.bf16.mxu0 %v4584_v47  ;;  %v5751_v21 = vmovacc.add.high.vacc3  ;;  %5700 = vmac.bf16.f32.vacc1 %v5412_v25, %v7867_v13  ;;  %5725 = vmac.bf16.f32.vacc2 %v5445_v31, %v7873_v34  ;;  %v5194_v34 = vld [vmem:[%s6781_s25 + $0x510] ss:$20 sps:$4 sm:$0xff]   ;;  %v2496_v47 = vadd.f32 %v8175_v61, %v2364_v60 }
 0x194   : > { %4660 = vmatpush1.bf16.msra.mxu0 %v4583_v58  ;;  %5701 = vmac.bf16.f32.vacc1 %v5448_v57, %v7877_v44  ;;  %v5302_v44 = vld [vmem:[%s6781_s25 + $0x600] ss:$20 sps:$4 sm:$0xff]   ;;  %5670 = vmul.bf16.f32.vacc0 %v5194_v34, %v7892_v52  ;;  %v2365_v52 = vld [vmem:[%s7824_s8 + $0x18] sm:$0x3f]  ;;  %v5581_v38 = vld [vmem:[%s8092_s2 + $0x4] sm:$0x7] }
 0x195   : > { %v5752_v45 = vcombine.low %v5750_v62, %v5751_v21  ;;  %v5753_v50 = vcombine.high %v5750_v62, %v5751_v21  ;;  %v5726_v63 = vmovacc.add.low.vacc2  ;;  %2501 = vst [vmem:[%s7824_s8 + $0x10] sm:$0x3f] %v2496_v47 }
 0x196   : > { %v5727_v8 = vmovacc.add.high.vacc2  ;;  %v5702_v33 = vmovacc.add.low.vacc1 }
 0x197   : > { %v5759_v42 = vrot.slane %v5752_v45, %v6897_v56  ;;  %v5765_v7 = vrot.slane %v5753_v50, %v6897_v56  ;;  %v5703_v35 = vmovacc.add.high.vacc1 }
 0x198   : > { %v5728_v11 = vcombine.low %v5726_v63, %v5727_v8  ;;  %v5729_v1 = vcombine.high %v5726_v63, %v5727_v8 }
 0x199   : > { %v4585_v20 = vpack.c.bf16 %v5765_v7, %v5759_v42  ;;  %v5704_v6 = vcombine.low %v5702_v33, %v5703_v35  ;;  %v5705_v46 = vcombine.high %v5702_v33, %v5703_v35 }
 0x19a   : > { %v5735_v49 = vrot.slane %v5728_v11, %v6897_v56  ;;  %v5741_v48 = vrot.slane %v5729_v1, %v6897_v56 }
 0x19b   : > { %5501 = vmatpush3.bf16.msra.mxu1 %v4585_v20  ;;  %v5711_v5 = vrot.slane %v5704_v6, %v6897_v56  ;;  %v5717_v13 = vrot.slane %v5705_v46, %v6897_v56 }
 0x19c   : > { %5502 = vmatprep.subr.bf16.mxu1 %v8171_v53  ;;  %v5230_v53 = vld [vmem:[%s6781_s25 + $0x560] ss:$20 sps:$4 sm:$0xff]  }
 0x19d   : > { %v4579_v4 = vpack.c.bf16 %v5717_v13, %v5741_v48  ;;  %5671 = vmac.bf16.f32.vacc0 %v5230_v53, %v7896_v24  ;;  %v4578_v16 = vpack.c.bf16 %v5711_v5, %v5735_v49  ;;  %v8173_v24 = vld [vmem:[#allocation15_spill] sm:$0xff] }
 0x19e   : > { %5672 = vmac.bf16.f32.vacc0 %v5266_v41, %v7900_v26  ;;  %v2494_v26 = vadd.f32 %v8174_v10, %v2362_v59  ;;  %v4598_v15 = vld [vmem:[%s7824_s8 + $0x10] sm:$0x3f] }
 0x19f   : > { %4661 = vmatprep.subr.bf16.mxu0 %v4579_v4  ;;  %5673 = vmac.bf16.f32.vacc0 %v5302_v44, %v7904_v22  ;;  %v2497_v22 = vadd.f32 %v8177_v43, %v2365_v52 }
 0x1a0   : > { %5674 = vmac.bf16.f32.vacc0 %v5338_v18, %v8172_v32  ;;  %4662 = vmatpush1.bf16.msra.mxu0 %v4578_v16  ;;  %2499 = vst [vmem:[%s7824_s8] sm:$0x3f] %v2494_v26 }
 0x1a1   : > { %5675 = vmac.bf16.f32.vacc0 %v5374_v0, %v8173_v24  ;;  %2502 = vst [vmem:[%s7824_s8 + $0x18] sm:$0x3f] %v2497_v22 }
 0x1a2   : > { %5676 = vmac.bf16.f32.vacc0 %v5410_v27, %v8178_v30 }
 0x1a3   : > { %5470 = vmatmul.mubr.msk.bf16.vlgmr.msra.gmra.mxu0 %vm2368_vm0, %v5581_v38  ;;  %5677 = vmac.bf16.f32.vacc0 %v5446_v12, %v7924_v55 }
 0x1a5   : > { %v5678_v14 = vmovacc.add.low.vacc0 }
 0x1a6   : > { %v5679_v58 = vmovacc.add.high.vacc0 }
 0x1a7   : > { %v4596_v50 = vld [vmem:[%s7824_s8] sm:$0x3f] }
 0x1a8   : > { %v5680_v54 = vcombine.low %v5678_v14, %v5679_v58  ;;  %v5681_v19 = vcombine.high %v5678_v14, %v5679_v58  ;;  %v4599_v31 = vld [vmem:[%s7824_s8 + $0x18] sm:$0x3f] }
 0x1aa   : > { %v5687_v9 = vrot.slane %v5680_v54, %v6897_v56  ;;  %v5693_v29 = vrot.slane %v5681_v19, %v6897_v56  ;;  %v4597_v56 = vld [vmem:[%s7824_s8 + $0x8] sm:$0x3f] }
 0x1ab   : > { %v4640_v42 = vpop.f32.mrf.mxu1 }
 0x1ac   : > { %v4580_v2 = vpack.c.bf16 %v5693_v29, %v5687_v9  ;;  %v4728_v7 = vadd.f32 %v4640_v42, %v4596_v50 }
 0x1ad   : > { %v2488_v23 = vpop.f32.mrf.mxu0  ;;  %v4642_v51 = vpop.f32.mrf.mxu1 }
 0x1ae   : > { %5503 = vmatpush3.bf16.msra.mxu1 %v4580_v2  ;;  %v2498_v55 = vadd.f32 %v2488_v23, %v2366_v40  ;;  %4733 = vst [vmem:[%s7824_s8] sm:$0x3f] %v4728_v7  ;;  %v4729_v17 = vadd.f32 %v4642_v51, %v4597_v56 }
 0x1af   : > { %v5494_v62 = vpop.f32.mrf.mxu0  ;;  %v4644_v20 = vpop.f32.mrf.mxu1 }
 0x1b0   : > { %2503 = vst [vmem:[%s7824_s8 + $0x20] sm:$0x3f] %v2498_v55  ;;  %4734 = vst [vmem:[%s7824_s8 + $0x8] sm:$0x3f] %v4729_v17 }
 0x1b1   : > { %5505 = vmatmul.mubr.msk.bf16.vlgmr.msra.gmra.mxu1 %vm2368_vm0, %v5581_v38  ;;  %v2491_v21 = vpop.f32.mrf.mxu0  ;;  %v4645_v37 = vpop.f32.mrf.mxu1 }
 0x1b3   : > { %v5495_v45 = vpop.f32.mrf.mxu0 }
 0x1b7   : > { %v4600_v1 = vld [vmem:[%s7824_s8 + $0x20] sm:$0x3f] }
 0x263   : > { %v4681_v3 = vpop.f32.mrf.mxu0 }
 0x264   : > { %v4730_v25 = vadd.f32 %v4681_v3, %v4598_v15 }
 0x265   : > { %v4683_v57 = vpop.f32.mrf.mxu0 }
 0x266   : > { %4735 = vst [vmem:[%s7824_s8 + $0x10] sm:$0x3f] %v4730_v25  ;;  %v4731_v63 = vadd.f32 %v4683_v57, %v4599_v31 }
 0x267   : > { %v4685_v8 = vpop.f32.mrf.mxu0 }
 0x268   : > { %4736 = vst [vmem:[%s7824_s8 + $0x18] sm:$0x3f] %v4731_v63 }
 0x269   : > { %v4686_v11 = vpop.f32.mrf.mxu0 }
 0x271   : > { %v4722_v49 = vpop.f32.mrf.mxu1 }
 0x272   : > { %v4732_v48 = vadd.f32 %v4722_v49, %v4600_v1 }
 0x273   : > { %v5506_v33 = vpop.f32.mrf.mxu1 }
 0x274   : > { %4737 = vst [vmem:[%s7824_s8 + $0x20] sm:$0x3f] %v4732_v48 }
 0x275   : > { %v4725_v35 = vpop.f32.mrf.mxu1 }
 0x277   : > { %v5507_v6 = vpop.f32.mrf.mxu1 }
 0x278 PF: > { %s19_s17 = sadd.s32 1, %s6652_s17   ;;  %s8179_s12 = smov %s6636_s13 }
 0x279   : > { %p16_p9 = scmp.ge.s32.totalorder %s19_s17, 4   ;;  %s8180_s13 = smov %s6640_s14 }
 0x27a   : > { %s8181_s14 = smov %s6727_s23  ;;  %s8182_s15 = smov %s6648_s16 }
 0x27b   : > { %s8183_s16 = smov %s8185_s19  ;;  %18 = sbr.rel (!%p16_p9) target bundleno = 6 (0x6), region = 134 }
 0x280   :  { %4768 = vsyncpa [#allocation4], 1 }
 0x281   :  { %4770 = vsyncpa [#allocation4 + $0x1], 1 }
 0x282   :  { %4771 = vsyncpa [#allocation6], 1 }
 0x283   :  { %4773 = vsyncpa [#allocation6 + $0x1], 1 }

// kernel: tpu_custom_call.1
= control target key start
LH: loop header
LB: loop body
LE: loop exit
PB: predicated region body
PF: predicated region fallthrough
CT: control target
= control target key end

     0   :  { %8 = vsyncpa [#allocation4], 0  ;;  %s8090_s0 = inlined_call_operand.hbm [shape: bf16[2,512,640], index: 0, kind: input, shape index: {}]   ;;  %s8091_s1 = inlined_call_operand.hbm [shape: bf16[2,1024,640], index: 1, kind: input, shape index: {}]   ;;  %s8092_s2 = inlined_call_operand.vmem [shape: bf16[2,6,64], index: 2, kind: input, shape index: {}]   ;;  %s8093_s3 = inlined_call_operand.vmem [shape: f32[2,6,640], index: 3, kind: output, shape index: {}]  }
   0x1   :  { %10 = vsyncpa [#allocation4 + $0x1], 0 }
   0x2   :  { %11 = vsyncpa [#allocation6], 0 }
   0x3   :  { %13 = vsyncpa [#allocation6 + $0x1], 0  ;;  %s6682_s12 = smov 0   ;;  %s6684_s13 = smov 0  }
   0x4   :  { %s6686_s14 = smov 0   ;;  %s6688_s15 = smov 0  }
   0x5   :  { %s6690_s16 = smov 0   ;;  %s6692_s17 = smov 0  }
   0x6 LB: > { %s4905_s18 = sadd.s32 4294967295, %s6652_s17   ;;  %s31_s19 = sadd.s32 1, %s6648_s16  ;;  %s6652_s17 = sphi %s6692_s17, %s19_s17   ;;  %s6648_s16 = sphi %s6690_s16, %s8183_s16   ;;  %s6644_s15 = sphi %s6688_s15, %s8182_s15   ;;  %s6640_s14 = sphi %s6686_s14, %s8181_s14   ;;  %s6636_s13 = sphi %s6684_s13, %s8180_s13   ;;  %s6632_s12 = sphi %s6682_s12, %s8179_s12  }
   0x7   : > { %p33_p0 = scmp.ge.s32.totalorder %s31_s19, 2  ;;  %s40_s20 = sadd.s32 1, %s6640_s14 }
   0x8   : > { %p47_p1 = scmp.ne.s32.totalorder %s6640_s14, %s6636_s13  ;;  %p48_p2 = scmp.eq.s32.totalorder %s6652_s17, 0 }
   0x9   : > { %s8185_s19 = smov (%p33_p0, %s31_s19), 0  ;;  %p53_p4 = scmp.ne.s32.totalorder %s6636_s13, %s6632_s12 }
   0xa   : > { %p49_p3 = por %p48_p2, %p47_p1  ;;  %s35_s21 = ssub.s32 %s6648_s16, %s8185_s19 }
   0xb   : > { %p54_p5 = scmp.eq.s32.totalorder %s4905_s18, 0  ;;  %p38_p6 = scmp.eq.s32.totalorder %s35_s21, 0 }
   0xc   : > { %p5526_p8 = scmp.lt.s32.totalorder %s6652_s17, 2  ;;  %s6730_s24 = sand.u32 1, %s6640_s14  }
   0xd   : > { %p6721_p7 = por %p54_p5, %p53_p4  ;;  %s5509_s25 = smul.u32 20480, %s6648_s16 }
   0xe   : > { %s6727_s23 = scalar_select %p38_p6, %s6640_s14, %s40_s20  }
   0xf   : > { %s5508_s26 = smul.u32 1280, %s6730_s24  ;;  %s169_s29 = scalar_lea.hbm %s8090_s0, %s5509_s25 }
  0x10   : > { %p6737_p9 = pnand %p5526_p8, %p49_p3  ;;  %s158_s6 = scalar_lea.sflag [#allocation4], %s6730_s24 }
  0x11   : > { %s161_s4 = scalar_lea.vmem [#allocation3], %s5508_s26  ;;  %s6654_s8 = smov [#allocation3]  }
  0x12   : > { %s170_s5 = sshll.u32 %s161_s4, 4  ;;  %p5584_p10 = pneg %p6737_p9  ;;  %s171_s5 = int_to_ptr.vmem [resolvable:$true] %s170_s5 }
  0x13   : > { %s5595_s7 = scalar_lea.vmem %s171_s5, 20480  ;;  %s5600_s9 = sshll.u32 %s6654_s8, 4  ;;  %s5601_s9 = int_to_ptr.vmem [resolvable:$false] %s5600_s9 }
  0x14   : > { %p5596_p11 = scmp.ne.s32.totalorder %s171_s5, %s5595_s7  ;;  %s5602_s10 = scalar_lea.vmem %s5601_s9, 40960 }
  0x15   : > { %p5603_p0 = scmp.lt.s32.totalorder %s171_s5, %s5601_s9  ;;  %p5604_p1 = scmp.lt.s32.totalorder %s5602_s10, %s5595_s7 }
  0x16   : > { %p5598_p12 = pnand %p5596_p11, %p5584_p10 }
  0x17   : > { %p5605_p2 = por %p5604_p1, %p5603_p0 }
  0x18   : > { %p5599_p13 = pneg %p5598_p12 }
  0x1a   : > { %p5606_p3 = pnand %p5605_p2, %p5599_p13 }
  0x1c   : > { %5609 = shalt.err (!%p5606_p3)
}
  0x1d   : > { %s6655_s11 = smov 320   ;;  %s6656_s12 = smov 20  }
  0x1e   : > { %5522 = dma.hbm_to_vmem [thread:$0]  (!%p6737_p9), %s169_s29, 20480, %s171_s5, %s158_s6, %s6655_s11, %s6655_s11, %s6656_s12  }
  0x1f   : > { %p4911_p4 = scmp.ge.s32.totalorder %s6652_s17, 1  ;;  %p201_p5 = scmp.lt.s32.totalorder %s6652_s17, 3 }
  0x20   : > { %s5510_s18 = smul.u32 2560, %s6730_s24  ;;  %s181_s7 = scalar_lea.sflag [#allocation6], %s6730_s24 }
  0x21   : > { %p6755_p6 = pnand %p4911_p4, %p201_p5  ;;  %s5511_s21 = smul.u32 40960, %s6648_s16 }
  0x22   : > { %s184_s28 = scalar_lea.vmem [#allocation5], %s5510_s18  ;;  %s6657_s29 = smov [#allocation5]  }
  0x23   : > { %s192_s27 = scalar_lea.hbm %s8091_s1, %s5511_s21  ;;  %s193_s4 = sshll.u32 %s184_s28, 4  ;;  %s194_s4 = int_to_ptr.vmem [resolvable:$true] %s193_s4 }
  0x24   : > { %s5623_s8 = scalar_lea.vmem %s194_s4, 40960  ;;  %s5628_s5 = sshll.u32 %s6657_s29, 4  ;;  %s5629_s5 = int_to_ptr.vmem [resolvable:$false] %s5628_s5 }
  0x25   : > { %p5624_p8 = scmp.ne.s32.totalorder %s194_s4, %s5623_s8  ;;  %s5630_s6 = scalar_lea.vmem %s5629_s5, 81920 }
  0x26   : > { %p5631_p13 = scmp.lt.s32.totalorder %s194_s4, %s5629_s5  ;;  %p5632_p0 = scmp.lt.s32.totalorder %s5630_s6, %s5623_s8 }
  0x27   : > { %p5626_p11 = pnand %p5624_p8, %p5584_p10 }
  0x28   : > { %p5633_p1 = por %p5632_p0, %p5631_p13 }
  0x29   : > { %p5627_p12 = pneg %p5626_p11 }
  0x2b   : > { %p5634_p2 = pnand %p5633_p1, %p5627_p12 }
  0x2d   : > { %5637 = shalt.err (!%p5634_p2)
}
  0x2e   : > { %5525 = dma.hbm_to_vmem [thread:$0]  (!%p6737_p9), %s192_s27, 40960, %s194_s4, %s181_s7, %s6655_s11, %s6655_s11, %s6656_s12  }
  0x2f   : > { %205 = sbr.rel (%p6755_p6) target bundleno = 632 (0x278), region = 32 }
  0x34   : > { %s207_s24 = sand.u32 1, %s6636_s13  }
  0x35   : > { %s5512_s9 = smul.u32 1280, %s207_s24  ;;  %s208_s10 = scalar_lea.sflag [#allocation4], %s207_s24 }
  0x37   : > { %s6775_s18 = scalar_lea.vmem [#allocation3], %s5512_s9 }
  0x38   : > { %5663 = dma.done.wait (%p6721_p7), %s208_s10, 20480  }
  0x39   : > { %5665 = vsyncadd (%p6721_p7), %s208_s10, 4294946816  ;;  %s5513_s30 = smul.u32 2560, %s207_s24  ;;  %s217_s21 = scalar_lea.sflag [#allocation6], %s207_s24 }
  0x3b   : > { %s6781_s25 = scalar_lea.vmem [#allocation5], %s5513_s30 }
  0x3c   : > { %5667 = dma.done.wait (%p6721_p7), %s217_s21, 40960  }
  0x3d   : > { %5669 = vsyncadd (%p6721_p7), %s217_s21, 4294926336  ;;  %v6788_v0 = vld [vmem:[%s6775_s18 + $0x28] sm:$0xff]  ;;  %v6791_v1 = vld [vmem:[%s6775_s18 + $0x3c] sm:$0xff]  ;;  %v6658_v51 = vmov 1935823168   ;;  %v6620_v54 = vlaneseq  ;;  %vm2368_vm0 = vcmask 523264  }
  0x3e   : > { %v4919_v2 = vld [vmem:[%s6781_s25 + $0x2a8] sm:$0xff]  ;;  %v4922_v3 = vld [vmem:[%s6781_s25 + $0x2bc] sm:$0xff]  ;;  %v6860_v32 = vld [vmem:[%s6775_s18 + $0x30] sm:$0xff]  ;;  %v6618_v52 = vunpack.c.l.s4 %v6658_v51  ;;  %vm6661_vm1 = vmmov 0   ;;  %p255_p7 = scmp.lt.s32.totalorder %s6644_s15, 1 }
  0x3f   : > { %v6796_v4 = vld [vmem:[%s6775_s18 + $0x78] sm:$0xff]  ;;  %v6799_v5 = vld [vmem:[%s6775_s18 + $0x8c] sm:$0xff]  ;;  %6606 = vmul.bf16.f32.vacc3 %v4919_v2, %v6788_v0  ;;  %6582 = vmul.bf16.f32.vacc0 %v4922_v3, %v6791_v1  ;;  %v6863_v33 = vld [vmem:[%s6775_s18 + $0x44] sm:$0xff]  ;;  %v6621_v55 = vshrl.u32 %v6620_v54, 7 }
  0x40   : > { %v4955_v6 = vld [vmem:[%s6781_s25 + $0x2f8] sm:$0xff]  ;;  %v4958_v7 = vld [vmem:[%s6781_s25 + $0x30c] sm:$0xff]  ;;  %v4923_v35 = vld [vmem:[%s6781_s25 + $0x2c4] sm:$0xff]  ;;  %v6619_v53 = vunpack.c.0.s8 %v6618_v52  ;;  %s8187_s15 = smov (!%p255_p7, %s6644_s15), 1 }
  0x41   : > { %v6804_v8 = vld [vmem:[%s6775_s18 + $0xc8] sm:$0xff]  ;;  %v6807_v9 = vld [vmem:[%s6775_s18 + $0xdc] sm:$0xff]  ;;  %6607 = vmac.bf16.f32.vacc3 %v4955_v6, %v6796_v4  ;;  %6583 = vmac.bf16.f32.vacc0 %v4958_v7, %v6799_v5  ;;  %v4920_v34 = vld [vmem:[%s6781_s25 + $0x2b0] sm:$0xff]  ;;  %6534 = vmul.bf16.f32.vacc1 %v4923_v35, %v6863_v33  ;;  %s5514_s28 = smul.u32 40, %s8187_s15 }
  0x42   : > { %v4991_v10 = vld [vmem:[%s6781_s25 + $0x348] sm:$0xff]  ;;  %v4994_v11 = vld [vmem:[%s6781_s25 + $0x35c] sm:$0xff]  ;;  %v6873_v37 = vld [vmem:[%s6775_s18 + $0x94] sm:$0xff]  ;;  %v6897_v56 = vsub.s32 %v6619_v53, %v6621_v55 }
  0x43   : > { %v6812_v12 = vld [vmem:[%s6775_s18 + $0x118] sm:$0xff]  ;;  %v6815_v13 = vld [vmem:[%s6775_s18 + $0x12c] sm:$0xff]  ;;  %6608 = vmac.bf16.f32.vacc3 %v4991_v10, %v6804_v8  ;;  %6584 = vmac.bf16.f32.vacc0 %v4994_v11, %v6807_v9  ;;  %v6870_v36 = vld [vmem:[%s6775_s18 + $0x80] sm:$0xff]  ;;  %s7824_s8 = scalar_lea.vmem %s8093_s3, %s5514_s28 }
  0x44   : > { %v5027_v14 = vld [vmem:[%s6781_s25 + $0x398] sm:$0xff]  ;;  %v5030_v15 = vld [vmem:[%s6781_s25 + $0x3ac] sm:$0xff]  ;;  %v4956_v38 = vld [vmem:[%s6781_s25 + $0x300] sm:$0xff] }
  0x45   : > { %v6820_v16 = vld [vmem:[%s6775_s18 + $0x168] sm:$0xff]  ;;  %v6823_v17 = vld [vmem:[%s6775_s18 + $0x17c] sm:$0xff]  ;;  %6609 = vmac.bf16.f32.vacc3 %v5027_v14, %v6812_v12  ;;  %6585 = vmac.bf16.f32.vacc0 %v5030_v15, %v6815_v13  ;;  %v4959_v39 = vld [vmem:[%s6781_s25 + $0x314] sm:$0xff] }
  0x46   : > { %v5063_v18 = vld [vmem:[%s6781_s25 + $0x3e8] sm:$0xff]  ;;  %v5066_v19 = vld [vmem:[%s6781_s25 + $0x3fc] sm:$0xff]  ;;  %v6880_v40 = vld [vmem:[%s6775_s18 + $0xd0] sm:$0xff]  ;;  %6535 = vmac.bf16.f32.vacc1 %v4959_v39, %v6873_v37 }
  0x47   : > { %v6828_v20 = vld [vmem:[%s6775_s18 + $0x1b8] sm:$0xff]  ;;  %v6835_v21 = vld [vmem:[%s6775_s18 + $0x1cc] sm:$0xff]  ;;  %6610 = vmac.bf16.f32.vacc3 %v5063_v18, %v6820_v16  ;;  %6586 = vmac.bf16.f32.vacc0 %v5066_v19, %v6823_v17  ;;  %v6883_v41 = vld [vmem:[%s6775_s18 + $0xe4] sm:$0xff] }
  0x48   : > { %v5099_v22 = vld [vmem:[%s6781_s25 + $0x438] sm:$0xff]  ;;  %v5102_v23 = vld [vmem:[%s6781_s25 + $0x44c] sm:$0xff]  ;;  %v4995_v43 = vld [vmem:[%s6781_s25 + $0x364] sm:$0xff] }
  0x49   : > { %v6840_v24 = vld [vmem:[%s6775_s18 + $0x208] sm:$0xff]  ;;  %v6843_v25 = vld [vmem:[%s6775_s18 + $0x21c] sm:$0xff]  ;;  %6611 = vmac.bf16.f32.vacc3 %v5099_v22, %v6828_v20  ;;  %6587 = vmac.bf16.f32.vacc0 %v5102_v23, %v6835_v21  ;;  %v4992_v42 = vld [vmem:[%s6781_s25 + $0x350] sm:$0xff]  ;;  %6536 = vmac.bf16.f32.vacc1 %v4995_v43, %v6883_v41 }
  0x4a   : > { %v5135_v26 = vld [vmem:[%s6781_s25 + $0x488] sm:$0xff]  ;;  %v5138_v27 = vld [vmem:[%s6781_s25 + $0x49c] sm:$0xff]  ;;  %v6893_v45 = vld [vmem:[%s6775_s18 + $0x134] sm:$0xff] }
  0x4b   : > { %v6850_v28 = vld [vmem:[%s6775_s18 + $0x258] sm:$0xff]  ;;  %v6853_v29 = vld [vmem:[%s6775_s18 + $0x26c] sm:$0xff]  ;;  %6612 = vmac.bf16.f32.vacc3 %v5135_v26, %v6840_v24  ;;  %6588 = vmac.bf16.f32.vacc0 %v5138_v27, %v6843_v25  ;;  %v6890_v44 = vld [vmem:[%s6775_s18 + $0x120] sm:$0xff] }
  0x4c   : > { %v5171_v30 = vld [vmem:[%s6781_s25 + $0x4d8] sm:$0xff]  ;;  %v5174_v31 = vld [vmem:[%s6781_s25 + $0x4ec] sm:$0xff]  ;;  %v5028_v46 = vld [vmem:[%s6781_s25 + $0x3a0] sm:$0xff] }
  0x4d   : > { %6613 = vmac.bf16.f32.vacc3 %v5171_v30, %v6850_v28  ;;  %6589 = vmac.bf16.f32.vacc0 %v5174_v31, %v6853_v29  ;;  %v5031_v3 = vld [vmem:[%s6781_s25 + $0x3b4] sm:$0xff]  ;;  %v6909_v7 = vld [vmem:[%s6775_s18 + $0x184] sm:$0xff] }
  0x4e   : > { %v6906_v6 = vld [vmem:[%s6775_s18 + $0x170] sm:$0xff]  ;;  %v5067_v14 = vld [vmem:[%s6781_s25 + $0x404] sm:$0xff]  ;;  %6537 = vmac.bf16.f32.vacc1 %v5031_v3, %v6893_v45 }
  0x4f   : > { %v6614_v47 = vmovacc.add.low.vacc3  ;;  %v6590_v59 = vmovacc.add.low.vacc0  ;;  %v5064_v11 = vld [vmem:[%s6781_s25 + $0x3f0] sm:$0xff]  ;;  %v6918_v15 = vld [vmem:[%s6775_s18 + $0x1c0] sm:$0xff]  ;;  %6538 = vmac.bf16.f32.vacc1 %v5067_v14, %v6909_v7 }
  0x50   : > { %v6615_v48 = vmovacc.add.high.vacc3  ;;  %v6591_v60 = vmovacc.add.high.vacc0  ;;  %v6921_v18 = vld [vmem:[%s6775_s18 + $0x1d4] sm:$0xff]  ;;  %v5100_v19 = vld [vmem:[%s6781_s25 + $0x440] sm:$0xff] }
  0x51   : > { %v5103_v22 = vld [vmem:[%s6781_s25 + $0x454] sm:$0xff]  ;;  %v6931_v26 = vld [vmem:[%s6775_s18 + $0x224] sm:$0xff] }
  0x52   : > { %v6616_v49 = vcombine.low %v6614_v47, %v6615_v48  ;;  %v6617_v50 = vcombine.high %v6614_v47, %v6615_v48  ;;  %v6592_v61 = vcombine.low %v6590_v59, %v6591_v60  ;;  %v6593_v62 = vcombine.high %v6590_v59, %v6591_v60  ;;  %v6928_v23 = vld [vmem:[%s6775_s18 + $0x210] sm:$0xff]  ;;  %v5139_v30 = vld [vmem:[%s6781_s25 + $0x4a4] sm:$0xff] }
  0x53   : > { %6558 = vmul.bf16.f32.vacc3 %v4920_v34, %v6860_v32  ;;  %v5136_v27 = vld [vmem:[%s6781_s25 + $0x490] sm:$0xff]  ;;  %v6937_v31 = vld [vmem:[%s6775_s18 + $0x260] sm:$0xff]  ;;  %6539 = vmac.bf16.f32.vacc1 %v5103_v22, %v6921_v18 }
  0x54   : > { %v6623_v57 = vrot.slane %v6616_v49, %v6897_v56  ;;  %v6629_v58 = vrot.slane %v6617_v50, %v6897_v56  ;;  %v6599_v63 = vrot.slane %v6592_v61, %v6897_v56  ;;  %v6605_v2 = vrot.slane %v6593_v62, %v6897_v56  ;;  %v6940_v34 = vld [vmem:[%s6775_s18 + $0x274] sm:$0xff]  ;;  %v5172_v35 = vld [vmem:[%s6781_s25 + $0x4e0] sm:$0xff] }
  0x55   : > { %6559 = vmac.bf16.f32.vacc3 %v4956_v38, %v6870_v36  ;;  %v5175_v38 = vld [vmem:[%s6781_s25 + $0x4f4] sm:$0xff]  ;;  %6540 = vmac.bf16.f32.vacc1 %v5139_v30, %v6931_v26  ;;  %v6958_v59 = vld [vmem:[%s6775_s18] sm:$0xff] }
  0x56   : > { %v2358_v10 = vpack.c.bf16 %v6605_v2, %v6629_v58  ;;  %6560 = vmac.bf16.f32.vacc3 %v4992_v42, %v6880_v40  ;;  %6541 = vmac.bf16.f32.vacc1 %v5175_v38, %v6940_v34  ;;  %v2357_v58 = vpack.c.bf16 %v6599_v63, %v6623_v57  ;;  %v6961_v60 = vld [vmem:[%s6775_s18 + $0x14] sm:$0xff]  ;;  %v4913_v61 = vld [vmem:[%s6781_s25 + $0x280] sm:$0xff] }
  0x57   : > { %6561 = vmac.bf16.f32.vacc3 %v5028_v46, %v6890_v44  ;;  %v4916_v62 = vld [vmem:[%s6781_s25 + $0x294] sm:$0xff]  ;;  %v6969_v3 = vld [vmem:[%s6775_s18 + $0x64] sm:$0xff]  ;;  %6510 = vmul.bf16.f32.vacc2 %v4913_v61, %v6958_v59 }
  0x58   : > { %2380 = vmatprep.subr.bf16.mxu0 %v2358_v10  ;;  %6562 = vmac.bf16.f32.vacc3 %v5064_v11, %v6906_v6  ;;  %v6542_v49 = vmovacc.add.low.vacc1  ;;  %v6966_v2 = vld [vmem:[%s6775_s18 + $0x50] sm:$0xff]  ;;  %v4952_v11 = vld [vmem:[%s6781_s25 + $0x2e4] sm:$0xff]  ;;  %6486 = vmul.bf16.f32.vacc0 %v4916_v62, %v6961_v60 }
  0x59   : > { %6563 = vmac.bf16.f32.vacc3 %v5100_v19, %v6918_v15  ;;  %v6543_v50 = vmovacc.add.high.vacc1  ;;  %2381 = vmatpush1.bf16.msra.mxu0 %v2357_v58  ;;  %v4949_v10 = vld [vmem:[%s6781_s25 + $0x2d0] sm:$0xff]  ;;  %v6974_v57 = vld [vmem:[%s6775_s18 + $0xa0] sm:$0xff]  ;;  %6487 = vmac.bf16.f32.vacc0 %v4952_v11, %v6969_v3 }
  0x5a   : > { %6564 = vmac.bf16.f32.vacc3 %v5136_v27, %v6928_v23  ;;  %8123 = vst [vmem:[#allocation9_spill] sm:$0xff] %v6974_v57  ;;  %v6977_v63 = vld [vmem:[%s6775_s18 + $0xb4] sm:$0xff]  ;;  %v4985_v14 = vld [vmem:[%s6781_s25 + $0x320] sm:$0xff]  ;;  %6511 = vmac.bf16.f32.vacc2 %v4949_v10, %v6966_v2  ;;  %v7032_v10 = vld [vmem:[%s6775_s18 + $0x8] sm:$0xff] }
  0x5b   : > { %6565 = vmac.bf16.f32.vacc3 %v5172_v35, %v6937_v31  ;;  %v6544_v51 = vcombine.low %v6542_v49, %v6543_v50  ;;  %v6545_v52 = vcombine.high %v6542_v49, %v6543_v50  ;;  %8124 = vst [vmem:[#allocation10_spill] sm:$0xff] %v6977_v63  ;;  %v4988_v19 = vld [vmem:[%s6781_s25 + $0x334] sm:$0xff]  ;;  %v6985_v27 = vld [vmem:[%s6775_s18 + $0x104] sm:$0xff]  ;;  %6512 = vmac.bf16.f32.vacc2 %v4985_v14, %v6974_v57  ;;  %v7035_v11 = vld [vmem:[%s6775_s18 + $0x1c] sm:$0xff] }
  0x5c   : > { %v6982_v22 = vld [vmem:[%s6775_s18 + $0xf0] sm:$0xff]  ;;  %8126 = vst [vmem:[#allocation12_spill] sm:$0xff] %v6985_v27  ;;  %v5024_v35 = vld [vmem:[%s6781_s25 + $0x384] sm:$0xff]  ;;  %6488 = vmac.bf16.f32.vacc0 %v4988_v19, %v6977_v63  ;;  %v4917_v19 = vld [vmem:[%s6781_s25 + $0x29c] sm:$0xff] }
  0x5d   : > { %v6566_v39 = vmovacc.add.low.vacc3  ;;  %v6551_v53 = vrot.slane %v6544_v51, %v6897_v56  ;;  %v6557_v54 = vrot.slane %v6545_v52, %v6897_v56  ;;  %8125 = vst [vmem:[#allocation11_spill] sm:$0xff] %v6982_v22  ;;  %v5021_v30 = vld [vmem:[%s6781_s25 + $0x370] sm:$0xff]  ;;  %v6990_v38 = vld [vmem:[%s6775_s18 + $0x140] sm:$0xff]  ;;  %6489 = vmac.bf16.f32.vacc0 %v5024_v35, %v6985_v27  ;;  %v4914_v14 = vld [vmem:[%s6781_s25 + $0x288] sm:$0xff] }
  0x5e   : > { %v6567_v42 = vmovacc.add.high.vacc3  ;;  %8127 = vst [vmem:[#allocation13_spill] sm:$0xff] %v6990_v38  ;;  %v7005_v49 = vld [vmem:[%s6775_s18 + $0x1a4] sm:$0xff]  ;;  %v5093_v50 = vld [vmem:[%s6781_s25 + $0x410] sm:$0xff]  ;;  %6513 = vmac.bf16.f32.vacc2 %v5021_v30, %v6982_v22  ;;  %v7042_v30 = vld [vmem:[%s6775_s18 + $0x58] sm:$0xff]  ;;  %6462 = vmul.bf16.f32.vacc1 %v4914_v14, %v7032_v10 }
  0x5f   : > { %8130 = vst [vmem:[#allocation16_spill] sm:$0xff] %v7005_v49  ;;  %v7012_v51 = vld [vmem:[%s6775_s18 + $0x1e0] sm:$0xff]  ;;  %v7015_v52 = vld [vmem:[%s6775_s18 + $0x1f4] sm:$0xff]  ;;  %8135 = vst [vmem:[#allocation21_spill] sm:$0xff] %v7042_v30 }
  0x60   : > { %v6568_v43 = vcombine.low %v6566_v39, %v6567_v42  ;;  %v6569_v46 = vcombine.high %v6566_v39, %v6567_v42  ;;  %v6993_v39 = vld [vmem:[%s6775_s18 + $0x154] sm:$0xff]  ;;  %v5057_v42 = vld [vmem:[%s6781_s25 + $0x3c0] sm:$0xff]  ;;  %8131 = vst [vmem:[#allocation17_spill] sm:$0xff] %v7012_v51  ;;  %8132 = vst [vmem:[#allocation18_spill] sm:$0xff] %v7015_v52 }
  0x61   : > { %8128 = vst [vmem:[#allocation14_spill] sm:$0xff] %v6993_v39  ;;  %v7025_v58 = vld [vmem:[%s6775_s18 + $0x244] sm:$0xff]  ;;  %v5165_v61 = vld [vmem:[%s6781_s25 + $0x4b0] sm:$0xff]  ;;  %6514 = vmac.bf16.f32.vacc2 %v5057_v42, %v6990_v38  ;;  %v4950_v42 = vld [vmem:[%s6781_s25 + $0x2d8] sm:$0xff] }
  0x62   : > { %v6575_v47 = vrot.slane %v6568_v43, %v6897_v56  ;;  %v6581_v48 = vrot.slane %v6569_v46, %v6897_v56  ;;  %v5060_v46 = vld [vmem:[%s6781_s25 + $0x3d4] sm:$0xff]  ;;  %8134 = vst [vmem:[#allocation20_spill] sm:$0xff] %v7025_v58  ;;  %v5168_v62 = vld [vmem:[%s6781_s25 + $0x4c4] sm:$0xff]  ;;  %v7045_v35 = vld [vmem:[%s6775_s18 + $0x6c] sm:$0xff]  ;;  %6463 = vmac.bf16.f32.vacc1 %v4950_v42, %v7042_v30 }
  0x63   : > { %6490 = vmac.bf16.f32.vacc0 %v5060_v46, %v6993_v39  ;;  %8136 = vst [vmem:[#allocation22_spill] sm:$0xff] %v7045_v35  ;;  %v7052_v46 = vld [vmem:[%s6775_s18 + $0xa8] sm:$0xff]  ;;  %v7055_v39 = vld [vmem:[%s6775_s18 + $0xbc] sm:$0xff] }
  0x64   : > { %v2360_v55 = vpack.c.bf16 %v6557_v54, %v6581_v48  ;;  %v2359_v43 = vpack.c.bf16 %v6551_v53, %v6575_v47  ;;  %v7002_v48 = vld [vmem:[%s6775_s18 + $0x190] sm:$0xff]  ;;  %v5096_v47 = vld [vmem:[%s6781_s25 + $0x424] sm:$0xff]  ;;  %v4989_v27 = vld [vmem:[%s6781_s25 + $0x33c] sm:$0xff] }
  0x65   : > { %8129 = vst [vmem:[#allocation15_spill] sm:$0xff] %v7002_v48  ;;  %v5129_v53 = vld [vmem:[%s6781_s25 + $0x460] sm:$0xff]  ;;  %v5132_v54 = vld [vmem:[%s6781_s25 + $0x474] sm:$0xff]  ;;  %6515 = vmac.bf16.f32.vacc2 %v5093_v50, %v7002_v48  ;;  %6491 = vmac.bf16.f32.vacc0 %v5096_v47, %v7005_v49  ;;  %v4986_v38 = vld [vmem:[%s6781_s25 + $0x328] sm:$0xff] }
  0x66   : > { %2421 = vmatprep.subr.bf16.mxu1 %v2360_v55  ;;  %v7022_v55 = vld [vmem:[%s6775_s18 + $0x230] sm:$0xff]  ;;  %6516 = vmac.bf16.f32.vacc2 %v5129_v53, %v7012_v51  ;;  %6492 = vmac.bf16.f32.vacc0 %v5132_v54, %v7015_v52  ;;  %v7060_v50 = vld [vmem:[%s6775_s18 + $0xf8] sm:$0xff]  ;;  %6464 = vmac.bf16.f32.vacc1 %v4986_v38, %v7052_v46  ;;  %v5130_v30 = vld [vmem:[%s6781_s25 + $0x468] sm:$0xff] }
  0x67   : > { %2422 = vmatpush1.bf16.msra.mxu1 %v2359_v43  ;;  %8133 = vst [vmem:[#allocation19_spill] sm:$0xff] %v7022_v55  ;;  %v4953_v43 = vld [vmem:[%s6781_s25 + $0x2ec] sm:$0xff]  ;;  %6517 = vmac.bf16.f32.vacc2 %v5165_v61, %v7022_v55  ;;  %6493 = vmac.bf16.f32.vacc0 %v5168_v62, %v7025_v58  ;;  %v7077_v58 = vld [vmem:[%s6775_s18 + $0x15c] sm:$0xff] }
  0x68   : > { %v5097_v14 = vld [vmem:[%s6781_s25 + $0x42c] sm:$0xff]  ;;  %v7099_v42 = vld [vmem:[%s6775_s18 + $0x1fc] sm:$0xff] }
  0x69   : > { %v6518_v47 = vmovacc.add.low.vacc2  ;;  %v6494_v51 = vmovacc.add.low.vacc0  ;;  %8139 = vst [vmem:[#allocation25_spill] sm:$0xff] %v7099_v42  ;;  %v5169_v38 = vld [vmem:[%s6781_s25 + $0x4cc] sm:$0xff] }
  0x6a   : > { %v6519_v49 = vmovacc.add.high.vacc2  ;;  %v6495_v22 = vmovacc.add.high.vacc0 }
  0x6c   : > { %v6520_v48 = vcombine.low %v6518_v47, %v6519_v49  ;;  %v6521_v53 = vcombine.high %v6518_v47, %v6519_v49  ;;  %v6496_v63 = vcombine.low %v6494_v51, %v6495_v22  ;;  %v6497_v61 = vcombine.high %v6494_v51, %v6495_v22  ;;  %v7069_v49 = vld [vmem:[%s6775_s18 + $0x10c] sm:$0xff]  ;;  %v5022_v47 = vld [vmem:[%s6781_s25 + $0x378] sm:$0xff] }
  0x6d   : > { %8137 = vst [vmem:[#allocation23_spill] sm:$0xff] %v7069_v49  ;;  %v5058_v22 = vld [vmem:[%s6781_s25 + $0x3c8] sm:$0xff]  ;;  %v7084_v51 = vld [vmem:[%s6775_s18 + $0x198] sm:$0xff]  ;;  %6438 = vmul.bf16.f32.vacc2 %v4917_v19, %v7035_v11  ;;  %6465 = vmac.bf16.f32.vacc1 %v5022_v47, %v7060_v50 }
  0x6e   : > { %v6527_v54 = vrot.slane %v6520_v48, %v6897_v56  ;;  %v6533_v52 = vrot.slane %v6521_v53, %v6897_v56  ;;  %v6503_v55 = vrot.slane %v6496_v63, %v6897_v56  ;;  %v6509_v57 = vrot.slane %v6497_v61, %v6897_v56  ;;  %v5025_v48 = vld [vmem:[%s6781_s25 + $0x38c] sm:$0xff]  ;;  %v5061_v63 = vld [vmem:[%s6781_s25 + $0x3dc] sm:$0xff] }
  0x6f   : > { %v7074_v53 = vld [vmem:[%s6775_s18 + $0x148] sm:$0xff]  ;;  %6439 = vmac.bf16.f32.vacc2 %v4953_v43, %v7045_v35  ;;  %v7105_v19 = vld [vmem:[%s6775_s18 + $0x238] sm:$0xff] }
  0x70   : > { %v2353_v62 = vpack.c.bf16 %v6509_v57, %v6533_v52  ;;  %v7089_v57 = vld [vmem:[%s6775_s18 + $0x1ac] sm:$0xff]  ;;  %v5094_v52 = vld [vmem:[%s6781_s25 + $0x418] sm:$0xff]  ;;  %6440 = vmac.bf16.f32.vacc2 %v4989_v27, %v7055_v39  ;;  %8140 = vst [vmem:[#allocation26_spill] sm:$0xff] %v7105_v19  ;;  %6466 = vmac.bf16.f32.vacc1 %v5058_v22, %v7074_v53 }
  0x71   : > { %v7095_v61 = vld [vmem:[%s6775_s18 + $0x1e8] sm:$0xff]  ;;  %6441 = vmac.bf16.f32.vacc2 %v5025_v48, %v7069_v49  ;;  %v5166_v35 = vld [vmem:[%s6781_s25 + $0x4b8] sm:$0xff]  ;;  %6467 = vmac.bf16.f32.vacc1 %v5094_v52, %v7084_v51 }
  0x72   : > { %2382 = vmatprep.subr.bf16.mxu0 %v2353_v62  ;;  %8138 = vst [vmem:[#allocation24_spill] sm:$0xff] %v7095_v61  ;;  %v5133_v62 = vld [vmem:[%s6781_s25 + $0x47c] sm:$0xff]  ;;  %v7109_v43 = vld [vmem:[%s6775_s18 + $0x24c] sm:$0xff]  ;;  %6442 = vmac.bf16.f32.vacc2 %v5061_v63, %v7077_v58  ;;  %6468 = vmac.bf16.f32.vacc1 %v5130_v30, %v7095_v61 }
  0x73   : > { %8141 = vst [vmem:[#allocation27_spill] sm:$0xff] %v7109_v43  ;;  %6443 = vmac.bf16.f32.vacc2 %v5097_v14, %v7089_v57  ;;  %6469 = vmac.bf16.f32.vacc1 %v5166_v35, %v7105_v19  ;;  %v4946_v19 = vld [vmem:[%s6781_s25 + $0x8c] sm:$0xff] }
  0x74   : > { %6444 = vmac.bf16.f32.vacc2 %v5133_v62, %v7099_v42  ;;  %v4979_v42 = vld [vmem:[%s6781_s25 + $0xc8] sm:$0xff] }
  0x75   : > { %v6470_v27 = vmovacc.add.low.vacc1  ;;  %6445 = vmac.bf16.f32.vacc2 %v5169_v38, %v7109_v43  ;;  %v313_v38 = vld [vmem:[%s6781_s25 + $0x28] sm:$0xff]  ;;  %v4943_v43 = vld [vmem:[%s6781_s25 + $0x78] sm:$0xff] }
  0x76   : > { %v6471_v47 = vmovacc.add.high.vacc1  ;;  %v5051_v61 = vld [vmem:[%s6781_s25 + $0x168] sm:$0xff]  ;;  %6414 = vmul.bf16.f32.vacc3 %v313_v38, %v6788_v0  ;;  %v5124_v38 = vld [vmem:[%s6781_s25 + $0x210] sm:$0xff] }
  0x77   : > { %v6446_v30 = vmovacc.add.low.vacc2  ;;  %6415 = vmac.bf16.f32.vacc3 %v4943_v43, %v6796_v4  ;;  %v5162_v0 = vld [vmem:[%s6781_s25 + $0x26c] sm:$0xff]  ;;  %v317_v4 = vld [vmem:[%s6781_s25 + $0x44] sm:$0xff] }
  0x78   : > { %v6472_v48 = vcombine.low %v6470_v27, %v6471_v47  ;;  %v6473_v49 = vcombine.high %v6470_v27, %v6471_v47  ;;  %v6447_v52 = vmovacc.add.high.vacc2  ;;  %6416 = vmac.bf16.f32.vacc3 %v4979_v42, %v6804_v8  ;;  %v4980_v43 = vld [vmem:[%s6781_s25 + $0xd0] sm:$0xff]  ;;  %v4983_v8 = vld [vmem:[%s6781_s25 + $0xe4] sm:$0xff] }
  0x79   : > { %v5052_v42 = vld [vmem:[%s6781_s25 + $0x170] sm:$0xff] }
  0x7a   : > { %v6479_v22 = vrot.slane %v6472_v48, %v6897_v56  ;;  %v6485_v63 = vrot.slane %v6473_v49, %v6897_v56  ;;  %v6448_v35 = vcombine.low %v6446_v30, %v6447_v52  ;;  %v6449_v14 = vcombine.high %v6446_v30, %v6447_v52  ;;  %v316_v48 = vld [vmem:[%s6781_s25 + $0x3c] sm:$0xff] }
  0x7b   : > { %v2352_v49 = vpack.c.bf16 %v6503_v55, %v6527_v54  ;;  %v4982_v30 = vld [vmem:[%s6781_s25 + $0xdc] sm:$0xff]  ;;  %6390 = vmul.bf16.f32.vacc0 %v316_v48, %v6791_v1  ;;  %v5090_v55 = vld [vmem:[%s6781_s25 + $0x1cc] sm:$0xff]  ;;  %6342 = vmul.bf16.f32.vacc2 %v317_v4, %v6863_v33  ;;  %v5127_v48 = vld [vmem:[%s6781_s25 + $0x224] sm:$0xff] }
  0x7c   : > { %v6455_v62 = vrot.slane %v6448_v35, %v6897_v56  ;;  %v6461_v27 = vrot.slane %v6449_v14, %v6897_v56  ;;  %v5015_v52 = vld [vmem:[%s6781_s25 + $0x118] sm:$0xff]  ;;  %v5018_v35 = vld [vmem:[%s6781_s25 + $0x12c] sm:$0xff]  ;;  %6391 = vmac.bf16.f32.vacc0 %v4946_v19, %v6799_v5  ;;  %v4944_v5 = vld [vmem:[%s6781_s25 + $0x80] sm:$0xff] }
  0x7d   : > { %2383 = vmatpush1.bf16.msra.mxu0 %v2352_v49  ;;  %v5054_v14 = vld [vmem:[%s6781_s25 + $0x17c] sm:$0xff]  ;;  %v5123_v54 = vld [vmem:[%s6781_s25 + $0x208] sm:$0xff]  ;;  %6392 = vmac.bf16.f32.vacc0 %v4982_v30, %v6807_v9  ;;  %v314_v1 = vld [vmem:[%s6781_s25 + $0x30] sm:$0xff]  ;;  %6417 = vmac.bf16.f32.vacc3 %v5015_v52, %v6812_v12 }
  0x7e   : > { %v2355_v47 = vpack.c.bf16 %v6461_v27, %v6485_v63  ;;  %v5087_v63 = vld [vmem:[%s6781_s25 + $0x1b8] sm:$0xff]  ;;  %6393 = vmac.bf16.f32.vacc0 %v5018_v35, %v6815_v13  ;;  %6418 = vmac.bf16.f32.vacc3 %v5051_v61, %v6820_v16  ;;  %v5016_v9 = vld [vmem:[%s6781_s25 + $0x120] sm:$0xff]  ;;  %6366 = vmul.bf16.f32.vacc1 %v314_v1, %v6860_v32 }
  0x7f   : > { %v5126_v27 = vld [vmem:[%s6781_s25 + $0x21c] sm:$0xff]  ;;  %v4947_v19 = vld [vmem:[%s6781_s25 + $0x94] sm:$0xff]  ;;  %6394 = vmac.bf16.f32.vacc0 %v5054_v14, %v6823_v17  ;;  %6419 = vmac.bf16.f32.vacc3 %v5087_v63, %v6828_v20  ;;  %v5055_v13 = vld [vmem:[%s6781_s25 + $0x184] sm:$0xff]  ;;  %6367 = vmac.bf16.f32.vacc1 %v4944_v5, %v6870_v36 }
  0x80   : > { %2423 = vmatprep.subr.bf16.mxu1 %v2355_v47  ;;  %v2354_v47 = vpack.c.bf16 %v6455_v62, %v6479_v22  ;;  %v5159_v49 = vld [vmem:[%s6781_s25 + $0x258] sm:$0xff]  ;;  %6395 = vmac.bf16.f32.vacc0 %v5090_v55, %v6835_v21  ;;  %6420 = vmac.bf16.f32.vacc3 %v5123_v54, %v6840_v24  ;;  %6343 = vmac.bf16.f32.vacc2 %v4947_v19, %v6873_v37  ;;  %v5088_v16 = vld [vmem:[%s6781_s25 + $0x1c0] sm:$0xff]  ;;  %v4937_v54 = vld [vmem:[%s6781_s25 + $0x50] sm:$0xff] }
  0x81   : > { %v5019_v12 = vld [vmem:[%s6781_s25 + $0x134] sm:$0xff]  ;;  %6396 = vmac.bf16.f32.vacc0 %v5126_v27, %v6843_v25  ;;  %6421 = vmac.bf16.f32.vacc3 %v5159_v49, %v6850_v28  ;;  %6368 = vmac.bf16.f32.vacc1 %v4980_v43, %v6880_v40  ;;  %6344 = vmac.bf16.f32.vacc2 %v4983_v8, %v6883_v41  ;;  %v5160_v30 = vld [vmem:[%s6781_s25 + $0x260] sm:$0xff] }
  0x82   : > { %2424 = vmatpush1.bf16.msra.mxu1 %v2354_v47  ;;  %v5091_v17 = vld [vmem:[%s6781_s25 + $0x1d4] sm:$0xff]  ;;  %6397 = vmac.bf16.f32.vacc0 %v5162_v0, %v6853_v29  ;;  %6369 = vmac.bf16.f32.vacc1 %v5016_v9, %v6890_v44  ;;  %6345 = vmac.bf16.f32.vacc2 %v5019_v12, %v6893_v45  ;;  %v4940_v27 = vld [vmem:[%s6781_s25 + $0x64] sm:$0xff] }
  0x83   : > { %v6422_v20 = vmovacc.add.low.vacc3  ;;  %v5163_v35 = vld [vmem:[%s6781_s25 + $0x274] sm:$0xff]  ;;  %6370 = vmac.bf16.f32.vacc1 %v5052_v42, %v6906_v6  ;;  %6346 = vmac.bf16.f32.vacc2 %v5055_v13, %v6909_v7  ;;  %v4973_v47 = vld [vmem:[%s6781_s25 + $0xa0] sm:$0xff] }
  0x84   : > { %v6423_v21 = vmovacc.add.high.vacc3  ;;  %v6398_v33 = vmovacc.add.low.vacc0  ;;  %6371 = vmac.bf16.f32.vacc1 %v5088_v16, %v6918_v15  ;;  %6347 = vmac.bf16.f32.vacc2 %v5091_v17, %v6921_v18  ;;  %v310_v55 = vld [vmem:[%s6781_s25 + $0x14] sm:$0xff]  ;;  %v5012_v1 = vld [vmem:[%s6781_s25 + $0x104] sm:$0xff] }
  0x85   : > { %v6399_v37 = vmovacc.add.high.vacc0  ;;  %6372 = vmac.bf16.f32.vacc1 %v5124_v38, %v6928_v23  ;;  %6348 = vmac.bf16.f32.vacc2 %v5127_v48, %v6931_v26  ;;  %v4976_v49 = vld [vmem:[%s6781_s25 + $0xb4] sm:$0xff]  ;;  %v5045_v4 = vld [vmem:[%s6781_s25 + $0x140] sm:$0xff]  ;;  %v8143_v16 = vld [vmem:[#allocation10_spill] sm:$0xff] }
  0x86   : > { %v6424_v24 = vcombine.low %v6422_v20, %v6423_v21  ;;  %v6425_v25 = vcombine.high %v6422_v20, %v6423_v21  ;;  %6373 = vmac.bf16.f32.vacc1 %v5160_v30, %v6937_v31  ;;  %6349 = vmac.bf16.f32.vacc2 %v5163_v35, %v6940_v34  ;;  %v307_v34 = vld [vmem:[%s6781_s25] sm:$0xff]  ;;  %v5009_v0 = vld [vmem:[%s6781_s25 + $0xf0] sm:$0xff]  ;;  %v308_v17 = vld [vmem:[%s6781_s25 + $0x8] sm:$0xff] }
  0x87   : > { %v6400_v61 = vcombine.low %v6398_v33, %v6399_v37  ;;  %v6401_v22 = vcombine.high %v6398_v33, %v6399_v37  ;;  %v5048_v5 = vld [vmem:[%s6781_s25 + $0x154] sm:$0xff]  ;;  %6318 = vmul.bf16.f32.vacc3 %v307_v34, %v6958_v59  ;;  %v5084_v43 = vld [vmem:[%s6781_s25 + $0x1a4] sm:$0xff]  ;;  %6294 = vmul.bf16.f32.vacc0 %v310_v55, %v6961_v60  ;;  %v311_v20 = vld [vmem:[%s6781_s25 + $0x1c] sm:$0xff] }
  0x88   : > { %v6431_v32 = vrot.slane %v6424_v24, %v6897_v56  ;;  %v6437_v36 = vrot.slane %v6425_v25, %v6897_v56  ;;  %v6374_v29 = vmovacc.add.low.vacc1  ;;  %v6350_v7 = vmovacc.add.low.vacc2  ;;  %v5081_v19 = vld [vmem:[%s6781_s25 + $0x190] sm:$0xff]  ;;  %v5117_v8 = vld [vmem:[%s6781_s25 + $0x1e0] sm:$0xff]  ;;  %v4938_v60 = vld [vmem:[%s6781_s25 + $0x58] sm:$0xff] }
  0x89   : > { %v6407_v62 = vrot.slane %v6400_v61, %v6897_v56  ;;  %v6413_v28 = vrot.slane %v6401_v22, %v6897_v56  ;;  %v6375_v40 = vmovacc.add.high.vacc1  ;;  %v6351_v15 = vmovacc.add.high.vacc2  ;;  %v8142_v9 = vld [vmem:[#allocation9_spill] sm:$0xff]  ;;  %v5120_v12 = vld [vmem:[%s6781_s25 + $0x1f4] sm:$0xff]  ;;  %v4941_v24 = vld [vmem:[%s6781_s25 + $0x6c] sm:$0xff] }
  0x8a   : > { %6319 = vmac.bf16.f32.vacc3 %v4937_v54, %v6966_v2  ;;  %6295 = vmac.bf16.f32.vacc0 %v4940_v27, %v6969_v3  ;;  %v5153_v13 = vld [vmem:[%s6781_s25 + $0x230] sm:$0xff]  ;;  %v5156_v59 = vld [vmem:[%s6781_s25 + $0x244] sm:$0xff]  ;;  %v8145_v3 = vld [vmem:[#allocation12_spill] sm:$0xff] }
  0x8b   : > { %v2348_v52 = vpack.c.bf16 %v6413_v28, %v6437_v36  ;;  %v6376_v41 = vcombine.low %v6374_v29, %v6375_v40  ;;  %v6377_v44 = vcombine.high %v6374_v29, %v6375_v40  ;;  %v6352_v18 = vcombine.low %v6350_v7, %v6351_v15  ;;  %v8144_v2 = vld [vmem:[#allocation11_spill] sm:$0xff]  ;;  %v8146_v21 = vld [vmem:[#allocation13_spill] sm:$0xff]  ;;  %v4974_v25 = vld [vmem:[%s6781_s25 + $0xa8] sm:$0xff] }
  0x8c   : > { %v6353_v23 = vcombine.high %v6350_v7, %v6351_v15  ;;  %v2347_v63 = vpack.c.bf16 %v6407_v62, %v6431_v32  ;;  %6320 = vmac.bf16.f32.vacc3 %v4973_v47, %v8142_v9  ;;  %6296 = vmac.bf16.f32.vacc0 %v4976_v49, %v8143_v16  ;;  %v4977_v32 = vld [vmem:[%s6781_s25 + $0xbc] sm:$0xff]  ;;  %v8147_v36 = vld [vmem:[#allocation14_spill] sm:$0xff]  ;;  %v8148_v33 = vld [vmem:[#allocation15_spill] sm:$0xff] }
  0x8d   : > { %2384 = vmatprep.subr.bf16.mxu0 %v2348_v52  ;;  %v6383_v45 = vrot.slane %v6376_v41, %v6897_v56  ;;  %v6389_v6 = vrot.slane %v6377_v44, %v6897_v56  ;;  %v6359_v26 = vrot.slane %v6352_v18, %v6897_v56  ;;  %6321 = vmac.bf16.f32.vacc3 %v5009_v0, %v8144_v2  ;;  %v5010_v37 = vld [vmem:[%s6781_s25 + $0xf8] sm:$0xff]  ;;  %v5013_v61 = vld [vmem:[%s6781_s25 + $0x10c] sm:$0xff]  ;;  %v8150_v62 = vld [vmem:[#allocation17_spill] sm:$0xff] }
  0x8e   : > { %v6365_v31 = vrot.slane %v6353_v23, %v6897_v56  ;;  %2385 = vmatpush1.bf16.msra.mxu0 %v2347_v63  ;;  %6297 = vmac.bf16.f32.vacc0 %v5012_v1, %v8145_v3  ;;  %6322 = vmac.bf16.f32.vacc3 %v5045_v4, %v8146_v21  ;;  %v8149_v22 = vld [vmem:[#allocation16_spill] sm:$0xff]  ;;  %v5046_v28 = vld [vmem:[%s6781_s25 + $0x148] sm:$0xff]  ;;  %6270 = vmul.bf16.f32.vacc1 %v308_v17, %v7032_v10  ;;  %v8151_v38 = vld [vmem:[#allocation21_spill] sm:$0xff] }
  0x8f   : > { %v2349_v42 = vpack.c.bf16 %v6359_v26, %v6383_v45  ;;  %6298 = vmac.bf16.f32.vacc0 %v5048_v5, %v8147_v36  ;;  %6323 = vmac.bf16.f32.vacc3 %v5081_v19, %v8148_v33  ;;  %6271 = vmac.bf16.f32.vacc1 %v4938_v60, %v8151_v38  ;;  %v5049_v48 = vld [vmem:[%s6781_s25 + $0x15c] sm:$0xff]  ;;  %v8152_v52 = vld [vmem:[#allocation18_spill] sm:$0xff]  ;;  %v8153_v35 = vld [vmem:[#allocation19_spill] sm:$0xff] }
  0x90   : > { %v2350_v14 = vpack.c.bf16 %v6365_v31, %v6389_v6  ;;  %6299 = vmac.bf16.f32.vacc0 %v5084_v43, %v8149_v22  ;;  %6324 = vmac.bf16.f32.vacc3 %v5117_v8, %v8150_v62  ;;  %v5082_v30 = vld [vmem:[%s6781_s25 + $0x198] sm:$0xff]  ;;  %v5085_v10 = vld [vmem:[%s6781_s25 + $0x1ac] sm:$0xff]  ;;  %6272 = vmac.bf16.f32.vacc1 %v4974_v25, %v7052_v46  ;;  %v8158_v49 = vld [vmem:[#allocation25_spill] sm:$0xff] }
  0x91   : > { %6300 = vmac.bf16.f32.vacc0 %v5120_v12, %v8152_v52  ;;  %6325 = vmac.bf16.f32.vacc3 %v5153_v13, %v8153_v35  ;;  %v5118_v7 = vld [vmem:[%s6781_s25 + $0x1e8] sm:$0xff]  ;;  %v8155_v18 = vld [vmem:[#allocation20_spill] sm:$0xff]  ;;  %6273 = vmac.bf16.f32.vacc1 %v5010_v37, %v7060_v50  ;;  %v8156_v47 = vld [vmem:[#allocation23_spill] sm:$0xff]  ;;  %v8113_v17 = vmov 0  }
  0x92   : > { %2425 = vmatprep.subr.bf16.mxu1 %v2350_v14  ;;  %v8154_v15 = vld [vmem:[#allocation22_spill] sm:$0xff]  ;;  %6301 = vmac.bf16.f32.vacc0 %v5156_v59, %v8155_v18  ;;  %v5121_v55 = vld [vmem:[%s6781_s25 + $0x1fc] sm:$0xff]  ;;  %6274 = vmac.bf16.f32.vacc1 %v5046_v28, %v7074_v53  ;;  %v8160_v5 = vld [vmem:[#allocation27_spill] sm:$0xff]  ;;  %2404 = vmatprep.mubr.bf16.mxu0 %v8113_v17  ;;  %v8115_v3 = vmov 0.0  }
  0x93   : > { %2426 = vmatpush1.bf16.msra.mxu1 %v2349_v42  ;;  %v6326_v29 = vmovacc.add.low.vacc3  ;;  %v5154_v54 = vld [vmem:[%s6781_s25 + $0x238] sm:$0xff]  ;;  %v5157_v27 = vld [vmem:[%s6781_s25 + $0x24c] sm:$0xff]  ;;  %6275 = vmac.bf16.f32.vacc1 %v5082_v30, %v7084_v51  ;;  %v2367_v13 = vld [vmem:[%s8092_s2] sm:$0x7]  ;;  %2445 = vmatprep.mubr.bf16.mxu1 %v8113_v17  ;;  %265 = vst [vmem:[%s7824_s8] sm:$0x3f] %v8115_v3 }
  0x94   : > { %v6327_v40 = vmovacc.add.high.vacc3  ;;  %v6302_v23 = vmovacc.add.low.vacc0  ;;  %v8157_v46 = vld [vmem:[#allocation24_spill] sm:$0xff]  ;;  %v7273_v59 = vld [vmem:[%s6775_s18 + $0x2a8] sm:$0xff]  ;;  %266 = vst [vmem:[%s7824_s8 + $0x8] sm:$0x3f] %v8115_v3  ;;  %267 = vst [vmem:[%s7824_s8 + $0x10] sm:$0x3f] %v8115_v3 }
  0x95   : > { %v6303_v26 = vmovacc.add.high.vacc0  ;;  %6276 = vmac.bf16.f32.vacc1 %v5118_v7, %v8157_v46  ;;  %v7276_v16 = vld [vmem:[%s6775_s18 + $0x2bc] sm:$0xff]  ;;  %v5210_v2 = vld [vmem:[%s6781_s25 + $0x7a8] sm:$0xff]  ;;  %268 = vst [vmem:[%s7824_s8 + $0x18] sm:$0x3f] %v8115_v3  ;;  %269 = vst [vmem:[%s7824_s8 + $0x20] sm:$0x3f] %v8115_v3 }
  0x96   : > { %v6328_v41 = vcombine.low %v6326_v29, %v6327_v40  ;;  %v6329_v44 = vcombine.high %v6326_v29, %v6327_v40  ;;  %6246 = vmul.bf16.f32.vacc3 %v311_v20, %v7035_v11  ;;  %v5213_v20 = vld [vmem:[%s6781_s25 + $0x7bc] sm:$0xff]  ;;  %v7288_v21 = vld [vmem:[%s6775_s18 + $0x30c] sm:$0xff]  ;;  %6198 = vmul.bf16.f32.vacc2 %v5210_v2, %v7273_v59 }
  0x97   : > { %6247 = vmac.bf16.f32.vacc3 %v4941_v24, %v8154_v15  ;;  %v6304_v31 = vcombine.low %v6302_v23, %v6303_v26  ;;  %v6305_v14 = vcombine.high %v6302_v23, %v6303_v26  ;;  %v7283_v60 = vld [vmem:[%s6775_s18 + $0x2f8] sm:$0xff]  ;;  %v5249_v25 = vld [vmem:[%s6781_s25 + $0x80c] sm:$0xff] }
  0x98   : > { %v6335_v45 = vrot.slane %v6328_v41, %v6897_v56  ;;  %v6341_v6 = vrot.slane %v6329_v44, %v6897_v56  ;;  %6248 = vmac.bf16.f32.vacc3 %v4977_v32, %v7055_v39  ;;  %v8159_v39 = vld [vmem:[#allocation26_spill] sm:$0xff]  ;;  %v5246_v24 = vld [vmem:[%s6781_s25 + $0x7f8] sm:$0xff] }
  0x99   : > { %v6311_v63 = vrot.slane %v6304_v31, %v6897_v56  ;;  %v6317_v34 = vrot.slane %v6305_v14, %v6897_v56  ;;  %6249 = vmac.bf16.f32.vacc3 %v5013_v61, %v8156_v47  ;;  %6277 = vmac.bf16.f32.vacc1 %v5154_v54, %v8159_v39  ;;  %v7293_v32 = vld [vmem:[%s6775_s18 + $0x348] sm:$0xff]  ;;  %v7296_v36 = vld [vmem:[%s6775_s18 + $0x35c] sm:$0xff] }
  0x9a   : > { %6250 = vmac.bf16.f32.vacc3 %v5049_v48, %v7077_v58  ;;  %v5282_v33 = vld [vmem:[%s6781_s25 + $0x848] sm:$0xff]  ;;  %v5285_v37 = vld [vmem:[%s6781_s25 + $0x85c] sm:$0xff]  ;;  %6199 = vmac.bf16.f32.vacc2 %v5246_v24, %v7283_v60 }
  0x9b   : > { %v2343_v11 = vpack.c.bf16 %v6317_v34, %v6341_v6  ;;  %6251 = vmac.bf16.f32.vacc3 %v5085_v10, %v7089_v57  ;;  %v6278_v0 = vmovacc.add.low.vacc1  ;;  %v2342_v42 = vpack.c.bf16 %v6311_v63, %v6335_v45  ;;  %v7301_v61 = vld [vmem:[%s6775_s18 + $0x398] sm:$0xff]  ;;  %v7304_v22 = vld [vmem:[%s6775_s18 + $0x3ac] sm:$0xff] }
  0x9c   : > { %6252 = vmac.bf16.f32.vacc3 %v5121_v55, %v8158_v49  ;;  %v6279_v1 = vmovacc.add.high.vacc1  ;;  %v5318_v28 = vld [vmem:[%s6781_s25 + $0x898] sm:$0xff]  ;;  %v5321_v38 = vld [vmem:[%s6781_s25 + $0x8ac] sm:$0xff]  ;;  %6200 = vmac.bf16.f32.vacc2 %v5282_v33, %v7293_v32 }
  0x9d   : > { %2386 = vmatprep.subr.bf16.mxu0 %v2343_v11  ;;  %6253 = vmac.bf16.f32.vacc3 %v5157_v27, %v8160_v5  ;;  %v7309_v48 = vld [vmem:[%s6775_s18 + $0x3e8] sm:$0xff]  ;;  %v7316_v30 = vld [vmem:[%s6775_s18 + $0x3fc] sm:$0xff]  ;;  %6201 = vmac.bf16.f32.vacc2 %v5318_v28, %v7301_v61 }
  0x9e   : > { %v6280_v50 = vcombine.low %v6278_v0, %v6279_v1  ;;  %v6281_v4 = vcombine.high %v6278_v0, %v6279_v1  ;;  %2387 = vmatpush1.bf16.msra.mxu0 %v2342_v42  ;;  %6174 = vmul.bf16.f32.vacc1 %v5213_v20, %v7276_v16  ;;  %v5354_v52 = vld [vmem:[%s6781_s25 + $0x8e8] sm:$0xff]  ;;  %v5357_v35 = vld [vmem:[%s6781_s25 + $0x8fc] sm:$0xff] }
  0x9f   : > { %v6254_v51 = vmovacc.add.low.vacc3  ;;  %5484 = vmatprep.subr.bf16.mxu0 %v8115_v3  ;;  %6175 = vmac.bf16.f32.vacc1 %v5249_v25, %v7288_v21  ;;  %v7321_v29 = vld [vmem:[%s6775_s18 + $0x438] sm:$0xff]  ;;  %v7327_v40 = vld [vmem:[%s6775_s18 + $0x44c] sm:$0xff]  ;;  %6202 = vmac.bf16.f32.vacc2 %v5354_v52, %v7309_v48  ;;  %v7405_v28 = vld [vmem:[%s6775_s18 + $0x280] sm:$0xff] }
  0xa0   : > { %v6287_v53 = vrot.slane %v6280_v50, %v6897_v56  ;;  %v6293_v58 = vrot.slane %v6281_v4, %v6897_v56  ;;  %v6255_v57 = vmovacc.add.high.vacc3  ;;  %6176 = vmac.bf16.f32.vacc1 %v5285_v37, %v7296_v36  ;;  %v5390_v41 = vld [vmem:[%s6781_s25 + $0x938] sm:$0xff]  ;;  %v5393_v44 = vld [vmem:[%s6781_s25 + $0x94c] sm:$0xff]  ;;  %v5204_v52 = vld [vmem:[%s6781_s25 + $0x780] sm:$0xff] }
  0xa1   : > { %5177 = vmatmul.mubr.msk.bf16.vlgmr.msra.gmra.mxu0 %vm2368_vm0, %v2367_v13  ;;  %v7333_v45 = vld [vmem:[%s6775_s18 + $0x488] sm:$0xff]  ;;  %6177 = vmac.bf16.f32.vacc1 %v5321_v38, %v7304_v22  ;;  %v7338_v6 = vld [vmem:[%s6775_s18 + $0x49c] sm:$0xff]  ;;  %6203 = vmac.bf16.f32.vacc2 %v5390_v41, %v7321_v29  ;;  %v7408_v38 = vld [vmem:[%s6775_s18 + $0x294] sm:$0xff] }
  0xa2   : > { %v6256_v19 = vcombine.low %v6254_v51, %v6255_v57  ;;  %v6257_v43 = vcombine.high %v6254_v51, %v6255_v57  ;;  %v5426_v10 = vld [vmem:[%s6781_s25 + $0x988] sm:$0xff]  ;;  %v5429_v7 = vld [vmem:[%s6781_s25 + $0x99c] sm:$0xff]  ;;  %6178 = vmac.bf16.f32.vacc1 %v5357_v35, %v7316_v30  ;;  %v5207_v41 = vld [vmem:[%s6781_s25 + $0x794] sm:$0xff]  ;;  %6126 = vmul.bf16.f32.vacc3 %v5204_v52, %v7405_v28  ;;  %5492 = vmatprep.mubr.msk.bf16.mxu0 %vm6661_vm1, %v8115_v3 }
  0xa3   : > { %v7343_v15 = vld [vmem:[%s6775_s18 + $0x4d8] sm:$0xff]  ;;  %v7348_v18 = vld [vmem:[%s6775_s18 + $0x4ec] sm:$0xff]  ;;  %6179 = vmac.bf16.f32.vacc1 %v5393_v44, %v7327_v40  ;;  %6204 = vmac.bf16.f32.vacc2 %v5426_v10, %v7333_v45  ;;  %v7416_v10 = vld [vmem:[%s6775_s18 + $0x2e4] sm:$0xff] }
  0xa4   : > { %v6263_v8 = vrot.slane %v6256_v19, %v6897_v56  ;;  %v6269_v9 = vrot.slane %v6257_v43, %v6897_v56  ;;  %v5462_v23 = vld [vmem:[%s6781_s25 + $0x9d8] sm:$0xff]  ;;  %v5465_v26 = vld [vmem:[%s6781_s25 + $0x9ec] sm:$0xff]  ;;  %6180 = vmac.bf16.f32.vacc1 %v5429_v7, %v7338_v6  ;;  %v4951_v52 = vld [vmem:[%s6781_s25 + $0x2e0] ss:$20 sps:$4 sm:$0xff]  }
  0xa5   : > { %v7353_v31 = vld [vmem:[%s6775_s18 + $0x38] ss:$20 sps:$4 sm:$0xff]   ;;  %v7359_v63 = vld [vmem:[%s6775_s18 + $0x88] ss:$20 sps:$4 sm:$0xff]   ;;  %6205 = vmac.bf16.f32.vacc2 %v5462_v23, %v7343_v15  ;;  %6181 = vmac.bf16.f32.vacc1 %v5465_v26, %v7348_v18  ;;  %v7413_v44 = vld [vmem:[%s6775_s18 + $0x2d0] sm:$0xff] }
  0xa6   : > { %v2345_v12 = vpack.c.bf16 %v6269_v9, %v6293_v58  ;;  %v2344_v62 = vpack.c.bf16 %v6263_v8, %v6287_v53  ;;  %v4921_v14 = vld [vmem:[%s6781_s25 + $0x2b8] ss:$20 sps:$4 sm:$0xff]   ;;  %v4957_v34 = vld [vmem:[%s6781_s25 + $0x308] ss:$20 sps:$4 sm:$0xff]   ;;  %v5240_v7 = vld [vmem:[%s6781_s25 + $0x7d0] sm:$0xff] }
  0xa7   : > { %v7365_v55 = vld [vmem:[%s6775_s18 + $0xd8] ss:$20 sps:$4 sm:$0xff]   ;;  %v7369_v27 = vld [vmem:[%s6775_s18 + $0x128] ss:$20 sps:$4 sm:$0xff]   ;;  %v6206_v11 = vmovacc.add.low.vacc2  ;;  %v6182_v1 = vmovacc.add.low.vacc1  ;;  %6222 = vmul.bf16.f32.vacc0 %v4921_v14, %v7353_v31  ;;  %v7422_v26 = vld [vmem:[%s6775_s18 + $0x320] sm:$0xff]  ;;  %6127 = vmac.bf16.f32.vacc3 %v5240_v7, %v7413_v44 }
  0xa8   : > { %2427 = vmatprep.subr.bf16.mxu1 %v2345_v12  ;;  %v4993_v54 = vld [vmem:[%s6781_s25 + $0x358] ss:$20 sps:$4 sm:$0xff]   ;;  %v6207_v47 = vmovacc.add.high.vacc2  ;;  %v6183_v50 = vmovacc.add.high.vacc1  ;;  %v5029_v51 = vld [vmem:[%s6781_s25 + $0x3a8] ss:$20 sps:$4 sm:$0xff]   ;;  %6223 = vmac.bf16.f32.vacc0 %v4957_v34, %v7359_v63  ;;  %v5276_v34 = vld [vmem:[%s6781_s25 + $0x820] sm:$0xff] }
  0xa9   : > { %2428 = vmatpush1.bf16.msra.mxu1 %v2344_v62  ;;  %v7379_v57 = vld [vmem:[%s6775_s18 + $0x178] ss:$20 sps:$4 sm:$0xff]   ;;  %v7385_v8 = vld [vmem:[%s6775_s18 + $0x1c8] ss:$20 sps:$4 sm:$0xff]   ;;  %6224 = vmac.bf16.f32.vacc0 %v4993_v54, %v7365_v55  ;;  %6128 = vmac.bf16.f32.vacc3 %v5276_v34, %v7422_v26  ;;  %v7496_v7 = vld [vmem:[%s6775_s18 + $0x100] ss:$20 sps:$4 sm:$0xff]  }
  0xaa   : > { %v6208_v46 = vcombine.low %v6206_v11, %v6207_v47  ;;  %v6209_v49 = vcombine.high %v6206_v11, %v6207_v47  ;;  %v6184_v4 = vcombine.low %v6182_v1, %v6183_v50  ;;  %v6185_v53 = vcombine.high %v6182_v1, %v6183_v50  ;;  %v5065_v43 = vld [vmem:[%s6781_s25 + $0x3f8] ss:$20 sps:$4 sm:$0xff]   ;;  %v5101_v9 = vld [vmem:[%s6781_s25 + $0x448] ss:$20 sps:$4 sm:$0xff]   ;;  %v7430_v11 = vld [vmem:[%s6775_s18 + $0x370] sm:$0xff] }
  0xab   : > { %v7390_v12 = vld [vmem:[%s6775_s18 + $0x218] ss:$20 sps:$4 sm:$0xff]   ;;  %6225 = vmac.bf16.f32.vacc0 %v5029_v51, %v7369_v27  ;;  %v5173_v2 = vld [vmem:[%s6781_s25 + $0x4e8] ss:$20 sps:$4 sm:$0xff]   ;;  %6102 = vmul.bf16.f32.vacc2 %v5207_v41, %v7408_v38  ;;  %v7442_v1 = vld [vmem:[%s6775_s18 + $0x3c0] sm:$0xff] }
  0xac   : > { %5178 = vmatmul.mubr.msk.bf16.vlgmr.msra.gmra.mxu1 %vm2368_vm0, %v2367_v13  ;;  %v6215_v39 = vrot.slane %v6208_v46, %v6897_v56  ;;  %v6221_v0 = vrot.slane %v6209_v49, %v6897_v56  ;;  %v6191_v58 = vrot.slane %v6184_v4, %v6897_v56  ;;  %v6197_v5 = vrot.slane %v6185_v53, %v6897_v56  ;;  %v5137_v42 = vld [vmem:[%s6781_s25 + $0x498] ss:$20 sps:$4 sm:$0xff]   ;;  %v7395_v13 = vld [vmem:[%s6775_s18 + $0x268] ss:$20 sps:$4 sm:$0xff]   ;;  %v5312_v46 = vld [vmem:[%s6781_s25 + $0x870] sm:$0xff] }
  0xad   : > { %4638 = vmatprep.mubr.bf16.mxu1 %v8113_v17  ;;  %6226 = vmac.bf16.f32.vacc0 %v5065_v43, %v7379_v57  ;;  %v5243_v23 = vld [vmem:[%s6781_s25 + $0x7e4] sm:$0xff]  ;;  %v7425_v14 = vld [vmem:[%s6775_s18 + $0x334] sm:$0xff]  ;;  %6129 = vmac.bf16.f32.vacc3 %v5312_v46, %v7430_v11 }
  0xae   : > { %v4592_v19 = vpack.c.bf16 %v6197_v5, %v6221_v0  ;;  %6227 = vmac.bf16.f32.vacc0 %v5101_v9, %v7385_v8  ;;  %v5279_v54 = vld [vmem:[%s6781_s25 + $0x834] sm:$0xff]  ;;  %v7433_v47 = vld [vmem:[%s6775_s18 + $0x384] sm:$0xff]  ;;  %v4591_v0 = vpack.c.bf16 %v6191_v58, %v6215_v39  ;;  %6103 = vmac.bf16.f32.vacc2 %v5243_v23, %v7416_v10 }
  0xaf   : > { %6228 = vmac.bf16.f32.vacc0 %v5137_v42, %v7390_v12  ;;  %v5315_v49 = vld [vmem:[%s6781_s25 + $0x884] sm:$0xff]  ;;  %v7445_v50 = vld [vmem:[%s6775_s18 + $0x3d4] sm:$0xff]  ;;  %6104 = vmac.bf16.f32.vacc2 %v5279_v54, %v7425_v14 }
  0xb0   : > { %4614 = vmatprep.subr.bf16.mxu1 %v4592_v19  ;;  %6229 = vmac.bf16.f32.vacc0 %v5173_v2, %v7395_v13  ;;  %v5348_v4 = vld [vmem:[%s6781_s25 + $0x8c0] sm:$0xff]  ;;  %v5351_v53 = vld [vmem:[%s6781_s25 + $0x8d4] sm:$0xff]  ;;  %6105 = vmac.bf16.f32.vacc2 %v5315_v49, %v7433_v47 }
  0xb1   : > { %4615 = vmatpush1.bf16.msra.mxu1 %v4591_v0  ;;  %v7452_v39 = vld [vmem:[%s6775_s18 + $0x410] sm:$0xff]  ;;  %v7455_v58 = vld [vmem:[%s6775_s18 + $0x424] sm:$0xff]  ;;  %6130 = vmac.bf16.f32.vacc3 %v5348_v4, %v7442_v1  ;;  %6106 = vmac.bf16.f32.vacc2 %v5351_v53, %v7445_v50 }
  0xb2   : > { %v6230_v20 = vmovacc.add.low.vacc0  ;;  %v5384_v5 = vld [vmem:[%s6781_s25 + $0x910] sm:$0xff]  ;;  %v5387_v51 = vld [vmem:[%s6781_s25 + $0x924] sm:$0xff] }
  0xb3   : > { %v6231_v24 = vmovacc.add.high.vacc0  ;;  %v7462_v19 = vld [vmem:[%s6775_s18 + $0x460] sm:$0xff]  ;;  %v7465_v43 = vld [vmem:[%s6775_s18 + $0x474] sm:$0xff]  ;;  %6131 = vmac.bf16.f32.vacc3 %v5384_v5, %v7452_v39  ;;  %6107 = vmac.bf16.f32.vacc2 %v5387_v51, %v7455_v58 }
  0xb4   : > { %v5420_v9 = vld [vmem:[%s6781_s25 + $0x960] sm:$0xff]  ;;  %v5423_v42 = vld [vmem:[%s6781_s25 + $0x974] sm:$0xff] }
  0xb5   : > { %v6232_v25 = vcombine.low %v6230_v20, %v6231_v24  ;;  %v6233_v33 = vcombine.high %v6230_v20, %v6231_v24  ;;  %v7472_v2 = vld [vmem:[%s6775_s18 + $0x4b0] sm:$0xff]  ;;  %v7475_v20 = vld [vmem:[%s6775_s18 + $0x4c4] sm:$0xff]  ;;  %6132 = vmac.bf16.f32.vacc3 %v5420_v9, %v7462_v19  ;;  %6108 = vmac.bf16.f32.vacc2 %v5423_v42, %v7465_v43 }
  0xb6   : > { %v5456_v24 = vld [vmem:[%s6781_s25 + $0x9b0] sm:$0xff] }
  0xb7   : > { %v6239_v37 = vrot.slane %v6232_v25, %v6897_v56  ;;  %v6245_v62 = vrot.slane %v6233_v33, %v6897_v56  ;;  %v5459_v25 = vld [vmem:[%s6781_s25 + $0x9c4] sm:$0xff]  ;;  %6133 = vmac.bf16.f32.vacc3 %v5456_v24, %v7472_v2  ;;  %v5023_v24 = vld [vmem:[%s6781_s25 + $0x380] ss:$20 sps:$4 sm:$0xff]  }
  0xb8   : > { %v7482_v33 = vld [vmem:[%s6775_s18 + $0x10] ss:$20 sps:$4 sm:$0xff]   ;;  %6109 = vmac.bf16.f32.vacc2 %v5459_v25, %v7475_v20  ;;  %v7512_v25 = vld [vmem:[%s6775_s18 + $0x1a0] ss:$20 sps:$4 sm:$0xff]  }
  0xb9   : > { %v2361_v35 = vpack.c.bf16 %v6245_v62, %v6239_v37  ;;  %v4915_v37 = vld [vmem:[%s6781_s25 + $0x290] ss:$20 sps:$4 sm:$0xff]   ;;  %v7486_v62 = vld [vmem:[%s6775_s18 + $0x60] ss:$20 sps:$4 sm:$0xff]   ;;  %v6134_v23 = vmovacc.add.low.vacc3 }
  0xba   : > { %v4987_v41 = vld [vmem:[%s6781_s25 + $0x330] ss:$20 sps:$4 sm:$0xff]   ;;  %v6135_v34 = vmovacc.add.high.vacc3  ;;  %v6110_v4 = vmovacc.add.low.vacc2  ;;  %6150 = vmul.bf16.f32.vacc0 %v4915_v37, %v7482_v33  ;;  %v5167_v37 = vld [vmem:[%s6781_s25 + $0x4c0] ss:$20 sps:$4 sm:$0xff]  }
  0xbb   : > { %5485 = vmatpush3.bf16.msra.mxu0 %v2361_v35  ;;  %v7492_v35 = vld [vmem:[%s6775_s18 + $0xb0] ss:$20 sps:$4 sm:$0xff]   ;;  %v6111_v53 = vmovacc.add.high.vacc2  ;;  %6151 = vmac.bf16.f32.vacc0 %v4951_v52, %v7486_v62 }
  0xbc   : > { %5486 = vmatprep.subr.bf16.mxu0 %v8115_v3  ;;  %v6136_v54 = vcombine.low %v6134_v23, %v6135_v34  ;;  %v6137_v46 = vcombine.high %v6134_v23, %v6135_v34  ;;  %v7506_v23 = vld [vmem:[%s6775_s18 + $0x150] ss:$20 sps:$4 sm:$0xff]   ;;  %6152 = vmac.bf16.f32.vacc0 %v4987_v41, %v7492_v35 }
  0xbd   : > { %v6112_v5 = vcombine.low %v6110_v4, %v6111_v53  ;;  %v6113_v51 = vcombine.high %v6110_v4, %v6111_v53  ;;  %v7516_v17 = vld [vmem:[%s6775_s18 + $0x1f0] ss:$20 sps:$4 sm:$0xff]   ;;  %v7521_v53 = vld [vmem:[%s6775_s18 + $0x240] ss:$20 sps:$4 sm:$0xff]   ;;  %6153 = vmac.bf16.f32.vacc0 %v5023_v24, %v7496_v7  ;;  %v5198_v24 = vld [vmem:[%s6781_s25 + $0x528] sm:$0xff] }
  0xbe   : > { %v6143_v49 = vrot.slane %v6136_v54, %v6897_v56  ;;  %v6149_v0 = vrot.slane %v6137_v46, %v6897_v56  ;;  %v5059_v54 = vld [vmem:[%s6781_s25 + $0x3d0] ss:$20 sps:$4 sm:$0xff]   ;;  %v5095_v46 = vld [vmem:[%s6781_s25 + $0x420] ss:$20 sps:$4 sm:$0xff]   ;;  %8161 = vst [vmem:[#allocation9_spill] sm:$0xff] %v7521_v53  ;;  %6054 = vmul.bf16.f32.vacc1 %v5198_v24, %v7273_v59  ;;  %v5414_v24 = vld [vmem:[%s6781_s25 + $0x708] sm:$0xff] }
  0xbf   : > { %v6119_v9 = vrot.slane %v6112_v5, %v6897_v56  ;;  %v6125_v42 = vrot.slane %v6113_v51, %v6897_v56  ;;  %v5131_v4 = vld [vmem:[%s6781_s25 + $0x470] ss:$20 sps:$4 sm:$0xff]   ;;  %6154 = vmac.bf16.f32.vacc0 %v5059_v54, %v7506_v23 }
  0xc0   : > { %6155 = vmac.bf16.f32.vacc0 %v5095_v46, %v7512_v25  ;;  %v5234_v46 = vld [vmem:[%s6781_s25 + $0x578] sm:$0xff] }
  0xc1   : > { %v4587_v34 = vpack.c.bf16 %v6125_v42, %v6149_v0  ;;  %6156 = vmac.bf16.f32.vacc0 %v5131_v4, %v7516_v17  ;;  %v5237_v4 = vld [vmem:[%s6781_s25 + $0x58c] sm:$0xff]  ;;  %6055 = vmac.bf16.f32.vacc1 %v5234_v46, %v7283_v60  ;;  %v4586_v59 = vpack.c.bf16 %v6119_v9, %v6143_v49  ;;  %v5417_v60 = vld [vmem:[%s6781_s25 + $0x71c] sm:$0xff] }
  0xc2   : > { %6157 = vmac.bf16.f32.vacc0 %v5167_v37, %v7521_v53  ;;  %v5270_v37 = vld [vmem:[%s6781_s25 + $0x5c8] sm:$0xff]  ;;  %v5273_v53 = vld [vmem:[%s6781_s25 + $0x5dc] sm:$0xff] }
  0xc3   : > { %4616 = vmatprep.subr.bf16.mxu1 %v4587_v34  ;;  %v5201_v34 = vld [vmem:[%s6781_s25 + $0x53c] sm:$0xff]  ;;  %6056 = vmac.bf16.f32.vacc1 %v5270_v37, %v7293_v32  ;;  %v5125_v37 = vld [vmem:[%s6781_s25 + $0x218] ss:$20 sps:$4 sm:$0xff]  }
  0xc4   : > { %v6158_v52 = vmovacc.add.low.vacc0  ;;  %6030 = vmul.bf16.f32.vacc3 %v5201_v34, %v7276_v16  ;;  %4617 = vmatpush1.bf16.msra.mxu1 %v4586_v59  ;;  %v5450_v16 = vld [vmem:[%s6781_s25 + $0x758] sm:$0xff] }
  0xc5   : > { %v6159_v41 = vmovacc.add.high.vacc0  ;;  %6031 = vmac.bf16.f32.vacc3 %v5237_v4, %v7288_v21  ;;  %v5453_v21 = vld [vmem:[%s6781_s25 + $0x76c] sm:$0xff]  ;;  %v4945_v32 = vld [vmem:[%s6781_s25 + $0x88] ss:$20 sps:$4 sm:$0xff]   ;;  %v5267_v59 = vld [vmem:[%s6781_s25 + $0x5b4] sm:$0xff] }
  0xc6   : > { %6032 = vmac.bf16.f32.vacc3 %v5273_v53, %v7296_v36  ;;  %v315_v34 = vld [vmem:[%s6781_s25 + $0x38] ss:$20 sps:$4 sm:$0xff]   ;;  %v5089_v4 = vld [vmem:[%s6781_s25 + $0x1c8] ss:$20 sps:$4 sm:$0xff]  }
  0xc7   : > { %v6160_v0 = vcombine.low %v6158_v52, %v6159_v41  ;;  %v6161_v5 = vcombine.high %v6158_v52, %v6159_v41  ;;  %v5306_v52 = vld [vmem:[%s6781_s25 + $0x618] sm:$0xff]  ;;  %v5309_v41 = vld [vmem:[%s6781_s25 + $0x62c] sm:$0xff]  ;;  %6078 = vmul.bf16.f32.vacc0 %v315_v34, %v7353_v31  ;;  %v5375_v34 = vld [vmem:[%s6781_s25 + $0x6a4] sm:$0xff] }
  0xc8   : > { %6057 = vmac.bf16.f32.vacc1 %v5306_v52, %v7301_v61  ;;  %6033 = vmac.bf16.f32.vacc3 %v5309_v41, %v7304_v22  ;;  %v4981_v36 = vld [vmem:[%s6781_s25 + $0xd8] ss:$20 sps:$4 sm:$0xff]   ;;  %v5017_v61 = vld [vmem:[%s6781_s25 + $0x128] ss:$20 sps:$4 sm:$0xff]   ;;  %6079 = vmac.bf16.f32.vacc0 %v4945_v32, %v7359_v63 }
  0xc9   : > { %v6167_v51 = vrot.slane %v6160_v0, %v6897_v56  ;;  %v6173_v42 = vrot.slane %v6161_v5, %v6897_v56  ;;  %v5342_v0 = vld [vmem:[%s6781_s25 + $0x668] sm:$0xff]  ;;  %v5345_v5 = vld [vmem:[%s6781_s25 + $0x67c] sm:$0xff]  ;;  %6080 = vmac.bf16.f32.vacc0 %v4981_v36, %v7365_v55  ;;  %v5195_v31 = vld [vmem:[%s6781_s25 + $0x514] sm:$0xff] }
  0xca   : > { %6058 = vmac.bf16.f32.vacc1 %v5342_v0, %v7309_v48  ;;  %6034 = vmac.bf16.f32.vacc3 %v5345_v5, %v7316_v30  ;;  %v5053_v22 = vld [vmem:[%s6781_s25 + $0x178] ss:$20 sps:$4 sm:$0xff]   ;;  %v5161_v41 = vld [vmem:[%s6781_s25 + $0x268] ss:$20 sps:$4 sm:$0xff]   ;;  %6081 = vmac.bf16.f32.vacc0 %v5017_v61, %v7369_v27  ;;  %v309_v36 = vld [vmem:[%s6781_s25 + $0x10] ss:$20 sps:$4 sm:$0xff]  }
  0xcb   : > { %v2356_v54 = vpack.c.bf16 %v6173_v42, %v6167_v51  ;;  %v5378_v51 = vld [vmem:[%s6781_s25 + $0x6b8] sm:$0xff]  ;;  %v5381_v42 = vld [vmem:[%s6781_s25 + $0x6cc] sm:$0xff]  ;;  %6082 = vmac.bf16.f32.vacc0 %v5053_v22, %v7379_v57  ;;  %6006 = vmul.bf16.f32.vacc2 %v309_v36, %v7482_v33  ;;  %v8162_v33 = vld [vmem:[#allocation9_spill] sm:$0xff] }
  0xcc   : > { %6059 = vmac.bf16.f32.vacc1 %v5378_v51, %v7321_v29  ;;  %6035 = vmac.bf16.f32.vacc3 %v5381_v42, %v7327_v40  ;;  %6083 = vmac.bf16.f32.vacc0 %v5089_v4, %v7385_v8  ;;  %v5228_v8 = vld [vmem:[%s6781_s25 + $0x550] sm:$0xff]  ;;  %v5231_v51 = vld [vmem:[%s6781_s25 + $0x564] sm:$0xff] }
  0xcd   : > { %5487 = vmatpush3.bf16.msra.mxu0 %v2356_v54  ;;  %6060 = vmac.bf16.f32.vacc1 %v5414_v24, %v7333_v45  ;;  %6036 = vmac.bf16.f32.vacc3 %v5417_v60, %v7338_v6  ;;  %6084 = vmac.bf16.f32.vacc0 %v5125_v37, %v7390_v12  ;;  %v5264_v42 = vld [vmem:[%s6781_s25 + $0x5a0] sm:$0xff]  ;;  %v7655_v4 = vld [vmem:[%s6775_s18 + $0x314] sm:$0xff] }
  0xce   : > { %5488 = vmatprep.subr.bf16.mxu0 %v8115_v3  ;;  %6061 = vmac.bf16.f32.vacc1 %v5450_v16, %v7343_v15  ;;  %6037 = vmac.bf16.f32.vacc3 %v5453_v21, %v7348_v18  ;;  %v5192_v18 = vld [vmem:[%s6781_s25 + $0x500] sm:$0xff]  ;;  %6085 = vmac.bf16.f32.vacc0 %v5161_v41, %v7395_v13  ;;  %v5300_v13 = vld [vmem:[%s6781_s25 + $0x5f0] sm:$0xff] }
  0xcf   : > { %v5303_v24 = vld [vmem:[%s6781_s25 + $0x604] sm:$0xff]  ;;  %v5339_v16 = vld [vmem:[%s6781_s25 + $0x654] sm:$0xff] }
  0xd0   : > { %v6062_v49 = vmovacc.add.low.vacc1  ;;  %v6038_v40 = vmovacc.add.low.vacc3  ;;  %v6086_v63 = vmovacc.add.low.vacc0  ;;  %v5336_v60 = vld [vmem:[%s6781_s25 + $0x640] sm:$0xff]  ;;  %v5372_v21 = vld [vmem:[%s6781_s25 + $0x690] sm:$0xff] }
  0xd1   : > { %v6063_v48 = vmovacc.add.high.vacc1  ;;  %v6039_v45 = vmovacc.add.high.vacc3  ;;  %v6087_v55 = vmovacc.add.high.vacc0  ;;  %v5047_v61 = vld [vmem:[%s6781_s25 + $0x150] ss:$20 sps:$4 sm:$0xff]   ;;  %v7725_v36 = vld [vmem:[%s6775_s18 + $0x4f4] sm:$0xff] }
  0xd2   : > { %v5247_v37 = vld [vmem:[%s6781_s25 + $0x800] sm:$0xff]  ;;  %v7660_v41 = vld [vmem:[%s6775_s18 + $0x350] sm:$0xff] }
  0xd3   : > { %v6064_v9 = vcombine.low %v6062_v49, %v6063_v48  ;;  %v6065_v30 = vcombine.high %v6062_v49, %v6063_v48  ;;  %v6040_v54 = vcombine.low %v6038_v40, %v6039_v45  ;;  %v6041_v6 = vcombine.high %v6038_v40, %v6039_v45  ;;  %v5155_v40 = vld [vmem:[%s6781_s25 + $0x240] ss:$20 sps:$4 sm:$0xff]  }
  0xd4   : > { %v6088_v0 = vcombine.low %v6086_v63, %v6087_v55  ;;  %v6089_v5 = vcombine.high %v6086_v63, %v6087_v55  ;;  %5982 = vmul.bf16.f32.vacc0 %v5192_v18, %v7405_v28  ;;  %5958 = vmul.bf16.f32.vacc1 %v5195_v31, %v7408_v38  ;;  %v5408_v28 = vld [vmem:[%s6781_s25 + $0x6e0] sm:$0xff]  ;;  %v5444_v38 = vld [vmem:[%s6781_s25 + $0x730] sm:$0xff] }
  0xd5   : > { %v6071_v29 = vrot.slane %v6064_v9, %v6897_v56  ;;  %v6077_v53 = vrot.slane %v6065_v30, %v6897_v56  ;;  %v6047_v15 = vrot.slane %v6040_v54, %v6897_v56  ;;  %v6053_v46 = vrot.slane %v6041_v6, %v6897_v56  ;;  %v5083_v30 = vld [vmem:[%s6781_s25 + $0x1a0] ss:$20 sps:$4 sm:$0xff]   ;;  %v5214_v6 = vld [vmem:[%s6781_s25 + $0x7c4] sm:$0xff] }
  0xd6   : > { %v6095_v27 = vrot.slane %v6088_v0, %v6897_v56  ;;  %v6101_v57 = vrot.slane %v6089_v5, %v6897_v56  ;;  %5983 = vmac.bf16.f32.vacc0 %v5228_v8, %v7413_v44  ;;  %5959 = vmac.bf16.f32.vacc1 %v5231_v51, %v7416_v10  ;;  %v5411_v44 = vld [vmem:[%s6781_s25 + $0x6f4] sm:$0xff]  ;;  %v5447_v10 = vld [vmem:[%s6781_s25 + $0x744] sm:$0xff]  ;;  %v5580_v63 = vld [vmem:[%s8092_s2] sm:$0x7] }
  0xd7   : > { %v4582_v52 = vpack.c.bf16 %v6053_v46, %v6077_v53  ;;  %5984 = vmac.bf16.f32.vacc0 %v5264_v42, %v7422_v26  ;;  %v4581_v32 = vpack.c.bf16 %v6047_v15, %v6071_v29  ;;  %5960 = vmac.bf16.f32.vacc1 %v5267_v59, %v7425_v14  ;;  %v4939_v26 = vld [vmem:[%s6781_s25 + $0x60] ss:$20 sps:$4 sm:$0xff]   ;;  %v4975_v14 = vld [vmem:[%s6781_s25 + $0xb0] ss:$20 sps:$4 sm:$0xff]  }
  0xd8   : > { %v2351_v12 = vpack.c.bf16 %v6101_v57, %v6095_v27  ;;  %5985 = vmac.bf16.f32.vacc0 %v5300_v13, %v7430_v11  ;;  %5961 = vmac.bf16.f32.vacc1 %v5303_v24, %v7433_v47  ;;  %v5011_v11 = vld [vmem:[%s6781_s25 + $0x100] ss:$20 sps:$4 sm:$0xff]   ;;  %6007 = vmac.bf16.f32.vacc2 %v4939_v26, %v7486_v62  ;;  %v5119_v29 = vld [vmem:[%s6781_s25 + $0x1f0] ss:$20 sps:$4 sm:$0xff]  }
  0xd9   : > { %4618 = vmatprep.subr.bf16.mxu1 %v4582_v52  ;;  %5986 = vmac.bf16.f32.vacc0 %v5336_v60, %v7442_v1  ;;  %5962 = vmac.bf16.f32.vacc1 %v5339_v16, %v7445_v50  ;;  %6008 = vmac.bf16.f32.vacc2 %v4975_v14, %v7492_v35  ;;  %v7650_v15 = vld [vmem:[%s6775_s18 + $0x300] sm:$0xff]  ;;  %v5250_v52 = vld [vmem:[%s6781_s25 + $0x814] sm:$0xff]  ;;  %v8163_v5 = vmov 0  }
  0xda   : > { %5489 = vmatpush3.bf16.msra.mxu0 %v2351_v12  ;;  %4619 = vmatpush1.bf16.msra.mxu1 %v4581_v32  ;;  %5987 = vmac.bf16.f32.vacc0 %v5372_v21, %v7452_v39  ;;  %5963 = vmac.bf16.f32.vacc1 %v5375_v34, %v7455_v58  ;;  %6009 = vmac.bf16.f32.vacc2 %v5011_v11, %v7496_v7  ;;  %v7663_v18 = vld [vmem:[%s6775_s18 + $0x364] sm:$0xff]  ;;  %v5283_v31 = vld [vmem:[%s6781_s25 + $0x850] sm:$0xff] }
  0xdb   : > { %5490 = vmatprep.subr.bf16.mxu0 %v8115_v3  ;;  %5988 = vmac.bf16.f32.vacc0 %v5408_v28, %v7462_v19  ;;  %5964 = vmac.bf16.f32.vacc1 %v5411_v44, %v7465_v43  ;;  %6010 = vmac.bf16.f32.vacc2 %v5047_v61, %v7506_v23  ;;  %v5286_v55 = vld [vmem:[%s6781_s25 + $0x864] sm:$0xff]  ;;  %v7676_v27 = vld [vmem:[%s6775_s18 + $0x3b4] sm:$0xff] }
  0xdc   : > { %5989 = vmac.bf16.f32.vacc0 %v5444_v38, %v7472_v2  ;;  %5965 = vmac.bf16.f32.vacc1 %v5447_v10, %v7475_v20  ;;  %6011 = vmac.bf16.f32.vacc2 %v5083_v30, %v7512_v25  ;;  %v7639_v20 = vld [vmem:[%s6775_s18 + $0x2b0] sm:$0xff]  ;;  %v7645_v25 = vld [vmem:[%s6775_s18 + $0x2c4] sm:$0xff] }
  0xdd   : > { %6012 = vmac.bf16.f32.vacc2 %v5119_v29, %v7516_v17  ;;  %v5211_v17 = vld [vmem:[%s6781_s25 + $0x7b0] sm:$0xff]  ;;  %v7672_v0 = vld [vmem:[%s6775_s18 + $0x3a0] sm:$0xff]  ;;  %v7744_v29 = vld [vmem:[%s6775_s18 + $0x308] ss:$20 sps:$4 sm:$0xff]  }
  0xde   : > { %v5990_v47 = vmovacc.add.low.vacc0  ;;  %v5966_v19 = vmovacc.add.low.vacc1  ;;  %6013 = vmac.bf16.f32.vacc2 %v5155_v40, %v8162_v33  ;;  %v5319_v8 = vld [vmem:[%s6781_s25 + $0x8a0] sm:$0xff]  ;;  %v5322_v51 = vld [vmem:[%s6781_s25 + $0x8b4] sm:$0xff]  ;;  %5934 = vmul.bf16.f32.vacc3 %v5211_v17, %v7639_v20 }
  0xdf   : > { %v5991_v1 = vmovacc.add.high.vacc0  ;;  %v5967_v49 = vmovacc.add.high.vacc1  ;;  %5935 = vmac.bf16.f32.vacc3 %v5247_v37, %v7650_v15  ;;  %v7685_v12 = vld [vmem:[%s6775_s18 + $0x3f0] sm:$0xff]  ;;  %v5468_v42 = vld [vmem:[%s8092_s2 + $0x4] sm:$0x7]  ;;  %v7748_v40 = vld [vmem:[%s6775_s18 + $0x358] ss:$20 sps:$4 sm:$0xff]  }
  0xe0   : > { %v6014_v62 = vmovacc.add.low.vacc2  ;;  %v7691_v59 = vld [vmem:[%s6775_s18 + $0x404] sm:$0xff]  ;;  %v5355_v13 = vld [vmem:[%s6781_s25 + $0x8f0] sm:$0xff]  ;;  %5936 = vmac.bf16.f32.vacc3 %v5283_v31, %v7660_v41  ;;  %v5284_v33 = vld [vmem:[%s6781_s25 + $0x858] ss:$20 sps:$4 sm:$0xff]  }
  0xe1   : > { %v5992_v22 = vcombine.low %v5990_v47, %v5991_v1  ;;  %v5993_v50 = vcombine.high %v5990_v47, %v5991_v1  ;;  %v5968_v48 = vcombine.low %v5966_v19, %v5967_v49  ;;  %v5969_v43 = vcombine.high %v5966_v19, %v5967_v49  ;;  %v5358_v24 = vld [vmem:[%s6781_s25 + $0x904] sm:$0xff]  ;;  %v7703_v16 = vld [vmem:[%s6775_s18 + $0x454] sm:$0xff] }
  0xe2   : > { %v6015_v35 = vmovacc.add.high.vacc2  ;;  %v7699_v60 = vld [vmem:[%s6775_s18 + $0x440] sm:$0xff]  ;;  %v5394_v34 = vld [vmem:[%s6781_s25 + $0x954] sm:$0xff]  ;;  %5937 = vmac.bf16.f32.vacc3 %v5319_v8, %v7672_v0  ;;  %v7772_v37 = vld [vmem:[%s6775_s18 + $0x4e8] ss:$20 sps:$4 sm:$0xff]  }
  0xe3   : > { %v5999_v39 = vrot.slane %v5992_v22, %v6897_v56  ;;  %v6005_v58 = vrot.slane %v5993_v50, %v6897_v56  ;;  %v5975_v9 = vrot.slane %v5968_v48, %v6897_v56  ;;  %v5981_v2 = vrot.slane %v5969_v43, %v6897_v56  ;;  %v5391_v21 = vld [vmem:[%s6781_s25 + $0x940] sm:$0xff]  ;;  %v7712_v32 = vld [vmem:[%s6775_s18 + $0x490] sm:$0xff]  ;;  %v7767_v17 = vld [vmem:[%s6775_s18 + $0x498] ss:$20 sps:$4 sm:$0xff]  }
  0xe4   : > { %v6016_v45 = vcombine.low %v6014_v62, %v6015_v35  ;;  %v6017_v54 = vcombine.high %v6014_v62, %v6015_v35  ;;  %5910 = vmul.bf16.f32.vacc2 %v5214_v6, %v7645_v25  ;;  %v7715_v28 = vld [vmem:[%s6775_s18 + $0x4a4] sm:$0xff]  ;;  %v5427_v44 = vld [vmem:[%s6781_s25 + $0x990] sm:$0xff]  ;;  %5938 = vmac.bf16.f32.vacc3 %v5355_v13, %v7685_v12  ;;  %v5241_v13 = vld [vmem:[%s6781_s25 + $0x7d8] sm:$0xff] }
  0xe5   : > { %v4577_v53 = vpack.c.bf16 %v5981_v2, %v6005_v58  ;;  %v4576_v57 = vpack.c.bf16 %v5975_v9, %v5999_v39  ;;  %5911 = vmac.bf16.f32.vacc2 %v5250_v52, %v7655_v4  ;;  %v5430_v38 = vld [vmem:[%s6781_s25 + $0x9a4] sm:$0xff]  ;;  %v5466_v14 = vld [vmem:[%s6781_s25 + $0x9f4] sm:$0xff]  ;;  %5939 = vmac.bf16.f32.vacc3 %v5391_v21, %v7699_v60  ;;  %v7790_v8 = vld [vmem:[%s6775_s18 + $0x2ec] sm:$0xff] }
  0xe6   : > { %v6023_v7 = vrot.slane %v6016_v45, %v6897_v56  ;;  %v6029_v23 = vrot.slane %v6017_v54, %v6897_v56  ;;  %5912 = vmac.bf16.f32.vacc2 %v5286_v55, %v7663_v18  ;;  %v7722_v10 = vld [vmem:[%s6775_s18 + $0x4e0] sm:$0xff]  ;;  %5940 = vmac.bf16.f32.vacc3 %v5427_v44, %v7712_v32  ;;  %v7740_v9 = vld [vmem:[%s6775_s18 + $0x2b8] ss:$20 sps:$4 sm:$0xff]   ;;  %v7752_v62 = vld [vmem:[%s6775_s18 + $0x3a8] ss:$20 sps:$4 sm:$0xff]  }
  0xe7   : > { %4620 = vmatprep.subr.bf16.mxu1 %v4577_v53  ;;  %5913 = vmac.bf16.f32.vacc2 %v5322_v51, %v7676_v27  ;;  %v5463_v26 = vld [vmem:[%s6781_s25 + $0x9e0] sm:$0xff]  ;;  %v5212_v2 = vld [vmem:[%s6781_s25 + $0x7b8] ss:$20 sps:$4 sm:$0xff]   ;;  %v5248_v53 = vld [vmem:[%s6781_s25 + $0x808] ss:$20 sps:$4 sm:$0xff]  }
  0xe8   : > { %v2346_v46 = vpack.c.bf16 %v6029_v23, %v6023_v7  ;;  %4621 = vmatpush1.bf16.msra.mxu1 %v4576_v57  ;;  %5914 = vmac.bf16.f32.vacc2 %v5358_v24, %v7691_v59  ;;  %5941 = vmac.bf16.f32.vacc3 %v5463_v26, %v7722_v10  ;;  %v5320_v35 = vld [vmem:[%s6781_s25 + $0x8a8] ss:$20 sps:$4 sm:$0xff]   ;;  %v7756_v45 = vld [vmem:[%s6775_s18 + $0x3f8] ss:$20 sps:$4 sm:$0xff]   ;;  %5886 = vmul.bf16.f32.vacc1 %v5212_v2, %v7740_v9 }
  0xe9   : > { %5496 = vmatprep.subr.bf16.mxu1 %v8115_v3  ;;  %5915 = vmac.bf16.f32.vacc2 %v5394_v34, %v7703_v16  ;;  %5887 = vmac.bf16.f32.vacc1 %v5248_v53, %v7744_v29  ;;  %v5356_v54 = vld [vmem:[%s6781_s25 + $0x8f8] ss:$20 sps:$4 sm:$0xff]   ;;  %v7762_v7 = vld [vmem:[%s6775_s18 + $0x448] ss:$20 sps:$4 sm:$0xff]  }
  0xea   : > { %5491 = vmatpush3.bf16.msra.mxu0 %v2346_v46  ;;  %5916 = vmac.bf16.f32.vacc2 %v5430_v38, %v7715_v28  ;;  %v5942_v11 = vmovacc.add.low.vacc3  ;;  %5888 = vmac.bf16.f32.vacc1 %v5284_v33, %v7748_v40  ;;  %v5392_v23 = vld [vmem:[%s6781_s25 + $0x948] ss:$20 sps:$4 sm:$0xff]   ;;  %v5428_v46 = vld [vmem:[%s6781_s25 + $0x998] ss:$20 sps:$4 sm:$0xff]  }
  0xeb   : > { %5469 = vmatmul.mubr.msk.bf16.vlgmr.msra.gmra.mxu1 %vm2368_vm0, %v5468_v42  ;;  %v5943_v61 = vmovacc.add.high.vacc3  ;;  %5917 = vmac.bf16.f32.vacc2 %v5466_v14, %v7725_v36  ;;  %5889 = vmac.bf16.f32.vacc1 %v5320_v35, %v7752_v62  ;;  %v5464_v52 = vld [vmem:[%s6781_s25 + $0x9e8] ss:$20 sps:$4 sm:$0xff]   ;;  %v5244_v14 = vld [vmem:[%s6781_s25 + $0x7ec] sm:$0xff] }
  0xec   : > { %5504 = vmatprep.mubr.msk.bf16.mxu1 %vm6661_vm1, %v8115_v3  ;;  %5890 = vmac.bf16.f32.vacc1 %v5356_v54, %v7756_v45  ;;  %v7777_v31 = vld [vmem:[%s6775_s18 + $0x288] sm:$0xff]  ;;  %v7786_v57 = vld [vmem:[%s6775_s18 + $0x2d8] sm:$0xff] }
  0xed   : > { %5493 = vmatmul.mubr.msk.bf16.vlgmr.msra.gmra.mxu0 %vm2368_vm0, %v5580_v63  ;;  %v5944_v47 = vcombine.low %v5942_v11, %v5943_v61  ;;  %v5945_v1 = vcombine.high %v5942_v11, %v5943_v61  ;;  %v5918_v39 = vmovacc.add.low.vacc2  ;;  %v7780_v63 = vld [vmem:[%s6775_s18 + $0x29c] sm:$0xff]  ;;  %5891 = vmac.bf16.f32.vacc1 %v5392_v23, %v7762_v7  ;;  %v5205_v55 = vld [vmem:[%s6781_s25 + $0x788] sm:$0xff] }
  0xee   : > { %4679 = vmatprep.mubr.bf16.mxu0 %v8163_v5  ;;  %v5919_v58 = vmovacc.add.high.vacc2  ;;  %v5208_v5 = vld [vmem:[%s6781_s25 + $0x79c] sm:$0xff]  ;;  %5892 = vmac.bf16.f32.vacc1 %v5428_v46, %v7767_v17  ;;  %v7803_v11 = vld [vmem:[%s6775_s18 + $0x328] sm:$0xff]  ;;  %5862 = vmul.bf16.f32.vacc0 %v5205_v55, %v7777_v31 }
  0xef   : > { %v5951_v22 = vrot.slane %v5944_v47, %v6897_v56  ;;  %v5957_v50 = vrot.slane %v5945_v1, %v6897_v56  ;;  %5893 = vmac.bf16.f32.vacc1 %v5464_v52, %v7772_v37  ;;  %v7811_v1 = vld [vmem:[%s6775_s18 + $0x33c] sm:$0xff]  ;;  %v5316_v53 = vld [vmem:[%s6781_s25 + $0x88c] sm:$0xff]  ;;  %5863 = vmac.bf16.f32.vacc0 %v5241_v13, %v7786_v57 }
  0xf0   : > { %v5920_v19 = vcombine.low %v5918_v39, %v5919_v58  ;;  %v5921_v49 = vcombine.high %v5918_v39, %v5919_v58  ;;  %v7841_v33 = vld [vmem:[%s6775_s18 + $0x3c8] sm:$0xff]  ;;  %5838 = vmul.bf16.f32.vacc3 %v5208_v5, %v7780_v63  ;;  %v7847_v35 = vld [vmem:[%s6775_s18 + $0x3dc] sm:$0xff] }
  0xf1   : > { %v5894_v24 = vmovacc.add.low.vacc1  ;;  %5839 = vmac.bf16.f32.vacc3 %v5244_v14, %v7790_v8  ;;  %v5349_v54 = vld [vmem:[%s6781_s25 + $0x8c8] sm:$0xff]  ;;  %v5352_v23 = vld [vmem:[%s6781_s25 + $0x8dc] sm:$0xff] }
  0xf2   : > { %v5927_v48 = vrot.slane %v5920_v19, %v6897_v56  ;;  %v5933_v43 = vrot.slane %v5921_v49, %v6897_v56  ;;  %v5895_v21 = vmovacc.add.high.vacc1  ;;  %v7816_v49 = vld [vmem:[%s6775_s18 + $0x378] sm:$0xff]  ;;  %v7857_v46 = vld [vmem:[%s6775_s18 + $0x42c] sm:$0xff] }
  0xf3   : > { %v5385_v52 = vld [vmem:[%s6781_s25 + $0x918] sm:$0xff]  ;;  %v5388_v55 = vld [vmem:[%s6781_s25 + $0x92c] sm:$0xff] }
  0xf4   : > { %v4594_v30 = vpack.c.bf16 %v5933_v43, %v5957_v50  ;;  %v4593_v6 = vpack.c.bf16 %v5927_v48, %v5951_v22  ;;  %v5896_v34 = vcombine.low %v5894_v24, %v5895_v21  ;;  %v5897_v44 = vcombine.high %v5894_v24, %v5895_v21  ;;  %v5277_v22 = vld [vmem:[%s6781_s25 + $0x828] sm:$0xff]  ;;  %v5280_v50 = vld [vmem:[%s6781_s25 + $0x83c] sm:$0xff] }
  0xf5   : > { %v7819_v48 = vld [vmem:[%s6775_s18 + $0x38c] sm:$0xff]  ;;  %5864 = vmac.bf16.f32.vacc0 %v5277_v22, %v7803_v11  ;;  %5840 = vmac.bf16.f32.vacc3 %v5280_v50, %v7811_v1  ;;  %v7867_v13 = vld [vmem:[%s6775_s18 + $0x47c] sm:$0xff] }
  0xf6   : > { %4655 = vmatprep.subr.bf16.mxu0 %v4594_v30  ;;  %v5903_v38 = vrot.slane %v5896_v34, %v6897_v56  ;;  %v5909_v26 = vrot.slane %v5897_v44, %v6897_v56  ;;  %v5313_v30 = vld [vmem:[%s6781_s25 + $0x878] sm:$0xff]  ;;  %v7863_v5 = vld [vmem:[%s6775_s18 + $0x468] sm:$0xff]  ;;  %5841 = vmac.bf16.f32.vacc3 %v5316_v53, %v7819_v48 }
  0xf7   : > { %4656 = vmatpush1.bf16.msra.mxu0 %v4593_v6  ;;  %v7853_v6 = vld [vmem:[%s6775_s18 + $0x418] sm:$0xff]  ;;  %5865 = vmac.bf16.f32.vacc0 %v5313_v30, %v7816_v49  ;;  %v5421_v24 = vld [vmem:[%s6781_s25 + $0x968] sm:$0xff]  ;;  %5842 = vmac.bf16.f32.vacc3 %v5352_v23, %v7847_v35 }
  0xf8   : > { %v4595_v19 = vpack.c.bf16 %v5909_v26, %v5903_v38  ;;  %v5424_v21 = vld [vmem:[%s6781_s25 + $0x97c] sm:$0xff]  ;;  %5866 = vmac.bf16.f32.vacc0 %v5349_v54, %v7841_v33  ;;  %v7877_v44 = vld [vmem:[%s6775_s18 + $0x4cc] sm:$0xff]  ;;  %5843 = vmac.bf16.f32.vacc3 %v5388_v55, %v7857_v46 }
  0xf9   : > { %v7873_v34 = vld [vmem:[%s6775_s18 + $0x4b8] sm:$0xff]  ;;  %v5460_v26 = vld [vmem:[%s6781_s25 + $0x9cc] sm:$0xff]  ;;  %5867 = vmac.bf16.f32.vacc0 %v5385_v52, %v7853_v6  ;;  %5844 = vmac.bf16.f32.vacc3 %v5424_v21, %v7867_v13 }
  0xfa   : > { %5497 = vmatpush3.bf16.msra.mxu1 %v4595_v19  ;;  %v5457_v38 = vld [vmem:[%s6781_s25 + $0x9b8] sm:$0xff]  ;;  %5868 = vmac.bf16.f32.vacc0 %v5421_v24, %v7863_v5  ;;  %5845 = vmac.bf16.f32.vacc3 %v5460_v26, %v7877_v44  ;;  %v7892_v52 = vld [vmem:[%s6775_s18 + $0x290] ss:$20 sps:$4 sm:$0xff]   ;;  %v7896_v24 = vld [vmem:[%s6775_s18 + $0x2e0] ss:$20 sps:$4 sm:$0xff]  }
  0xfb   : > { %5498 = vmatprep.subr.bf16.mxu1 %v8115_v3  ;;  %5869 = vmac.bf16.f32.vacc0 %v5457_v38, %v7873_v34  ;;  %v5206_v55 = vld [vmem:[%s6781_s25 + $0x790] ss:$20 sps:$4 sm:$0xff]   ;;  %v5242_v38 = vld [vmem:[%s6781_s25 + $0x7e0] ss:$20 sps:$4 sm:$0xff]  }
  0xfc   : > { %v7900_v26 = vld [vmem:[%s6775_s18 + $0x330] ss:$20 sps:$4 sm:$0xff]   ;;  %5814 = vmul.bf16.f32.vacc2 %v5206_v55, %v7892_v52  ;;  %v7924_v55 = vld [vmem:[%s6775_s18 + $0x4c0] ss:$20 sps:$4 sm:$0xff]  }
  0xfd   : > { %v5870_v14 = vmovacc.add.low.vacc0  ;;  %5815 = vmac.bf16.f32.vacc2 %v5242_v38, %v7896_v24  ;;  %v5199_v38 = vld [vmem:[%s6781_s25 + $0x530] sm:$0xff]  ;;  %v5202_v3 = vld [vmem:[%s6781_s25 + $0x544] sm:$0xff] }
  0xfe   : > { %v5871_v22 = vmovacc.add.high.vacc0  ;;  %5790 = vmul.bf16.f32.vacc1 %v5199_v38, %v7639_v20  ;;  %v5451_v20 = vld [vmem:[%s6781_s25 + $0x760] sm:$0xff]  ;;  %v5452_v38 = vld [vmem:[%s6781_s25 + $0x768] ss:$20 sps:$4 sm:$0xff]  }
 0x100   : > { %v5872_v50 = vcombine.low %v5870_v14, %v5871_v22  ;;  %5766 = vmul.bf16.f32.vacc0 %v5202_v3, %v7645_v25 }
 0x161   : > { %v7793_v51 = vpop.f32.mrf.mxu0 }
 0x162   : > { %8164 = vst [vmem:[#allocation10_spill] sm:$0xff] %v7793_v51 }
 0x163   : > { %v7806_v61 = vpop.f32.mrf.mxu0 }
 0x164   : > { %8166 = vst [vmem:[#allocation12_spill] sm:$0xff] %v7806_v61  ;;  %v5271_v61 = vld [vmem:[%s6781_s25 + $0x5d0] sm:$0xff] }
 0x165   : > { %v2410_v39 = vpop.f32.mrf.mxu0 }
 0x166   : > { %v5873_v39 = vcombine.high %v5870_v14, %v5871_v22  ;;  %v5278_v14 = vld [vmem:[%s6781_s25 + $0x830] ss:$20 sps:$4 sm:$0xff]   ;;  %v7904_v22 = vld [vmem:[%s6775_s18 + $0x380] ss:$20 sps:$4 sm:$0xff]  }
 0x167   : > { %v2411_v43 = vpop.f32.mrf.mxu0  ;;  %5816 = vmac.bf16.f32.vacc2 %v5278_v14, %v7900_v26  ;;  %v5238_v14 = vld [vmem:[%s6781_s25 + $0x594] sm:$0xff] }
 0x168   : > { %v5885_v19 = vrot.slane %v5873_v39, %v6897_v56  ;;  %v5846_v43 = vmovacc.add.low.vacc3  ;;  %v7908_v39 = vld [vmem:[%s6775_s18 + $0x3d0] ss:$20 sps:$4 sm:$0xff]   ;;  %5767 = vmac.bf16.f32.vacc0 %v5238_v14, %v7655_v4  ;;  %v5193_v14 = vld [vmem:[%s6781_s25 + $0x508] sm:$0xff] }
 0x169   : > { %8168 = vst [vmem:[#allocation14_spill] sm:$0xff] %v7908_v39 }
 0x16c   : > { %v7795_v42 = vpop.f32.mrf.mxu1 }
 0x16d   : > { %8165 = vst [vmem:[#allocation11_spill] sm:$0xff] %v7795_v42 }
 0x16e   : > { %v7808_v47 = vpop.f32.mrf.mxu1 }
 0x16f   : > { %8167 = vst [vmem:[#allocation13_spill] sm:$0xff] %v7808_v47  ;;  %v5235_v47 = vld [vmem:[%s6781_s25 + $0x580] sm:$0xff] }
 0x170   : > { %v2451_v58 = vpop.f32.mrf.mxu1  ;;  %5791 = vmac.bf16.f32.vacc1 %v5235_v47, %v7650_v15  ;;  %v5454_v15 = vld [vmem:[%s6781_s25 + $0x774] sm:$0xff] }
 0x171   : > { %v5879_v58 = vrot.slane %v5872_v50, %v6897_v56  ;;  %v5314_v50 = vld [vmem:[%s6781_s25 + $0x880] ss:$20 sps:$4 sm:$0xff]   ;;  %5792 = vmac.bf16.f32.vacc1 %v5271_v61, %v7660_v41  ;;  %v5272_v61 = vld [vmem:[%s6781_s25 + $0x5d8] ss:$20 sps:$4 sm:$0xff]  }
 0x172   : > { %v2452_v2 = vpop.f32.mrf.mxu1  ;;  %5817 = vmac.bf16.f32.vacc2 %v5314_v50, %v7904_v22 }
 0x173   : > { %v5847_v2 = vmovacc.add.high.vacc3 }
 0x175   : > { %v5848_v30 = vcombine.low %v5846_v43, %v5847_v2  ;;  %v5849_v53 = vcombine.high %v5846_v43, %v5847_v2  ;;  %v7914_v43 = vld [vmem:[%s6775_s18 + $0x420] ss:$20 sps:$4 sm:$0xff]  }
 0x176   : > { %8169 = vst [vmem:[#allocation15_spill] sm:$0xff] %v7914_v43  ;;  %v5386_v2 = vld [vmem:[%s6781_s25 + $0x920] ss:$20 sps:$4 sm:$0xff]  }
 0x177   : > { %v5855_v54 = vrot.slane %v5848_v30, %v6897_v56  ;;  %v5861_v23 = vrot.slane %v5849_v53, %v6897_v56  ;;  %v7919_v30 = vld [vmem:[%s6775_s18 + $0x470] ss:$20 sps:$4 sm:$0xff]  }
 0x178   : > { %8170 = vst [vmem:[#allocation16_spill] sm:$0xff] %v7919_v30 }
 0x179   : > { %v4589_v21 = vpack.c.bf16 %v5861_v23, %v5885_v19  ;;  %v5350_v19 = vld [vmem:[%s6781_s25 + $0x8d0] ss:$20 sps:$4 sm:$0xff]   ;;  %v4588_v53 = vpack.c.bf16 %v5855_v54, %v5879_v58 }
 0x17a   : > { %v5422_v23 = vld [vmem:[%s6781_s25 + $0x970] ss:$20 sps:$4 sm:$0xff]   ;;  %5818 = vmac.bf16.f32.vacc2 %v5350_v19, %v7908_v39 }
 0x17b   : > { %4657 = vmatprep.subr.bf16.mxu0 %v4589_v21  ;;  %v5458_v21 = vld [vmem:[%s6781_s25 + $0x9c0] ss:$20 sps:$4 sm:$0xff]   ;;  %5819 = vmac.bf16.f32.vacc2 %v5386_v2, %v7914_v43  ;;  %v5274_v58 = vld [vmem:[%s6781_s25 + $0x5e4] sm:$0xff] }
 0x17c   : > { %4658 = vmatpush1.bf16.msra.mxu0 %v4588_v53  ;;  %5820 = vmac.bf16.f32.vacc2 %v5422_v23, %v7919_v30  ;;  %v5307_v54 = vld [vmem:[%s6781_s25 + $0x620] sm:$0xff]  ;;  %v5310_v43 = vld [vmem:[%s6781_s25 + $0x634] sm:$0xff]  ;;  %5768 = vmac.bf16.f32.vacc0 %v5274_v58, %v7663_v18 }
 0x17d   : > { %5821 = vmac.bf16.f32.vacc2 %v5458_v21, %v7924_v55  ;;  %v5343_v39 = vld [vmem:[%s6781_s25 + $0x670] sm:$0xff]  ;;  %v5346_v30 = vld [vmem:[%s6781_s25 + $0x684] sm:$0xff]  ;;  %5793 = vmac.bf16.f32.vacc1 %v5307_v54, %v7672_v0  ;;  %5769 = vmac.bf16.f32.vacc0 %v5310_v43, %v7676_v27  ;;  %v5196_v54 = vld [vmem:[%s6781_s25 + $0x51c] sm:$0xff] }
 0x17e   : > { %v5379_v21 = vld [vmem:[%s6781_s25 + $0x6c0] sm:$0xff]  ;;  %5794 = vmac.bf16.f32.vacc1 %v5343_v39, %v7685_v12  ;;  %5770 = vmac.bf16.f32.vacc0 %v5346_v30, %v7691_v59  ;;  %v5344_v39 = vld [vmem:[%s6781_s25 + $0x678] ss:$20 sps:$4 sm:$0xff]   ;;  %v5380_v43 = vld [vmem:[%s6781_s25 + $0x6c8] ss:$20 sps:$4 sm:$0xff]  }
 0x17f   : > { %v5822_v50 = vmovacc.add.low.vacc2  ;;  %5795 = vmac.bf16.f32.vacc1 %v5379_v21, %v7699_v60  ;;  %v5416_v30 = vld [vmem:[%s6781_s25 + $0x718] ss:$20 sps:$4 sm:$0xff]  }
 0x180   : > { %v5823_v53 = vmovacc.add.high.vacc2 }
 0x182   : > { %v5824_v19 = vcombine.low %v5822_v50, %v5823_v53  ;;  %v5825_v42 = vcombine.high %v5822_v50, %v5823_v53  ;;  %v5382_v50 = vld [vmem:[%s6781_s25 + $0x6d4] sm:$0xff]  ;;  %v8171_v53 = vmov 0.0   ;;  %5718 = vmul.bf16.f32.vacc2 %v5193_v14, %v7777_v31 }
 0x183   : > { %5771 = vmac.bf16.f32.vacc0 %v5382_v50, %v7703_v16  ;;  %v5445_v31 = vld [vmem:[%s6781_s25 + $0x738] sm:$0xff] }
 0x184   : > { %v5831_v51 = vrot.slane %v5824_v19, %v6897_v56  ;;  %v5837_v2 = vrot.slane %v5825_v42, %v6897_v56  ;;  %v5415_v42 = vld [vmem:[%s6781_s25 + $0x710] sm:$0xff]  ;;  %v5229_v19 = vld [vmem:[%s6781_s25 + $0x558] sm:$0xff] }
 0x185   : > { %5796 = vmac.bf16.f32.vacc1 %v5415_v42, %v7712_v32  ;;  %5719 = vmac.bf16.f32.vacc2 %v5229_v19, %v7786_v57  ;;  %v5448_v57 = vld [vmem:[%s6781_s25 + $0x74c] sm:$0xff] }
 0x186   : > { %v4590_v23 = vpack.c.bf16 %v5837_v2, %v5831_v51  ;;  %v5418_v51 = vld [vmem:[%s6781_s25 + $0x724] sm:$0xff]  ;;  %5797 = vmac.bf16.f32.vacc1 %v5451_v20, %v7722_v10  ;;  %v5268_v2 = vld [vmem:[%s6781_s25 + $0x5bc] sm:$0xff] }
 0x187   : > { %5772 = vmac.bf16.f32.vacc0 %v5418_v51, %v7715_v28  ;;  %v5200_v28 = vld [vmem:[%s6781_s25 + $0x538] ss:$20 sps:$4 sm:$0xff]   ;;  %v5236_v10 = vld [vmem:[%s6781_s25 + $0x588] ss:$20 sps:$4 sm:$0xff]  }
 0x188   : > { %5499 = vmatpush3.bf16.msra.mxu1 %v4590_v23  ;;  %v5798_v3 = vmovacc.add.low.vacc1  ;;  %5773 = vmac.bf16.f32.vacc0 %v5454_v15, %v7725_v36  ;;  %v5308_v36 = vld [vmem:[%s6781_s25 + $0x628] ss:$20 sps:$4 sm:$0xff]   ;;  %5742 = vmul.bf16.f32.vacc3 %v5200_v28, %v7740_v9  ;;  %v5232_v9 = vld [vmem:[%s6781_s25 + $0x56c] sm:$0xff] }
 0x189   : > { %5500 = vmatprep.subr.bf16.mxu1 %v8171_v53  ;;  %v5799_v25 = vmovacc.add.high.vacc1  ;;  %5743 = vmac.bf16.f32.vacc3 %v5236_v10, %v7744_v29  ;;  %v5265_v29 = vld [vmem:[%s6781_s25 + $0x5a8] sm:$0xff] }
 0x18a   : > { %v5774_v27 = vmovacc.add.low.vacc0  ;;  %5744 = vmac.bf16.f32.vacc3 %v5272_v61, %v7748_v40  ;;  %v5301_v40 = vld [vmem:[%s6781_s25 + $0x5f8] sm:$0xff]  ;;  %v5304_v23 = vld [vmem:[%s6781_s25 + $0x60c] sm:$0xff]  ;;  %5720 = vmac.bf16.f32.vacc2 %v5265_v29, %v7803_v11 }
 0x18b   : > { %v5800_v4 = vcombine.low %v5798_v3, %v5799_v25  ;;  %v5801_v41 = vcombine.high %v5798_v3, %v5799_v25  ;;  %v5775_v12 = vmovacc.add.high.vacc0  ;;  %5745 = vmac.bf16.f32.vacc3 %v5308_v36, %v7752_v62  ;;  %v5337_v51 = vld [vmem:[%s6781_s25 + $0x648] sm:$0xff]  ;;  %v5412_v25 = vld [vmem:[%s6781_s25 + $0x6fc] sm:$0xff]  ;;  %v8175_v61 = vld [vmem:[#allocation11_spill] sm:$0xff] }
 0x18c   : > { %5746 = vmac.bf16.f32.vacc3 %v5344_v39, %v7756_v45  ;;  %5694 = vmul.bf16.f32.vacc1 %v5196_v54, %v7780_v63  ;;  %v5376_v15 = vld [vmem:[%s6781_s25 + $0x6ac] sm:$0xff]  ;;  %5721 = vmac.bf16.f32.vacc2 %v5301_v40, %v7816_v49  ;;  %v8176_v36 = vld [vmem:[#allocation12_spill] sm:$0xff]  ;;  %v2366_v40 = vld [vmem:[%s7824_s8 + $0x20] sm:$0x3f] }
 0x18d   : > { %v5807_v18 = vrot.slane %v5800_v4, %v6897_v56  ;;  %v5813_v0 = vrot.slane %v5801_v41, %v6897_v56  ;;  %v5776_v59 = vcombine.low %v5774_v27, %v5775_v12  ;;  %v5777_v60 = vcombine.high %v5774_v27, %v5775_v12  ;;  %v5409_v3 = vld [vmem:[%s6781_s25 + $0x6e8] sm:$0xff]  ;;  %v5266_v41 = vld [vmem:[%s6781_s25 + $0x5b0] ss:$20 sps:$4 sm:$0xff]   ;;  %v5446_v12 = vld [vmem:[%s6781_s25 + $0x740] ss:$20 sps:$4 sm:$0xff]  }
 0x18e   : > { %5747 = vmac.bf16.f32.vacc3 %v5380_v43, %v7762_v7  ;;  %5695 = vmac.bf16.f32.vacc1 %v5232_v9, %v7790_v8  ;;  %5722 = vmac.bf16.f32.vacc2 %v5337_v51, %v7841_v33  ;;  %v5410_v27 = vld [vmem:[%s6781_s25 + $0x6f0] ss:$20 sps:$4 sm:$0xff]   ;;  %v2363_v28 = vld [vmem:[%s7824_s8 + $0x8] sm:$0x3f] }
 0x18f   : > { %v5783_v16 = vrot.slane %v5776_v59, %v6897_v56  ;;  %v5789_v32 = vrot.slane %v5777_v60, %v6897_v56  ;;  %5748 = vmac.bf16.f32.vacc3 %v5416_v30, %v7767_v17  ;;  %v5340_v17 = vld [vmem:[%s6781_s25 + $0x65c] sm:$0xff]  ;;  %5696 = vmac.bf16.f32.vacc1 %v5268_v2, %v7811_v1  ;;  %v2364_v60 = vld [vmem:[%s7824_s8 + $0x10] sm:$0x3f]  ;;  %v8174_v10 = vld [vmem:[#allocation10_spill] sm:$0xff] }
 0x190   : > { %5749 = vmac.bf16.f32.vacc3 %v5452_v38, %v7772_v37  ;;  %v5373_v37 = vld [vmem:[%s6781_s25 + $0x698] sm:$0xff]  ;;  %5697 = vmac.bf16.f32.vacc1 %v5304_v23, %v7819_v48  ;;  %v2362_v59 = vld [vmem:[%s7824_s8] sm:$0x3f]  ;;  %v2495_v39 = vadd.f32 %v8176_v36, %v2363_v28 }
 0x191   : > { %v4584_v47 = vpack.c.bf16 %v5789_v32, %v5813_v0  ;;  %v4583_v58 = vpack.c.bf16 %v5783_v16, %v5807_v18  ;;  %5698 = vmac.bf16.f32.vacc1 %v5340_v17, %v7847_v35  ;;  %5723 = vmac.bf16.f32.vacc2 %v5373_v37, %v7853_v6  ;;  %v5338_v18 = vld [vmem:[%s6781_s25 + $0x650] ss:$20 sps:$4 sm:$0xff]   ;;  %v5374_v0 = vld [vmem:[%s6781_s25 + $0x6a0] ss:$20 sps:$4 sm:$0xff]   ;;  %v8172_v32 = vld [vmem:[#allocation14_spill] sm:$0xff] }
 0x192   : > { %v5750_v62 = vmovacc.add.low.vacc3  ;;  %5699 = vmac.bf16.f32.vacc1 %v5376_v15, %v7857_v46  ;;  %5724 = vmac.bf16.f32.vacc2 %v5409_v3, %v7863_v5  ;;  %v8177_v43 = vld [vmem:[#allocation13_spill] sm:$0xff]  ;;  %v8178_v30 = vld [vmem:[#allocation16_spill] sm:$0xff]  ;;  %2500 = vst [vmem:[%s7824_s8 + $0x8] sm:$0x3f] %v2495_v39 }
 0x193   : > { %4659 = vmatprep.subr.bf16.mxu0 %v4584_v47  ;;  %v5751_v21 = vmovacc.add.high.vacc3  ;;  %5700 = vmac.bf16.f32.vacc1 %v5412_v25, %v7867_v13  ;;  %5725 = vmac.bf16.f32.vacc2 %v5445_v31, %v7873_v34  ;;  %v5194_v34 = vld [vmem:[%s6781_s25 + $0x510] ss:$20 sps:$4 sm:$0xff]   ;;  %v2496_v47 = vadd.f32 %v8175_v61, %v2364_v60 }
 0x194   : > { %4660 = vmatpush1.bf16.msra.mxu0 %v4583_v58  ;;  %5701 = vmac.bf16.f32.vacc1 %v5448_v57, %v7877_v44  ;;  %v5302_v44 = vld [vmem:[%s6781_s25 + $0x600] ss:$20 sps:$4 sm:$0xff]   ;;  %5670 = vmul.bf16.f32.vacc0 %v5194_v34, %v7892_v52  ;;  %v2365_v52 = vld [vmem:[%s7824_s8 + $0x18] sm:$0x3f]  ;;  %v5581_v38 = vld [vmem:[%s8092_s2 + $0x4] sm:$0x7] }
 0x195   : > { %v5752_v45 = vcombine.low %v5750_v62, %v5751_v21  ;;  %v5753_v50 = vcombine.high %v5750_v62, %v5751_v21  ;;  %v5726_v63 = vmovacc.add.low.vacc2  ;;  %2501 = vst [vmem:[%s7824_s8 + $0x10] sm:$0x3f] %v2496_v47 }
 0x196   : > { %v5727_v8 = vmovacc.add.high.vacc2  ;;  %v5702_v33 = vmovacc.add.low.vacc1 }
 0x197   : > { %v5759_v42 = vrot.slane %v5752_v45, %v6897_v56  ;;  %v5765_v7 = vrot.slane %v5753_v50, %v6897_v56  ;;  %v5703_v35 = vmovacc.add.high.vacc1 }
 0x198   : > { %v5728_v11 = vcombine.low %v5726_v63, %v5727_v8  ;;  %v5729_v1 = vcombine.high %v5726_v63, %v5727_v8 }
 0x199   : > { %v4585_v20 = vpack.c.bf16 %v5765_v7, %v5759_v42  ;;  %v5704_v6 = vcombine.low %v5702_v33, %v5703_v35  ;;  %v5705_v46 = vcombine.high %v5702_v33, %v5703_v35 }
 0x19a   : > { %v5735_v49 = vrot.slane %v5728_v11, %v6897_v56  ;;  %v5741_v48 = vrot.slane %v5729_v1, %v6897_v56 }
 0x19b   : > { %5501 = vmatpush3.bf16.msra.mxu1 %v4585_v20  ;;  %v5711_v5 = vrot.slane %v5704_v6, %v6897_v56  ;;  %v5717_v13 = vrot.slane %v5705_v46, %v6897_v56 }
 0x19c   : > { %5502 = vmatprep.subr.bf16.mxu1 %v8171_v53  ;;  %v5230_v53 = vld [vmem:[%s6781_s25 + $0x560] ss:$20 sps:$4 sm:$0xff]  }
 0x19d   : > { %v4579_v4 = vpack.c.bf16 %v5717_v13, %v5741_v48  ;;  %5671 = vmac.bf16.f32.vacc0 %v5230_v53, %v7896_v24  ;;  %v4578_v16 = vpack.c.bf16 %v5711_v5, %v5735_v49  ;;  %v8173_v24 = vld [vmem:[#allocation15_spill] sm:$0xff] }
 0x19e   : > { %5672 = vmac.bf16.f32.vacc0 %v5266_v41, %v7900_v26  ;;  %v2494_v26 = vadd.f32 %v8174_v10, %v2362_v59  ;;  %v4598_v15 = vld [vmem:[%s7824_s8 + $0x10] sm:$0x3f] }
 0x19f   : > { %4661 = vmatprep.subr.bf16.mxu0 %v4579_v4  ;;  %5673 = vmac.bf16.f32.vacc0 %v5302_v44, %v7904_v22  ;;  %v2497_v22 = vadd.f32 %v8177_v43, %v2365_v52 }
 0x1a0   : > { %5674 = vmac.bf16.f32.vacc0 %v5338_v18, %v8172_v32  ;;  %4662 = vmatpush1.bf16.msra.mxu0 %v4578_v16  ;;  %2499 = vst [vmem:[%s7824_s8] sm:$0x3f] %v2494_v26 }
 0x1a1   : > { %5675 = vmac.bf16.f32.vacc0 %v5374_v0, %v8173_v24  ;;  %2502 = vst [vmem:[%s7824_s8 + $0x18] sm:$0x3f] %v2497_v22 }
 0x1a2   : > { %5676 = vmac.bf16.f32.vacc0 %v5410_v27, %v8178_v30 }
 0x1a3   : > { %5470 = vmatmul.mubr.msk.bf16.vlgmr.msra.gmra.mxu0 %vm2368_vm0, %v5581_v38  ;;  %5677 = vmac.bf16.f32.vacc0 %v5446_v12, %v7924_v55 }
 0x1a5   : > { %v5678_v14 = vmovacc.add.low.vacc0 }
 0x1a6   : > { %v5679_v58 = vmovacc.add.high.vacc0 }
 0x1a7   : > { %v4596_v50 = vld [vmem:[%s7824_s8] sm:$0x3f] }
 0x1a8   : > { %v5680_v54 = vcombine.low %v5678_v14, %v5679_v58  ;;  %v5681_v19 = vcombine.high %v5678_v14, %v5679_v58  ;;  %v4599_v31 = vld [vmem:[%s7824_s8 + $0x18] sm:$0x3f] }
 0x1aa   : > { %v5687_v9 = vrot.slane %v5680_v54, %v6897_v56  ;;  %v5693_v29 = vrot.slane %v5681_v19, %v6897_v56  ;;  %v4597_v56 = vld [vmem:[%s7824_s8 + $0x8] sm:$0x3f] }
 0x1ab   : > { %v4640_v42 = vpop.f32.mrf.mxu1 }
 0x1ac   : > { %v4580_v2 = vpack.c.bf16 %v5693_v29, %v5687_v9  ;;  %v4728_v7 = vadd.f32 %v4640_v42, %v4596_v50 }
 0x1ad   : > { %v2488_v23 = vpop.f32.mrf.mxu0  ;;  %v4642_v51 = vpop.f32.mrf.mxu1 }
 0x1ae   : > { %5503 = vmatpush3.bf16.msra.mxu1 %v4580_v2  ;;  %v2498_v55 = vadd.f32 %v2488_v23, %v2366_v40  ;;  %4733 = vst [vmem:[%s7824_s8] sm:$0x3f] %v4728_v7  ;;  %v4729_v17 = vadd.f32 %v4642_v51, %v4597_v56 }
 0x1af   : > { %v5494_v62 = vpop.f32.mrf.mxu0  ;;  %v4644_v20 = vpop.f32.mrf.mxu1 }
 0x1b0   : > { %2503 = vst [vmem:[%s7824_s8 + $0x20] sm:$0x3f] %v2498_v55  ;;  %4734 = vst [vmem:[%s7824_s8 + $0x8] sm:$0x3f] %v4729_v17 }
 0x1b1   : > { %5505 = vmatmul.mubr.msk.bf16.vlgmr.msra.gmra.mxu1 %vm2368_vm0, %v5581_v38  ;;  %v2491_v21 = vpop.f32.mrf.mxu0  ;;  %v4645_v37 = vpop.f32.mrf.mxu1 }
 0x1b3   : > { %v5495_v45 = vpop.f32.mrf.mxu0 }
 0x1b7   : > { %v4600_v1 = vld [vmem:[%s7824_s8 + $0x20] sm:$0x3f] }
 0x263   : > { %v4681_v3 = vpop.f32.mrf.mxu0 }
 0x264   : > { %v4730_v25 = vadd.f32 %v4681_v3, %v4598_v15 }
 0x265   : > { %v4683_v57 = vpop.f32.mrf.mxu0 }
 0x266   : > { %4735 = vst [vmem:[%s7824_s8 + $0x10] sm:$0x3f] %v4730_v25  ;;  %v4731_v63 = vadd.f32 %v4683_v57, %v4599_v31 }
 0x267   : > { %v4685_v8 = vpop.f32.mrf.mxu0 }
 0x268   : > { %4736 = vst [vmem:[%s7824_s8 + $0x18] sm:$0x3f] %v4731_v63 }
 0x269   : > { %v4686_v11 = vpop.f32.mrf.mxu0 }
 0x271   : > { %v4722_v49 = vpop.f32.mrf.mxu1 }
 0x272   : > { %v4732_v48 = vadd.f32 %v4722_v49, %v4600_v1 }
 0x273   : > { %v5506_v33 = vpop.f32.mrf.mxu1 }
 0x274   : > { %4737 = vst [vmem:[%s7824_s8 + $0x20] sm:$0x3f] %v4732_v48 }
 0x275   : > { %v4725_v35 = vpop.f32.mrf.mxu1 }
 0x277   : > { %v5507_v6 = vpop.f32.mrf.mxu1 }
 0x278 PF: > { %s19_s17 = sadd.s32 1, %s6652_s17   ;;  %s8179_s12 = smov %s6636_s13 }
 0x279   : > { %p16_p9 = scmp.ge.s32.totalorder %s19_s17, 4   ;;  %s8180_s13 = smov %s6640_s14 }
 0x27a   : > { %s8181_s14 = smov %s6727_s23  ;;  %s8182_s15 = smov %s6648_s16 }
 0x27b   : > { %s8183_s16 = smov %s8185_s19  ;;  %18 = sbr.rel (!%p16_p9) target bundleno = 6 (0x6), region = 134 }
 0x280   :  { %4768 = vsyncpa [#allocation4], 1 }
 0x281   :  { %4770 = vsyncpa [#allocation4 + $0x1], 1 }
 0x282   :  { %4771 = vsyncpa [#allocation6], 1 }
 0x283   :  { %4773 = vsyncpa [#allocation6 + $0x1], 1 }

</bundles_post_ra>
